<compile_context>
chip_gen: v6e
topology: v6e:2x2x1
jax: 0.10.0
libtpu: 0.0.40
codegen_flags: <defaults>
</compile_context>

<pallas_src>
import functools

import jax
import jax.numpy as jnp
from jax.experimental import pallas as pl
from jax.experimental.pallas import tpu as pltpu


# --------------------------------------------------------------------------
# Helpers
# --------------------------------------------------------------------------

@functools.lru_cache(maxsize=1)
def _vmem_limit_bytes():
    """Generation-aware VMEM budget (v7x has 64 MiB/TC, v5e/v6e have 128 MiB)."""
    try:
        cap = int(pltpu.get_tpu_info().vmem_capacity_bytes)
    except Exception:
        cap = 64 * 1024 * 1024  # conservative: assume v7x
    # Leave headroom for compiler-internal scratch and output buffers.
    return max(16 * 1024 * 1024, min(int(cap * 0.7), 100 * 1024 * 1024))


def _pick_cout_tile(cout):
    """Lane-dense Cout tile (multiple of 128) when it divides Cout, else full Cout."""
    for t in (256, 128):
        if cout % t == 0:
            return t
    return cout


def _pick_row_tile(ho, wo):
    """Largest divisor TH of Ho with TH*Wo <= 512 rows and TH*Wo % 8 == 0."""
    for th in range(ho, 0, -1):
        if ho % th:
            continue
        rows = th * wo
        if rows <= 512 and rows % 8 == 0:
            return th
    return ho  # full-height block always satisfies the (8,128) rule (equals full dim)


# --------------------------------------------------------------------------
# Pallas kernel: fused 3x3 conv (im2col-in-kernel) + bias + ReLU
# --------------------------------------------------------------------------

def _conv3x3_relu_kernel(x_ref, w_ref, b_ref, o_ref, acc_ref, *, th, w_out, cin):
    # x_ref : (1, H+2, W+2, Cin)        bf16  (full padded image of this batch elem)
    # w_ref : (3, 3, Cin, TCout)        bf16
    # b_ref : (1, TCout)                f32
    # o_ref : (1, TH*W, TCout)          f32
    # acc_ref: (TH*W, TCout)            f32 VMEM scratch accumulator
    i = pl.program_id(1)  # output-row tile index

    acc_ref[...] = jnp.zeros_like(acc_ref)

    for ky in range(3):
        # Rows [i*TH + ky, i*TH + ky + TH) of the padded image, full width, all Cin.
        rows = x_ref[0, pl.ds(i * th + ky, th), :, :]          # (TH, W+2, Cin) bf16
        for kx in range(3):
            win = rows[:, kx:kx + w_out, :].reshape(th * w_out, cin)
            acc_ref[...] += jnp.dot(win, w_ref[ky, kx],
                                    preferred_element_type=jnp.float32)

    out = acc_ref[...] + b_ref[...]          # (TH*W, TCout) + (1, TCout), f32
    out = jnp.maximum(out, 0.0)              # ReLU
    o_ref[...] = out[None].astype(o_ref.dtype)


# --------------------------------------------------------------------------
# ConvRelu parameters (torch layout in, MXU layout out) and forward pass
# --------------------------------------------------------------------------

def prepare_conv_relu_params(w_torch, b):
    """w_torch: (Cout, Cin, 3, 3) f32, b: (Cout,) f32.
    Pre-transpose ONCE to MXU-friendly (3, 3, Cin, Cout) bf16; bias stays f32."""
    w = jnp.transpose(jnp.asarray(w_torch), (2, 3, 1, 0)).astype(jnp.bfloat16)
    b = jnp.asarray(b, jnp.float32).reshape(1, -1)
    return {"w": w, "b": b}


def conv_relu_forward(params, x_nchw):
    """PyTorch ConvRelu.forward: relu(Conv2d(Cin, Cout, 3, padding=1)(x)).
    x_nchw: (N, Cin, H, W) float32 -> (N, Cout, H, W) float32."""
    w, b = params["w"], params["b"]
    KH, KW, Cin, Cout = w.shape
    assert KH == 3 and KW == 3
    N, Cin_x, H, W = x_nchw.shape
    assert Cin_x == Cin

    # NCHW -> NHWC, pad spatially by 1, cast to bf16 for the MXU.
    x = jnp.transpose(x_nchw, (0, 2, 3, 1)).astype(jnp.bfloat16)
    x_pad = jnp.pad(x, ((0, 0), (1, 1), (1, 1), (0, 0)))

    TH = _pick_row_tile(H, W)
    TCout = _pick_cout_tile(Cout)

    kernel = functools.partial(_conv3x3_relu_kernel, th=TH, w_out=W, cin=Cin)

    out = pl.pallas_call(
        kernel,
        out_shape=jax.ShapeDtypeStruct((N, H * W, Cout), jnp.float32),
        grid_spec=pltpu.PrefetchScalarGridSpec(
            num_scalar_prefetch=0,
            grid=(N, H // TH, Cout // TCout),
            in_specs=[
                # Full padded image of batch element n; block index constant in (i, j)
                # so it is DMA'd only when n changes.
                pl.BlockSpec((1, H + 2, W + 2, Cin), lambda n, i, j: (n, 0, 0, 0)),
                # All 9 taps of one Cout tile of the weights.
                pl.BlockSpec((3, 3, Cin, TCout), lambda n, i, j: (0, 0, 0, j)),
                # Bias tile.
                pl.BlockSpec((1, TCout), lambda n, i, j: (0, j)),
            ],
            out_specs=pl.BlockSpec((1, TH * W, TCout), lambda n, i, j: (n, i, j)),
            scratch_shapes=[pltpu.VMEM((TH * W, TCout), jnp.float32)],
        ),
        compiler_params=pltpu.CompilerParams(
            dimension_semantics=("parallel", "parallel", "parallel"),
            vmem_limit_bytes=_vmem_limit_bytes(),
        ),
    )(x_pad, w, b)

    out = out.reshape(N, H, W, Cout)
    return jnp.transpose(out, (0, 3, 1, 2))  # NHWC -> NCHW


# --------------------------------------------------------------------------
# Pure-JAX reference (same bf16 inputs, f32 accumulation) for correctness check
# --------------------------------------------------------------------------

def conv_relu_reference(params, x_nchw):
    w, b = params["w"], params["b"]
    x = jnp.transpose(x_nchw, (0, 2, 3, 1)).astype(jnp.bfloat16)
    y = jax.lax.conv_general_dilated(
        x, w, window_strides=(1, 1), padding=((1, 1), (1, 1)),
        dimension_numbers=("NHWC", "HWIO", "NHWC"),
        preferred_element_type=jnp.float32)
    y = jnp.maximum(y + b.reshape(1, 1, 1, -1), 0.0)
    return jnp.transpose(y, (0, 3, 1, 2))


# --------------------------------------------------------------------------

if __name__ == "__main__":
    key = jax.random.PRNGKey(0)
    k1, k2, k3, k4, k5, k6 = jax.random.split(key, 6)

    fwd = jax.jit(conv_relu_forward)

    # Case 1: MXU/lane-friendly channels (Cout multiple of 128), tiled rows.
    N, Cin, Cout, H, W = 2, 16, 128, 32, 32
    x = jax.random.normal(k1, (N, Cin, H, W), jnp.float32)
    wt = jax.random.normal(k2, (Cout, Cin, 3, 3), jnp.float32) * (2.0 / (Cin * 9)) ** 0.5
    bias = jax.random.normal(k3, (Cout,), jnp.float32) * 0.1
    params = prepare_conv_relu_params(wt, bias)

    y = jax.block_until_ready(fwd(params, x))
    y_ref = conv_relu_reference(params, x)
    assert y.shape == (N, Cout, H, W), y.shape
    assert bool(jnp.all(jnp.isfinite(y)))
    assert bool(jnp.allclose(y, y_ref, atol=2e-2, rtol=2e-2)), \
        float(jnp.max(jnp.abs(y - y_ref)))

    # Case 2: small / ragged channels (exercises the full-Cout fallback tile).
    N2, Cin2, Cout2, H2, W2 = 2, 4, 32, 16, 16
    x2 = jax.random.normal(k4, (N2, Cin2, H2, W2), jnp.float32)
    wt2 = jax.random.normal(k5, (Cout2, Cin2, 3, 3), jnp.float32) * (2.0 / (Cin2 * 9)) ** 0.5
    b2 = jax.random.normal(k6, (Cout2,), jnp.float32) * 0.1
    params2 = prepare_conv_relu_params(wt2, b2)

    y2 = jax.block_until_ready(jax.jit(conv_relu_forward)(params2, x2))
    y2_ref = conv_relu_reference(params2, x2)
    assert y2.shape == (N2, Cout2, H2, W2), y2.shape
    assert bool(jnp.all(jnp.isfinite(y2)))
    assert bool(jnp.allclose(y2, y2_ref, atol=2e-2, rtol=2e-2)), \
        float(jnp.max(jnp.abs(y2 - y2_ref)))

    print("KERNEL_OK")
</pallas_src>

<mosaic_0001>
module attributes {stable_mosaic.version = 11 : i64} {
  func.func @_conv3x3_relu_kernel(%arg0: i32, %arg1: i32, %arg2: i32, %arg3: memref<1x34x34x16xbf16, #tpu.memory_space<vmem>>, %arg4: memref<3x3x16x128xbf16, #tpu.memory_space<vmem>>, %arg5: memref<1x128xf32, #tpu.memory_space<vmem>>, %arg6: memref<1x512x128xf32, #tpu.memory_space<vmem>>, %arg7: memref<512x128xf32, #tpu.memory_space<vmem>>) attributes {dimension_semantics = [#tpu.dimension_semantics<parallel>, #tpu.dimension_semantics<parallel>, #tpu.dimension_semantics<parallel>], iteration_bounds = array<i64: 2, 2, 1>, scalar_prefetch = 0 : i64, scratch_operands = 1 : i64, tpu.core_type = #tpu.core_type<tc>, window_params = [{transform_indices = @transform_0, window_bounds = array<i64: 1, 34, 34, 16>}, {transform_indices = @transform_1, window_bounds = array<i64: 3, 3, 16, 128>}, {transform_indices = @transform_2, window_bounds = array<i64: 1, 128>}, {transform_indices = @transform_3, window_bounds = array<i64: 1, 512, 128>}]} {
    %cst = arith.constant 0.000000e+00 : f32
    %0 = vector.broadcast %cst : f32 to vector<512x128xf32>
    %c0 = arith.constant 0 : index
    %c0_0 = arith.constant 0 : index
    %1 = vector.load %arg7[%c0, %c0_0] : memref<512x128xf32, #tpu.memory_space<vmem>>, vector<512x128xf32>
    tpu.vector_store %arg7[%c0, %c0_0], %0 {strides = array<i32>} : memref<512x128xf32, #tpu.memory_space<vmem>>, vector<512x128xf32>,
    %c16_i32 = arith.constant 16 : i32
    %2 = arith.muli %arg1, %c16_i32 : i32
    %c0_i32 = arith.constant 0 : i32
    %3 = arith.addi %2, %c0_i32 : i32
    %c0_1 = arith.constant 0 : index
    %4 = arith.index_cast %3 : i32 to index
    %c0_2 = arith.constant 0 : index
    %c0_3 = arith.constant 0 : index
    %5 = vector.load %arg3[%c0_1, %4, %c0_2, %c0_3] : memref<1x34x34x16xbf16, #tpu.memory_space<vmem>>, vector<1x16x34x16xbf16>
    %6 = vector.shape_cast %5 : vector<1x16x34x16xbf16> to vector<16x34x16xbf16>
    %7 = vector.extract_strided_slice %6 {offsets = [0, 0, 0], sizes = [16, 32, 16], strides = [1, 1, 1]} : vector<16x34x16xbf16> to vector<16x32x16xbf16>
    %8 = vector.shape_cast %7 : vector<16x32x16xbf16> to vector<512x16xbf16>
    %c0_4 = arith.constant 0 : index
    %c0_5 = arith.constant 0 : index
    %9 = vector.load %arg7[%c0_4, %c0_5] : memref<512x128xf32, #tpu.memory_space<vmem>>, vector<512x128xf32>
    %c0_6 = arith.constant 0 : index
    %c0_7 = arith.constant 0 : index
    %c0_8 = arith.constant 0 : index
    %c0_9 = arith.constant 0 : index
    %10 = vector.load %arg4[%c0_6, %c0_7, %c0_8, %c0_9] : memref<3x3x16x128xbf16, #tpu.memory_space<vmem>>, vector<1x1x16x128xbf16>
    %11 = vector.shape_cast %10 : vector<1x1x16x128xbf16> to vector<16x128xbf16>
    %cst_10 = arith.constant dense<0.000000e+00> : vector<512x128xf32>
    %12 = tpu.matmul %8, %11, %cst_10 {dimension_numbers = #tpu.dot_dimension_numbers<[1], [0], [0], [1], [0, 0, 1, 1], [], []>} : vector<512x16xbf16>, vector<16x128xbf16>, vector<512x128xf32> -> vector<512x128xf32>
    %13 = arith.addf %9, %12 : vector<512x128xf32>
    %c0_11 = arith.constant 0 : index
    %c0_12 = arith.constant 0 : index
    %14 = vector.load %arg7[%c0_11, %c0_12] : memref<512x128xf32, #tpu.memory_space<vmem>>, vector<512x128xf32>
    tpu.vector_store %arg7[%c0_11, %c0_12], %13 {strides = array<i32>} : memref<512x128xf32, #tpu.memory_space<vmem>>, vector<512x128xf32>,
    %15 = vector.extract_strided_slice %6 {offsets = [0, 1, 0], sizes = [16, 32, 16], strides = [1, 1, 1]} : vector<16x34x16xbf16> to vector<16x32x16xbf16>
    %16 = vector.shape_cast %15 : vector<16x32x16xbf16> to vector<512x16xbf16>
    %c0_13 = arith.constant 0 : index
    %c0_14 = arith.constant 0 : index
    %17 = vector.load %arg7[%c0_13, %c0_14] : memref<512x128xf32, #tpu.memory_space<vmem>>, vector<512x128xf32>
    %c0_15 = arith.constant 0 : index
    %c1 = arith.constant 1 : index
    %c0_16 = arith.constant 0 : index
    %c0_17 = arith.constant 0 : index
    %18 = vector.load %arg4[%c0_15, %c1, %c0_16, %c0_17] : memref<3x3x16x128xbf16, #tpu.memory_space<vmem>>, vector<1x1x16x128xbf16>
    %19 = vector.shape_cast %18 : vector<1x1x16x128xbf16> to vector<16x128xbf16>
    %cst_18 = arith.constant dense<0.000000e+00> : vector<512x128xf32>
    %20 = tpu.matmul %16, %19, %cst_18 {dimension_numbers = #tpu.dot_dimension_numbers<[1], [0], [0], [1], [0, 0, 1, 1], [], []>} : vector<512x16xbf16>, vector<16x128xbf16>, vector<512x128xf32> -> vector<512x128xf32>
    %21 = arith.addf %17, %20 : vector<512x128xf32>
    %c0_19 = arith.constant 0 : index
    %c0_20 = arith.constant 0 : index
    %22 = vector.load %arg7[%c0_19, %c0_20] : memref<512x128xf32, #tpu.memory_space<vmem>>, vector<512x128xf32>
    tpu.vector_store %arg7[%c0_19, %c0_20], %21 {strides = array<i32>} : memref<512x128xf32, #tpu.memory_space<vmem>>, vector<512x128xf32>,
    %23 = vector.extract_strided_slice %6 {offsets = [0, 2, 0], sizes = [16, 32, 16], strides = [1, 1, 1]} : vector<16x34x16xbf16> to vector<16x32x16xbf16>
    %24 = vector.shape_cast %23 : vector<16x32x16xbf16> to vector<512x16xbf16>
    %c0_21 = arith.constant 0 : index
    %c0_22 = arith.constant 0 : index
    %25 = vector.load %arg7[%c0_21, %c0_22] : memref<512x128xf32, #tpu.memory_space<vmem>>, vector<512x128xf32>
    %c0_23 = arith.constant 0 : index
    %c2 = arith.constant 2 : index
    %c0_24 = arith.constant 0 : index
    %c0_25 = arith.constant 0 : index
    %26 = vector.load %arg4[%c0_23, %c2, %c0_24, %c0_25] : memref<3x3x16x128xbf16, #tpu.memory_space<vmem>>, vector<1x1x16x128xbf16>
    %27 = vector.shape_cast %26 : vector<1x1x16x128xbf16> to vector<16x128xbf16>
    %cst_26 = arith.constant dense<0.000000e+00> : vector<512x128xf32>
    %28 = tpu.matmul %24, %27, %cst_26 {dimension_numbers = #tpu.dot_dimension_numbers<[1], [0], [0], [1], [0, 0, 1, 1], [], []>} : vector<512x16xbf16>, vector<16x128xbf16>, vector<512x128xf32> -> vector<512x128xf32>
    %29 = arith.addf %25, %28 : vector<512x128xf32>
    %c0_27 = arith.constant 0 : index
    %c0_28 = arith.constant 0 : index
    %30 = vector.load %arg7[%c0_27, %c0_28] : memref<512x128xf32, #tpu.memory_space<vmem>>, vector<512x128xf32>
    tpu.vector_store %arg7[%c0_27, %c0_28], %29 {strides = array<i32>} : memref<512x128xf32, #tpu.memory_space<vmem>>, vector<512x128xf32>,
    %c16_i32_29 = arith.constant 16 : i32
    %31 = arith.muli %arg1, %c16_i32_29 : i32
    %c1_i32 = arith.constant 1 : i32
    %32 = arith.addi %31, %c1_i32 : i32
    %c0_30 = arith.constant 0 : index
    %33 = arith.index_cast %32 : i32 to index
    %c0_31 = arith.constant 0 : index
    %c0_32 = arith.constant 0 : index
    %34 = vector.load %arg3[%c0_30, %33, %c0_31, %c0_32] : memref<1x34x34x16xbf16, #tpu.memory_space<vmem>>, vector<1x16x34x16xbf16>
    %35 = vector.shape_cast %34 : vector<1x16x34x16xbf16> to vector<16x34x16xbf16>
    %36 = vector.extract_strided_slice %35 {offsets = [0, 0, 0], sizes = [16, 32, 16], strides = [1, 1, 1]} : vector<16x34x16xbf16> to vector<16x32x16xbf16>
    %37 = vector.shape_cast %36 : vector<16x32x16xbf16> to vector<512x16xbf16>
    %c0_33 = arith.constant 0 : index
    %c0_34 = arith.constant 0 : index
    %38 = vector.load %arg7[%c0_33, %c0_34] : memref<512x128xf32, #tpu.memory_space<vmem>>, vector<512x128xf32>
    %c1_35 = arith.constant 1 : index
    %c0_36 = arith.constant 0 : index
    %c0_37 = arith.constant 0 : index
    %c0_38 = arith.constant 0 : index
    %39 = vector.load %arg4[%c1_35, %c0_36, %c0_37, %c0_38] : memref<3x3x16x128xbf16, #tpu.memory_space<vmem>>, vector<1x1x16x128xbf16>
    %40 = vector.shape_cast %39 : vector<1x1x16x128xbf16> to vector<16x128xbf16>
    %cst_39 = arith.constant dense<0.000000e+00> : vector<512x128xf32>
    %41 = tpu.matmul %37, %40, %cst_39 {dimension_numbers = #tpu.dot_dimension_numbers<[1], [0], [0], [1], [0, 0, 1, 1], [], []>} : vector<512x16xbf16>, vector<16x128xbf16>, vector<512x128xf32> -> vector<512x128xf32>
    %42 = arith.addf %38, %41 : vector<512x128xf32>
    %c0_40 = arith.constant 0 : index
    %c0_41 = arith.constant 0 : index
    %43 = vector.load %arg7[%c0_40, %c0_41] : memref<512x128xf32, #tpu.memory_space<vmem>>, vector<512x128xf32>
    tpu.vector_store %arg7[%c0_40, %c0_41], %42 {strides = array<i32>} : memref<512x128xf32, #tpu.memory_space<vmem>>, vector<512x128xf32>,
    %44 = vector.extract_strided_slice %35 {offsets = [0, 1, 0], sizes = [16, 32, 16], strides = [1, 1, 1]} : vector<16x34x16xbf16> to vector<16x32x16xbf16>
    %45 = vector.shape_cast %44 : vector<16x32x16xbf16> to vector<512x16xbf16>
    %c0_42 = arith.constant 0 : index
    %c0_43 = arith.constant 0 : index
    %46 = vector.load %arg7[%c0_42, %c0_43] : memref<512x128xf32, #tpu.memory_space<vmem>>, vector<512x128xf32>
    %c1_44 = arith.constant 1 : index
    %c1_45 = arith.constant 1 : index
    %c0_46 = arith.constant 0 : index
    %c0_47 = arith.constant 0 : index
    %47 = vector.load %arg4[%c1_44, %c1_45, %c0_46, %c0_47] : memref<3x3x16x128xbf16, #tpu.memory_space<vmem>>, vector<1x1x16x128xbf16>
    %48 = vector.shape_cast %47 : vector<1x1x16x128xbf16> to vector<16x128xbf16>
    %cst_48 = arith.constant dense<0.000000e+00> : vector<512x128xf32>
    %49 = tpu.matmul %45, %48, %cst_48 {dimension_numbers = #tpu.dot_dimension_numbers<[1], [0], [0], [1], [0, 0, 1, 1], [], []>} : vector<512x16xbf16>, vector<16x128xbf16>, vector<512x128xf32> -> vector<512x128xf32>
    %50 = arith.addf %46, %49 : vector<512x128xf32>
    %c0_49 = arith.constant 0 : index
    %c0_50 = arith.constant 0 : index
    %51 = vector.load %arg7[%c0_49, %c0_50] : memref<512x128xf32, #tpu.memory_space<vmem>>, vector<512x128xf32>
    tpu.vector_store %arg7[%c0_49, %c0_50], %50 {strides = array<i32>} : memref<512x128xf32, #tpu.memory_space<vmem>>, vector<512x128xf32>,
    %52 = vector.extract_strided_slice %35 {offsets = [0, 2, 0], sizes = [16, 32, 16], strides = [1, 1, 1]} : vector<16x34x16xbf16> to vector<16x32x16xbf16>
    %53 = vector.shape_cast %52 : vector<16x32x16xbf16> to vector<512x16xbf16>
    %c0_51 = arith.constant 0 : index
    %c0_52 = arith.constant 0 : index
    %54 = vector.load %arg7[%c0_51, %c0_52] : memref<512x128xf32, #tpu.memory_space<vmem>>, vector<512x128xf32>
    %c1_53 = arith.constant 1 : index
    %c2_54 = arith.constant 2 : index
    %c0_55 = arith.constant 0 : index
    %c0_56 = arith.constant 0 : index
    %55 = vector.load %arg4[%c1_53, %c2_54, %c0_55, %c0_56] : memref<3x3x16x128xbf16, #tpu.memory_space<vmem>>, vector<1x1x16x128xbf16>
    %56 = vector.shape_cast %55 : vector<1x1x16x128xbf16> to vector<16x128xbf16>
    %cst_57 = arith.constant dense<0.000000e+00> : vector<512x128xf32>
    %57 = tpu.matmul %53, %56, %cst_57 {dimension_numbers = #tpu.dot_dimension_numbers<[1], [0], [0], [1], [0, 0, 1, 1], [], []>} : vector<512x16xbf16>, vector<16x128xbf16>, vector<512x128xf32> -> vector<512x128xf32>
    %58 = arith.addf %54, %57 : vector<512x128xf32>
    %c0_58 = arith.constant 0 : index
    %c0_59 = arith.constant 0 : index
    %59 = vector.load %arg7[%c0_58, %c0_59] : memref<512x128xf32, #tpu.memory_space<vmem>>, vector<512x128xf32>
    tpu.vector_store %arg7[%c0_58, %c0_59], %58 {strides = array<i32>} : memref<512x128xf32, #tpu.memory_space<vmem>>, vector<512x128xf32>,
    %c16_i32_60 = arith.constant 16 : i32
    %60 = arith.muli %arg1, %c16_i32_60 : i32
    %c2_i32 = arith.constant 2 : i32
    %61 = arith.addi %60, %c2_i32 : i32
    %c0_61 = arith.constant 0 : index
    %62 = arith.index_cast %61 : i32 to index
    %c0_62 = arith.constant 0 : index
    %c0_63 = arith.constant 0 : index
    %63 = vector.load %arg3[%c0_61, %62, %c0_62, %c0_63] : memref<1x34x34x16xbf16, #tpu.memory_space<vmem>>, vector<1x16x34x16xbf16>
    %64 = vector.shape_cast %63 : vector<1x16x34x16xbf16> to vector<16x34x16xbf16>
    %65 = vector.extract_strided_slice %64 {offsets = [0, 0, 0], sizes = [16, 32, 16], strides = [1, 1, 1]} : vector<16x34x16xbf16> to vector<16x32x16xbf16>
    %66 = vector.shape_cast %65 : vector<16x32x16xbf16> to vector<512x16xbf16>
    %c0_64 = arith.constant 0 : index
    %c0_65 = arith.constant 0 : index
    %67 = vector.load %arg7[%c0_64, %c0_65] : memref<512x128xf32, #tpu.memory_space<vmem>>, vector<512x128xf32>
    %c2_66 = arith.constant 2 : index
    %c0_67 = arith.constant 0 : index
    %c0_68 = arith.constant 0 : index
    %c0_69 = arith.constant 0 : index
    %68 = vector.load %arg4[%c2_66, %c0_67, %c0_68, %c0_69] : memref<3x3x16x128xbf16, #tpu.memory_space<vmem>>, vector<1x1x16x128xbf16>
    %69 = vector.shape_cast %68 : vector<1x1x16x128xbf16> to vector<16x128xbf16>
    %cst_70 = arith.constant dense<0.000000e+00> : vector<512x128xf32>
    %70 = tpu.matmul %66, %69, %cst_70 {dimension_numbers = #tpu.dot_dimension_numbers<[1], [0], [0], [1], [0, 0, 1, 1], [], []>} : vector<512x16xbf16>, vector<16x128xbf16>, vector<512x128xf32> -> vector<512x128xf32>
    %71 = arith.addf %67, %70 : vector<512x128xf32>
    %c0_71 = arith.constant 0 : index
    %c0_72 = arith.constant 0 : index
    %72 = vector.load %arg7[%c0_71, %c0_72] : memref<512x128xf32, #tpu.memory_space<vmem>>, vector<512x128xf32>
    tpu.vector_store %arg7[%c0_71, %c0_72], %71 {strides = array<i32>} : memref<512x128xf32, #tpu.memory_space<vmem>>, vector<512x128xf32>,
    %73 = vector.extract_strided_slice %64 {offsets = [0, 1, 0], sizes = [16, 32, 16], strides = [1, 1, 1]} : vector<16x34x16xbf16> to vector<16x32x16xbf16>
    %74 = vector.shape_cast %73 : vector<16x32x16xbf16> to vector<512x16xbf16>
    %c0_73 = arith.constant 0 : index
    %c0_74 = arith.constant 0 : index
    %75 = vector.load %arg7[%c0_73, %c0_74] : memref<512x128xf32, #tpu.memory_space<vmem>>, vector<512x128xf32>
    %c2_75 = arith.constant 2 : index
    %c1_76 = arith.constant 1 : index
    %c0_77 = arith.constant 0 : index
    %c0_78 = arith.constant 0 : index
    %76 = vector.load %arg4[%c2_75, %c1_76, %c0_77, %c0_78] : memref<3x3x16x128xbf16, #tpu.memory_space<vmem>>, vector<1x1x16x128xbf16>
    %77 = vector.shape_cast %76 : vector<1x1x16x128xbf16> to vector<16x128xbf16>
    %cst_79 = arith.constant dense<0.000000e+00> : vector<512x128xf32>
    %78 = tpu.matmul %74, %77, %cst_79 {dimension_numbers = #tpu.dot_dimension_numbers<[1], [0], [0], [1], [0, 0, 1, 1], [], []>} : vector<512x16xbf16>, vector<16x128xbf16>, vector<512x128xf32> -> vector<512x128xf32>
    %79 = arith.addf %75, %78 : vector<512x128xf32>
    %c0_80 = arith.constant 0 : index
    %c0_81 = arith.constant 0 : index
    %80 = vector.load %arg7[%c0_80, %c0_81] : memref<512x128xf32, #tpu.memory_space<vmem>>, vector<512x128xf32>
    tpu.vector_store %arg7[%c0_80, %c0_81], %79 {strides = array<i32>} : memref<512x128xf32, #tpu.memory_space<vmem>>, vector<512x128xf32>,
    %81 = vector.extract_strided_slice %64 {offsets = [0, 2, 0], sizes = [16, 32, 16], strides = [1, 1, 1]} : vector<16x34x16xbf16> to vector<16x32x16xbf16>
    %82 = vector.shape_cast %81 : vector<16x32x16xbf16> to vector<512x16xbf16>
    %c0_82 = arith.constant 0 : index
    %c0_83 = arith.constant 0 : index
    %83 = vector.load %arg7[%c0_82, %c0_83] : memref<512x128xf32, #tpu.memory_space<vmem>>, vector<512x128xf32>
    %c2_84 = arith.constant 2 : index
    %c2_85 = arith.constant 2 : index
    %c0_86 = arith.constant 0 : index
    %c0_87 = arith.constant 0 : index
    %84 = vector.load %arg4[%c2_84, %c2_85, %c0_86, %c0_87] : memref<3x3x16x128xbf16, #tpu.memory_space<vmem>>, vector<1x1x16x128xbf16>
    %85 = vector.shape_cast %84 : vector<1x1x16x128xbf16> to vector<16x128xbf16>
    %cst_88 = arith.constant dense<0.000000e+00> : vector<512x128xf32>
    %86 = tpu.matmul %82, %85, %cst_88 {dimension_numbers = #tpu.dot_dimension_numbers<[1], [0], [0], [1], [0, 0, 1, 1], [], []>} : vector<512x16xbf16>, vector<16x128xbf16>, vector<512x128xf32> -> vector<512x128xf32>
    %87 = arith.addf %83, %86 : vector<512x128xf32>
    %c0_89 = arith.constant 0 : index
    %c0_90 = arith.constant 0 : index
    %88 = vector.load %arg7[%c0_89, %c0_90] : memref<512x128xf32, #tpu.memory_space<vmem>>, vector<512x128xf32>
    tpu.vector_store %arg7[%c0_89, %c0_90], %87 {strides = array<i32>} : memref<512x128xf32, #tpu.memory_space<vmem>>, vector<512x128xf32>,
    %c0_91 = arith.constant 0 : index
    %c0_92 = arith.constant 0 : index
    %89 = vector.load %arg7[%c0_91, %c0_92] : memref<512x128xf32, #tpu.memory_space<vmem>>, vector<512x128xf32>
    %c0_93 = arith.constant 0 : index
    %c0_94 = arith.constant 0 : index
    %90 = vector.load %arg5[%c0_93, %c0_94] : memref<1x128xf32, #tpu.memory_space<vmem>>, vector<1x128xf32>
    %91 = vector.broadcast %90 : vector<1x128xf32> to vector<512x128xf32>
    %92 = arith.addf %89, %91 : vector<512x128xf32>
    %cst_95 = arith.constant 0.000000e+00 : f32
    %93 = vector.broadcast %cst_95 : f32 to vector<512x128xf32>
    %94 = arith.maximumf %92, %93 : vector<512x128xf32>
    %95 = vector.shape_cast %94 : vector<512x128xf32> to vector<1x512x128xf32>
    %c0_96 = arith.constant 0 : index
    %c0_97 = arith.constant 0 : index
    %c0_98 = arith.constant 0 : index
    %96 = vector.load %arg6[%c0_96, %c0_97, %c0_98] : memref<1x512x128xf32, #tpu.memory_space<vmem>>, vector<1x512x128xf32>
    tpu.vector_store %arg6[%c0_96, %c0_97, %c0_98], %95 {strides = array<i32>} : memref<1x512x128xf32, #tpu.memory_space<vmem>>, vector<1x512x128xf32>,
    return
  }
  func.func @transform_0(%arg0: i32, %arg1: i32, %arg2: i32) -> (i32, i32, i32, i32) {
    %c0_i32 = arith.constant 0 : i32
    %c0_i32_0 = arith.constant 0 : i32
    %c0_i32_1 = arith.constant 0 : i32
    %c0_i32_2 = arith.constant 0 : i32
    return %arg0, %c0_i32, %c0_i32_0, %c0_i32_1 : i32, i32, i32, i32
  }
  func.func @transform_1(%arg0: i32, %arg1: i32, %arg2: i32) -> (i32, i32, i32, i32) {
    %c0_i32 = arith.constant 0 : i32
    %c0_i32_0 = arith.constant 0 : i32
    %c0_i32_1 = arith.constant 0 : i32
    %c0_i32_2 = arith.constant 0 : i32
    return %c0_i32, %c0_i32_0, %c0_i32_1, %arg2 : i32, i32, i32, i32
  }
  func.func @transform_2(%arg0: i32, %arg1: i32, %arg2: i32) -> (i32, i32) {
    %c0_i32 = arith.constant 0 : i32
    %c0_i32_0 = arith.constant 0 : i32
    return %c0_i32, %arg2 : i32, i32
  }
  func.func @transform_3(%arg0: i32, %arg1: i32, %arg2: i32) -> (i32, i32, i32) {
    %c0_i32 = arith.constant 0 : i32
    return %arg0, %arg1, %arg2 : i32, i32, i32
  }
}

</mosaic_0001>

<bundles_post_ra>
// kernel: conv_relu_forward.1
= control target key start
LH: loop header
LB: loop body
LE: loop exit
PB: predicated region body
PF: predicated region fallthrough
CT: control target
= control target key end

     0   :  { %8 = vsyncpa [#allocation4], 0  ;;  %s16861_s0 = inlined_call_operand.vmem [shape: bf16[2,34,34,16], index: 0, kind: input, shape index: {}]   ;;  %s16862_s1 = inlined_call_operand.vmem [shape: bf16[3,3,16,128], index: 1, kind: input, shape index: {}]   ;;  %s16863_s2 = inlined_call_operand.vmem [shape: f32[1,128], index: 2, kind: input, shape index: {}]   ;;  %s16864_s3 = inlined_call_operand.hbm [shape: f32[2,1024,128], index: 3, kind: output, shape index: {}]  }
   0x1   :  { %10 = vsyncpa [#allocation4 + $0x1], 0  ;;  %s12257_s12 = smov 0   ;;  %s12259_s13 = smov 0  }
   0x2   :  { %s12261_s14 = smov 0   ;;  %s12263_s15 = smov 0  }
   0x3   :  { %s12265_s16 = smov 0   ;;  %s12267_s17 = smov 0  }
   0x4   :  { %s12269_s18 = smov 0   ;;  %s12271_s19 = smov 0  }
   0x5 LB: > { %s10058_s20 = sadd.s32 4294967295, %s12232_s19   ;;  %s10059_s21 = sadd.s32 4294967294, %s12232_s19   ;;  %s12232_s19 = sphi %s12271_s19, %s16_s19   ;;  %s12228_s18 = sphi %s12269_s18, %s17620_s18   ;;  %s12224_s17 = sphi %s12267_s17, %s17619_s17   ;;  %s12220_s16 = sphi %s12265_s16, %s17618_s16   ;;  %s12216_s15 = sphi %s12263_s15, %s17617_s15   ;;  %s12212_s14 = sphi %s12261_s14, %s17616_s14   ;;  %s12208_s13 = sphi %s12259_s13, %s17615_s13   ;;  %s12204_s12 = sphi %s12257_s12, %s17614_s12  }
   0x6   : > { %s31_s22 = sadd.s32 1, %s12224_s17  ;;  %s35_s23 = sadd.s32 1, %s12228_s18 }
   0x7   : > { %p33_p0 = scmp.ge.s32.totalorder %s31_s22, 2  ;;  %p134_p1 = scmp.ne.s32.totalorder %s12212_s14, %s12208_s13 }
   0x8   : > { %p135_p2 = scmp.eq.s32.totalorder %s10058_s20, 3  ;;  %p140_p5 = scmp.ne.s32.totalorder %s12208_s13, %s12204_s12 }
   0x9   : > { %s17622_s22 = smov (%p33_p0, %s31_s22), 0  ;;  %s17624_s23 = smov (!%p33_p0, %s35_s23), %s12228_s18 }
   0xa   : > { %s118_s24 = ssub.s32 %s12224_s17, %s17622_s22  ;;  %p12308_p3 = por %p135_p2, %p134_p1 }
   0xb   : > { %p37_p4 = scmp.ge.s32.totalorder %s17624_s23, 2  ;;  %p141_p6 = scmp.eq.s32.totalorder %s10059_s21, 3 }
   0xc   : > { %p10064_p7 = scmp.ge.s32.totalorder %s12232_s19, 1  ;;  %p180_p9 = scmp.lt.s32.totalorder %s12232_s19, 5 }
   0xd   : > { %s17626_s23 = smov (%p37_p4, %s17624_s23), 0  ;;  %p12317_p8 = por %p141_p6, %p140_p5 }
   0xe   : > { %s117_s27 = ssub.s32 %s12228_s18, %s17626_s23  ;;  %s124_s28 = sadd.s32 1, %s12212_s14 }
   0xf   : > { %s119_s29 = sor.u32 %s118_s24, %s117_s27  ;;  %p181_p10 = pnand %p10064_p7, %p180_p9 }
  0x10   : > { %p122_p11 = scmp.eq.s32.totalorder %s119_s29, 0 }
  0x11   : > { %184 = sbr.rel (%p181_p10) target bundleno = 947 (0x3b3), region = 32 }
  0x12   : > { %s12326_s30 = scalar_select %p122_p11, %s12212_s14, %s124_s28  }
  0x16   : > { %v11858_v0 = vld [vmem:[%s16862_s1] sm:$0xff]   ;;  %p211_p12 = scmp.lt.s32.totalorder %s12220_s16, 1  ;;  %v12336_v1 = vld [vmem:[%s16862_s1 + $0x8] sm:$0xff]   ;;  %s10890_s9 = smul.u32 320, %s12216_s15  ;;  %v12342_v2 = vld [vmem:[%s16862_s1 + $0x10] sm:$0xff]   ;;  %vm605_vm0 = vcmask 130048  }
  0x17   : > { %11782 = vmatprep.subr.bf16.mxu1 %v11858_v0  ;;  %11188 = vmatprep.subr.bf16.mxu0 %v11858_v0  ;;  %vm1119_vm1 = vsmask.f32 3328  ;;  %vm1120_vm2 = vsmask.f32 7440  ;;  %v12413_v40 = vld [vmem:[%s16862_s1 + $0x20] sm:$0xff]   ;;  %vm2524_vm3 = vcmask 1042432  }
  0x18   : > { %s212_s6 = scalar_select %p211_p12, %s12220_s16, 1  ;;  %11783 = vmatpush3.bf16.msra.mxu1 %v11858_v0  ;;  %11189 = vmatpush3.bf16.msra.mxu0 %v11858_v0  ;;  %vm2525_vm4 = vcmask 1046532   ;;  %v12448_v56 = vld [vmem:[%s16862_s1 + $0x18] sm:$0xff]   ;;  %vm12527_vm5 = vmor %vm1119_vm1, %vm1120_vm2 }
  0x19   : > { %11254 = vmatprep.subr.bf16.mxu1 %v12336_v1  ;;  %11320 = vmatprep.subr.bf16.mxu0 %v12342_v2  ;;  %vm12557_vm6 = vmor %vm2524_vm3, %vm2525_vm4  ;;  %s10885_s24 = sshll.u32 %s12216_s15, 6 }
  0x1a   : > { %s11784_s20 = smul.u32 680, %s212_s6 }
  0x1c   : > { %s215_s27 = scalar_lea.vmem %s16861_s0, %s11784_s20 }
  0x1d   : > { %s12349_s28 = scalar_lea.vmem %s215_s27, %s10890_s9  ;;  %s10886_s27 = sshll.u32 %s12220_s16, 7 }
  0x1e   : > { %v12352_v3 = vld [vmem:[%s12349_s28] sm:$0xf]  ;;  %v12355_v4 = vld [vmem:[%s12349_s28 + $0x4] sm:$0xf]  ;;  %v12378_v19 = vld [vmem:[%s12349_s28 + $0x8] sm:$0xf]  ;;  %s9938_s29 = sadd.s32 %s10886_s27, %s10885_s24 }
  0x1f   : > { %v12358_v5 = vld [vmem:[%s12349_s28 + $0xa0] sm:$0xf]  ;;  %v10070_v6 = vcombine.low %v12352_v3, %v12355_v4  ;;  %v1123_v7 = vshrl.u32 %v12352_v3, 16  ;;  %v1126_v8 = vshll.u32 %v12352_v3, 16  ;;  %v1132_v9 = vshll.u32 %v12355_v4, 16  ;;  %s10887_s15 = sshll.u32 %s9938_s29, 7 }
  0x20   : > { %v12366_v10 = vld [vmem:[%s12349_s28 + $0xa4] sm:$0xf]  ;;  %v1136_v11 = vshrl.u32 %v12355_v4, 16  ;;  %v10202_v12 = vrot.slane %v12352_v3, 9  ;;  %v2529_v13 = vrot.slane %v12355_v4, 5  ;;  %v1475_v18 = vshrl.u32 %v12358_v5, 16  ;;  %s16802_s6 = scalar_lea.hbm %s16864_s3, %s10887_s15 }
  0x21   : > { %v10086_v14 = vcombine.low %v12358_v5, %v12366_v10  ;;  %11190 = vmatprep.mubr.msk.bf16.mxu0 %vm605_vm0, %v10070_v6  ;;  %v1125_v15 = vrot.slane %v1123_v7, 4  ;;  %v1128_v16 = vrot.slane %v1126_v8, 5  ;;  %v12374_v17 = vrot.slane %v1132_v9, 5  ;;  %v12388_v24 = vld [vmem:[%s12349_s28 + $0xc] sm:$0xf]  ;;  %s12234_s9 = smov [#allocation3]  }
  0x22   : > { %v1138_v20 = vrot.slane %v1136_v11, 4  ;;  %v12382_v21 = vrot.slane %v2529_v13, 4  ;;  %v1478_v22 = vshll.u32 %v12358_v5, 16  ;;  %v1484_v23 = vshll.u32 %v12366_v10, 16  ;;  %v12393_v29 = vld [vmem:[%s12349_s28 + $0xa8] sm:$0xf] }
  0x23   : > { %11222 = vmatprep.mubr.msk.bf16.mxu1 %vm605_vm0, %v10086_v14  ;;  %v1129_v25 = vor.u32 %v1128_v16, %v1125_v15  ;;  %v1477_v26 = vrot.slane %v1475_v18, 4  ;;  %v1488_v27 = vshrl.u32 %v12366_v10, 16  ;;  %v10210_v28 = vrot.slane %v12358_v5, 9  ;;  %16944 = vst [vmem:[#allocation6_spill] sm:$0xff] %v12393_v29  ;;  %v12400_v34 = vld [vmem:[%s12349_s28 + $0xac] sm:$0xf] }
  0x24   : > { %v1139_v30 = vor.u32 %v1138_v20, %v12374_v17  ;;  %v1480_v31 = vrot.slane %v1478_v22, 5  ;;  %v12396_v32 = vrot.slane %v1484_v23, 5  ;;  %v2633_v33 = vrot.slane %v12366_v10, 5  ;;  %16946 = vst [vmem:[#allocation8_spill] sm:$0xff] %v12400_v34  ;;  %v12408_v39 = vld [vmem:[%s12349_s28 + $0x14] sm:$0xf] }
  0x25   : > { %v12402_v35 = vrot.slane %v1129_v25, 4  ;;  %v1490_v36 = vrot.slane %v1488_v27, 4  ;;  %v10071_v37 = vcombine.low %v12378_v19, %v12388_v24  ;;  %v1146_v38 = vshrl.u32 %v12378_v19, 16  ;;  %v12423_v45 = vld [vmem:[%s12349_s28 + $0x18] sm:$0xf]  ;;  %s12144_s10 = sshll.u32 %s12234_s9, 4  ;;  %s12145_s10 = int_to_ptr.vmem [resolvable:$false] %s12144_s10 }
  0x26   : > { %16945 = vst [vmem:[#allocation7_spill] sm:$0xff] %v12396_v32  ;;  %v12415_v41 = vrot.slane %v1139_v30, 4  ;;  %v1481_v42 = vor.u32 %v1480_v31, %v1477_v26  ;;  %v12419_v43 = vrot.slane %v2633_v33, 4  ;;  %v1152_v44 = vshll.u32 %v12388_v24, 16  ;;  %v12432_v50 = vld [vmem:[%s12349_s28 + $0xb4] sm:$0xf] }
  0x27   : > { %v1491_v46 = vor.u32 %v1490_v36, %v12396_v32  ;;  %11191 = vmatmul.mubr.msk.bf16.vlgmr.msra.gmra.mxu0 %vm605_vm0, %v10071_v37  ;;  %v12427_v47 = vrot.slane %v1146_v38, 4  ;;  %v1156_v48 = vshrl.u32 %v12388_v24, 16  ;;  %v16865_v49 = vrot.slane %v12388_v24, 5  ;;  %16948 = vst [vmem:[#allocation10_spill] sm:$0xff] %v12432_v50  ;;  %v12443_v55 = vld [vmem:[%s12349_s28 + $0xb8] sm:$0xf] }
  0x28   : > { %16947 = vst [vmem:[#allocation9_spill] sm:$0xff] %v12419_v43  ;;  %v12434_v51 = vrot.slane %v1481_v42, 4  ;;  %v12436_v52 = vrot.slane %v1152_v44, 5  ;;  %v10087_v53 = vcombine.low %v12393_v29, %v12400_v34  ;;  %11321 = vmatpush3.bf16.msra.mxu0 %v12342_v2  ;;  %16950 = vst [vmem:[#allocation12_spill] sm:$0xff] %v12443_v55  ;;  %v12453_v59 = vld [vmem:[%s12349_s28 + $0x1c] sm:$0xf]  ;;  %v10072_v63 = vcombine.low %v12408_v39, %v12423_v45 }
  0x29   : > { %v12450_v57 = vrot.slane %v1491_v46, 4  ;;  %v1158_v58 = vrot.slane %v1156_v48, 4  ;;  %v12456_v60 = vld [vmem:[%s12349_s28 + $0x20] sm:$0xf]  ;;  %11452 = vmatprep.subr.bf16.mxu0 %v12413_v40  ;;  %v12461_v61 = vrot.slane %v16865_v49, 4  ;;  %v10088_v6 = vcombine.low %v12432_v50, %v12443_v55  ;;  %s12146_s11 = scalar_lea.vmem %s12145_s10, 16384 }
  0x2a   : > { %16949 = vst [vmem:[#allocation11_spill] sm:$0xff] %v12434_v51  ;;  %11223 = vmatmul.mubr.msk.bf16.vlgmr.msra.gmra.mxu1 %vm605_vm0, %v10087_v53  ;;  %v12473_v7 = vld [vmem:[%s12349_s28 + $0xbc] sm:$0xf]  ;;  %v12476_v8 = vld [vmem:[%s12349_s28 + $0xc0] sm:$0xf]  ;;  %11194 = vmatprep.mubr.msk.bf16.mxu0 %vm605_vm0, %v10072_v63  ;;  %v12570_v18 = vsel %vm12557_vm6, %v10210_v28, %v2633_v33  ;;  %v2532_v10 = vrot.slane %v12378_v19, 5 }
  0x2b   : > { %16951 = vst [vmem:[#allocation13_spill] sm:$0xff] %v12450_v57  ;;  %v1159_v2 = vor.u32 %v1158_v58, %v12436_v52  ;;  %11255 = vmatpush3.bf16.msra.mxu1 %v12336_v1  ;;  %16952 = vst [vmem:[#allocation14_spill] sm:$0xff] %v12473_v7  ;;  %v12479_v9 = vld [vmem:[%s12349_s28 + $0x28] sm:$0xf]  ;;  %v10073_v1 = vcombine.low %v12453_v59, %v12456_v60  ;;  %v12488_v16 = vld [vmem:[%s12349_s28 + $0x2c] sm:$0xf]  ;;  %11226 = vmatprep.mubr.msk.bf16.mxu1 %vm605_vm0, %v10088_v6 }
  0x2c   : > { %16953 = vst [vmem:[#allocation15_spill] sm:$0xff] %v12476_v8  ;;  %11386 = vmatprep.subr.bf16.mxu1 %v12448_v56  ;;  %v12497_v25 = vld [vmem:[%s12349_s28 + $0xc8] sm:$0xf]  ;;  %v10089_v27 = vcombine.low %v12473_v7, %v12476_v8  ;;  %v10074_v31 = vcombine.low %v12479_v9, %v12488_v16  ;;  %v12507_v36 = vld [vmem:[%s12349_s28 + $0xcc] sm:$0xf]  ;;  %v1142_v6 = vshll.u32 %v12378_v19, 16 }
  0x2d   : > { %16954 = vst [vmem:[#allocation16_spill] sm:$0xff] %v12497_v25  ;;  %v12499_v26 = vrot.slane %v1159_v2, 4  ;;  %16955 = vst [vmem:[#allocation17_spill] sm:$0xff] %v12507_v36  ;;  %v10090_v44 = vcombine.low %v12497_v25, %v12507_v36  ;;  %v12516_v46 = vld [vmem:[%s12349_s28 + $0x30] sm:$0xf]  ;;  %v16956_v2 = vmov 0 }
  0x2e   : > { %v12523_v63 = vld [vmem:[%s12349_s28 + $0x34] sm:$0xf]  ;;  %v16957_v2 = vsel %vm12527_vm5, 4294967295, %v16956_v2  ;;  %v12535_v37 = vld [vmem:[%s12349_s28 + $0xd0] sm:$0xf]  ;;  %v1144_v54 = vrot.slane %v1142_v6, 5 }
  0x2f   : > { %11195 = vmatmul.mubr.msk.bf16.gmra.mxu0 %vm605_vm0, %v10073_v1  ;;  %16958 = vst [vmem:[#allocation18_spill] sm:$0xff] %v16957_v2  ;;  %16959 = vst [vmem:[#allocation19_spill] sm:$0xff] %v12535_v37  ;;  %v12538_v30 = vld [vmem:[%s12349_s28 + $0x3c] sm:$0xf]  ;;  %v10075_v53 = vcombine.low %v12516_v46, %v12523_v63  ;;  %v12549_v20 = vld [vmem:[%s12349_s28 + $0xd4] sm:$0xf] }
  0x30   : > { %11198 = vmatprep.mubr.msk.bf16.mxu0 %vm605_vm0, %v10074_v31  ;;  %16960 = vst [vmem:[#allocation20_spill] sm:$0xff] %v12549_v20  ;;  %v12553_v15 = vld [vmem:[%s12349_s28 + $0x40] sm:$0xf]  ;;  %16963 = vst [vmem:[#allocation21_spill] sm:$0xff] %v12570_v18  ;;  %v12586_v33 = vld [vmem:[%s12349_s28 + $0x44] sm:$0xf]  ;;  %v1149_v6 = vor.u32 %v12427_v47, %v1144_v54  ;;  %v10091_v31 = vcombine.low %v12535_v37, %v12549_v20  ;;  %v1135_v47 = vsel %vm12527_vm5, %v12402_v35, %v12374_v17 }
  0x31   : > { %v10076_v1 = vcombine.low %v12538_v30, %v12553_v15  ;;  %v12580_v62 = vld [vmem:[%s12349_s28 + $0xe0] sm:$0xf]  ;;  %v12596_v42 = vld [vmem:[%s12349_s28 + $0xe4] sm:$0xf]  ;;  %v12604_v5 = vld [vmem:[%s12349_s28 + $0xe8] sm:$0xf]  ;;  %v1145_v38 = vsel %vm12527_vm5, %v12415_v41, %v1144_v54  ;;  %v12676_v35 = vsel %vm12557_vm6, %v12382_v21, %v2532_v10 }
  0x32   : > { %11227 = vmatmul.mubr.msk.bf16.gmra.mxu1 %vm605_vm0, %v10089_v27  ;;  %v12577_v27 = vld [vmem:[%s12349_s28 + $0xdc] sm:$0xf]  ;;  %16965 = vst [vmem:[#allocation23_spill] sm:$0xff] %v12580_v62  ;;  %16966 = vst [vmem:[#allocation24_spill] sm:$0xff] %v12596_v42  ;;  %v12608_v23 = vld [vmem:[%s12349_s28 + $0x50] sm:$0xf]  ;;  %v12661_v4 = vcombine.low %v1135_v47, %v1145_v38 }
  0x33   : > { %11230 = vmatprep.mubr.msk.bf16.mxu1 %vm605_vm0, %v10090_v44  ;;  %16964 = vst [vmem:[#allocation22_spill] sm:$0xff] %v12577_v27  ;;  %v12592_v44 = vld [vmem:[%s12349_s28 + $0x48] sm:$0xf]  ;;  %v10092_v28 = vcombine.low %v12577_v27, %v12580_v62  ;;  %16967 = vst [vmem:[#allocation25_spill] sm:$0xff] %v12604_v5  ;;  %v12613_v48 = vld [vmem:[%s12349_s28 + $0x54] sm:$0xf] }
  0x34   : > { %v12617_v22 = vld [vmem:[%s12349_s28 + $0xf0] sm:$0xf]  ;;  %v12629_v14 = vld [vmem:[%s12349_s28 + $0xf4] sm:$0xf]  ;;  %v12632_v49 = vrot.slane %v1149_v6, 4  ;;  %v12649_v6 = vsel %vm12557_vm6, %v10202_v12, %v2529_v13  ;;  %v2534_v3 = vrot.slane %v2532_v10, 4  ;;  %v10078_v12 = vcombine.low %v12608_v23, %v12613_v48 }
  0x35   : > { %16968 = vst [vmem:[#allocation26_spill] sm:$0xff] %v12617_v22  ;;  %16969 = vst [vmem:[#allocation27_spill] sm:$0xff] %v12629_v14  ;;  %v12638_v41 = vld [vmem:[%s12349_s28 + $0x58] sm:$0xf]  ;;  %v12641_v54 = vld [vmem:[%s12349_s28 + $0x5c] sm:$0xf]  ;;  %v10094_v62 = vcombine.low %v12617_v22, %v12629_v14 }
  0x36   : > { %v12656_v17 = vld [vmem:[%s12349_s28 + $0xf8] sm:$0xf]  ;;  %v12668_v19 = vld [vmem:[%s12349_s28 + $0x64] sm:$0xf]  ;;  %v12690_v21 = vld [vmem:[%s12349_s28 + $0x108] sm:$0xf]  ;;  %v10079_v10 = vcombine.low %v12638_v41, %v12641_v54 }
  0x37   : > { %11199 = vmatmul.mubr.msk.bf16.gmra.mxu0 %vm605_vm0, %v10075_v53  ;;  %16970 = vst [vmem:[#allocation28_spill] sm:$0xff] %v12656_v17  ;;  %v12659_v53 = vld [vmem:[%s12349_s28 + $0xfc] sm:$0xf]  ;;  %v12683_v0 = vld [vmem:[%s12349_s28 + $0x104] sm:$0xf]  ;;  %16973 = vst [vmem:[#allocation31_spill] sm:$0xff] %v12690_v21 }
  0x38   : > { %11202 = vmatprep.mubr.msk.bf16.mxu0 %vm605_vm0, %v10076_v1  ;;  %16971 = vst [vmem:[#allocation29_spill] sm:$0xff] %v12659_v53  ;;  %v12671_v1 = vld [vmem:[%s12349_s28 + $0x68] sm:$0xf]  ;;  %16972 = vst [vmem:[#allocation30_spill] sm:$0xff] %v12683_v0  ;;  %v12694_v38 = vld [vmem:[%s12349_s28 + $0x6c] sm:$0xf] }
  0x39   : > { %16974 = vst [vmem:[#allocation32_spill] sm:$0xff] %v12694_v38  ;;  %v16975_v11 = vshrl.u32 %v12408_v39, 16  ;;  %v16977_v22 = vshll.u32 %v12408_v39, 16  ;;  %v12719_v47 = vld [vmem:[%s12349_s28 + $0x78] sm:$0xf]  ;;  %v10080_v14 = vcombine.low %v12668_v19, %v12671_v1  ;;  %v1176_v8 = vshll.u32 %v12423_v45, 16 }
  0x3a   : > { %11231 = vmatmul.mubr.msk.bf16.gmra.mxu1 %vm605_vm0, %v10091_v31  ;;  %v10077_v31 = vcombine.low %v12586_v33, %v12592_v44  ;;  %16978 = vst [vmem:[#allocation34_spill] sm:$0xff] %v12719_v47  ;;  %v12740_v36 = vld [vmem:[%s12349_s28 + $0x118] sm:$0xf]  ;;  %v12743_v20 = vld [vmem:[%s12349_s28 + $0x11c] sm:$0xf]  ;;  %v16980_v25 = vrot.slane %v12388_v24, 5 }
  0x3b   : > { %11234 = vmatprep.mubr.msk.bf16.mxu1 %vm605_vm0, %v10092_v28  ;;  %v10093_v28 = vcombine.low %v12596_v42, %v12604_v5  ;;  %v1169_v13 = vrot.slane %v16975_v11, 4  ;;  %v12702_v42 = vld [vmem:[%s12349_s28 + $0x70] sm:$0xf]  ;;  %v1172_v27 = vrot.slane %v16977_v22, 5  ;;  %v10095_v11 = vcombine.low %v12656_v17, %v12659_v53  ;;  %v12731_v17 = vld [vmem:[%s12349_s28 + $0x7c] sm:$0xf] }
  0x3c   : > { %16976 = vst [vmem:[#allocation33_spill] sm:$0xff] %v12702_v42  ;;  %v12716_v5 = vld [vmem:[%s12349_s28 + $0x110] sm:$0xf]  ;;  %16979 = vst [vmem:[#allocation35_spill] sm:$0xff] %v12731_v17  ;;  %v10081_v22 = vcombine.low %v12694_v38, %v12702_v42  ;;  %v12769_v37 = vsel %vm12557_vm6, %v2534_v3, %v16980_v25  ;;  %v12777_v7 = vld [vmem:[%s12349_s28 + $0x124] sm:$0xf] }
  0x3d   : > { %v1173_v53 = vor.u32 %v1172_v27, %v1169_v13  ;;  %v12760_v13 = vld [vmem:[%s12349_s28 + $0x84] sm:$0xf]  ;;  %v12780_v55 = vld [vmem:[%s12349_s28 + $0x8c] sm:$0xf]  ;;  %v12786_v32 = vld [vmem:[%s12349_s28 + $0x90] sm:$0xf] }
  0x3e   : > { %v12800_v3 = vld [vmem:[%s12349_s28 + $0x130] sm:$0xf]  ;;  %v12807_v57 = vld [vmem:[%s12349_s28 + $0x94] sm:$0xf]  ;;  %v12814_v18 = vld [vmem:[%s12349_s28 + $0x98] sm:$0xf] }
  0x3f   : > { %11203 = vmatmul.mubr.msk.bf16.gmra.mxu0 %vm605_vm0, %v10077_v31  ;;  %v12713_v31 = vld [vmem:[%s12349_s28 + $0x10c] sm:$0xf]  ;;  %v1174_v50 = vrot.slane %v1173_v53, 4  ;;  %16982 = vst [vmem:[#allocation37_spill] sm:$0xff] %v12800_v3  ;;  %v1178_v53 = vrot.slane %v1176_v8, 5  ;;  %v1186_v27 = vshll.u32 %v12453_v59, 16 }
  0x40   : > { %11206 = vmatprep.mubr.msk.bf16.mxu0 %vm605_vm0, %v10078_v12  ;;  %v10096_v12 = vcombine.low %v12683_v0, %v12690_v21  ;;  %v10082_v21 = vcombine.low %v12719_v47, %v12731_v17  ;;  %v12797_v0 = vld [vmem:[%s12349_s28 + $0x12c] sm:$0xf]  ;;  %v12818_v34 = vld [vmem:[%s12349_s28 + $0x134] sm:$0xf]  ;;  %v12827_v25 = vld [vmem:[%s12349_s28 + $0x138] sm:$0xf] }
  0x41   : > { %16981 = vst [vmem:[#allocation36_spill] sm:$0xff] %v12797_v0  ;;  %v297_v43 = vld [vmem:[%s12349_s28 + $0x10] sm:$0x1]  ;;  %v10203_v47 = vrot.slane %v12408_v39, 9  ;;  %v2542_v24 = vrot.slane %v12423_v45, 5 }
  0x42   : > { %11235 = vmatmul.mubr.msk.bf16.gmra.mxu1 %vm605_vm0, %v10093_v28  ;;  %v12763_v28 = vld [vmem:[%s12349_s28 + $0x120] sm:$0xf]  ;;  %v1162_v29 = vshll.u32 %v297_v43, 16  ;;  %v2538_v8 = vrot.slane %v297_v43, 5 }
  0x43   : > { %11238 = vmatprep.mubr.msk.bf16.mxu1 %vm605_vm0, %v10094_v62  ;;  %v12757_v62 = vld [vmem:[%s12349_s28 + $0x80] sm:$0xf]  ;;  %v12853_v39 = vsel %vm12557_vm6, %v10203_v47, %v2542_v24 }
  0x44   : > { %v1164_v42 = vrot.slane %v1162_v29, 5 }
  0x46   : > { %v1165_v29 = vsel %vm12527_vm5, %v12499_v26, %v1164_v42 }
  0x47   : > { %11207 = vmatmul.mubr.msk.bf16.gmra.mxu0 %vm605_vm0, %v10079_v10  ;;  %v16983_v10 = vshrl.u32 %v12423_v45, 16  ;;  %v2544_v45 = vrot.slane %v2542_v24, 4 }
  0x48   : > { %11210 = vmatprep.mubr.msk.bf16.mxu0 %vm605_vm0, %v10080_v14  ;;  %v1179_v14 = vsel %vm12527_vm5, %v1174_v50, %v1178_v53  ;;  %v12843_v50 = vsel %vm12557_vm6, %v12461_v61, %v2538_v8  ;;  %v1196_v61 = vshll.u32 %v12456_v60, 16 }
  0x49   : > { %v1182_v51 = vrot.slane %v16983_v10, 4  ;;  %v302_v10 = vld [vmem:[%s12349_s28 + $0x24] sm:$0x1] }
  0x4a   : > { %11239 = vmatmul.mubr.msk.bf16.gmra.mxu1 %vm605_vm0, %v10095_v11  ;;  %v16984_v11 = vshrl.u32 %v12453_v59, 16  ;;  %v1206_v26 = vshll.u32 %v302_v10, 16 }
  0x4b   : > { %11242 = vmatprep.mubr.msk.bf16.mxu1 %vm605_vm0, %v10096_v12  ;;  %v1183_v17 = vor.u32 %v1182_v51, %v1178_v53  ;;  %v2545_v12 = vrot.slane %v12453_v59, 5  ;;  %v1188_v53 = vrot.slane %v1186_v27, 5  ;;  %v16985_v59 = vshrl.u32 %v12456_v60, 16 }
  0x4c   : > { %v1192_v38 = vrot.slane %v16984_v11, 4  ;;  %v1198_v11 = vrot.slane %v1196_v61, 5  ;;  %v16990_v61 = vshll.u32 %v12479_v9, 16 }
  0x4d   : > { %v1184_v51 = vrot.slane %v1183_v17, 4  ;;  %v1202_v8 = vrot.slane %v16985_v59, 4  ;;  %v16986_v17 = vsel %vm12527_vm5, %v12632_v49, %v12436_v52  ;;  %v12876_v24 = vsel %vm12557_vm6, %v2544_v45, %v2545_v12  ;;  %v307_v49 = vld [vmem:[%s12349_s28 + $0x38] sm:$0x1] }
  0x4e   : > { %v12868_v47 = vcombine.low %v16986_v17, %v1165_v29  ;;  %v1193_v27 = vor.u32 %v1192_v38, %v1188_v53  ;;  %v16987_v59 = vcombine.low %v12713_v31, %v12716_v5  ;;  %v1208_v38 = vrot.slane %v1206_v26, 5 }
  0x4f   : > { %11211 = vmatmul.mubr.msk.bf16.gmra.mxu0 %vm605_vm0, %v10081_v22  ;;  %v1189_v22 = vsel %vm12527_vm5, %v1184_v51, %v1188_v53  ;;  %v16988_v51 = vcombine.low %v12740_v36, %v12743_v20  ;;  %v1203_v53 = vor.u32 %v1202_v8, %v1198_v11  ;;  %v16989_v29 = vshrl.u32 %v12479_v9, 16 }
  0x50   : > { %11214 = vmatprep.mubr.msk.bf16.mxu0 %vm605_vm0, %v10082_v21  ;;  %v12872_v42 = vcombine.low %v1179_v14, %v1189_v22  ;;  %v2547_v21 = vrot.slane %v2545_v12, 4  ;;  %v1194_v52 = vrot.slane %v1193_v27, 4  ;;  %v2548_v14 = vrot.slane %v12456_v60, 5 }
  0x51   : > { %v2551_v12 = vrot.slane %v302_v10, 5  ;;  %v1213_v45 = vrot.slane %v16989_v29, 4  ;;  %v1216_v17 = vrot.slane %v16990_v61, 5  ;;  %v1220_v26 = vshll.u32 %v12488_v16, 16 }
  0x52   : > { %11243 = vmatmul.mubr.msk.bf16.gmra.mxu1 %vm605_vm0, %v16987_v59  ;;  %v1199_v22 = vsel %vm12527_vm5, %v1194_v52, %v1198_v11  ;;  %v12897_v27 = vsel %vm12557_vm6, %v2547_v21, %v2548_v14  ;;  %v2550_v60 = vrot.slane %v2548_v14, 4  ;;  %v1204_v59 = vrot.slane %v1203_v53, 4 }
  0x53   : > { %11246 = vmatprep.mubr.msk.bf16.mxu1 %vm605_vm0, %v16988_v51  ;;  %v1217_v51 = vor.u32 %v1216_v17, %v1213_v45  ;;  %v16991_v10 = vshrl.u32 %v12488_v16, 16  ;;  %v1230_v29 = vshll.u32 %v12516_v46, 16  ;;  %v1222_v11 = vrot.slane %v1220_v26, 5 }
  0x54   : > { %v12906_v61 = vsel %vm12557_vm6, %v2550_v60, %v2551_v12  ;;  %v10204_v52 = vrot.slane %v12479_v9, 9  ;;  %v2555_v21 = vrot.slane %v12488_v16, 5  ;;  %v16992_v14 = vcombine.low %v12757_v62, %v12760_v13 }
  0x55   : > { %v1226_v8 = vrot.slane %v16991_v10, 4  ;;  %v1209_v53 = vsel %vm12527_vm5, %v1204_v59, %v1208_v38  ;;  %v1218_v17 = vrot.slane %v1217_v51, 4  ;;  %v1232_v10 = vrot.slane %v1230_v29, 5 }
  0x56   : > { %v16993_v12 = vcombine.low %v12780_v55, %v12786_v32  ;;  %v12922_v9 = vcombine.low %v1199_v22, %v1209_v53  ;;  %v12926_v60 = vsel %vm12557_vm6, %v10204_v52, %v2555_v21  ;;  %v2557_v26 = vrot.slane %v2555_v21, 4 }
  0x57   : > { %11215 = vmatmul.mubr.msk.bf16.gmra.mxu0 %vm605_vm0, %v16992_v14  ;;  %v1227_v16 = vor.u32 %v1226_v8, %v1222_v11  ;;  %v1223_v38 = vsel %vm12527_vm5, %v1218_v17, %v1222_v11  ;;  %v2558_v59 = vrot.slane %v12516_v46, 5  ;;  %v16994_v51 = vshrl.u32 %v12516_v46, 16 }
  0x58   : > { %11218 = vmatprep.mubr.msk.bf16.mxu0 %vm605_vm0, %v16993_v12  ;;  %v1240_v14 = vshll.u32 %v12523_v63, 16  ;;  %v16995_v22 = vcombine.low %v12763_v28, %v12777_v7  ;;  %v16996_v52 = vshrl.u32 %v12523_v63, 16  ;;  %v1250_v21 = vshll.u32 %v307_v49, 16 }
  0x59   : > { %v1236_v29 = vrot.slane %v16994_v51, 4  ;;  %v1228_v8 = vrot.slane %v1227_v16, 4  ;;  %v2561_v12 = vrot.slane %v12523_v63, 5  ;;  %v16997_v11 = vcombine.low %v12797_v0, %v12800_v3 }
  0x5a   : > { %11247 = vmatmul.mubr.msk.bf16.gmra.mxu1 %vm605_vm0, %v16995_v22  ;;  %v1246_v53 = vrot.slane %v16996_v52, 4  ;;  %v12947_v46 = vsel %vm12557_vm6, %v2557_v26, %v2558_v59  ;;  %v1242_v51 = vrot.slane %v1240_v14, 5  ;;  %v2560_v45 = vrot.slane %v2558_v59, 4 }
  0x5b   : > { %11250 = vmatprep.mubr.msk.bf16.mxu1 %vm605_vm0, %v16997_v11  ;;  %v1237_v17 = vor.u32 %v1236_v29, %v1232_v10  ;;  %v1233_v16 = vsel %vm12527_vm5, %v1228_v8, %v1232_v10  ;;  %v10224_v22 = vcombine.low %v12926_v60, %v12947_v46  ;;  %v1252_v52 = vrot.slane %v1250_v21, 5 }
  0x5c   : > { %v2563_v63 = vrot.slane %v2561_v12, 4  ;;  %v12953_v43 = vcombine.low %v1223_v38, %v1233_v16  ;;  %v1247_v0 = vor.u32 %v1246_v53, %v1242_v51  ;;  %v12957_v11 = vsel %vm12557_vm6, %v2560_v45, %v2561_v12 }
  0x5d   : > { %v1238_v3 = vrot.slane %v1237_v17, 4  ;;  %v2564_v26 = vrot.slane %v307_v49, 5  ;;  %v16998_v29 = vshrl.u32 %v12538_v30, 16  ;;  %v16999_v14 = vshll.u32 %v12538_v30, 16 }
  0x5e   : > { %v1264_v8 = vshll.u32 %v12553_v15, 16  ;;  %v17000_v38 = vcombine.low %v12807_v57, %v12814_v18  ;;  %v1248_v45 = vrot.slane %v1247_v0, 4  ;;  %v17001_v49 = vshrl.u32 %v12553_v15, 16 }
  0x5f   : > { %v1257_v59 = vrot.slane %v16998_v29, 4  ;;  %v1260_v10 = vrot.slane %v16999_v14, 5  ;;  %v1243_v53 = vsel %vm12527_vm5, %v1238_v3, %v1242_v51  ;;  %v1274_v12 = vshll.u32 %v12586_v33, 16 }
  0x60   : > { %11219 = vmatmul.mubr.msk.bf16.gmra.mxu0 %vm605_vm0, %v17000_v38  ;;  %v1270_v21 = vrot.slane %v17001_v49, 4  ;;  %v17002_v17 = vcombine.low %v12649_v6, %v12676_v35  ;;  %v12979_v16 = vsel %vm12557_vm6, %v2563_v63, %v2564_v26  ;;  %v1266_v14 = vrot.slane %v1264_v8, 5  ;;  %v312_v35 = vld [vmem:[%s12349_s28 + $0x4c] sm:$0x1] }
  0x61   : > { %v1261_v29 = vor.u32 %v1260_v10, %v1257_v59  ;;  %v10205_v38 = vrot.slane %v12538_v30, 9  ;;  %v1253_v0 = vsel %vm12527_vm5, %v1248_v45, %v1252_v52  ;;  %v10225_v3 = vcombine.low %v12957_v11, %v12979_v16 }
  0x62   : > { %11322 = vmatprep.mubr.msk.bf16.mxu0 %vm605_vm0, %v17002_v17  ;;  %v1276_v51 = vrot.slane %v1274_v12, 5  ;;  %v2568_v49 = vrot.slane %v12553_v15, 5  ;;  %v17003_v6 = vcombine.low %v12818_v34, %v12827_v25  ;;  %v12992_v63 = vcombine.low %v1243_v53, %v1253_v0 }
  0x63   : > { %v1262_v26 = vrot.slane %v1261_v29, 4  ;;  %v1271_v59 = vor.u32 %v1270_v21, %v1266_v14  ;;  %v2571_v30 = vrot.slane %v12586_v33, 5  ;;  %v17004_v10 = vshrl.u32 %v12586_v33, 16 }
  0x64   : > { %11251 = vmatmul.mubr.msk.bf16.gmra.mxu1 %vm605_vm0, %v17003_v6  ;;  %v12999_v52 = vsel %vm12557_vm6, %v10205_v38, %v2568_v49  ;;  %v2570_v15 = vrot.slane %v2568_v49, 4  ;;  %v1284_v45 = vshll.u32 %v12592_v44, 16  ;;  %v17005_v21 = vshrl.u32 %v12592_v44, 16 }
  0x65   : > { %11256 = vmatprep.mubr.msk.bf16.mxu1 %vm605_vm0, %v12661_v4  ;;  %v1280_v8 = vrot.slane %v17004_v10, 4  ;;  %v1267_v53 = vsel %vm12527_vm5, %v1262_v26, %v1266_v14  ;;  %v1272_v12 = vrot.slane %v1271_v59, 4  ;;  %v1294_v29 = vshll.u32 %v312_v35, 16 }
  0x66   : > { %v1290_v17 = vrot.slane %v17005_v21, 4  ;;  %v13010_v4 = vsel %vm12557_vm6, %v2570_v15, %v2571_v30  ;;  %v1286_v0 = vrot.slane %v1284_v45, 5  ;;  %v2573_v49 = vrot.slane %v2571_v30, 4 }
  0x67   : > { %v1281_v38 = vor.u32 %v1280_v8, %v1276_v51  ;;  %v1277_v33 = vsel %vm12527_vm5, %v1272_v12, %v1276_v51  ;;  %v10226_v6 = vcombine.low %v12999_v52, %v13010_v4  ;;  %v1296_v10 = vrot.slane %v1294_v29, 5 }
  0x68   : > { %v2574_v14 = vrot.slane %v12592_v44, 5  ;;  %v17006_v26 = vcombine.low %v12769_v37, %v12843_v50  ;;  %v13021_v59 = vcombine.low %v1267_v53, %v1277_v33  ;;  %v1291_v8 = vor.u32 %v1290_v17, %v1286_v0 }
  0x69   : > { %v1282_v15 = vrot.slane %v1281_v38, 4  ;;  %v2577_v45 = vrot.slane %v312_v35, 5  ;;  %v17007_v51 = vcombine.low %v12853_v39, %v12876_v24  ;;  %v17008_v37 = vshrl.u32 %v12608_v23, 16 }
  0x6a   : > { %11323 = vmatmul.mubr.msk.bf16.vlgmr.msra.gmra.mxu0 %vm605_vm0, %v17006_v26  ;;  %v13030_v44 = vsel %vm12557_vm6, %v2573_v49, %v2574_v14  ;;  %v2576_v30 = vrot.slane %v2574_v14, 4  ;;  %v17009_v53 = vshll.u32 %v12608_v23, 16  ;;  %v1292_v35 = vrot.slane %v1291_v8, 4  ;;  %v317_v26 = vld [vmem:[%s12349_s28 + $0x60] sm:$0x1] }
  0x6b   : > { %11453 = vmatpush3.bf16.msra.mxu0 %v12413_v40  ;;  %11326 = vmatprep.mubr.msk.bf16.mxu0 %vm605_vm0, %v17007_v51  ;;  %v1301_v50 = vrot.slane %v17008_v37, 4  ;;  %v1287_v40 = vsel %vm12527_vm5, %v1282_v15, %v1286_v0  ;;  %v1308_v39 = vshll.u32 %v12613_v48, 16  ;;  %v17010_v24 = vshrl.u32 %v12613_v48, 16 }
  0x6c   : > { %v1304_v12 = vrot.slane %v17009_v53, 5  ;;  %11257 = vmatmul.mubr.msk.bf16.vlgmr.msra.gmra.mxu1 %vm605_vm0, %v12868_v47  ;;  %v13045_v17 = vsel %vm12557_vm6, %v2576_v30, %v2577_v45  ;;  %v1318_v38 = vshll.u32 %v12638_v41, 16  ;;  %v10206_v49 = vrot.slane %v12608_v23, 9 }
  0x6d   : > { %v1314_v21 = vrot.slane %v17010_v24, 4  ;;  %11387 = vmatpush3.bf16.msra.mxu1 %v12448_v56  ;;  %11260 = vmatprep.mubr.msk.bf16.mxu1 %vm605_vm0, %v12872_v42  ;;  %v1297_v0 = vsel %vm12527_vm5, %v1292_v35, %v1296_v10  ;;  %v10227_v47 = vcombine.low %v13030_v44, %v13045_v17  ;;  %v1310_v33 = vrot.slane %v1308_v39, 5  ;;  %v11896_v56 = vld [vmem:[%s16862_s1 + $0x28] sm:$0xff]  }
  0x6e   : > { %v1305_v29 = vor.u32 %v1304_v12, %v1301_v50  ;;  %v2581_v14 = vrot.slane %v12613_v48, 5  ;;  %v13058_v15 = vcombine.low %v1287_v40, %v1297_v0  ;;  %v1320_v45 = vrot.slane %v1318_v38, 5  ;;  %11518 = vmatprep.subr.bf16.mxu1 %v11896_v56 }
  0x6f   : > { %v2584_v23 = vrot.slane %v12638_v41, 5  ;;  %v1315_v42 = vor.u32 %v1314_v21, %v1310_v33  ;;  %v17011_v30 = vshrl.u32 %v12638_v41, 16  ;;  %v1328_v50 = vshll.u32 %v12641_v54, 16 }
  0x70   : > { %v1306_v8 = vrot.slane %v1305_v29, 4  ;;  %v13066_v10 = vsel %vm12557_vm6, %v10206_v49, %v2581_v14  ;;  %v2583_v51 = vrot.slane %v2581_v14, 4  ;;  %v17012_v53 = vshrl.u32 %v12641_v54, 16 }
  0x71   : > { %v1324_v48 = vrot.slane %v17011_v30, 4  ;;  %v1338_v40 = vshll.u32 %v317_v26, 16  ;;  %v17013_v35 = vcombine.low %v12897_v27, %v12906_v61  ;;  %v1316_v39 = vrot.slane %v1315_v42, 4  ;;  %v11898_v61 = vld [vmem:[%s16862_s1 + $0x30] sm:$0xff]  }
  0x72   : > { %v1311_v37 = vsel %vm12527_vm5, %v1306_v8, %v1310_v33  ;;  %v1334_v12 = vrot.slane %v17012_v53, 4  ;;  %v13081_v41 = vsel %vm12557_vm6, %v2583_v51, %v2584_v23  ;;  %v2586_v21 = vrot.slane %v2584_v23, 4  ;;  %11584 = vmatprep.subr.bf16.mxu0 %v11898_v61 }
  0x73   : > { %11327 = vmatmul.mubr.msk.bf16.gmra.mxu0 %vm605_vm0, %v17013_v35  ;;  %v1325_v24 = vor.u32 %v1324_v48, %v1320_v45  ;;  %v10228_v29 = vcombine.low %v13066_v10, %v13081_v41  ;;  %v1330_v38 = vrot.slane %v1328_v50, 5  ;;  %v1340_v49 = vrot.slane %v1338_v40, 5 }
  0x74   : > { %11330 = vmatprep.mubr.msk.bf16.mxu0 %vm605_vm0, %v10224_v22  ;;  %v2587_v27 = vrot.slane %v12641_v54, 5  ;;  %v1321_v0 = vsel %vm12527_vm5, %v1316_v39, %v1320_v45  ;;  %v2590_v14 = vrot.slane %v317_v26, 5  ;;  %v17014_v60 = vshrl.u32 %v12668_v19, 16  ;;  %11261 = vmatmul.mubr.msk.bf16.gmra.mxu1 %vm605_vm0, %v12922_v9 }
  0x75   : > { %v1326_v33 = vrot.slane %v1325_v24, 4  ;;  %v13099_v22 = vcombine.low %v1311_v37, %v1321_v0  ;;  %v1335_v8 = vor.u32 %v1334_v12, %v1330_v38  ;;  %11264 = vmatprep.mubr.msk.bf16.mxu1 %vm605_vm0, %v12953_v43  ;;  %v17015_v45 = vshll.u32 %v12668_v19, 16  ;;  %v17017_v37 = vld [vmem:[#allocation32_spill] sm:$0xff] }
  0x76   : > { %v1345_v46 = vrot.slane %v17014_v60, 4  ;;  %v13103_v54 = vsel %vm12557_vm6, %v2586_v21, %v2587_v27  ;;  %v2589_v23 = vrot.slane %v2587_v27, 4  ;;  %v1352_v9 = vshll.u32 %v12671_v1, 16  ;;  %v17019_v60 = vld [vmem:[#allocation33_spill] sm:$0xff] }
  0x77   : > { %v1331_v26 = vsel %vm12527_vm5, %v1326_v33, %v1330_v38  ;;  %v1348_v56 = vrot.slane %v17015_v45, 5  ;;  %v17016_v42 = vshrl.u32 %v12671_v1, 16  ;;  %v1336_v30 = vrot.slane %v1335_v8, 4  ;;  %v322_v38 = vld [vmem:[%s12349_s28 + $0x74] sm:$0x1] }
  0x78   : > { %v13116_v48 = vsel %vm12557_vm6, %v2589_v23, %v2590_v14  ;;  %v1362_v50 = vshll.u32 %v17017_v37, 16  ;;  %v10207_v43 = vrot.slane %v12668_v19, 9  ;;  %v1354_v40 = vrot.slane %v1352_v9, 5 }
  0x79   : > { %v1358_v51 = vrot.slane %v17016_v42, 4  ;;  %v10229_v53 = vcombine.low %v13103_v54, %v13116_v48  ;;  %v1349_v12 = vor.u32 %v1348_v56, %v1345_v46  ;;  %v2594_v35 = vrot.slane %v12671_v1, 5 }
  0x7a   : > { %v1341_v39 = vsel %vm12527_vm5, %v1336_v30, %v1340_v49  ;;  %v1364_v24 = vrot.slane %v1362_v50, 5  ;;  %v2597_v21 = vrot.slane %v17017_v37, 5  ;;  %v17018_v27 = vshrl.u32 %v17017_v37, 16 }
  0x7b   : > { %11331 = vmatmul.mubr.msk.bf16.gmra.mxu0 %vm605_vm0, %v10225_v3  ;;  %v13133_v19 = vcombine.low %v1331_v26, %v1341_v39  ;;  %v1350_v0 = vrot.slane %v1349_v12, 4  ;;  %v1359_v33 = vor.u32 %v1358_v51, %v1354_v40  ;;  %v13137_v1 = vsel %vm12557_vm6, %v10207_v43, %v2594_v35 }
  0x7c   : > { %v1368_v61 = vrot.slane %v17018_v27, 4  ;;  %11334 = vmatprep.mubr.msk.bf16.mxu0 %vm605_vm0, %v10226_v6  ;;  %v2596_v49 = vrot.slane %v2594_v35, 4  ;;  %v1372_v46 = vshll.u32 %v17019_v60, 16  ;;  %v17020_v11 = vshrl.u32 %v17019_v60, 16  ;;  %11265 = vmatmul.mubr.msk.bf16.gmra.mxu1 %vm605_vm0, %v12992_v63 }
  0x7d   : > { %v1355_v3 = vsel %vm12527_vm5, %v1350_v0, %v1354_v40  ;;  %v1360_v8 = vrot.slane %v1359_v33, 4  ;;  %v1382_v23 = vshll.u32 %v322_v38, 16  ;;  %v2599_v26 = vrot.slane %v2597_v21, 4  ;;  %11268 = vmatprep.mubr.msk.bf16.mxu1 %vm605_vm0, %v13021_v59  ;;  %v17021_v59 = vld [vmem:[#allocation34_spill] sm:$0xff] }
  0x7e   : > { %v1369_v14 = vor.u32 %v1368_v61, %v1364_v24  ;;  %v1378_v16 = vrot.slane %v17020_v11, 4  ;;  %v13152_v52 = vsel %vm12557_vm6, %v2596_v49, %v2597_v21  ;;  %v1374_v6 = vrot.slane %v1372_v46, 5  ;;  %v327_v11 = vld [vmem:[%s12349_s28 + $0x88] sm:$0x1] }
  0x7f   : > { %v2600_v45 = vrot.slane %v17019_v60, 5  ;;  %v1365_v56 = vsel %vm12527_vm5, %v1360_v8, %v1364_v24  ;;  %v10230_v9 = vcombine.low %v13137_v1, %v13152_v52  ;;  %v1384_v42 = vrot.slane %v1382_v23, 5  ;;  %v17024_v24 = vld [vmem:[#allocation35_spill] sm:$0xff] }
  0x80   : > { %v1370_v4 = vrot.slane %v1369_v14, 4  ;;  %v2603_v51 = vrot.slane %v322_v38, 5  ;;  %v13161_v63 = vcombine.low %v1355_v3, %v1365_v56  ;;  %v1379_v37 = vor.u32 %v1378_v16, %v1374_v6 }
  0x81   : > { %v13167_v50 = vsel %vm12557_vm6, %v2599_v26, %v2600_v45  ;;  %v2602_v43 = vrot.slane %v2600_v45, 4  ;;  %v17022_v12 = vshrl.u32 %v17021_v59, 16  ;;  %v17023_v35 = vshll.u32 %v17021_v59, 16 }
  0x82   : > { %v1375_v30 = vsel %vm12527_vm5, %v1370_v4, %v1374_v6  ;;  %v1396_v21 = vshll.u32 %v17024_v24, 16  ;;  %v1380_v38 = vrot.slane %v1379_v37, 4  ;;  %v17025_v27 = vshrl.u32 %v17024_v24, 16 }
  0x83   : > { %v1389_v40 = vrot.slane %v17022_v12, 4  ;;  %v1392_v39 = vrot.slane %v17023_v35, 5  ;;  %v1406_v0 = vshll.u32 %v12757_v62, 16  ;;  %v10208_v33 = vrot.slane %v17021_v59, 9  ;;  %11335 = vmatmul.mubr.msk.bf16.gmra.mxu0 %vm605_vm0, %v10227_v47 }
  0x84   : > { %v1402_v61 = vrot.slane %v17025_v27, 4  ;;  %v13184_v1 = vsel %vm12557_vm6, %v2602_v43, %v2603_v51  ;;  %v1398_v14 = vrot.slane %v1396_v21, 5  ;;  %v2607_v60 = vrot.slane %v17024_v24, 5  ;;  %11338 = vmatprep.mubr.msk.bf16.mxu0 %vm605_vm0, %v10228_v29  ;;  %11269 = vmatmul.mubr.msk.bf16.gmra.mxu1 %vm605_vm0, %v13058_v15 }
  0x85   : > { %v1393_v49 = vor.u32 %v1392_v39, %v1389_v40  ;;  %v1385_v46 = vsel %vm12527_vm5, %v1380_v38, %v1384_v42  ;;  %v10231_v44 = vcombine.low %v13167_v50, %v13184_v1  ;;  %v1408_v17 = vrot.slane %v1406_v0, 5  ;;  %11272 = vmatprep.mubr.msk.bf16.mxu1 %vm605_vm0, %v13099_v22 }
  0x86   : > { %v2610_v47 = vrot.slane %v12757_v62, 5  ;;  %v13197_v16 = vcombine.low %v1375_v30, %v1385_v46  ;;  %v1403_v8 = vor.u32 %v1402_v61, %v1398_v14  ;;  %v13201_v23 = vsel %vm12557_vm6, %v10208_v33, %v2607_v60 }
  0x87   : > { %v1394_v3 = vrot.slane %v1393_v49, 4  ;;  %v2609_v10 = vrot.slane %v2607_v60, 4  ;;  %v17026_v41 = vshrl.u32 %v12757_v62, 16  ;;  %v1416_v26 = vshll.u32 %v12760_v13, 16 }
  0x88   : > { %v17027_v52 = vshrl.u32 %v12760_v13, 16  ;;  %v1404_v45 = vrot.slane %v1403_v8, 4  ;;  %v1426_v56 = vshll.u32 %v327_v11, 16  ;;  %v2612_v42 = vrot.slane %v2610_v47, 4 }
  0x89   : > { %v1412_v29 = vrot.slane %v17026_v41, 4  ;;  %v1399_v6 = vsel %vm12527_vm5, %v1394_v3, %v1398_v14  ;;  %v2611_v15 = vsel %vm12557_vm6, %v2609_v10, %v2610_v47  ;;  %v1418_v62 = vrot.slane %v1416_v26, 5  ;;  %v332_v3 = vld [vmem:[%s12349_s28 + $0x9c] sm:$0x1] }
  0x8a   : > { %v1422_v4 = vrot.slane %v17027_v52, 4  ;;  %v2613_v30 = vrot.slane %v12760_v13, 5  ;;  %v1409_v37 = vsel %vm12527_vm5, %v1404_v45, %v1408_v17  ;;  %v10232_v43 = vcombine.low %v13201_v23, %v2611_v15 }
  0x8b   : > { %v1413_v51 = vor.u32 %v1412_v29, %v1408_v17  ;;  %v1428_v59 = vrot.slane %v1426_v56, 5  ;;  %v2616_v22 = vrot.slane %v327_v11, 5  ;;  %v13220_v12 = vcombine.low %v1399_v6, %v1409_v37  ;;  %11339 = vmatmul.mubr.msk.bf16.gmra.mxu0 %vm605_vm0, %v10229_v53 }
  0x8c   : > { %v1423_v35 = vor.u32 %v1422_v4, %v1418_v62  ;;  %v13224_v39 = vsel %vm12557_vm6, %v2612_v42, %v2613_v30  ;;  %v2615_v13 = vrot.slane %v2613_v30, 4  ;;  %v17028_v24 = vshrl.u32 %v12780_v55, 16  ;;  %11342 = vmatprep.mubr.msk.bf16.mxu0 %vm605_vm0, %v10230_v9  ;;  %11273 = vmatmul.mubr.msk.bf16.gmra.mxu1 %vm605_vm0, %v13133_v19 }
  0x8d   : > { %v1414_v40 = vrot.slane %v1413_v51, 4  ;;  %v17029_v38 = vshll.u32 %v12780_v55, 16  ;;  %v1440_v61 = vshll.u32 %v12786_v32, 16  ;;  %v17030_v54 = vshrl.u32 %v12786_v32, 16  ;;  %11276 = vmatprep.mubr.msk.bf16.mxu1 %vm605_vm0, %v13161_v63 }
  0x8e   : > { %v1433_v21 = vrot.slane %v17028_v24, 4  ;;  %v1424_v33 = vrot.slane %v1423_v35, 4  ;;  %v1450_v53 = vshll.u32 %v12807_v57, 16  ;;  %v13243_v49 = vsel %vm12557_vm6, %v2615_v13, %v2616_v22 }
  0x8f   : > { %v1436_v27 = vrot.slane %v17029_v38, 5  ;;  %v1419_v0 = vsel %vm12527_vm5, %v1414_v40, %v1418_v62  ;;  %v1446_v48 = vrot.slane %v17030_v54, 4  ;;  %v1442_v60 = vrot.slane %v1440_v61, 5  ;;  %v11964_v61 = vld [vmem:[%s12349_s28 + $0xac] sm:$0xf] }
  0x90   : > { %v10209_v46 = vrot.slane %v12780_v55, 9  ;;  %v1429_v9 = vsel %vm12527_vm5, %v1424_v33, %v1428_v59  ;;  %v10233_v17 = vcombine.low %v13224_v39, %v13243_v49  ;;  %v1452_v47 = vrot.slane %v1450_v53, 5  ;;  %v17036_v53 = vld [vmem:[#allocation8_spill] sm:$0xff] }
  0x91   : > { %v1437_v14 = vor.u32 %v1436_v27, %v1433_v21  ;;  %v2620_v11 = vrot.slane %v12786_v32, 5  ;;  %v13256_v8 = vcombine.low %v1419_v0, %v1429_v9  ;;  %v1447_v55 = vor.u32 %v1446_v48, %v1442_v60  ;;  %v17033_v21 = vld [vmem:[#allocation6_spill] sm:$0xff]  ;;  %v17035_v48 = vld [vmem:[#allocation9_spill] sm:$0xff] }
  0x92   : > { %v2623_v10 = vrot.slane %v12807_v57, 5  ;;  %v17031_v29 = vshrl.u32 %v12807_v57, 16  ;;  %v1460_v52 = vshll.u32 %v12814_v18, 16  ;;  %v17032_v63 = vshrl.u32 %v12814_v18, 16  ;;  %v17038_v9 = vld [vmem:[#allocation21_spill] sm:$0xff] }
  0x93   : > { %v1438_v23 = vrot.slane %v1437_v14, 4  ;;  %v2621_v19 = vsel %vm12557_vm6, %v10209_v46, %v2620_v11  ;;  %v2622_v41 = vrot.slane %v2620_v11, 4  ;;  %v1448_v4 = vrot.slane %v1447_v55, 4  ;;  %11343 = vmatmul.mubr.msk.bf16.gmra.mxu0 %vm605_vm0, %v10231_v44  ;;  %v11963_v44 = vld [vmem:[%s12349_s28 + $0xa8] sm:$0xf] }
  0x94   : > { %v1456_v26 = vrot.slane %v17031_v29, 4  ;;  %v1466_v6 = vrot.slane %v17032_v63, 4  ;;  %v1470_v45 = vshll.u32 %v332_v3, 16  ;;  %v1462_v15 = vrot.slane %v1460_v52, 5  ;;  %11346 = vmatprep.mubr.msk.bf16.mxu0 %vm605_vm0, %v10232_v43  ;;  %11277 = vmatmul.mubr.msk.bf16.gmra.mxu1 %vm605_vm0, %v13197_v16  ;;  %v337_v43 = vld [vmem:[%s12349_s28 + $0xb0] sm:$0x1] }
  0x95   : > { %v1443_v32 = vsel %vm12527_vm5, %v1438_v23, %v1442_v60  ;;  %v2624_v56 = vsel %vm12557_vm6, %v2622_v41, %v2623_v10  ;;  %v2625_v51 = vrot.slane %v2623_v10, 4  ;;  %v1453_v57 = vsel %vm12527_vm5, %v1448_v4, %v1452_v47  ;;  %11280 = vmatprep.mubr.msk.bf16.mxu1 %vm605_vm0, %v13220_v12  ;;  %v17041_v41 = vld [vmem:[#allocation7_spill] sm:$0xff] }
  0x96   : > { %v1457_v42 = vor.u32 %v1456_v26, %v1452_v47  ;;  %v10234_v62 = vcombine.low %v2621_v19, %v2624_v56  ;;  %v1472_v30 = vrot.slane %v1470_v45, 5  ;;  %v2626_v37 = vrot.slane %v12814_v18, 5  ;;  %v17040_v19 = vld [vmem:[#allocation11_spill] sm:$0xff]  ;;  %v17043_v56 = vld [vmem:[#allocation10_spill] sm:$0xff] }
  0x97   : > { %v10151_v59 = vcombine.low %v1443_v32, %v1453_v57  ;;  %v1467_v40 = vor.u32 %v1466_v6, %v1462_v15  ;;  %v2629_v35 = vrot.slane %v332_v3, 5  ;;  %v1494_v39 = vshll.u32 %v11963_v44, 16  ;;  %v17039_v3 = vld [vmem:[#allocation13_spill] sm:$0xff] }
  0x98   : > { %v1458_v22 = vrot.slane %v1457_v42, 4  ;;  %v13280_v50 = vsel %vm12557_vm6, %v2625_v51, %v2626_v37  ;;  %v2628_v1 = vrot.slane %v2626_v37, 4  ;;  %v2636_v13 = vrot.slane %v11963_v44, 5 }
  0x99   : > { %v1468_v24 = vrot.slane %v1467_v40, 4  ;;  %v17034_v38 = vshrl.u32 %v17033_v21, 16  ;;  %v1504_v0 = vshll.u32 %v11964_v61, 16  ;;  %v1496_v54 = vrot.slane %v1494_v39, 5  ;;  %v11965_v40 = vld [vmem:[%s12349_s28 + $0xb8] sm:$0xf] }
  0x9a   : > { %v1463_v18 = vsel %vm12527_vm5, %v1458_v22, %v1462_v15  ;;  %v2630_v33 = vsel %vm12557_vm6, %v2628_v1, %v2629_v35  ;;  %v2637_v16 = vsel %vm12557_vm6, %v17035_v48, %v2636_v13  ;;  %v17037_v49 = vshrl.u32 %v17036_v53, 16  ;;  %v11966_v39 = vld [vmem:[%s12349_s28 + $0xbc] sm:$0xf] }
  0x9b   : > { %v1500_v27 = vrot.slane %v17034_v38, 4  ;;  %v1473_v60 = vsel %vm12527_vm5, %v1468_v24, %v1472_v30  ;;  %v10235_v46 = vcombine.low %v13280_v50, %v2630_v33  ;;  %v10236_v47 = vcombine.low %v17038_v9, %v2637_v16  ;;  %11347 = vmatmul.mubr.msk.bf16.gmra.mxu0 %vm605_vm0, %v10233_v17  ;;  %v17046_v50 = vld [vmem:[#allocation12_spill] sm:$0xff]  ;;  %v342_v38 = vld [vmem:[%s12349_s28 + $0xc4] sm:$0x1] }
  0x9c   : > { %v1510_v14 = vrot.slane %v17037_v49, 4  ;;  %v1506_v11 = vrot.slane %v1504_v0, 5  ;;  %v13304_v12 = vcombine.low %v1463_v18, %v1473_v60  ;;  %v1497_v23 = vsel %vm12527_vm5, %v17039_v3, %v1496_v54  ;;  %11350 = vmatprep.mubr.msk.bf16.mxu0 %vm605_vm0, %v10234_v62  ;;  %11281 = vmatmul.mubr.msk.bf16.gmra.mxu1 %vm605_vm0, %v13256_v8  ;;  %v17048_v16 = vld [vmem:[#allocation14_spill] sm:$0xff] }
  0x9d   : > { %v1501_v55 = vor.u32 %v1500_v27, %v1496_v54  ;;  %v1514_v10 = vshll.u32 %v337_v43, 16  ;;  %v17042_v29 = vsel %vm12527_vm5, %v17040_v19, %v17041_v41  ;;  %v2638_v32 = vrot.slane %v2636_v13, 4  ;;  %11284 = vmatprep.mubr.msk.bf16.mxu1 %vm605_vm0, %v10151_v59  ;;  %v11968_v60 = vld [vmem:[%s12349_s28 + $0xc0] sm:$0xf] }
  0x9e   : > { %v13314_v26 = vcombine.low %v17042_v29, %v1497_v23  ;;  %v1511_v52 = vor.u32 %v1510_v14, %v1506_v11  ;;  %v2639_v4 = vrot.slane %v11964_v61, 5  ;;  %v2642_v45 = vrot.slane %v337_v43, 5  ;;  %v11967_v43 = vld [vmem:[%s12349_s28 + $0xb4] sm:$0xf] }
  0x9f   : > { %v1502_v63 = vrot.slane %v1501_v55, 4  ;;  %v1516_v6 = vrot.slane %v1514_v10, 5  ;;  %v17044_v42 = vshrl.u32 %v17043_v56, 16  ;;  %v17045_v37 = vshll.u32 %v17043_v56, 16 }
  0xa0   : > { %v1512_v51 = vrot.slane %v1511_v52, 4  ;;  %v13322_v57 = vsel %vm12557_vm6, %v2638_v32, %v2639_v4  ;;  %v2641_v30 = vrot.slane %v2639_v4, 4  ;;  %v1528_v35 = vshll.u32 %v11965_v40, 16 }
  0xa1   : > { %v1521_v15 = vrot.slane %v17044_v42, 4  ;;  %v1524_v22 = vrot.slane %v17045_v37, 5  ;;  %v1507_v17 = vsel %vm12527_vm5, %v1502_v63, %v1506_v11  ;;  %v17047_v1 = vshrl.u32 %v17046_v50, 16  ;;  %v17050_v11 = vld [vmem:[#allocation15_spill] sm:$0xff] }
  0xa2   : > { %v1538_v62 = vshll.u32 %v11966_v39, 16  ;;  %v1517_v13 = vsel %vm12527_vm5, %v1512_v51, %v1516_v6  ;;  %v13338_v18 = vsel %vm12557_vm6, %v2641_v30, %v2642_v45  ;;  %v10211_v21 = vrot.slane %v11967_v43, 9  ;;  %v11971_v43 = vld [vmem:[%s12349_s28 + $0xc8] sm:$0xf] }
  0xa3   : > { %v1534_v44 = vrot.slane %v17047_v1, 4  ;;  %v1525_v24 = vor.u32 %v1524_v22, %v1521_v15  ;;  %v13343_v27 = vcombine.low %v1507_v17, %v1517_v13  ;;  %v10237_v61 = vcombine.low %v13322_v57, %v13338_v18  ;;  %11351 = vmatmul.mubr.msk.bf16.gmra.mxu0 %vm605_vm0, %v10235_v46  ;;  %v17052_v46 = vld [vmem:[#allocation16_spill] sm:$0xff]  ;;  %v11969_v1 = vld [vmem:[%s12349_s28 + $0xcc] sm:$0xf] }
  0xa4   : > { %v1530_v8 = vrot.slane %v1528_v35, 5  ;;  %v1540_v0 = vrot.slane %v1538_v62, 5  ;;  %v2646_v54 = vrot.slane %v11965_v40, 5  ;;  %v2649_v48 = vrot.slane %v11966_v39, 5  ;;  %11354 = vmatprep.mubr.msk.bf16.mxu0 %vm605_vm0, %v10236_v47  ;;  %11285 = vmatmul.mubr.msk.bf16.gmra.mxu1 %vm605_vm0, %v13304_v12  ;;  %v17055_v12 = vld [vmem:[#allocation17_spill] sm:$0xff] }
  0xa5   : > { %v1526_v33 = vrot.slane %v1525_v24, 4  ;;  %v17049_v53 = vshrl.u32 %v17048_v16, 16  ;;  %v1548_v9 = vshll.u32 %v11968_v60, 16  ;;  %v17051_v3 = vshrl.u32 %v17050_v11, 16  ;;  %11288 = vmatprep.mubr.msk.bf16.mxu1 %vm605_vm0, %v13314_v26  ;;  %v11970_v18 = vld [vmem:[%s12349_s28 + $0xd0] sm:$0xf] }
  0xa6   : > { %v1535_v14 = vor.u32 %v1534_v44, %v1530_v8  ;;  %v1558_v59 = vshll.u32 %v342_v38, 16  ;;  %v2647_v10 = vsel %vm12557_vm6, %v10211_v21, %v2646_v54  ;;  %v2648_v19 = vrot.slane %v2646_v54, 4  ;;  %v347_v54 = vld [vmem:[%s12349_s28 + $0xd8] sm:$0x1]  ;;  %v17057_v11 = vld [vmem:[#allocation19_spill] sm:$0xff] }
  0xa7   : > { %v1544_v49 = vrot.slane %v17049_v53, 4  ;;  %v1554_v23 = vrot.slane %v17051_v3, 4  ;;  %v1531_v55 = vsel %vm12527_vm5, %v1526_v33, %v1530_v8  ;;  %v1550_v52 = vrot.slane %v1548_v9, 5 }
  0xa8   : > { %v1536_v29 = vrot.slane %v1535_v14, 4  ;;  %v1560_v32 = vrot.slane %v1558_v59, 5  ;;  %v2651_v4 = vrot.slane %v2649_v48, 4  ;;  %v2650_v63 = vsel %vm12557_vm6, %v2648_v19, %v2649_v48  ;;  %v11972_v59 = vld [vmem:[%s12349_s28 + $0xd4] sm:$0xf] }
  0xa9   : > { %v1545_v41 = vor.u32 %v1544_v49, %v1540_v0  ;;  %v2652_v45 = vrot.slane %v11968_v60, 5  ;;  %v2655_v56 = vrot.slane %v342_v38, 5  ;;  %v10238_v15 = vcombine.low %v2647_v10, %v2650_v63  ;;  %v17059_v10 = vld [vmem:[#allocation20_spill] sm:$0xff] }
  0xaa   : > { %v1541_v42 = vsel %vm12527_vm5, %v1536_v29, %v1540_v0  ;;  %v1555_v51 = vor.u32 %v1554_v23, %v1550_v52  ;;  %v17053_v57 = vshrl.u32 %v17052_v46, 16  ;;  %v17054_v35 = vshll.u32 %v17052_v46, 16 }
  0xab   : > { %v1546_v6 = vrot.slane %v1545_v41, 4  ;;  %v10155_v47 = vcombine.low %v1531_v55, %v1541_v42  ;;  %v13370_v22 = vsel %vm12557_vm6, %v2651_v4, %v2652_v45  ;;  %v2654_v17 = vrot.slane %v2652_v45, 4  ;;  %11355 = vmatmul.mubr.msk.bf16.gmra.mxu0 %vm605_vm0, %v10237_v61 }
  0xac   : > { %v1565_v30 = vrot.slane %v17053_v57, 4  ;;  %v1556_v40 = vrot.slane %v1555_v51, 4  ;;  %v1568_v50 = vrot.slane %v17054_v35, 5  ;;  %v1572_v44 = vshll.u32 %v11969_v1, 16  ;;  %11358 = vmatprep.mubr.msk.bf16.mxu0 %vm605_vm0, %v10238_v15  ;;  %11289 = vmatmul.mubr.msk.bf16.gmra.mxu1 %vm605_vm0, %v13343_v27 }
  0xad   : > { %v1551_v37 = vsel %vm12527_vm5, %v1546_v6, %v1550_v52  ;;  %v17056_v39 = vshrl.u32 %v17055_v12, 16  ;;  %v2656_v13 = vsel %vm12557_vm6, %v2654_v17, %v2655_v56  ;;  %v1582_v24 = vshll.u32 %v11970_v18, 16  ;;  %11292 = vmatprep.mubr.msk.bf16.mxu1 %vm605_vm0, %v10155_v47 }
  0xae   : > { %v10212_v21 = vrot.slane %v11971_v43, 9  ;;  %v2659_v38 = vrot.slane %v11969_v1, 5  ;;  %v1561_v26 = vsel %vm12527_vm5, %v1556_v40, %v1560_v32  ;;  %v10239_v8 = vcombine.low %v13370_v22, %v2656_v13  ;;  %v17061_v22 = vld [vmem:[#allocation22_spill] sm:$0xff]  ;;  %v17064_v13 = vld [vmem:[#allocation23_spill] sm:$0xff] }
  0xaf   : > { %v1578_v62 = vrot.slane %v17056_v39, 4  ;;  %v1569_v0 = vor.u32 %v1568_v50, %v1565_v30  ;;  %v1574_v33 = vrot.slane %v1572_v44, 5  ;;  %v10156_v48 = vcombine.low %v1551_v37, %v1561_v26  ;;  %v11973_v44 = vld [vmem:[%s12349_s28 + $0xe0] sm:$0xf]  ;;  %v11974_v43 = vld [vmem:[%s12349_s28 + $0xe4] sm:$0xf] }
  0xb0   : > { %v1584_v16 = vrot.slane %v1582_v24, 5  ;;  %v2660_v53 = vsel %vm12557_vm6, %v10212_v21, %v2659_v38  ;;  %v2661_v49 = vrot.slane %v2659_v38, 4  ;;  %v2662_v9 = vrot.slane %v11970_v18, 5 }
  0xb1   : > { %v1570_v14 = vrot.slane %v1569_v0, 4  ;;  %v1579_v60 = vor.u32 %v1578_v62, %v1574_v33  ;;  %v17058_v3 = vshrl.u32 %v17057_v11, 16  ;;  %v1592_v55 = vshll.u32 %v11972_v59, 16  ;;  %v11975_v0 = vld [vmem:[%s12349_s28 + $0xdc] sm:$0xf] }
  0xb2   : > { %v17060_v19 = vshrl.u32 %v17059_v10, 16  ;;  %v1602_v29 = vshll.u32 %v347_v54, 16  ;;  %v2665_v52 = vrot.slane %v11972_v59, 5  ;;  %v2663_v61 = vsel %vm12557_vm6, %v2661_v49, %v2662_v9 }
  0xb3   : > { %v1588_v23 = vrot.slane %v17058_v3, 4  ;;  %v1575_v32 = vsel %vm12527_vm5, %v1570_v14, %v1574_v33  ;;  %v1580_v4 = vrot.slane %v1579_v60, 4  ;;  %v10240_v6 = vcombine.low %v2660_v53, %v2663_v61  ;;  %11359 = vmatmul.mubr.msk.bf16.gmra.mxu0 %vm605_vm0, %v10239_v8  ;;  %v352_v14 = vld [vmem:[%s12349_s28 + $0xec] sm:$0x1]  ;;  %v17066_v60 = vld [vmem:[#allocation24_spill] sm:$0xff] }
  0xb4   : > { %v1598_v41 = vrot.slane %v17060_v19, 4  ;;  %v1594_v45 = vrot.slane %v1592_v55, 5  ;;  %v1604_v56 = vrot.slane %v1602_v29, 5  ;;  %v2664_v42 = vrot.slane %v2662_v9, 4  ;;  %11293 = vmatmul.mubr.msk.bf16.gmra.mxu1 %vm605_vm0, %v10156_v48  ;;  %v11976_v19 = vld [vmem:[%s12349_s28 + $0xe8] sm:$0xf] }
  0xb5   : > { %v1589_v63 = vor.u32 %v1588_v23, %v1584_v16  ;;  %v1585_v15 = vsel %vm12527_vm5, %v1580_v4, %v1584_v16  ;;  %v2667_v46 = vrot.slane %v2665_v52, 4  ;;  %v2668_v57 = vrot.slane %v347_v54, 5  ;;  %11362 = vmatprep.mubr.msk.bf16.mxu0 %vm605_vm0, %v10240_v6  ;;  %v17068_v29 = vld [vmem:[#allocation25_spill] sm:$0xff] }
  0xb6   : > { %v10157_v30 = vcombine.low %v1575_v32, %v1585_v15  ;;  %v1599_v37 = vor.u32 %v1598_v41, %v1594_v45  ;;  %v2666_v27 = vsel %vm12557_vm6, %v2664_v42, %v2665_v52  ;;  %v17062_v17 = vshrl.u32 %v17061_v22, 16 }
  0xb7   : > { %v1590_v51 = vrot.slane %v1589_v63, 4  ;;  %v2669_v47 = vsel %vm12557_vm6, %v2667_v46, %v2668_v57  ;;  %v17063_v50 = vshll.u32 %v17061_v22, 16  ;;  %v1616_v12 = vshll.u32 %v11973_v44, 16 }
  0xb8   : > { %v1609_v40 = vrot.slane %v17062_v17, 4  ;;  %v1600_v39 = vrot.slane %v1599_v37, 4  ;;  %v10241_v62 = vcombine.low %v2666_v27, %v2669_v47  ;;  %v17065_v18 = vshrl.u32 %v17064_v13, 16  ;;  %11296 = vmatprep.mubr.msk.bf16.mxu1 %vm605_vm0, %v10157_v30  ;;  %v17073_v13 = vld [vmem:[#allocation27_spill] sm:$0xff] }
  0xb9   : > { %v1595_v35 = vsel %vm12527_vm5, %v1590_v51, %v1594_v45  ;;  %v1612_v1 = vrot.slane %v17063_v50, 5  ;;  %v1626_v21 = vshll.u32 %v11974_v43, 16  ;;  %v1618_v26 = vrot.slane %v1616_v12, 5 }
  0xba   : > { %v1622_v24 = vrot.slane %v17065_v18, 4  ;;  %v10213_v33 = vrot.slane %v11975_v0, 9  ;;  %v2672_v54 = vrot.slane %v11973_v44, 5  ;;  %v1605_v16 = vsel %vm12527_vm5, %v1600_v39, %v1604_v56  ;;  %v11977_v44 = vld [vmem:[%s12349_s28 + $0xf4] sm:$0xf] }
  0xbb   : > { %v1613_v38 = vor.u32 %v1612_v1, %v1609_v40  ;;  %v1628_v53 = vrot.slane %v1626_v21, 5  ;;  %v2675_v49 = vrot.slane %v11974_v43, 5  ;;  %v17067_v9 = vshrl.u32 %v17066_v60, 16  ;;  %11363 = vmatmul.mubr.msk.bf16.gmra.mxu0 %vm605_vm0, %v10241_v62  ;;  %v17070_v40 = vld [vmem:[#allocation26_spill] sm:$0xff]  ;;  %v11978_v43 = vld [vmem:[%s12349_s28 + $0xf8] sm:$0xf] }
  0xbc   : > { %v10158_v3 = vcombine.low %v1595_v35, %v1605_v16  ;;  %v1623_v8 = vor.u32 %v1622_v24, %v1618_v26  ;;  %v2673_v59 = vsel %vm12557_vm6, %v10213_v33, %v2672_v54  ;;  %v2674_v55 = vrot.slane %v2672_v54, 4  ;;  %v357_v60 = vld [vmem:[%s12349_s28 + $0x100] sm:$0x1] }
  0xbd   : > { %v1632_v11 = vrot.slane %v17067_v9, 4  ;;  %v1614_v23 = vrot.slane %v1613_v38, 4  ;;  %v1636_v41 = vshll.u32 %v11976_v19, 16  ;;  %v17069_v52 = vshrl.u32 %v17068_v29, 16  ;;  %v11979_v38 = vld [vmem:[%s12349_s28 + $0xf0] sm:$0xf] }
  0xbe   : > { %v1624_v61 = vrot.slane %v1623_v8, 4  ;;  %v1646_v63 = vshll.u32 %v352_v14, 16  ;;  %v2677_v6 = vrot.slane %v2675_v49, 4  ;;  %v2676_v45 = vsel %vm12557_vm6, %v2674_v55, %v2675_v49  ;;  %11297 = vmatmul.mubr.msk.bf16.gmra.mxu1 %vm605_vm0, %v10158_v3  ;;  %v17075_v55 = vld [vmem:[#allocation28_spill] sm:$0xff]  ;;  %v11980_v3 = vld [vmem:[%s12349_s28 + $0xfc] sm:$0xf] }
  0xbf   : > { %v1633_v10 = vor.u32 %v1632_v11, %v1628_v53  ;;  %v1642_v32 = vrot.slane %v17069_v52, 4  ;;  %v1619_v4 = vsel %vm12527_vm5, %v1614_v23, %v1618_v26  ;;  %v1638_v56 = vrot.slane %v1636_v41, 5  ;;  %v17077_v29 = vld [vmem:[#allocation29_spill] sm:$0xff] }
  0xc0   : > { %v2678_v42 = vrot.slane %v11976_v19, 5  ;;  %v1629_v15 = vsel %vm12527_vm5, %v1624_v61, %v1628_v53  ;;  %v10242_v51 = vcombine.low %v2673_v59, %v2676_v45  ;;  %v1648_v46 = vrot.slane %v1646_v63, 5 }
  0xc1   : > { %v1634_v48 = vrot.slane %v1633_v10, 4  ;;  %v2681_v57 = vrot.slane %v352_v14, 5  ;;  %v10159_v30 = vcombine.low %v1619_v4, %v1629_v15  ;;  %v1643_v27 = vor.u32 %v1642_v32, %v1638_v56 }
  0xc2   : > { %v2679_v22 = vsel %vm12557_vm6, %v2677_v6, %v2678_v42  ;;  %v2680_v17 = vrot.slane %v2678_v42, 4  ;;  %v17071_v35 = vshrl.u32 %v17070_v40, 16  ;;  %v17072_v50 = vshll.u32 %v17070_v40, 16  ;;  %11366 = vmatprep.mubr.msk.bf16.mxu0 %vm605_vm0, %v10242_v51  ;;  %v17079_v40 = vld [vmem:[#allocation30_spill] sm:$0xff] }
  0xc3   : > { %v1639_v37 = vsel %vm12527_vm5, %v1634_v48, %v1638_v56  ;;  %v1660_v12 = vshll.u32 %v11977_v44, 16  ;;  %v1644_v39 = vrot.slane %v1643_v27, 4  ;;  %v17074_v18 = vshrl.u32 %v17073_v13, 16  ;;  %11300 = vmatprep.mubr.msk.bf16.mxu1 %vm605_vm0, %v10159_v30 }
  0xc4   : > { %v1653_v47 = vrot.slane %v17071_v35, 4  ;;  %v1656_v1 = vrot.slane %v17072_v50, 5  ;;  %v1670_v21 = vshll.u32 %v11978_v43, 16  ;;  %v10214_v62 = vrot.slane %v11979_v38, 9 }
  0xc5   : > { %v1666_v24 = vrot.slane %v17074_v18, 4  ;;  %v2682_v26 = vsel %vm12557_vm6, %v2680_v17, %v2681_v57  ;;  %v1662_v33 = vrot.slane %v1660_v12, 5  ;;  %v2685_v54 = vrot.slane %v11977_v44, 5  ;;  %v11981_v44 = vld [vmem:[%s12349_s28 + $0x108] sm:$0xf] }
  0xc6   : > { %v1657_v0 = vor.u32 %v1656_v1, %v1653_v47  ;;  %v1649_v16 = vsel %vm12527_vm5, %v1644_v39, %v1648_v46  ;;  %v10243_v53 = vcombine.low %v2679_v22, %v2682_v26  ;;  %v1672_v49 = vrot.slane %v1670_v21, 5  ;;  %v17082_v18 = vld [vmem:[#allocation31_spill] sm:$0xff] }
  0xc7   : > { %v2688_v14 = vrot.slane %v11978_v43, 5  ;;  %v10160_v9 = vcombine.low %v1639_v37, %v1649_v16  ;;  %v1667_v23 = vor.u32 %v1666_v24, %v1662_v33  ;;  %v2686_v8 = vsel %vm12557_vm6, %v10214_v62, %v2685_v54  ;;  %v11982_v21 = vld [vmem:[%s12349_s28 + $0x10c] sm:$0xf] }
  0xc8   : > { %v1658_v11 = vrot.slane %v1657_v0, 4  ;;  %v2687_v59 = vrot.slane %v2685_v54, 4  ;;  %v17076_v10 = vshrl.u32 %v17075_v55, 16  ;;  %v1680_v41 = vshll.u32 %v11980_v3, 16  ;;  %11367 = vmatmul.mubr.msk.bf16.gmra.mxu0 %vm605_vm0, %v10243_v53 }
  0xc9   : > { %v17078_v52 = vshrl.u32 %v17077_v29, 16  ;;  %v1668_v61 = vrot.slane %v1667_v23, 4  ;;  %v1690_v63 = vshll.u32 %v357_v60, 16  ;;  %v2690_v6 = vrot.slane %v2688_v14, 4  ;;  %11301 = vmatmul.mubr.msk.bf16.gmra.mxu1 %vm605_vm0, %v10160_v9 }
  0xca   : > { %v1676_v19 = vrot.slane %v17076_v10, 4  ;;  %v1663_v4 = vsel %vm12527_vm5, %v1658_v11, %v1662_v33  ;;  %v2689_v45 = vsel %vm12557_vm6, %v2687_v59, %v2688_v14  ;;  %v1682_v56 = vrot.slane %v1680_v41, 5  ;;  %v11983_v33 = vld [vmem:[%s12349_s28 + $0x104] sm:$0xf] }
  0xcb   : > { %v1686_v32 = vrot.slane %v17078_v52, 4  ;;  %v2691_v42 = vrot.slane %v11980_v3, 5  ;;  %v1673_v15 = vsel %vm12527_vm5, %v1668_v61, %v1672_v49  ;;  %v10244_v51 = vcombine.low %v2686_v8, %v2689_v45  ;;  %v11984_v3 = vld [vmem:[%s12349_s28 + $0x110] sm:$0xf] }
  0xcc   : > { %v1677_v48 = vor.u32 %v1676_v19, %v1672_v49  ;;  %v1692_v46 = vrot.slane %v1690_v63, 5  ;;  %v2694_v57 = vrot.slane %v357_v60, 5  ;;  %v10161_v30 = vcombine.low %v1663_v4, %v1673_v15  ;;  %v362_v60 = vld [vmem:[%s12349_s28 + $0x114] sm:$0x1] }
  0xcd   : > { %v1687_v27 = vor.u32 %v1686_v32, %v1682_v56  ;;  %v2692_v22 = vsel %vm12557_vm6, %v2690_v6, %v2691_v42  ;;  %11370 = vmatprep.mubr.msk.bf16.mxu0 %vm605_vm0, %v10244_v51  ;;  %v2693_v17 = vrot.slane %v2691_v42, 4  ;;  %v17080_v35 = vshrl.u32 %v17079_v40, 16 }
  0xce   : > { %v1678_v37 = vrot.slane %v1677_v48, 4  ;;  %v17081_v50 = vshll.u32 %v17079_v40, 16  ;;  %v1704_v12 = vshll.u32 %v11981_v44, 16  ;;  %v17083_v24 = vshrl.u32 %v17082_v18, 16  ;;  %11304 = vmatprep.mubr.msk.bf16.mxu1 %vm605_vm0, %v10161_v30  ;;  %v11986_v18 = vld [vmem:[%s12349_s28 + $0x120] sm:$0xf] }
  0xcf   : > { %v1697_v47 = vrot.slane %v17080_v35, 4  ;;  %v1688_v13 = vrot.slane %v1687_v27, 4  ;;  %v1714_v38 = vshll.u32 %v11982_v21, 16  ;;  %v2695_v62 = vsel %vm12557_vm6, %v2693_v17, %v2694_v57 }
  0xd0   : > { %v1700_v1 = vrot.slane %v17081_v50, 5  ;;  %v1683_v39 = vsel %vm12527_vm5, %v1678_v37, %v1682_v56  ;;  %v1710_v43 = vrot.slane %v17083_v24, 4  ;;  %v1706_v0 = vrot.slane %v1704_v12, 5  ;;  %v11985_v50 = vld [vmem:[%s12349_s28 + $0x11c] sm:$0xf] }
  0xd1   : > { %v10215_v54 = vrot.slane %v11983_v33, 9  ;;  %v1693_v16 = vsel %vm12527_vm5, %v1688_v13, %v1692_v46  ;;  %v10245_v53 = vcombine.low %v2692_v22, %v2695_v62  ;;  %v1716_v49 = vrot.slane %v1714_v38, 5 }
  0xd2   : > { %v1701_v26 = vor.u32 %v1700_v1, %v1697_v47  ;;  %v2698_v14 = vrot.slane %v11981_v44, 5  ;;  %v10162_v9 = vcombine.low %v1683_v39, %v1693_v16  ;;  %v1711_v23 = vor.u32 %v1710_v43, %v1706_v0 }
  0xd3   : > { %v2701_v8 = vrot.slane %v11982_v21, 5  ;;  %v17084_v10 = vshrl.u32 %v12713_v31, 16  ;;  %v1724_v41 = vshll.u32 %v11984_v3, 16  ;;  %11371 = vmatmul.mubr.msk.bf16.gmra.mxu0 %vm605_vm0, %v10245_v53  ;;  %v17085_v32 = vshrl.u32 %v12716_v5, 16 }
  0xd4   : > { %v1702_v11 = vrot.slane %v1701_v26, 4  ;;  %v2699_v59 = vsel %vm12557_vm6, %v10215_v54, %v2698_v14  ;;  %v2700_v55 = vrot.slane %v2698_v14, 4  ;;  %v1712_v52 = vrot.slane %v1711_v23, 4  ;;  %11305 = vmatmul.mubr.msk.bf16.gmra.mxu1 %vm605_vm0, %v10162_v9  ;;  %v11988_v23 = vld [vmem:[%s12349_s28 + $0x124] sm:$0xf] }
  0xd5   : > { %v1720_v19 = vrot.slane %v17084_v10, 4  ;;  %v1730_v4 = vrot.slane %v17085_v32, 4  ;;  %v1734_v61 = vshll.u32 %v362_v60, 16  ;;  %v1726_v45 = vrot.slane %v1724_v41, 5 }
  0xd6   : > { %v1707_v29 = vsel %vm12527_vm5, %v1702_v11, %v1706_v0  ;;  %v2702_v63 = vsel %vm12557_vm6, %v2700_v55, %v2701_v8  ;;  %v2703_v48 = vrot.slane %v2701_v8, 4  ;;  %v1717_v31 = vsel %vm12527_vm5, %v1712_v52, %v1716_v49  ;;  %v367_v0 = vld [vmem:[%s12349_s28 + $0x128] sm:$0x1] }
  0xd7   : > { %v1721_v6 = vor.u32 %v1720_v19, %v1716_v49  ;;  %v10246_v56 = vcombine.low %v2699_v59, %v2702_v63  ;;  %v1736_v42 = vrot.slane %v1734_v61, 5  ;;  %v2704_v15 = vrot.slane %v11984_v3, 5 }
  0xd8   : > { %v10163_v51 = vcombine.low %v1707_v29, %v1717_v31  ;;  %v1731_v5 = vor.u32 %v1730_v4, %v1726_v45  ;;  %v2707_v57 = vrot.slane %v362_v60, 5  ;;  %v17086_v27 = vshrl.u32 %v12740_v36, 16 }
  0xd9   : > { %v1722_v46 = vrot.slane %v1721_v6, 4  ;;  %11374 = vmatprep.mubr.msk.bf16.mxu0 %vm605_vm0, %v10246_v56  ;;  %v2705_v30 = vsel %vm12557_vm6, %v2703_v48, %v2704_v15  ;;  %v2706_v37 = vrot.slane %v2704_v15, 4  ;;  %v17087_v17 = vshll.u32 %v12740_v36, 16  ;;  %v11987_v36 = vld [vmem:[%s12349_s28 + $0x118] sm:$0xf]  ;;  %v17091_v6 = vld [vmem:[#allocation36_spill] sm:$0xff] }
  0xda   : > { %v1741_v22 = vrot.slane %v17086_v27, 4  ;;  %11308 = vmatprep.mubr.msk.bf16.mxu1 %vm605_vm0, %v10163_v51  ;;  %v1732_v47 = vrot.slane %v1731_v5, 4  ;;  %v1748_v1 = vshll.u32 %v11985_v50, 16  ;;  %v17088_v44 = vshrl.u32 %v12743_v20, 16 }
  0xdb   : > { %v1744_v40 = vrot.slane %v17087_v17, 5  ;;  %v1727_v35 = vsel %vm12527_vm5, %v1722_v46, %v1726_v45  ;;  %v2708_v39 = vsel %vm12557_vm6, %v2706_v37, %v2707_v57  ;;  %v1758_v24 = vshll.u32 %v11986_v18, 16  ;;  %v11989_v57 = vld [vmem:[%s12349_s28 + $0x130] sm:$0xf]  ;;  %v17094_v37 = vld [vmem:[#allocation37_spill] sm:$0xff] }
  0xdc   : > { %v1754_v12 = vrot.slane %v17088_v44, 4  ;;  %v10216_v43 = vrot.slane %v11987_v36, 9  ;;  %v1737_v21 = vsel %vm12527_vm5, %v1732_v47, %v1736_v42  ;;  %v10247_v38 = vcombine.low %v2705_v30, %v2708_v39 }
  0xdd   : > { %v1745_v13 = vor.u32 %v1744_v40, %v1741_v22  ;;  %v1750_v62 = vrot.slane %v1748_v1, 5  ;;  %v2711_v26 = vrot.slane %v11985_v50, 5  ;;  %v10164_v33 = vcombine.low %v1727_v35, %v1737_v21  ;;  %v11990_v35 = vld [vmem:[%s12349_s28 + $0x134] sm:$0xf]  ;;  %v11991_v50 = vld [vmem:[%s12349_s28 + $0x12c] sm:$0xf] }
  0xde   : > { %v1760_v20 = vrot.slane %v1758_v24, 5  ;;  %v2714_v16 = vrot.slane %v11986_v18, 5  ;;  %11375 = vmatmul.mubr.msk.bf16.gmra.mxu0 %vm605_vm0, %v10247_v38  ;;  %v17089_v60 = vshrl.u32 %v12763_v28, 16  ;;  %v1768_v8 = vshll.u32 %v11988_v23, 16 }
  0xdf   : > { %v1746_v54 = vrot.slane %v1745_v13, 4  ;;  %v1755_v53 = vor.u32 %v1754_v12, %v1750_v62  ;;  %v2712_v49 = vsel %vm12557_vm6, %v10216_v43, %v2711_v26  ;;  %v2713_v14 = vrot.slane %v2711_v26, 4  ;;  %11309 = vmatmul.mubr.msk.bf16.gmra.mxu1 %vm605_vm0, %v10164_v33  ;;  %v372_v43 = vld [vmem:[%s12349_s28 + $0x13c] sm:$0x1] }
  0xe0   : > { %v1764_v9 = vrot.slane %v17089_v60, 4  ;;  %v17090_v59 = vshrl.u32 %v12777_v7, 16  ;;  %v1778_v10 = vshll.u32 %v367_v0, 16  ;;  %v2716_v29 = vrot.slane %v2714_v16, 4 }
  0xe1   : > { %v1751_v11 = vsel %vm12527_vm5, %v1746_v54, %v1750_v62  ;;  %v1756_v19 = vrot.slane %v1755_v53, 4  ;;  %v2715_v3 = vsel %vm12557_vm6, %v2713_v14, %v2714_v16  ;;  %v1770_v52 = vrot.slane %v1768_v8, 5  ;;  %v11992_v16 = vld [vmem:[%s12349_s28 + $0x138] sm:$0xf] }
  0xe2   : > { %v1774_v55 = vrot.slane %v17090_v59, 4  ;;  %v1765_v41 = vor.u32 %v1764_v9, %v1760_v20  ;;  %v10248_v28 = vcombine.low %v2712_v49, %v2715_v3  ;;  %v1780_v32 = vrot.slane %v1778_v10, 5  ;;  %v10287_v10 = vld [vmem:[%s12349_s28 + $0x14] sm:$0xf] }
  0xe3   : > { %v2717_v4 = vrot.slane %v11988_v23, 5  ;;  %v1761_v61 = vsel %vm12527_vm5, %v1756_v19, %v1760_v20  ;;  %v2720_v7 = vrot.slane %v367_v0, 5  ;;  %v17092_v45 = vshrl.u32 %v17091_v6, 16 }
  0xe4   : > { %v1766_v63 = vrot.slane %v1765_v41, 4  ;;  %v10165_v31 = vcombine.low %v1751_v11, %v1761_v61  ;;  %11378 = vmatprep.mubr.msk.bf16.mxu0 %vm605_vm0, %v10248_v28  ;;  %v1775_v56 = vor.u32 %v1774_v55, %v1770_v52  ;;  %v17093_v46 = vshll.u32 %v17091_v6, 16  ;;  %v13585_v28 = vld [vmem:[%s12349_s28 + $0x1c] sm:$0xf] }
  0xe5   : > { %v1785_v48 = vrot.slane %v17092_v45, 4  ;;  %v2718_v42 = vsel %vm12557_vm6, %v2716_v29, %v2717_v4  ;;  %v2719_v15 = vrot.slane %v2717_v4, 4  ;;  %v1792_v30 = vshll.u32 %v11989_v57, 16  ;;  %v10288_v29 = vld [vmem:[%s12349_s28 + $0x18] sm:$0xf] }
  0xe6   : > { %v1771_v51 = vsel %vm12527_vm5, %v1766_v63, %v1770_v52  ;;  %v1788_v5 = vrot.slane %v17093_v46, 5  ;;  %v17095_v27 = vshrl.u32 %v17094_v37, 16  ;;  %11312 = vmatprep.mubr.msk.bf16.mxu1 %vm605_vm0, %v10165_v31  ;;  %v1776_v17 = vrot.slane %v1775_v56, 4 }
  0xe7   : > { %v2721_v40 = vsel %vm12557_vm6, %v2719_v15, %v2720_v7  ;;  %v1802_v47 = vshll.u32 %v11990_v35, 16  ;;  %v10217_v1 = vrot.slane %v11991_v50, 9  ;;  %v1794_v39 = vrot.slane %v1792_v30, 5 }
  0xe8   : > { %v1798_v22 = vrot.slane %v17095_v27, 4  ;;  %v10249_v44 = vcombine.low %v2718_v42, %v2721_v40  ;;  %v1789_v12 = vor.u32 %v1788_v5, %v1785_v48  ;;  %v2724_v13 = vrot.slane %v11989_v57, 5  ;;  %v10290_v57 = vld [vmem:[%s12349_s28 + $0x20] sm:$0xf] }
  0xe9   : > { %v1781_v18 = vsel %vm12527_vm5, %v1776_v17, %v1780_v32  ;;  %v1804_v24 = vrot.slane %v1802_v47, 5  ;;  %v2727_v36 = vrot.slane %v11990_v35, 5  ;;  %v17096_v21 = vshrl.u32 %v12818_v34, 16  ;;  %v13601_v17 = vld [vmem:[%s12349_s28 + $0x24] sm:$0x1] }
  0xea   : > { %v10166_v62 = vcombine.low %v1771_v51, %v1781_v18  ;;  %11379 = vmatmul.mubr.msk.bf16.gmra.mxu0 %vm605_vm0, %v10249_v44  ;;  %v1790_v26 = vrot.slane %v1789_v12, 4  ;;  %v1799_v0 = vor.u32 %v1798_v22, %v1794_v39  ;;  %v2725_v33 = vsel %vm12557_vm6, %v10217_v1, %v2724_v13  ;;  %17098 = vst [vmem:[#allocation32_spill] sm:$0xff] %v13601_v17 }
  0xeb   : > { %v1808_v38 = vrot.slane %v17096_v21, 4  ;;  %v2726_v54 = vrot.slane %v2724_v13, 4  ;;  %v1812_v53 = vshll.u32 %v11992_v16, 16  ;;  %v17097_v49 = vshrl.u32 %v12827_v25, 16 }
  0xec   : > { %11313 = vmatmul.mubr.msk.bf16.gmra.mxu1 %vm605_vm0, %v10166_v62  ;;  %v1795_v34 = vsel %vm12527_vm5, %v1790_v26, %v1794_v39  ;;  %v1800_v60 = vrot.slane %v1799_v0, 4  ;;  %v1822_v9 = vshll.u32 %v372_v43, 16  ;;  %v2729_v11 = vrot.slane %v2727_v36, 4  ;;  %v10292_v39 = vld [vmem:[%s12349_s28 + $0x28] sm:$0xf] }
  0xed   : > { %v1809_v20 = vor.u32 %v1808_v38, %v1804_v24  ;;  %v1818_v14 = vrot.slane %v17097_v49, 4  ;;  %v2728_v23 = vsel %vm12557_vm6, %v2726_v54, %v2727_v36  ;;  %v1814_v59 = vrot.slane %v1812_v53, 5  ;;  %v13610_v38 = vpop.f32.mrf.mxu0  ;;  %v13615_v53 = vld [vmem:[%s12349_s28 + $0x30] sm:$0xf] }
  0xee   : > { %v2730_v55 = vrot.slane %v11992_v16, 5  ;;  %v1805_v25 = vsel %vm12527_vm5, %v1800_v60, %v1804_v24  ;;  %v10250_v19 = vcombine.low %v2725_v33, %v2728_v23  ;;  %v1824_v3 = vrot.slane %v1822_v9, 5 }
  0xef   : > { %v1810_v8 = vrot.slane %v1809_v20, 4  ;;  %v2733_v41 = vrot.slane %v372_v43, 5  ;;  %v10167_v52 = vcombine.low %v1795_v34, %v1805_v25  ;;  %v1819_v4 = vor.u32 %v1818_v14, %v1814_v59  ;;  %v10293_v43 = vld [vmem:[%s12349_s28 + $0x2c] sm:$0xf]  ;;  %v13619_v34 = vpop.f32.mrf.mxu0 }
  0xf0   : > { %v2731_v61 = vsel %vm12557_vm6, %v2729_v11, %v2730_v55  ;;  %11382 = vmatprep.mubr.msk.bf16.mxu0 %vm605_vm0, %v10250_v19  ;;  %v2732_v63 = vrot.slane %v2730_v55, 4  ;;  %v10369_v7 = vcombine.low %v10287_v10, %v10288_v29  ;;  %v4248_v6 = vshrl.u32 %v10287_v10, 16  ;;  %v13622_v11 = vld [vmem:[%s12349_s28 + $0x34] sm:$0xf] }
  0xf1   : > { %v1815_v32 = vsel %vm12527_vm5, %v1810_v8, %v1814_v59  ;;  %v4251_v45 = vshll.u32 %v10287_v10, 16  ;;  %11316 = vmatprep.mubr.msk.bf16.mxu1 %vm605_vm0, %v10167_v52  ;;  %v1820_v48 = vrot.slane %v1819_v4, 4  ;;  %v4261_v31 = vshrl.u32 %v10288_v29, 16  ;;  %v13624_v8 = vpop.f32.mrf.mxu1  ;;  %v13628_v19 = vpop.f32.mrf.mxu0  ;;  %v10296_v4 = vld [vmem:[%s12349_s28 + $0x38] sm:$0x1] }
  0xf2   : > { %v4257_v56 = vshll.u32 %v10288_v29, 16  ;;  %v4267_v42 = vshll.u32 %v13585_v28, 16  ;;  %v2734_v15 = vsel %vm12557_vm6, %v2732_v63, %v2733_v41  ;;  %v4250_v51 = vrot.slane %v4248_v6, 4  ;;  %17099 = vst [vmem:[#allocation33_spill] sm:$0xff] %v13624_v8 }
  0xf3   : > { %v4253_v46 = vrot.slane %v4251_v45, 5  ;;  %v4271_v5 = vshrl.u32 %v13585_v28, 16  ;;  %v1825_v30 = vsel %vm12527_vm5, %v1820_v48, %v1824_v3  ;;  %v10251_v37 = vcombine.low %v2731_v61, %v2734_v15  ;;  %v13638_v63 = vpop.f32.mrf.mxu0  ;;  %v10297_v48 = vld [vmem:[%s12349_s28 + $0x3c] sm:$0xf] }
  0xf4   : > { %v4259_v27 = vrot.slane %v4257_v56, 5  ;;  %v4263_v22 = vrot.slane %v4261_v31, 4  ;;  %v10168_v40 = vcombine.low %v1815_v32, %v1825_v30  ;;  %v4269_v47 = vrot.slane %v4267_v42, 5 }
  0xf5   : > { %v4254_v35 = vor.u32 %v4253_v46, %v4250_v51  ;;  %v4273_v50 = vrot.slane %v4271_v5, 4  ;;  %11383 = vmatmul.mubr.msk.bf16.gmra.mxu0 %vm605_vm0, %v10251_v37  ;;  %v4281_v44 = vshrl.u32 %v10290_v57, 16  ;;  %v4277_v12 = vshll.u32 %v10290_v57, 16  ;;  %v11993_v46 = vld [vmem:[%s16862_s1 + $0x28] sm:$0xff]  }
  0xf6   : > { %v4264_v1 = vor.u32 %v4263_v22, %v4259_v27  ;;  %11317 = vmatmul.mubr.msk.bf16.gmra.mxu1 %vm605_vm0, %v10168_v40  ;;  %v10370_v24 = vcombine.low %v13585_v28, %v10290_v57  ;;  %v4287_v36 = vshll.u32 %v13601_v17, 16  ;;  %v10371_v0 = vcombine.low %v10292_v39, %v10293_v43  ;;  %v13632_v28 = vpop.f32.mrf.mxu1  ;;  %v13650_v57 = vpop.f32.mrf.mxu0  ;;  %v10298_v22 = vld [vmem:[%s12349_s28 + $0x40] sm:$0xf] }
  0xf7   : > { %v4255_v13 = vrot.slane %v4254_v35, 4  ;;  %v4274_v18 = vor.u32 %v4273_v50, %v4269_v47  ;;  %11388 = vmatprep.mubr.msk.bf16.mxu1 %vm605_vm0, %v10369_v7  ;;  %v4279_v62 = vrot.slane %v4277_v12, 5  ;;  %v4283_v26 = vrot.slane %v4281_v44, 4  ;;  %17100 = vst [vmem:[#allocation34_spill] sm:$0xff] %v13632_v28  ;;  %v11994_v44 = vld [vmem:[%s16862_s1 + $0x30] sm:$0xff]  }
  0xf8   : > { %v4265_v21 = vrot.slane %v4264_v1, 4  ;;  %v4289_v20 = vrot.slane %v4287_v36, 5  ;;  %v4292_v16 = vshrl.u32 %v10292_v39, 16  ;;  %v4295_v60 = vshll.u32 %v10292_v39, 16  ;;  %v13643_v56 = vpop.f32.mrf.mxu1  ;;  %v13666_v36 = vld [vmem:[%s12349_s28 + $0x44] sm:$0xf] }
  0xf9   : > { %v4260_v33 = vsel %vm12527_vm5, %v4255_v13, %v4259_v27  ;;  %v4275_v54 = vrot.slane %v4274_v18, 4  ;;  %v4284_v14 = vor.u32 %v4283_v26, %v4279_v62  ;;  %v4305_v9 = vshrl.u32 %v10293_v43, 16  ;;  %17101 = vst [vmem:[#allocation35_spill] sm:$0xff] %v13643_v56  ;;  %v13663_v18 = vpop.f32.mrf.mxu0 }
  0xfa   : > { %v4270_v49 = vsel %vm12527_vm5, %v4265_v21, %v4269_v47  ;;  %v4294_v55 = vrot.slane %v4292_v16, 4  ;;  %v4301_v10 = vshll.u32 %v10293_v43, 16  ;;  %v4297_v3 = vrot.slane %v4295_v60, 5  ;;  %v13656_v40 = vpop.f32.mrf.mxu1 }
  0xfb   : > { %v10436_v23 = vcombine.low %v4260_v33, %v4270_v49  ;;  %v4280_v59 = vsel %vm12527_vm5, %v4275_v54, %v4279_v62  ;;  %v4285_v25 = vrot.slane %v4284_v14, 4  ;;  %v4307_v41 = vrot.slane %v4305_v9, 4  ;;  %17102 = vst [vmem:[#allocation6_spill] sm:$0xff] %v13656_v40  ;;  %v13673_v33 = vld [vmem:[%s12349_s28 + $0x48] sm:$0xf]  ;;  %v13675_v16 = vpop.f32.mrf.mxu0 }
  0xfc   : > { %v4311_v29 = vshll.u32 %v13615_v53, 16  ;;  %v4303_v52 = vrot.slane %v4301_v10, 5  ;;  %v4325_v32 = vshrl.u32 %v13622_v11, 16  ;;  %v4298_v7 = vor.u32 %v4297_v3, %v4294_v55  ;;  %v13670_v21 = vpop.f32.mrf.mxu1  ;;  %v10301_v3 = vld [vmem:[%s12349_s28 + $0x4c] sm:$0x1] }
  0xfd   : > { %11454 = vmatprep.mubr.msk.bf16.mxu0 %vm605_vm0, %v10436_v23  ;;  %v4290_v61 = vsel %vm12527_vm5, %v4285_v25, %v4289_v20  ;;  %v4315_v45 = vshrl.u32 %v13615_v53, 16  ;;  %v4321_v15 = vshll.u32 %v13622_v11, 16  ;;  %v10372_v30 = vcombine.low %v13615_v53, %v13622_v11  ;;  %17103 = vst [vmem:[#allocation9_spill] sm:$0xff] %v13670_v21  ;;  %v10331_v40 = vld [vmem:[%s12349_s28 + $0xc4] sm:$0x1] }
  0xfe   : > { %v4313_v6 = vrot.slane %v4311_v29, 5  ;;  %11389 = vmatmul.mubr.msk.bf16.vlgmr.msra.gmra.mxu1 %vm605_vm0, %v10370_v24  ;;  %v10437_v31 = vcombine.low %v4280_v59, %v4290_v61  ;;  %v4308_v42 = vor.u32 %v4307_v41, %v4303_v52  ;;  %v4327_v51 = vrot.slane %v4325_v32, 4  ;;  %v13677_v60 = vpop.f32.mrf.mxu1  ;;  %v13683_v59 = vpop.f32.mrf.mxu0 }
  0xff   : > { %11519 = vmatpush3.bf16.msra.mxu1 %v11993_v46  ;;  %11392 = vmatprep.mubr.msk.bf16.mxu1 %vm605_vm0, %v10371_v0  ;;  %v4299_v5 = vrot.slane %v4298_v7, 4  ;;  %v4317_v37 = vrot.slane %v4315_v45, 4  ;;  %v4331_v27 = vshll.u32 %v10296_v4, 16  ;;  %v4323_v47 = vrot.slane %v4321_v15, 5  ;;  %17104 = vst [vmem:[#allocation8_spill] sm:$0xff] %v13677_v60 }
 0x100   : > { %11455 = vmatmul.mubr.msk.bf16.vlgmr.msra.gmra.mxu0 %vm605_vm0, %v10437_v31  ;;  %v4309_v35 = vrot.slane %v4308_v42, 4  ;;  %v10373_v50 = vcombine.low %v10297_v48, %v10298_v22  ;;  %v4336_v1 = vshrl.u32 %v10297_v48, 16  ;;  %v4339_v24 = vshll.u32 %v10297_v48, 16  ;;  %v13690_v29 = vpop.f32.mrf.mxu1  ;;  %v10302_v48 = vld [vmem:[%s12349_s28 + $0x50] sm:$0xf] }
 0x101   : > { %11585 = vmatpush3.bf16.msra.mxu0 %v11994_v44  ;;  %v4304_v12 = vsel %vm12527_vm5, %v4299_v5, %v4303_v52  ;;  %v4318_v39 = vor.u32 %v4317_v37, %v4313_v6  ;;  %v4333_v13 = vrot.slane %v4331_v27, 5  ;;  %v4328_v62 = vor.u32 %v4327_v51, %v4323_v47  ;;  %17105 = vst [vmem:[#allocation21_spill] sm:$0xff] %v13690_v29  ;;  %v10303_v5 = vld [vmem:[%s12349_s28 + $0x54] sm:$0xf] }
 0x102   : > { %v4314_v43 = vsel %vm12527_vm5, %v4309_v35, %v4313_v6  ;;  %v4349_v26 = vshrl.u32 %v10298_v22, 16  ;;  %v4338_v0 = vrot.slane %v4336_v1, 4  ;;  %v4341_v53 = vrot.slane %v4339_v24, 5  ;;  %v13694_v6 = vpop.f32.mrf.mxu0  ;;  %v13698_v31 = vpop.f32.mrf.mxu1 }
 0x103   : > { %v10438_v54 = vcombine.low %v4304_v12, %v4314_v43  ;;  %v4319_v20 = vrot.slane %v4318_v39, 4  ;;  %v4345_v49 = vshll.u32 %v10298_v22, 16  ;;  %v4329_v14 = vrot.slane %v4328_v62, 4  ;;  %17106 = vst [vmem:[#allocation13_spill] sm:$0xff] %v13698_v31  ;;  %v13711_v39 = vld [vmem:[%s12349_s28 + $0x58] sm:$0xf] }
 0x104   : > { %v4351_v9 = vrot.slane %v4349_v26, 4  ;;  %v4355_v11 = vshll.u32 %v13666_v36, 16  ;;  %v4342_v55 = vor.u32 %v4341_v53, %v4338_v0  ;;  %v4369_v25 = vshrl.u32 %v13673_v33, 16  ;;  %v13706_v22 = vpop.f32.mrf.mxu0  ;;  %v13718_v26 = vld [vmem:[%s12349_s28 + $0x5c] sm:$0xf] }
 0x105   : > { %11458 = vmatprep.mubr.msk.bf16.mxu0 %vm605_vm0, %v10438_v54  ;;  %v4324_v23 = vsel %vm12527_vm5, %v4319_v20, %v4323_v47  ;;  %v4347_v10 = vrot.slane %v4345_v49, 5  ;;  %v4334_v41 = vsel %vm12527_vm5, %v4329_v14, %v4333_v13  ;;  %v4359_v32 = vshrl.u32 %v13666_v36, 16  ;;  %v13708_v47 = vpop.f32.mrf.mxu1 }
 0x106   : > { %11393 = vmatmul.mubr.msk.bf16.gmra.mxu1 %vm605_vm0, %v10372_v30  ;;  %v4357_v52 = vrot.slane %v4355_v11, 5  ;;  %v10439_v4 = vcombine.low %v4324_v23, %v4334_v41  ;;  %v4343_v61 = vrot.slane %v4342_v55, 4  ;;  %v4365_v45 = vshll.u32 %v13673_v33, 16  ;;  %17107 = vst [vmem:[#allocation11_spill] sm:$0xff] %v13708_v47  ;;  %v10306_v41 = vld [vmem:[%s12349_s28 + $0x60] sm:$0x1] }
 0x107   : > { %11396 = vmatprep.mubr.msk.bf16.mxu1 %vm605_vm0, %v10373_v50  ;;  %v4352_v7 = vor.u32 %v4351_v9, %v4347_v10  ;;  %v10374_v42 = vcombine.low %v13666_v36, %v13673_v33  ;;  %v4361_v15 = vrot.slane %v4359_v32, 4  ;;  %v4371_v51 = vrot.slane %v4369_v25, 4  ;;  %v13715_v36 = vpop.f32.mrf.mxu0  ;;  %v13720_v54 = vpop.f32.mrf.mxu1 }
 0x108   : > { %v4375_v46 = vshll.u32 %v10301_v3, 16  ;;  %11459 = vmatmul.mubr.msk.bf16.gmra.mxu0 %vm605_vm0, %v10439_v4  ;;  %v4348_v30 = vsel %vm12527_vm5, %v4343_v61, %v4347_v10  ;;  %v4367_v27 = vrot.slane %v4365_v45, 5  ;;  %v10375_v35 = vcombine.low %v10302_v48, %v10303_v5  ;;  %17108 = vst [vmem:[#allocation7_spill] sm:$0xff] %v13720_v54 }
 0x109   : > { %v4353_v37 = vrot.slane %v4352_v7, 4  ;;  %v4362_v50 = vor.u32 %v4361_v15, %v4357_v52  ;;  %v4380_v44 = vshrl.u32 %v10302_v48, 16  ;;  %v4383_v12 = vshll.u32 %v10302_v48, 16  ;;  %v13722_v14 = vpop.f32.mrf.mxu0  ;;  %v13729_v10 = vpop.f32.mrf.mxu1 }
 0x10a   : > { %v4377_v1 = vrot.slane %v4375_v46, 5  ;;  %v4372_v24 = vor.u32 %v4371_v51, %v4367_v27  ;;  %v4393_v43 = vshrl.u32 %v10303_v5, 16  ;;  %v4389_v62 = vshll.u32 %v10303_v5, 16  ;;  %17109 = vst [vmem:[#allocation10_spill] sm:$0xff] %v13729_v10  ;;  %v10307_v46 = vld [vmem:[%s12349_s28 + $0x64] sm:$0xf] }
 0x10b   : > { %v4358_v13 = vsel %vm12527_vm5, %v4353_v37, %v4357_v52  ;;  %v4363_v33 = vrot.slane %v4362_v50, 4  ;;  %v4382_v20 = vrot.slane %v4380_v44, 4  ;;  %v4385_v53 = vrot.slane %v4383_v12, 5  ;;  %v13737_v7 = vpop.f32.mrf.mxu0  ;;  %v13739_v48 = vpop.f32.mrf.mxu1  ;;  %v10308_v50 = vld [vmem:[%s12349_s28 + $0x68] sm:$0xf] }
 0x10c   : > { %v10440_v0 = vcombine.low %v4348_v30, %v4358_v13  ;;  %v4373_v49 = vrot.slane %v4372_v24, 4  ;;  %v4391_v9 = vrot.slane %v4389_v62, 5  ;;  %v4395_v11 = vrot.slane %v4393_v43, 4  ;;  %17110 = vst [vmem:[#allocation12_spill] sm:$0xff] %v13739_v48  ;;  %v13755_v43 = vld [vmem:[%s12349_s28 + $0x6c] sm:$0xf] }
 0x10d   : > { %v4399_v23 = vshll.u32 %v13711_v39, 16  ;;  %v4368_v55 = vsel %vm12527_vm5, %v4363_v33, %v4367_v27  ;;  %v4386_v25 = vor.u32 %v4385_v53, %v4382_v20  ;;  %v4413_v3 = vshrl.u32 %v13718_v26, 16  ;;  %v13752_v44 = vpop.f32.mrf.mxu1 }
 0x10e   : > { %11462 = vmatprep.mubr.msk.bf16.mxu0 %vm605_vm0, %v10440_v0  ;;  %11397 = vmatmul.mubr.msk.bf16.gmra.mxu1 %vm605_vm0, %v10374_v42  ;;  %v4378_v32 = vsel %vm12527_vm5, %v4373_v49, %v4377_v1  ;;  %v4396_v4 = vor.u32 %v4395_v11, %v4391_v9  ;;  %v4403_v15 = vshrl.u32 %v13711_v39, 16  ;;  %v4409_v51 = vshll.u32 %v13718_v26, 16  ;;  %17111 = vst [vmem:[#allocation14_spill] sm:$0xff] %v13752_v44 }
 0x10f   : > { %11400 = vmatprep.mubr.msk.bf16.mxu1 %vm605_vm0, %v10375_v35  ;;  %v4401_v61 = vrot.slane %v4399_v23, 5  ;;  %v10441_v45 = vcombine.low %v4368_v55, %v4378_v32  ;;  %v4387_v42 = vrot.slane %v4386_v25, 4  ;;  %v10376_v30 = vcombine.low %v13711_v39, %v13718_v26  ;;  %v13746_v35 = vpop.f32.mrf.mxu0  ;;  %v11930_v39 = vld [vmem:[%s16862_s1 + $0x38] sm:$0xff]   ;;  %v13764_v11 = vpop.f32.mrf.mxu1 }
 0x110   : > { %v4397_v5 = vrot.slane %v4396_v4, 4  ;;  %v4415_v37 = vrot.slane %v4413_v3, 4  ;;  %v4419_v27 = vshll.u32 %v10306_v41, 16  ;;  %v4405_v12 = vrot.slane %v4403_v15, 4  ;;  %17112 = vst [vmem:[#allocation15_spill] sm:$0xff] %v13764_v11  ;;  %11650 = vmatprep.subr.bf16.mxu1 %v11930_v39 }
 0x111   : > { %11463 = vmatmul.mubr.msk.bf16.gmra.mxu0 %vm605_vm0, %v10441_v45  ;;  %v4392_v1 = vsel %vm12527_vm5, %v4387_v42, %v4391_v9  ;;  %v4411_v13 = vrot.slane %v4409_v51, 5  ;;  %v10377_v24 = vcombine.low %v10307_v46, %v10308_v50  ;;  %v13762_v0 = vpop.f32.mrf.mxu0  ;;  %v4424_v33 = vshrl.u32 %v10307_v46, 16  ;;  %v10310_v4 = vld [vmem:[%s12349_s28 + $0x70] sm:$0xf]  ;;  %v13772_v42 = vpop.f32.mrf.mxu1 }
 0x112   : > { %v4402_v62 = vsel %vm12527_vm5, %v4397_v5, %v4401_v61  ;;  %v4421_v26 = vrot.slane %v4419_v27, 5  ;;  %v4427_v20 = vshll.u32 %v10307_v46, 16  ;;  %v4406_v49 = vor.u32 %v4405_v12, %v4401_v61  ;;  %17113 = vst [vmem:[#allocation16_spill] sm:$0xff] %v13772_v42 }
 0x113   : > { %v10442_v53 = vcombine.low %v4392_v1, %v4402_v62  ;;  %v4416_v9 = vor.u32 %v4415_v37, %v4411_v13  ;;  %v4437_v23 = vshrl.u32 %v10308_v50, 16  ;;  %v13766_v55 = vpop.f32.mrf.mxu0  ;;  %v4426_v25 = vrot.slane %v4424_v33, 4  ;;  %v10311_v1 = vld [vmem:[%s12349_s28 + $0x74] sm:$0x1]  ;;  %v13784_v39 = vpop.f32.mrf.mxu1 }
 0x114   : > { %v4429_v3 = vrot.slane %v4427_v20, 5  ;;  %v4433_v41 = vshll.u32 %v10308_v50, 16  ;;  %v4443_v32 = vshll.u32 %v13755_v43, 16  ;;  %v4407_v45 = vrot.slane %v4406_v49, 4  ;;  %17114 = vst [vmem:[#allocation17_spill] sm:$0xff] %v13784_v39  ;;  %v11932_v20 = vld [vmem:[%s16862_s1 + $0x40] sm:$0xff]  }
 0x115   : > { %11466 = vmatprep.mubr.msk.bf16.mxu0 %vm605_vm0, %v10442_v53  ;;  %v4417_v61 = vrot.slane %v4416_v9, 4  ;;  %v4439_v15 = vrot.slane %v4437_v23, 4  ;;  %v4447_v51 = vshrl.u32 %v13755_v43, 16  ;;  %v13776_v27 = vpop.f32.mrf.mxu0  ;;  %v10378_v50 = vcombine.low %v13755_v43, %v10310_v4  ;;  %11716 = vmatprep.subr.bf16.mxu0 %v11932_v20 }
 0x116   : > { %11401 = vmatmul.mubr.msk.bf16.gmra.mxu1 %vm605_vm0, %v10376_v30  ;;  %v4430_v46 = vor.u32 %v4429_v3, %v4426_v25  ;;  %v4435_v5 = vrot.slane %v4433_v41, 5  ;;  %v4445_v37 = vrot.slane %v4443_v32, 5  ;;  %v4412_v30 = vsel %vm12527_vm5, %v4407_v45, %v4411_v13  ;;  %v10313_v25 = vld [vmem:[%s12349_s28 + $0x7c] sm:$0xf]  ;;  %v13793_v3 = vpop.f32.mrf.mxu1 }
 0x117   : > { %11404 = vmatprep.mubr.msk.bf16.mxu1 %vm605_vm0, %v10377_v24  ;;  %v4422_v12 = vsel %vm12527_vm5, %v4417_v61, %v4421_v26  ;;  %v4449_v62 = vrot.slane %v4447_v51, 4  ;;  %v4457_v33 = vshrl.u32 %v10310_v4, 16  ;;  %v10312_v24 = vld [vmem:[%s12349_s28 + $0x78] sm:$0xf]  ;;  %v4453_v43 = vshll.u32 %v10310_v4, 16  ;;  %v13790_v23 = vpop.f32.mrf.mxu0  ;;  %17115 = vst [vmem:[#allocation19_spill] sm:$0xff] %v13793_v3 }
 0x118   : > { %v10443_v53 = vcombine.low %v4412_v30, %v4422_v12  ;;  %v4431_v49 = vrot.slane %v4430_v46, 4  ;;  %v4440_v9 = vor.u32 %v4439_v15, %v4435_v5  ;;  %v4463_v41 = vshll.u32 %v10311_v1, 16  ;;  %v13800_v12 = vpop.f32.mrf.mxu1  ;;  %v10314_v1 = vld [vmem:[%s12349_s28 + $0x80] sm:$0xf] }
 0x119   : > { %v4450_v13 = vor.u32 %v4449_v62, %v4445_v37  ;;  %v4459_v26 = vrot.slane %v4457_v33, 4  ;;  %v10379_v32 = vcombine.low %v10312_v24, %v10313_v25  ;;  %v4455_v15 = vrot.slane %v4453_v43, 5  ;;  %v13798_v4 = vpop.f32.mrf.mxu0  ;;  %17116 = vst [vmem:[#allocation20_spill] sm:$0xff] %v13800_v12 }
 0x11a   : > { %11467 = vmatmul.mubr.msk.bf16.gmra.mxu0 %vm605_vm0, %v10443_v53  ;;  %v4436_v45 = vsel %vm12527_vm5, %v4431_v49, %v4435_v5  ;;  %v4441_v61 = vrot.slane %v4440_v9, 4  ;;  %v4468_v51 = vshrl.u32 %v10312_v24, 16  ;;  %v4465_v30 = vrot.slane %v4463_v41, 5  ;;  %v10315_v9 = vld [vmem:[%s12349_s28 + $0x84] sm:$0xf]  ;;  %v13811_v41 = vpop.f32.mrf.mxu1 }
 0x11b   : > { %v4451_v46 = vrot.slane %v4450_v13, 4  ;;  %v4471_v62 = vshll.u32 %v10312_v24, 16  ;;  %v4481_v33 = vshrl.u32 %v10313_v25, 16  ;;  %v4460_v53 = vor.u32 %v4459_v26, %v4455_v15  ;;  %v13805_v52 = vpop.f32.mrf.mxu0  ;;  %17117 = vst [vmem:[#allocation22_spill] sm:$0xff] %v13811_v41  ;;  %v10317_v41 = vld [vmem:[%s12349_s28 + $0x8c] sm:$0xf] }
 0x11c   : > { %v4446_v20 = vsel %vm12527_vm5, %v4441_v61, %v4445_v37  ;;  %v4470_v5 = vrot.slane %v4468_v51, 4  ;;  %v4477_v49 = vshll.u32 %v10313_v25, 16  ;;  %v4487_v26 = vshll.u32 %v10314_v1, 16 }
 0x11d   : > { %v10444_v43 = vcombine.low %v4436_v45, %v4446_v20  ;;  %v4456_v13 = vsel %vm12527_vm5, %v4451_v46, %v4455_v15  ;;  %v4473_v24 = vrot.slane %v4471_v62, 5  ;;  %v4483_v12 = vrot.slane %v4481_v33, 4  ;;  %v13814_v25 = vpop.f32.mrf.mxu0  ;;  %v10316_v46 = vld [vmem:[%s12349_s28 + $0x88] sm:$0x1] }
 0x11e   : > { %11405 = vmatmul.mubr.msk.bf16.gmra.mxu1 %vm605_vm0, %v10378_v50  ;;  %v4461_v3 = vrot.slane %v4460_v53, 4  ;;  %v4479_v37 = vrot.slane %v4477_v49, 5  ;;  %v4491_v61 = vshrl.u32 %v10314_v1, 16  ;;  %v13817_v50 = vpop.f32.mrf.mxu1  ;;  %v10380_v15 = vcombine.low %v10314_v1, %v10315_v9  ;;  %v10318_v1 = vld [vmem:[%s12349_s28 + $0x90] sm:$0xf] }
 0x11f   : > { %11408 = vmatprep.mubr.msk.bf16.mxu1 %vm605_vm0, %v10379_v32  ;;  %11470 = vmatprep.mubr.msk.bf16.mxu0 %vm605_vm0, %v10444_v43  ;;  %17118 = vst [vmem:[#allocation23_spill] sm:$0xff] %v13817_v50  ;;  %v4474_v45 = vor.u32 %v4473_v24, %v4470_v5  ;;  %v4501_v51 = vshrl.u32 %v10315_v9, 16  ;;  %v4497_v62 = vshll.u32 %v10315_v9, 16  ;;  %v4489_v20 = vrot.slane %v4487_v26, 5  ;;  %v13822_v49 = vpop.f32.mrf.mxu0 }
 0x120   : > { %v4466_v33 = vsel %vm12527_vm5, %v4461_v3, %v4465_v30  ;;  %v4484_v32 = vor.u32 %v4483_v12, %v4479_v37  ;;  %v4493_v53 = vrot.slane %v4491_v61, 4  ;;  %v13825_v43 = vpop.f32.mrf.mxu1  ;;  %v4507_v9 = vshll.u32 %v10316_v46, 16 }
 0x121   : > { %v10445_v39 = vcombine.low %v4456_v13, %v4466_v33  ;;  %v4475_v42 = vrot.slane %v4474_v45, 4  ;;  %17119 = vst [vmem:[#allocation24_spill] sm:$0xff] %v13825_v43  ;;  %v4499_v5 = vrot.slane %v4497_v62, 5  ;;  %v4503_v24 = vrot.slane %v4501_v51, 4  ;;  %v13828_v44 = vpop.f32.mrf.mxu0  ;;  %v10319_v45 = vld [vmem:[%s12349_s28 + $0x94] sm:$0xf] }
 0x122   : > { %v4485_v50 = vrot.slane %v4484_v32, 4  ;;  %v4494_v11 = vor.u32 %v4493_v53, %v4489_v20  ;;  %v10381_v3 = vcombine.low %v10317_v41, %v10318_v1  ;;  %v13833_v13 = vpop.f32.mrf.mxu1  ;;  %v4512_v26 = vshrl.u32 %v10317_v41, 16 }
 0x123   : > { %11471 = vmatmul.mubr.msk.bf16.gmra.mxu0 %vm605_vm0, %v10445_v39  ;;  %v4480_v30 = vsel %vm12527_vm5, %v4475_v42, %v4479_v37  ;;  %v4504_v12 = vor.u32 %v4503_v24, %v4499_v5  ;;  %17120 = vst [vmem:[#allocation25_spill] sm:$0xff] %v13833_v13  ;;  %v4515_v61 = vshll.u32 %v10317_v41, 16  ;;  %v4509_v46 = vrot.slane %v4507_v9, 5  ;;  %v13838_v33 = vpop.f32.mrf.mxu0  ;;  %v10320_v41 = vld [vmem:[%s12349_s28 + $0x98] sm:$0xf] }
 0x124   : > { %v4490_v51 = vsel %vm12527_vm5, %v4485_v50, %v4489_v20  ;;  %v4495_v62 = vrot.slane %v4494_v11, 4  ;;  %v4525_v32 = vshrl.u32 %v10318_v1, 16  ;;  %v13841_v37 = vpop.f32.mrf.mxu1  ;;  %v4514_v53 = vrot.slane %v4512_v26, 4 }
 0x125   : > { %v10446_v39 = vcombine.low %v4480_v30, %v4490_v51  ;;  %v4505_v42 = vrot.slane %v4504_v12, 4  ;;  %17121 = vst [vmem:[#allocation26_spill] sm:$0xff] %v13841_v37  ;;  %v4517_v24 = vrot.slane %v4515_v61, 5  ;;  %v4521_v11 = vshll.u32 %v10318_v1, 16  ;;  %v13847_v9 = vpop.f32.mrf.mxu0  ;;  %v10321_v30 = vld [vmem:[%s12349_s28 + $0x9c] sm:$0x1] }
 0x126   : > { %11409 = vmatmul.mubr.msk.bf16.gmra.mxu1 %vm605_vm0, %v10380_v15  ;;  %v4500_v13 = vsel %vm12527_vm5, %v4495_v62, %v4499_v5  ;;  %v4527_v50 = vrot.slane %v4525_v32, 4  ;;  %v4531_v20 = vshll.u32 %v10319_v45, 16  ;;  %v13853_v12 = vpop.f32.mrf.mxu1  ;;  %v4535_v61 = vshrl.u32 %v10319_v45, 16  ;;  %v10322_v5 = vld [vmem:[%s12349_s28 + $0xa0] sm:$0xf] }
 0x127   : > { %11412 = vmatprep.mubr.msk.bf16.mxu1 %vm605_vm0, %v10381_v3  ;;  %11474 = vmatprep.mubr.msk.bf16.mxu0 %vm605_vm0, %v10446_v39  ;;  %v4510_v15 = vsel %vm12527_vm5, %v4505_v42, %v4509_v46  ;;  %17122 = vst [vmem:[#allocation27_spill] sm:$0xff] %v13853_v12  ;;  %v4518_v26 = vor.u32 %v4517_v24, %v4514_v53  ;;  %v4523_v1 = vrot.slane %v4521_v11, 5  ;;  %v4545_v32 = vshrl.u32 %v10320_v41, 16  ;;  %v13856_v37 = vpop.f32.mrf.mxu0  ;;  %v10323_v42 = vld [vmem:[%s12349_s28 + $0xa4] sm:$0xf] }
 0x128   : > { %v10382_v51 = vcombine.low %v10319_v45, %v10320_v41  ;;  %v10447_v62 = vcombine.low %v4500_v13, %v4510_v15  ;;  %v4533_v3 = vrot.slane %v4531_v20, 5  ;;  %v4537_v48 = vrot.slane %v4535_v61, 4  ;;  %v13858_v39 = vpop.f32.mrf.mxu1  ;;  %v13864_v13 = vld [vmem:[%s12349_s28 + $0xa8] sm:$0xf] }
 0x129   : > { %v4519_v43 = vrot.slane %v4518_v26, 4  ;;  %17123 = vst [vmem:[#allocation28_spill] sm:$0xff] %v13858_v39  ;;  %v4541_v10 = vshll.u32 %v10320_v41, 16  ;;  %v4551_v46 = vshll.u32 %v10321_v30, 16  ;;  %v4528_v54 = vor.u32 %v4527_v50, %v4523_v1  ;;  %v13861_v53 = vpop.f32.mrf.mxu0 }
 0x12a   : > { %v4547_v12 = vrot.slane %v4545_v32, 4  ;;  %v10383_v45 = vcombine.low %v10322_v5, %v10323_v42  ;;  %v4556_v24 = vshrl.u32 %v10322_v5, 16  ;;  %v4538_v20 = vor.u32 %v4537_v48, %v4533_v3  ;;  %v13869_v61 = vpop.f32.mrf.mxu1 }
 0x12b   : > { %11475 = vmatmul.mubr.msk.bf16.gmra.mxu0 %vm605_vm0, %v10447_v62  ;;  %v4524_v11 = vsel %vm12527_vm5, %v4519_v43, %v4523_v1  ;;  %v4543_v15 = vrot.slane %v4541_v10, 5  ;;  %v4553_v26 = vrot.slane %v4551_v46, 5  ;;  %17124 = vst [vmem:[#allocation29_spill] sm:$0xff] %v13869_v61  ;;  %v4529_v41 = vrot.slane %v4528_v54, 4  ;;  %v13871_v30 = vpop.f32.mrf.mxu0  ;;  %v10326_v61 = vld [vmem:[%s12349_s28 + $0xb0] sm:$0x1] }
 0x12c   : > { %v4559_v50 = vshll.u32 %v10322_v5, 16  ;;  %v4569_v32 = vshrl.u32 %v10323_v42, 16  ;;  %v4558_v39 = vrot.slane %v4556_v24, 4  ;;  %v4539_v47 = vrot.slane %v4538_v20, 4  ;;  %v13874_v62 = vpop.f32.mrf.mxu1  ;;  %v10325_v24 = vld [vmem:[%s12349_s28 + $0xac] sm:$0xf] }
 0x12d   : > { %v4548_v31 = vor.u32 %v4547_v12, %v4543_v15  ;;  %17125 = vst [vmem:[#allocation30_spill] sm:$0xff] %v13874_v62  ;;  %v4565_v43 = vshll.u32 %v10323_v42, 16  ;;  %v4575_v10 = vshll.u32 %v13864_v13, 16  ;;  %v4534_v48 = vsel %vm12527_vm5, %v4529_v41, %v4533_v3  ;;  %v13881_v46 = vpop.f32.mrf.mxu0 }
 0x12e   : > { %11413 = vmatmul.mubr.msk.bf16.gmra.mxu1 %vm605_vm0, %v10382_v51  ;;  %v4561_v54 = vrot.slane %v4559_v50, 5  ;;  %v4571_v1 = vrot.slane %v4569_v32, 4  ;;  %v4579_v5 = vshrl.u32 %v13864_v13, 16  ;;  %v10448_v51 = vcombine.low %v4524_v11, %v4534_v48  ;;  %v13886_v20 = vpop.f32.mrf.mxu1 }
 0x12f   : > { %11416 = vmatprep.mubr.msk.bf16.mxu1 %vm605_vm0, %v10383_v45  ;;  %v4544_v12 = vsel %vm12527_vm5, %v4539_v47, %v4543_v15  ;;  %v4549_v42 = vrot.slane %v4548_v31, 4  ;;  %17126 = vst [vmem:[#allocation31_spill] sm:$0xff] %v13886_v20  ;;  %v4567_v62 = vrot.slane %v4565_v43, 5  ;;  %v4577_v41 = vrot.slane %v4575_v10, 5  ;;  %v13890_v32 = vpop.f32.mrf.mxu0  ;;  %v10327_v43 = vld [vmem:[%s12349_s28 + $0xb4] sm:$0xf] }
 0x130   : > { %v4562_v3 = vor.u32 %v4561_v54, %v4558_v39  ;;  %v4581_v45 = vrot.slane %v4579_v5, 4  ;;  %v10384_v50 = vcombine.low %v13864_v13, %v10325_v24  ;;  %11478 = vmatprep.mubr.msk.bf16.mxu0 %vm605_vm0, %v10448_v51  ;;  %v13895_v15 = vpop.f32.mrf.mxu1  ;;  %v4589_v31 = vshrl.u32 %v10325_v24, 16  ;;  %v10328_v13 = vld [vmem:[%s12349_s28 + $0xb8] sm:$0xf] }
 0x131   : > { %v4554_v11 = vsel %vm12527_vm5, %v4549_v42, %v4553_v26  ;;  %v4572_v47 = vor.u32 %v4571_v1, %v4567_v62  ;;  %17127 = vst [vmem:[#allocation36_spill] sm:$0xff] %v13895_v15  ;;  %v4585_v48 = vshll.u32 %v10325_v24, 16  ;;  %v4595_v54 = vshll.u32 %v10326_v61, 16  ;;  %v13898_v5 = vpop.f32.mrf.mxu0 }
 0x132   : > { %v10449_v20 = vcombine.low %v4544_v12, %v4554_v11  ;;  %v4563_v39 = vrot.slane %v4562_v3, 4  ;;  %v4582_v10 = vor.u32 %v4581_v45, %v4577_v41  ;;  %v4591_v51 = vrot.slane %v4589_v31, 4  ;;  %v13901_v21 = vpop.f32.mrf.mxu1  ;;  %v10329_v3 = vld [vmem:[%s12349_s28 + $0xbc] sm:$0xf] }
 0x133   : > { %v4573_v29 = vrot.slane %v4572_v47, 4  ;;  %v4587_v60 = vrot.slane %v4585_v48, 5  ;;  %17128 = vst [vmem:[#allocation37_spill] sm:$0xff] %v13901_v21  ;;  %v10385_v26 = vcombine.low %v10327_v43, %v10328_v13  ;;  %v4597_v12 = vrot.slane %v4595_v54, 5  ;;  %v13906_v42 = vpop.f32.mrf.mxu0 }
 0x134   : > { %11479 = vmatmul.mubr.msk.bf16.gmra.mxu0 %vm605_vm0, %v10449_v20  ;;  %v4568_v1 = vsel %vm12527_vm5, %v4563_v39, %v4567_v62  ;;  %v4583_v24 = vrot.slane %v4582_v10, 4  ;;  %v4600_v61 = vshrl.u32 %v10327_v43, 16  ;;  %v13912_v47 = vpop.f32.mrf.mxu1  ;;  %v4603_v31 = vshll.u32 %v10327_v43, 16  ;;  %v10330_v20 = vld [vmem:[%s12349_s28 + $0xc0] sm:$0xf] }
 0x135   : > { %v4578_v45 = vsel %vm12527_vm5, %v4573_v29, %v4577_v41  ;;  %v4592_v11 = vor.u32 %v4591_v51, %v4587_v60  ;;  %17129 = vst [vmem:[#allocation38_spill] sm:$0xff] %v13912_v47  ;;  %v4613_v48 = vshrl.u32 %v10328_v13, 16  ;;  %v4609_v10 = vshll.u32 %v10328_v13, 16  ;;  %v11324_v54 = vpop.f32.mrf.mxu0 }
 0x136   : > { %11417 = vmatmul.mubr.msk.bf16.gmra.mxu1 %vm605_vm0, %v10384_v50  ;;  %v10450_v21 = vcombine.low %v4568_v1, %v4578_v45  ;;  %v4588_v62 = vsel %vm12527_vm5, %v4583_v24, %v4587_v60  ;;  %v4602_v39 = vrot.slane %v4600_v61, 4  ;;  %v13918_v29 = vpop.f32.mrf.mxu1  ;;  %v4605_v41 = vrot.slane %v4603_v31, 5 }
 0x137   : > { %11420 = vmatprep.mubr.msk.bf16.mxu1 %vm605_vm0, %v10385_v26  ;;  %v4593_v15 = vrot.slane %v4592_v11, 4  ;;  %17130 = vst [vmem:[#allocation39_spill] sm:$0xff] %v13918_v29  ;;  %v4615_v50 = vrot.slane %v4613_v48, 4  ;;  %v4619_v51 = vshll.u32 %v10329_v3, 16  ;;  %v4611_v43 = vrot.slane %v4609_v10, 5  ;;  %v3034_v56 = vpop.f32.mrf.mxu0 }
 0x138   : > { %11482 = vmatprep.mubr.msk.bf16.mxu0 %vm605_vm0, %v10450_v21  ;;  %v4623_v47 = vshrl.u32 %v10329_v3, 16  ;;  %v10386_v1 = vcombine.low %v10329_v3, %v10330_v20  ;;  %v4633_v45 = vshrl.u32 %v10330_v20, 16  ;;  %v4606_v26 = vor.u32 %v4605_v41, %v4602_v39  ;;  %v11258_v24 = vpop.f32.mrf.mxu1  ;;  %v10332_v41 = vld [vmem:[%s12349_s28 + $0xc8] sm:$0xf] }
 0x139   : > { %v4598_v60 = vsel %vm12527_vm5, %v4593_v15, %v4597_v12  ;;  %v4621_v13 = vrot.slane %v4619_v51, 5  ;;  %v4629_v61 = vshll.u32 %v10330_v20, 16  ;;  %v4616_v31 = vor.u32 %v4615_v50, %v4611_v43  ;;  %v11325_v10 = vpop.f32.mrf.mxu0  ;;  %v10333_v50 = vld [vmem:[%s12349_s28 + $0xcc] sm:$0xf] }
 0x13a   : > { %v10451_v11 = vcombine.low %v4588_v62, %v4598_v60  ;;  %v4625_v48 = vrot.slane %v4623_v47, 4  ;;  %v2382_v21 = vadd.f32 %v11258_v24, %v13610_v38  ;;  %v4607_v29 = vrot.slane %v4606_v26, 4  ;;  %v2125_v8 = vpop.f32.mrf.mxu1 }
 0x13b   : > { %v4631_v3 = vrot.slane %v4629_v61, 5  ;;  %v4635_v28 = vrot.slane %v4633_v45, 4  ;;  %v4639_v17 = vshll.u32 %v10331_v40, 16  ;;  %v4617_v15 = vrot.slane %v4616_v31, 4  ;;  %v3037_v62 = vpop.f32.mrf.mxu0 }
 0x13c   : > { %11483 = vmatmul.mubr.msk.bf16.gmra.mxu0 %vm605_vm0, %v10451_v11  ;;  %v4626_v12 = vor.u32 %v4625_v48, %v4621_v13  ;;  %v13926_v39 = vadd.f32 %v11324_v54, %v2382_v21  ;;  %v2380_v20 = vadd.f32 %v2125_v8, %v13619_v34  ;;  %v4612_v38 = vsel %vm12527_vm5, %v4607_v29, %v4611_v43  ;;  %v11259_v51 = vpop.f32.mrf.mxu1 }
 0x13d   : > { %v4636_v47 = vor.u32 %v4635_v28, %v4631_v3  ;;  %v4641_v40 = vrot.slane %v4639_v17, 5  ;;  %v10387_v45 = vcombine.low %v10332_v41, %v10333_v50  ;;  %v4622_v60 = vsel %vm12527_vm5, %v4617_v15, %v4621_v13  ;;  %v11328_v8 = vpop.f32.mrf.mxu0  ;;  %v10334_v17 = vld [vmem:[%s12349_s28 + $0xd0] sm:$0xf] }
 0x13e   : > { %11421 = vmatmul.mubr.msk.bf16.gmra.mxu1 %vm605_vm0, %v10386_v1  ;;  %v4627_v54 = vrot.slane %v4626_v12, 4  ;;  %v13936_v26 = vadd.f32 %v3034_v56, %v2380_v20  ;;  %v2383_v34 = vadd.f32 %v11259_v51, %v13628_v19  ;;  %v10452_v24 = vcombine.low %v4612_v38, %v4622_v60  ;;  %v2128_v11 = vpop.f32.mrf.mxu1  ;;  %v10335_v20 = vld [vmem:[%s12349_s28 + $0xd4] sm:$0xf] }
 0x13f   : > { %v4637_v61 = vrot.slane %v4636_v47, 4  ;;  %11424 = vmatprep.mubr.msk.bf16.mxu1 %vm605_vm0, %v10387_v45  ;;  %v4644_v29 = vshrl.u32 %v10332_v41, 16  ;;  %v4647_v28 = vshll.u32 %v10332_v41, 16  ;;  %v2381_v56 = vadd.f32 %v2128_v11, %v13638_v63  ;;  %v3050_v31 = vpop.f32.mrf.mxu0 }
 0x140   : > { %v4632_v43 = vsel %vm12527_vm5, %v4627_v54, %v4631_v3  ;;  %v13943_v1 = vadd.f32 %v11325_v10, %v2383_v34  ;;  %v4657_v13 = vshrl.u32 %v10333_v50, 16  ;;  %11486 = vmatprep.mubr.msk.bf16.mxu0 %vm605_vm0, %v10452_v24  ;;  %v4653_v15 = vshll.u32 %v10333_v50, 16  ;;  %v11262_v12 = vpop.f32.mrf.mxu1  ;;  %v10336_v54 = vld [vmem:[%s12349_s28 + $0xd8] sm:$0x1] }
 0x141   : > { %v4642_v19 = vsel %vm12527_vm5, %v4637_v61, %v4641_v40  ;;  %v4646_v48 = vrot.slane %v4644_v29, 4  ;;  %v4649_v21 = vrot.slane %v4647_v28, 5  ;;  %v13950_v38 = vadd.f32 %v3037_v62, %v2381_v56  ;;  %v11329_v47 = vpop.f32.mrf.mxu0 }
 0x142   : > { %v10453_v41 = vcombine.low %v4632_v43, %v4642_v19  ;;  %v4659_v10 = vrot.slane %v4657_v13, 4  ;;  %v4663_v3 = vshll.u32 %v10334_v17, 16  ;;  %v4655_v51 = vrot.slane %v4653_v15, 5  ;;  %v2141_v34 = vpop.f32.mrf.mxu1 }
 0x143   : > { %v4650_v63 = vor.u32 %v4649_v21, %v4646_v48  ;;  %v4667_v45 = vshrl.u32 %v10334_v17, 16  ;;  %v2386_v60 = vadd.f32 %v11262_v12, %v13650_v57  ;;  %v10388_v24 = vcombine.low %v10334_v17, %v10335_v20  ;;  %v3053_v11 = vpop.f32.mrf.mxu0 }
 0x144   : > { %11487 = vmatmul.mubr.msk.bf16.gmra.mxu0 %vm605_vm0, %v10453_v41  ;;  %v4665_v40 = vrot.slane %v4663_v3, 5  ;;  %v4677_v50 = vshrl.u32 %v10335_v20, 16  ;;  %v4673_v61 = vshll.u32 %v10335_v20, 16  ;;  %v4660_v62 = vor.u32 %v4659_v10, %v4655_v51  ;;  %v11263_v56 = vpop.f32.mrf.mxu1  ;;  %v10337_v41 = vld [vmem:[%s12349_s28 + $0xdc] sm:$0xf] }
 0x145   : > { %v4651_v29 = vrot.slane %v4650_v63, 4  ;;  %v4669_v28 = vrot.slane %v4667_v45, 4  ;;  %v13955_v43 = vadd.f32 %v11328_v8, %v2386_v60  ;;  %v4683_v19 = vshll.u32 %v10336_v54, 16  ;;  %v11332_v21 = vpop.f32.mrf.mxu0  ;;  %v10338_v60 = vld [vmem:[%s12349_s28 + $0xe0] sm:$0xf] }
 0x146   : > { %11425 = vmatmul.mubr.msk.bf16.gmra.mxu1 %vm605_vm0, %v10388_v24  ;;  %v4675_v57 = vrot.slane %v4673_v61, 5  ;;  %v4679_v13 = vrot.slane %v4677_v50, 4  ;;  %v2384_v48 = vadd.f32 %v2141_v34, %v13663_v18  ;;  %v4661_v15 = vrot.slane %v4660_v62, 4  ;;  %v2144_v8 = vpop.f32.mrf.mxu1  ;;  %v10339_v50 = vld [vmem:[%s12349_s28 + $0xe4] sm:$0xf] }
 0x147   : > { %v4656_v17 = vsel %vm12527_vm5, %v4651_v29, %v4655_v51  ;;  %v4670_v12 = vor.u32 %v4669_v28, %v4665_v40  ;;  %v2387_v20 = vadd.f32 %v11263_v56, %v13675_v16  ;;  %v4685_v3 = vrot.slane %v4683_v19, 5  ;;  %v3066_v54 = vpop.f32.mrf.mxu0 }
 0x148   : > { %v4680_v10 = vor.u32 %v4679_v13, %v4675_v57  ;;  %v13963_v63 = vadd.f32 %v3050_v31, %v2384_v48  ;;  %v2385_v45 = vadd.f32 %v2144_v8, %v13683_v59  ;;  %v4666_v18 = vsel %vm12527_vm5, %v4661_v15, %v4665_v40  ;;  %v11266_v61 = vpop.f32.mrf.mxu1  ;;  %v10340_v15 = vld [vmem:[%s12349_s28 + $0xe8] sm:$0xf] }
 0x149   : > { %v4671_v34 = vrot.slane %v4670_v12, 4  ;;  %v13969_v51 = vadd.f32 %v11329_v47, %v2387_v20  ;;  %v10389_v24 = vcombine.low %v10337_v41, %v10338_v60  ;;  %v10454_v16 = vcombine.low %v4656_v17, %v4666_v18  ;;  %v11333_v28 = vpop.f32.mrf.mxu0 }
 0x14a   : > { %v4681_v29 = vrot.slane %v4680_v10, 4  ;;  %v13972_v62 = vadd.f32 %v3053_v11, %v2385_v45  ;;  %v4688_v31 = vshrl.u32 %v10337_v41, 16  ;;  %v4691_v40 = vshll.u32 %v10337_v41, 16  ;;  %v2157_v13 = vpop.f32.mrf.mxu1  ;;  %v10341_v45 = vld [vmem:[%s12349_s28 + $0xec] sm:$0x1] }
 0x14b   : > { %17131 = vst [vmem:[#allocation40_spill] sm:$0xff] %v13969_v51  ;;  %v4676_v59 = vsel %vm12527_vm5, %v4671_v34, %v4675_v57  ;;  %11428 = vmatprep.mubr.msk.bf16.mxu1 %vm605_vm0, %v10389_v24  ;;  %v4701_v56 = vshrl.u32 %v10338_v60, 16  ;;  %v4697_v47 = vshll.u32 %v10338_v60, 16  ;;  %11490 = vmatprep.mubr.msk.bf16.mxu0 %vm605_vm0, %v10454_v16  ;;  %v4707_v11 = vshll.u32 %v10339_v50, 16  ;;  %v3069_v12 = vpop.f32.mrf.mxu0 }
 0x14c   : > { %17132 = vst [vmem:[#allocation41_spill] sm:$0xff] %v13972_v62  ;;  %v4686_v19 = vsel %vm12527_vm5, %v4681_v29, %v4685_v3  ;;  %v4690_v48 = vrot.slane %v4688_v31, 4  ;;  %v4711_v17 = vshrl.u32 %v10339_v50, 16  ;;  %v4693_v8 = vrot.slane %v4691_v40, 5  ;;  %v11267_v18 = vpop.f32.mrf.mxu1 }
 0x14d   : > { %v10455_v20 = vcombine.low %v4676_v59, %v4686_v19  ;;  %v4699_v57 = vrot.slane %v4697_v47, 5  ;;  %v4703_v10 = vrot.slane %v4701_v56, 4  ;;  %v4709_v41 = vrot.slane %v4707_v11, 5  ;;  %v11336_v16 = vpop.f32.mrf.mxu0 }
 0x14e   : > { %v4713_v34 = vrot.slane %v4711_v17, 4  ;;  %v2390_v60 = vadd.f32 %v11266_v61, %v13694_v6  ;;  %v10390_v24 = vcombine.low %v10339_v50, %v10340_v15  ;;  %v4694_v3 = vor.u32 %v4693_v8, %v4690_v48  ;;  %v2160_v51 = vpop.f32.mrf.mxu1  ;;  %v10342_v8 = vld [vmem:[%s12349_s28 + $0xf0] sm:$0xf] }
 0x14f   : > { %11491 = vmatmul.mubr.msk.bf16.gmra.mxu0 %vm605_vm0, %v10455_v20  ;;  %v4704_v29 = vor.u32 %v4703_v10, %v4699_v57  ;;  %v4721_v31 = vshrl.u32 %v10340_v15, 16  ;;  %v4717_v62 = vshll.u32 %v10340_v15, 16  ;;  %v4727_v56 = vshll.u32 %v10341_v45, 16  ;;  %v13988_v19 = vpop.f32.mrf.mxu0 }
 0x150   : > { %v4714_v59 = vor.u32 %v4713_v34, %v4709_v41  ;;  %v13984_v40 = vadd.f32 %v11332_v21, %v2390_v60  ;;  %11429 = vmatmul.mubr.msk.bf16.gmra.mxu1 %vm605_vm0, %v10390_v24  ;;  %v2388_v47 = vadd.f32 %v2157_v13, %v13706_v22  ;;  %v4695_v6 = vrot.slane %v4694_v3, 4  ;;  %v11270_v11 = vpop.f32.mrf.mxu1  ;;  %v10343_v34 = vld [vmem:[%s12349_s28 + $0xf4] sm:$0xf]  ;;  %v10344_v60 = vld [vmem:[%s12349_s28 + $0xf8] sm:$0xf] }
 0x151   : > { %v4705_v50 = vrot.slane %v4704_v29, 4  ;;  %v4719_v61 = vrot.slane %v4717_v62, 5  ;;  %v4723_v48 = vrot.slane %v4721_v31, 4  ;;  %v4729_v15 = vrot.slane %v4727_v56, 5  ;;  %v13994_v10 = vpop.f32.mrf.mxu0 }
 0x152   : > { %v4715_v17 = vrot.slane %v4714_v59, 4  ;;  %v13990_v20 = vadd.f32 %v3066_v54, %v2388_v47  ;;  %v2391_v21 = vadd.f32 %v11267_v18, %v13715_v36  ;;  %v4700_v22 = vsel %vm12527_vm5, %v4695_v6, %v4699_v57  ;;  %v2173_v24 = vpop.f32.mrf.mxu1 }
 0x153   : > { %v4710_v13 = vsel %vm12527_vm5, %v4705_v50, %v4709_v41  ;;  %v4724_v45 = vor.u32 %v4723_v48, %v4719_v61  ;;  %v2389_v62 = vadd.f32 %v2160_v51, %v13722_v14  ;;  %v10391_v18 = vcombine.low %v10342_v8, %v10343_v34  ;;  %v14007_v29 = vpop.f32.mrf.mxu0 }
 0x154   : > { %17133 = vst [vmem:[#allocation42_spill] sm:$0xff] %v13990_v20  ;;  %v10456_v3 = vcombine.low %v4700_v22, %v4710_v13  ;;  %v4720_v54 = vsel %vm12527_vm5, %v4715_v17, %v4719_v61  ;;  %v14005_v36 = vadd.f32 %v11333_v28, %v2391_v21  ;;  %v4732_v41 = vshrl.u32 %v10342_v8, 16  ;;  %v11271_v14 = vpop.f32.mrf.mxu1  ;;  %v10345_v17 = vld [vmem:[%s12349_s28 + $0xfc] sm:$0xf]  ;;  %v10346_v21 = vld [vmem:[%s12349_s28 + $0x100] sm:$0x1] }
 0x155   : > { %v4725_v31 = vrot.slane %v4724_v45, 4  ;;  %v14009_v57 = vadd.f32 %v3069_v12, %v2389_v62  ;;  %v4735_v59 = vshll.u32 %v10342_v8, 16  ;;  %11432 = vmatprep.mubr.msk.bf16.mxu1 %vm605_vm0, %v10391_v18  ;;  %v4745_v51 = vshrl.u32 %v10343_v34, 16  ;;  %v14013_v6 = vpop.f32.mrf.mxu0 }
 0x156   : > { %17134 = vst [vmem:[#allocation43_spill] sm:$0xff] %v14005_v36  ;;  %11494 = vmatprep.mubr.msk.bf16.mxu0 %vm605_vm0, %v10456_v3  ;;  %v4741_v56 = vshll.u32 %v10343_v34, 16  ;;  %v4751_v47 = vshll.u32 %v10344_v60, 16  ;;  %v4755_v28 = vshrl.u32 %v10344_v60, 16  ;;  %v4734_v61 = vrot.slane %v4732_v41, 4  ;;  %v2176_v8 = vpop.f32.mrf.mxu1 }
 0x157   : > { %17135 = vst [vmem:[#allocation44_spill] sm:$0xff] %v14009_v57  ;;  %v4730_v50 = vsel %vm12527_vm5, %v4725_v31, %v4729_v15  ;;  %v4737_v12 = vrot.slane %v4735_v59, 5  ;;  %v2394_v48 = vadd.f32 %v11270_v11, %v13737_v7  ;;  %v4747_v45 = vrot.slane %v4745_v51, 4  ;;  %v14020_v3 = vpop.f32.mrf.mxu0 }
 0x158   : > { %v10457_v22 = vcombine.low %v4720_v54, %v4730_v50  ;;  %v4743_v13 = vrot.slane %v4741_v56, 5  ;;  %v4753_v62 = vrot.slane %v4751_v47, 5  ;;  %v4757_v18 = vrot.slane %v4755_v28, 4  ;;  %v11274_v20 = vpop.f32.mrf.mxu1 }
 0x159   : > { %v4738_v34 = vor.u32 %v4737_v12, %v4734_v61  ;;  %v14022_v57 = vadd.f32 %v11336_v16, %v2394_v48  ;;  %v10392_v36 = vcombine.low %v10344_v60, %v10345_v17  ;;  %v4765_v7 = vshrl.u32 %v10345_v17, 16  ;;  %v14025_v41 = vpop.f32.mrf.mxu0  ;;  %v10347_v61 = vld [vmem:[%s12349_s28 + $0x104] sm:$0xf] }
 0x15a   : > { %11495 = vmatmul.mubr.msk.bf16.gmra.mxu0 %vm605_vm0, %v10457_v22  ;;  %v4748_v15 = vor.u32 %v4747_v45, %v4743_v13  ;;  %v4761_v11 = vshll.u32 %v10345_v17, 16  ;;  %v4771_v31 = vshll.u32 %v10346_v21, 16  ;;  %v4758_v59 = vor.u32 %v4757_v18, %v4753_v62  ;;  %v2189_v60 = vpop.f32.mrf.mxu1 }
 0x15b   : > { %v4739_v54 = vrot.slane %v4738_v34, 4  ;;  %11433 = vmatmul.mubr.msk.bf16.gmra.mxu1 %vm605_vm0, %v10392_v36  ;;  %v2392_v51 = vadd.f32 %v2173_v24, %v13746_v35  ;;  %v2395_v16 = vadd.f32 %v11271_v14, %v13762_v0  ;;  %v4767_v28 = vrot.slane %v4765_v7, 4  ;;  %v14031_v12 = vpop.f32.mrf.mxu0  ;;  %v10348_v0 = vld [vmem:[%s12349_s28 + $0x108] sm:$0xf]  ;;  %v10349_v34 = vld [vmem:[%s12349_s28 + $0x10c] sm:$0xf] }
 0x15c   : > { %v4749_v56 = vrot.slane %v4748_v15, 4  ;;  %v4763_v47 = vrot.slane %v4761_v11, 5  ;;  %v4773_v50 = vrot.slane %v4771_v31, 5  ;;  %v4759_v17 = vrot.slane %v4758_v59, 4  ;;  %v11275_v24 = vpop.f32.mrf.mxu1 }
 0x15d   : > { %v4744_v48 = vsel %vm12527_vm5, %v4739_v54, %v4743_v13  ;;  %v14036_v21 = vadd.f32 %v13988_v19, %v2392_v51  ;;  %v14039_v35 = vadd.f32 %v13994_v10, %v2395_v16  ;;  %v2393_v22 = vadd.f32 %v2176_v8, %v13766_v55  ;;  %v14046_v18 = vpop.f32.mrf.mxu0 }
 0x15e   : > { %v4754_v36 = vsel %vm12527_vm5, %v4749_v56, %v4753_v62  ;;  %v4768_v14 = vor.u32 %v4767_v28, %v4763_v47  ;;  %v10393_v45 = vcombine.low %v10347_v61, %v10348_v0  ;;  %v4764_v19 = vsel %vm12527_vm5, %v4759_v17, %v4763_v47  ;;  %v2192_v7 = vpop.f32.mrf.mxu1  ;;  %v10350_v56 = vld [vmem:[%s12349_s28 + $0x110] sm:$0xf]  ;;  %v10351_v17 = vld [vmem:[%s12349_s28 + $0x114] sm:$0x1] }
 0x15f   : > { %v10458_v13 = vcombine.low %v4744_v48, %v4754_v36  ;;  %v4776_v15 = vshrl.u32 %v10347_v61, 16  ;;  %v4779_v10 = vshll.u32 %v10347_v61, 16  ;;  %v14051_v31 = vadd.f32 %v14007_v29, %v2393_v22  ;;  %v14054_v62 = vpop.f32.mrf.mxu0 }
 0x160   : > { %v4769_v11 = vrot.slane %v4768_v14, 4  ;;  %11436 = vmatprep.mubr.msk.bf16.mxu1 %vm605_vm0, %v10393_v45  ;;  %v4789_v55 = vshrl.u32 %v10348_v0, 16  ;;  %v4785_v8 = vshll.u32 %v10348_v0, 16  ;;  %v4795_v51 = vshll.u32 %v10349_v34, 16  ;;  %v11278_v47 = vpop.f32.mrf.mxu1 }
 0x161   : > { %17136 = vst [vmem:[#allocation45_spill] sm:$0xff] %v14051_v31  ;;  %11498 = vmatprep.mubr.msk.bf16.mxu0 %vm605_vm0, %v10458_v13  ;;  %v4778_v54 = vrot.slane %v4776_v15, 4  ;;  %v4781_v59 = vrot.slane %v4779_v10, 5  ;;  %v4799_v16 = vshrl.u32 %v10349_v34, 16  ;;  %v2398_v48 = vadd.f32 %v11274_v20, %v13776_v27  ;;  %v14062_v36 = vpop.f32.mrf.mxu0 }
 0x162   : > { %v4774_v28 = vsel %vm12527_vm5, %v4769_v11, %v4773_v50  ;;  %v4787_v29 = vrot.slane %v4785_v8, 5  ;;  %v4791_v61 = vrot.slane %v4789_v55, 4  ;;  %v4797_v22 = vrot.slane %v4795_v51, 5  ;;  %v14064_v13 = vpop.f32.mrf.mxu1  ;;  %v10352_v51 = vld [vmem:[%s12349_s28 + $0x118] sm:$0xf] }
 0x163   : > { %v10459_v0 = vcombine.low %v4764_v19, %v4774_v28  ;;  %v4782_v14 = vor.u32 %v4781_v59, %v4778_v54  ;;  %v4801_v45 = vrot.slane %v4799_v16, 4  ;;  %v14067_v10 = vadd.f32 %v14013_v6, %v2398_v48  ;;  %v14069_v11 = vpop.f32.mrf.mxu0 }
 0x164   : > { %v4792_v15 = vor.u32 %v4791_v61, %v4787_v29  ;;  %v10394_v31 = vcombine.low %v10349_v34, %v10350_v56  ;;  %v4809_v50 = vshrl.u32 %v10350_v56, 16  ;;  %v4805_v19 = vshll.u32 %v10350_v56, 16  ;;  %v14072_v8 = vpop.f32.mrf.mxu1 }
 0x165   : > { %11499 = vmatmul.mubr.msk.bf16.gmra.mxu0 %vm605_vm0, %v10459_v0  ;;  %v4783_v27 = vrot.slane %v4782_v14, 4  ;;  %v4802_v20 = vor.u32 %v4801_v45, %v4797_v22  ;;  %v4815_v55 = vshll.u32 %v10351_v17, 16  ;;  %v2396_v6 = vadd.f32 %v2189_v60, %v13790_v23  ;;  %v14078_v16 = vpop.f32.mrf.mxu0  ;;  %v10353_v17 = vld [vmem:[%s12349_s28 + $0x11c] sm:$0xf]  ;;  %v10354_v60 = vld [vmem:[%s12349_s28 + $0x120] sm:$0xf] }
 0x166   : > { %v4793_v54 = vrot.slane %v4792_v15, 4  ;;  %11437 = vmatmul.mubr.msk.bf16.gmra.mxu1 %vm605_vm0, %v10394_v31  ;;  %v4811_v59 = vrot.slane %v4809_v50, 4  ;;  %v2399_v34 = vadd.f32 %v11275_v24, %v13798_v4  ;;  %v4807_v56 = vrot.slane %v4805_v19, 5  ;;  %v14083_v0 = vpop.f32.mrf.mxu1 }
 0x167   : > { %v4788_v28 = vsel %vm12527_vm5, %v4783_v27, %v4787_v29  ;;  %v4803_v61 = vrot.slane %v4802_v20, 4  ;;  %v4817_v48 = vrot.slane %v4815_v55, 5  ;;  %v14088_v14 = vadd.f32 %v14020_v3, %v2396_v6  ;;  %v14095_v24 = vpop.f32.mrf.mxu0 }
 0x168   : > { %v4798_v31 = vsel %vm12527_vm5, %v4793_v54, %v4797_v22  ;;  %v14091_v23 = vadd.f32 %v14025_v41, %v2399_v34  ;;  %v2397_v4 = vadd.f32 %v2192_v7, %v13805_v52  ;;  %v4812_v15 = vor.u32 %v4811_v59, %v4807_v56  ;;  %v14099_v27 = vpop.f32.mrf.mxu1 }
 0x169   : > { %17137 = vst [vmem:[#allocation46_spill] sm:$0xff] %v14088_v14  ;;  %v10460_v29 = vcombine.low %v4788_v28, %v4798_v31  ;;  %v4808_v45 = vsel %vm12527_vm5, %v4803_v61, %v4807_v56  ;;  %v10395_v50 = vcombine.low %v10352_v51, %v10353_v17  ;;  %v4820_v3 = vshrl.u32 %v10352_v51, 16  ;;  %v14104_v19 = vpop.f32.mrf.mxu0 }
 0x16a   : > { %17138 = vst [vmem:[#allocation47_spill] sm:$0xff] %v14091_v23  ;;  %v14102_v22 = vadd.f32 %v14031_v12, %v2397_v4  ;;  %v4823_v41 = vshll.u32 %v10352_v51, 16  ;;  %v4833_v20 = vshrl.u32 %v10353_v17, 16  ;;  %v4813_v52 = vrot.slane %v4812_v15, 4  ;;  %v14108_v59 = vpop.f32.mrf.mxu1  ;;  %v10355_v51 = vld [vmem:[%s12349_s28 + $0x124] sm:$0xf] }
 0x16b   : > { %11502 = vmatprep.mubr.msk.bf16.mxu0 %vm605_vm0, %v10460_v29  ;;  %11440 = vmatprep.mubr.msk.bf16.mxu1 %vm605_vm0, %v10395_v50  ;;  %v4829_v7 = vshll.u32 %v10353_v17, 16  ;;  %v4839_v55 = vshll.u32 %v10354_v60, 16  ;;  %v4843_v54 = vshrl.u32 %v10354_v60, 16  ;;  %v4822_v6 = vrot.slane %v4820_v3, 4  ;;  %v14112_v61 = vpop.f32.mrf.mxu0  ;;  %v10356_v15 = vld [vmem:[%s12349_s28 + $0x128] sm:$0x1] }
 0x16c   : > { %17139 = vst [vmem:[#allocation48_spill] sm:$0xff] %v14102_v22  ;;  %v4825_v12 = vrot.slane %v4823_v41, 5  ;;  %v4835_v34 = vrot.slane %v4833_v20, 4  ;;  %v2402_v28 = vadd.f32 %v11278_v47, %v13814_v25  ;;  %v4818_v56 = vsel %vm12527_vm5, %v4813_v52, %v4817_v48  ;;  %v14117_v17 = vpop.f32.mrf.mxu1 }
 0x16d   : > { %v4831_v31 = vrot.slane %v4829_v7, 5  ;;  %v4841_v4 = vrot.slane %v4839_v55, 5  ;;  %v4845_v29 = vrot.slane %v4843_v54, 4  ;;  %v10461_v50 = vcombine.low %v4808_v45, %v4818_v56  ;;  %v14122_v20 = vpop.f32.mrf.mxu0 }
 0x16e   : > { %v4826_v22 = vor.u32 %v4825_v12, %v4822_v6  ;;  %v14120_v3 = vadd.f32 %v14046_v18, %v2402_v28  ;;  %v10396_v41 = vcombine.low %v10354_v60, %v10355_v51  ;;  %v4853_v23 = vshrl.u32 %v10355_v51, 16  ;;  %v14124_v48 = vpop.f32.mrf.mxu1 }
 0x16f   : > { %v4836_v25 = vor.u32 %v4835_v34, %v4831_v31  ;;  %v4846_v47 = vor.u32 %v4845_v29, %v4841_v4  ;;  %v4849_v14 = vshll.u32 %v10355_v51, 16  ;;  %11503 = vmatmul.mubr.msk.bf16.gmra.mxu0 %vm605_vm0, %v10461_v50  ;;  %v4859_v45 = vshll.u32 %v10356_v15, 16  ;;  %v14132_v7 = vpop.f32.mrf.mxu0  ;;  %v10357_v34 = vld [vmem:[%s12349_s28 + $0x12c] sm:$0xf]  ;;  %v10359_v29 = vld [vmem:[%s12349_s28 + $0x134] sm:$0xf] }
 0x170   : > { %v4827_v52 = vrot.slane %v4826_v22, 4  ;;  %11441 = vmatmul.mubr.msk.bf16.gmra.mxu1 %vm605_vm0, %v10396_v41  ;;  %v2400_v18 = vadd.f32 %v14064_v13, %v13822_v49  ;;  %v2403_v60 = vadd.f32 %v14072_v8, %v13828_v44  ;;  %v4855_v12 = vrot.slane %v4853_v23, 4  ;;  %v14135_v28 = vpop.f32.mrf.mxu1  ;;  %v10358_v44 = vld [vmem:[%s12349_s28 + $0x130] sm:$0xf] }
 0x171   : > { %v4837_v55 = vrot.slane %v4836_v25, 4  ;;  %v4847_v54 = vrot.slane %v4846_v47, 4  ;;  %v4851_v6 = vrot.slane %v4849_v14, 5  ;;  %v4861_v51 = vrot.slane %v4859_v45, 5  ;;  %v14146_v13 = vpop.f32.mrf.mxu0 }
 0x172   : > { %v4832_v22 = vsel %vm12527_vm5, %v4827_v52, %v4831_v31  ;;  %v14140_v56 = vadd.f32 %v14054_v62, %v2400_v18  ;;  %v14143_v49 = vadd.f32 %v14062_v36, %v2403_v60  ;;  %v2401_v31 = vadd.f32 %v14083_v0, %v13838_v33  ;;  %v14155_v15 = vpop.f32.mrf.mxu1 }
 0x173   : > { %v4842_v8 = vsel %vm12527_vm5, %v4837_v55, %v4841_v4  ;;  %v4852_v14 = vsel %vm12527_vm5, %v4847_v54, %v4851_v6  ;;  %v4856_v23 = vor.u32 %v4855_v12, %v4851_v6  ;;  %v10397_v36 = vcombine.low %v10357_v34, %v10358_v44  ;;  %v14157_v25 = vpop.f32.mrf.mxu0  ;;  %v10360_v54 = vld [vmem:[%s12349_s28 + $0x138] sm:$0xf] }
 0x174   : > { %v10462_v62 = vcombine.low %v4832_v22, %v4842_v8  ;;  %v4864_v50 = vshrl.u32 %v10357_v34, 16  ;;  %v4867_v41 = vshll.u32 %v10357_v34, 16  ;;  %v14160_v4 = vadd.f32 %v14069_v11, %v2401_v31  ;;  %v14162_v18 = vpop.f32.mrf.mxu1 }
 0x175   : > { %v4857_v47 = vrot.slane %v4856_v23, 4  ;;  %v4877_v52 = vshrl.u32 %v10358_v44, 16  ;;  %v4873_v45 = vshll.u32 %v10358_v44, 16  ;;  %11444 = vmatprep.mubr.msk.bf16.mxu1 %vm605_vm0, %v10397_v36  ;;  %v4883_v60 = vshll.u32 %v10359_v29, 16  ;;  %v14167_v6 = vpop.f32.mrf.mxu0  ;;  %v10361_v44 = vld [vmem:[%s12349_s28 + $0x13c] sm:$0x1] }
 0x176   : > { %17140 = vst [vmem:[#allocation49_spill] sm:$0xff] %v14160_v4  ;;  %11506 = vmatprep.mubr.msk.bf16.mxu0 %vm605_vm0, %v10462_v62  ;;  %v4866_v33 = vrot.slane %v4864_v50, 4  ;;  %v4869_v0 = vrot.slane %v4867_v41, 5  ;;  %v4887_v55 = vshrl.u32 %v10359_v29, 16  ;;  %v2406_v22 = vadd.f32 %v14099_v27, %v13847_v9  ;;  %v14174_v8 = vpop.f32.mrf.mxu1 }
 0x177   : > { %v4862_v11 = vsel %vm12527_vm5, %v4857_v47, %v4861_v51  ;;  %v4875_v12 = vrot.slane %v4873_v45, 5  ;;  %v4879_v34 = vrot.slane %v4877_v52, 4  ;;  %v4885_v62 = vrot.slane %v4883_v60, 5  ;;  %v14176_v50 = vpop.f32.mrf.mxu0 }
 0x178   : > { %v10463_v23 = vcombine.low %v4852_v14, %v4862_v11  ;;  %v4870_v31 = vor.u32 %v4869_v0, %v4866_v33  ;;  %v4889_v36 = vrot.slane %v4887_v55, 4  ;;  %v14179_v4 = vadd.f32 %v14078_v16, %v2406_v22  ;;  %v14181_v52 = vpop.f32.mrf.mxu1  ;;  %v10362_v55 = vld [vmem:[%s12349_s28 + $0x140] sm:$0xf] }
 0x179   : > { %v4880_v41 = vor.u32 %v4879_v34, %v4875_v12  ;;  %v10398_v51 = vcombine.low %v10359_v29, %v10360_v54  ;;  %v4897_v47 = vshrl.u32 %v10360_v54, 16  ;;  %v4893_v14 = vshll.u32 %v10360_v54, 16  ;;  %v14184_v33 = vpop.f32.mrf.mxu0 }
 0x17a   : > { %17141 = vst [vmem:[#allocation50_spill] sm:$0xff] %v14179_v4  ;;  %11507 = vmatmul.mubr.msk.bf16.gmra.mxu0 %vm605_vm0, %v10463_v23  ;;  %v4871_v9 = vrot.slane %v4870_v31, 4  ;;  %v4890_v27 = vor.u32 %v4889_v36, %v4885_v62  ;;  %v4903_v45 = vshll.u32 %v10361_v44, 16  ;;  %v2404_v16 = vadd.f32 %v14108_v59, %v13856_v37  ;;  %v14192_v11 = vpop.f32.mrf.mxu1  ;;  %v10363_v23 = vld [vmem:[%s12349_s28 + $0x144] sm:$0xf] }
 0x17b   : > { %v4881_v0 = vrot.slane %v4880_v41, 4  ;;  %11445 = vmatmul.mubr.msk.bf16.gmra.mxu1 %vm605_vm0, %v10398_v51  ;;  %v4899_v60 = vrot.slane %v4897_v47, 4  ;;  %v2407_v29 = vadd.f32 %v14117_v17, %v13861_v53  ;;  %v4895_v22 = vrot.slane %v4893_v14, 5  ;;  %v14197_v31 = vpop.f32.mrf.mxu0  ;;  %v10364_v17 = vld [vmem:[%s12349_s28 + $0x148] sm:$0xf] }
 0x17c   : > { %v4876_v54 = vsel %vm12527_vm5, %v4871_v9, %v4875_v12  ;;  %v4891_v34 = vrot.slane %v4890_v27, 4  ;;  %v4905_v44 = vrot.slane %v4903_v45, 5  ;;  %v14202_v37 = vadd.f32 %v14095_v24, %v2404_v16  ;;  %v14210_v12 = vpop.f32.mrf.mxu1 }
 0x17d   : > { %v4886_v36 = vsel %vm12527_vm5, %v4881_v0, %v4885_v62  ;;  %v14205_v53 = vadd.f32 %v14104_v19, %v2407_v29  ;;  %v2405_v59 = vadd.f32 %v14124_v48, %v13871_v30  ;;  %v4900_v47 = vor.u32 %v4899_v60, %v4895_v22  ;;  %v14214_v27 = vpop.f32.mrf.mxu0 }
 0x17e   : > { %17142 = vst [vmem:[#allocation51_spill] sm:$0xff] %v14202_v37  ;;  %v10464_v41 = vcombine.low %v4876_v54, %v4886_v36  ;;  %v4896_v51 = vsel %vm12527_vm5, %v4891_v34, %v4895_v22  ;;  %v10399_v9 = vcombine.low %v10362_v55, %v10363_v23  ;;  %v4908_v19 = vshrl.u32 %v10362_v55, 16  ;;  %v14219_v45 = vpop.f32.mrf.mxu1  ;;  %v10365_v34 = vld [vmem:[%s12349_s28 + $0x14c] sm:$0xf] }
 0x17f   : > { %17143 = vst [vmem:[#allocation52_spill] sm:$0xff] %v14205_v53  ;;  %v14217_v24 = vadd.f32 %v14112_v61, %v2405_v59  ;;  %v4911_v62 = vshll.u32 %v10362_v55, 16  ;;  %v4921_v14 = vshrl.u32 %v10363_v23, 16  ;;  %v4901_v30 = vrot.slane %v4900_v47, 4  ;;  %v14223_v16 = vpop.f32.mrf.mxu0 }
 0x180   : > { %11510 = vmatprep.mubr.msk.bf16.mxu0 %vm605_vm0, %v10464_v41  ;;  %11448 = vmatprep.mubr.msk.bf16.mxu1 %vm605_vm0, %v10399_v9  ;;  %v4917_v48 = vshll.u32 %v10363_v23, 16  ;;  %v4927_v0 = vshll.u32 %v10364_v17, 16  ;;  %v4931_v60 = vshrl.u32 %v10364_v17, 16  ;;  %v4910_v29 = vrot.slane %v4908_v19, 4  ;;  %v14228_v22 = vpop.f32.mrf.mxu1  ;;  %v10366_v23 = vld [vmem:[%s12349_s28 + $0x150] sm:$0x1] }
 0x181   : > { %17144 = vst [vmem:[#allocation53_spill] sm:$0xff] %v14217_v24  ;;  %v4913_v61 = vrot.slane %v4911_v62, 5  ;;  %v4923_v54 = vrot.slane %v4921_v14, 4  ;;  %v2410_v55 = vadd.f32 %v14135_v28, %v13881_v46  ;;  %v4906_v36 = vsel %vm12527_vm5, %v4901_v30, %v4905_v44  ;;  %v14233_v9 = vpop.f32.mrf.mxu0 }
 0x182   : > { %v4919_v59 = vrot.slane %v4917_v48, 5  ;;  %v4929_v41 = vrot.slane %v4927_v0, 5  ;;  %v4933_v47 = vrot.slane %v4931_v60, 4  ;;  %v10465_v24 = vcombine.low %v4896_v51, %v4906_v36  ;;  %v14238_v14 = vpop.f32.mrf.mxu1  ;;  %v14271_v36 = vld [vmem:[%s12349_s28 + $0x28] sm:$0xf] }
 0x183   : > { %v4914_v53 = vor.u32 %v4913_v61, %v4910_v29  ;;  %v14236_v19 = vadd.f32 %v14122_v20, %v2410_v55  ;;  %v10400_v62 = vcombine.low %v10364_v17, %v10365_v34  ;;  %v4941_v37 = vshrl.u32 %v10365_v34, 16  ;;  %v14240_v44 = vpop.f32.mrf.mxu0 }
 0x184   : > { %v4924_v46 = vor.u32 %v4923_v54, %v4919_v59  ;;  %v4934_v28 = vor.u32 %v4933_v47, %v4929_v41  ;;  %v4937_v4 = vshll.u32 %v10365_v34, 16  ;;  %11511 = vmatmul.mubr.msk.bf16.gmra.mxu0 %vm605_vm0, %v10465_v24  ;;  %v4947_v51 = vshll.u32 %v10366_v23, 16  ;;  %v14248_v48 = vpop.f32.mrf.mxu1  ;;  %v11996_v47 = vld [vmem:[%s12349_s28 + $0x14] sm:$0xf]  ;;  %v11997_v23 = vld [vmem:[%s12349_s28 + $0x18] sm:$0xf] }
 0x185   : > { %v4915_v30 = vrot.slane %v4914_v53, 4  ;;  %11449 = vmatmul.mubr.msk.bf16.gmra.mxu1 %vm605_vm0, %v10400_v62  ;;  %v2408_v20 = vadd.f32 %v14155_v15, %v13890_v32  ;;  %v2411_v17 = vadd.f32 %v14162_v18, %v13898_v5  ;;  %v4943_v61 = vrot.slane %v4941_v37, 4  ;;  %v14250_v54 = vpop.f32.mrf.mxu0  ;;  %v14253_v53 = vld [vmem:[%s12349_s28 + $0x34] sm:$0xf] }
 0x186   : > { %v4925_v0 = vrot.slane %v4924_v46, 4  ;;  %v4935_v60 = vrot.slane %v4934_v28, 4  ;;  %v4939_v29 = vrot.slane %v4937_v4, 5  ;;  %v14264_v4 = vpop.f32.mrf.mxu1  ;;  %v4949_v55 = vrot.slane %v4947_v51, 5  ;;  %v11998_v46 = vld [vmem:[%s12349_s28 + $0x1c] sm:$0xf] }
 0x187   : > { %v4920_v32 = vsel %vm12527_vm5, %v4915_v30, %v4919_v59  ;;  %v14259_v5 = vadd.f32 %v14132_v7, %v2408_v20  ;;  %v14262_v15 = vadd.f32 %v14146_v13, %v2411_v17  ;;  %v2409_v34 = vadd.f32 %v14174_v8, %v13906_v42  ;;  %v14273_v59 = vpop.f32.mrf.mxu0  ;;  %v11999_v20 = vld [vmem:[%s12349_s28 + $0x20] sm:$0xf] }
 0x188   : > { %v4930_v18 = vsel %vm12527_vm5, %v4925_v0, %v4929_v41  ;;  %v4944_v37 = vor.u32 %v4943_v61, %v4939_v29  ;;  %v10501_v13 = vrot.slane %v11996_v47, 9  ;;  %v5651_v62 = vrot.slane %v11997_v23, 5  ;;  %v14279_v41 = vld [vmem:[%s12349_s28 + $0x2c] sm:$0xf]  ;;  %v14281_v30 = vpop.f32.mrf.mxu1  ;;  %v14292_v61 = vld [vmem:[%s12349_s28 + $0x38] sm:$0x1] }
 0x189   : > { %17145 = vst [vmem:[#allocation54_spill] sm:$0xff] %v14262_v15  ;;  %v10466_v7 = vcombine.low %v4920_v32, %v4930_v18  ;;  %v5654_v28 = vrot.slane %v11998_v46, 5  ;;  %v4940_v42 = vsel %vm12527_vm5, %v4935_v60, %v4939_v29  ;;  %v14286_v51 = vadd.f32 %v14157_v25, %v2409_v34  ;;  %v14289_v0 = vpop.f32.mrf.mxu0  ;;  %v14301_v25 = vld [vmem:[%s12349_s28 + $0x48] sm:$0xf]  ;;  %v17147_v32 = vld [vmem:[#allocation33_spill] sm:$0xff] }
 0x18a   : > { %v4945_v8 = vrot.slane %v4944_v37, 4  ;;  %v5657_v17 = vrot.slane %v11999_v20, 5  ;;  %v5652_v18 = vsel %vm12557_vm6, %v10501_v13, %v5651_v62  ;;  %v5653_v47 = vrot.slane %v5651_v62, 4  ;;  %v14298_v29 = vpop.f32.mrf.mxu1  ;;  %v17163_v15 = vld [vmem:[#allocation21_spill] sm:$0xff] }
 0x18b   : > { %17146 = vst [vmem:[#allocation55_spill] sm:$0xff] %v14286_v51  ;;  %11514 = vmatprep.mubr.msk.bf16.mxu0 %vm605_vm0, %v10466_v7  ;;  %v5656_v60 = vrot.slane %v5654_v28, 4  ;;  %v10668_v46 = vcombine.low %v14271_v36, %v14279_v41  ;;  %v14308_v7 = vpop.f32.mrf.mxu0  ;;  %v2414_v37 = vadd.f32 %v14181_v52, %v17147_v32  ;;  %v17148_v51 = vld [vmem:[#allocation32_spill] sm:$0xff] }
 0x18c   : > { %v4950_v34 = vsel %vm12527_vm5, %v4945_v8, %v4949_v55  ;;  %v5659_v23 = vrot.slane %v5657_v17, 4  ;;  %v5655_v13 = vsel %vm12557_vm6, %v5653_v47, %v5654_v28  ;;  %v14316_v24 = vpop.f32.mrf.mxu1  ;;  %v14319_v55 = vld [vmem:[%s12349_s28 + $0x4c] sm:$0x1]  ;;  %v17149_v2 = vrot.slane %v17148_v51, 5  ;;  %v17150_v47 = vld [vmem:[#allocation34_spill] sm:$0xff] }
 0x18d   : > { %v10467_v20 = vcombine.low %v4940_v42, %v4950_v34  ;;  %v5658_v62 = vsel %vm12557_vm6, %v5656_v60, %v5657_v17  ;;  %v10519_v28 = vcombine.low %v5652_v18, %v5655_v13  ;;  %v2412_v17 = vadd.f32 %v14192_v11, %v17150_v47  ;;  %v14328_v60 = vpop.f32.mrf.mxu0  ;;  %v10588_v51 = vld [vmem:[%s12349_s28 + $0x30] sm:$0xf]  ;;  %v17152_v34 = vld [vmem:[#allocation35_spill] sm:$0xff]  ;;  %v10589_v11 = vld [vmem:[%s12349_s28 + $0x34] sm:$0xf] }
 0x18e   : > { %v5661_v42 = vsel %vm12557_vm6, %v5659_v23, %v17149_v2  ;;  %v14332_v32 = vadd.f32 %v14167_v6, %v2414_v37  ;;  %v2415_v8 = vadd.f32 %v14210_v12, %v17152_v34  ;;  %v17153_v2 = vld [vmem:[#allocation6_spill] sm:$0xff]  ;;  %v14339_v23 = vpop.f32.mrf.mxu1  ;;  %v12003_v37 = vld [vmem:[%s12349_s28 + $0x28] sm:$0xf]  ;;  %v12004_v13 = vld [vmem:[%s12349_s28 + $0x2c] sm:$0xf] }
 0x18f   : > { %11515 = vmatmul.mubr.msk.bf16.gmra.mxu0 %vm605_vm0, %v10467_v20  ;;  %v10520_v52 = vcombine.low %v5658_v62, %v5661_v42  ;;  %v2413_v18 = vadd.f32 %v14219_v45, %v17153_v2  ;;  %11520 = vmatprep.mubr.msk.bf16.mxu1 %vm605_vm0, %v10519_v28  ;;  %v14345_v6 = vadd.f32 %v14176_v50, %v2412_v17  ;;  %v10502_v20 = vrot.slane %v12003_v37, 9  ;;  %v12005_v62 = vld [vmem:[%s12349_s28 + $0x30] sm:$0xf]  ;;  %v14350_v47 = vpop.f32.mrf.mxu0  ;;  %v14353_v45 = vld [vmem:[%s12349_s28 + $0x5c] sm:$0xf] }
 0x190   : > { %17151 = vst [vmem:[#allocation33_spill] sm:$0xff] %v14332_v32  ;;  %11586 = vmatprep.mubr.msk.bf16.mxu0 %vm605_vm0, %v10668_v46  ;;  %v5664_v12 = vrot.slane %v12004_v13, 5  ;;  %v5667_v42 = vrot.slane %v12005_v62, 5  ;;  %v14357_v34 = vld [vmem:[%s12349_s28 + $0x60] sm:$0x1]  ;;  %v14362_v50 = vadd.f32 %v14184_v33, %v2415_v8  ;;  %v14373_v13 = vpop.f32.mrf.mxu1  ;;  %v12008_v46 = vld [vmem:[%s16862_s1 + $0x38] sm:$0xff]   ;;  %v10669_v28 = vcombine.low %v10588_v51, %v10589_v11 }
 0x191   : > { %17154 = vst [vmem:[#allocation32_spill] sm:$0xff] %v14345_v6  ;;  %11521 = vmatmul.mubr.msk.bf16.vlgmr.msra.gmra.mxu1 %vm605_vm0, %v10520_v52  ;;  %v14365_v17 = vadd.f32 %v14197_v31, %v2413_v18  ;;  %v14368_v2 = vld [vmem:[%s12349_s28 + $0x3c] sm:$0xf]  ;;  %v14371_v37 = vld [vmem:[%s12349_s28 + $0x40] sm:$0xf]  ;;  %v14381_v52 = vpop.f32.mrf.mxu0  ;;  %v17160_v11 = vld [vmem:[#allocation8_spill] sm:$0xff] }
 0x192   : > { %17155 = vst [vmem:[#allocation34_spill] sm:$0xff] %v14362_v50  ;;  %11651 = vmatpush3.bf16.msra.mxu1 %v12008_v46  ;;  %v5665_v33 = vsel %vm12557_vm6, %v10502_v20, %v5664_v12  ;;  %v5666_v8 = vrot.slane %v5664_v12, 4  ;;  %v5669_v31 = vrot.slane %v5667_v42, 4  ;;  %v17158_v50 = vrot.slane %v14253_v53, 5  ;;  %v14388_v32 = vpop.f32.mrf.mxu1  ;;  %v14410_v53 = vld [vmem:[%s12349_s28 + $0x44] sm:$0xf] }
 0x193   : > { %17156 = vst [vmem:[#allocation35_spill] sm:$0xff] %v14365_v17  ;;  %v17157_v17 = vld [vmem:[#allocation9_spill] sm:$0xff]  ;;  %v10670_v12 = vcombine.low %v14368_v2, %v14371_v37 }
 0x194   : > { %v2418_v62 = vadd.f32 %v14228_v22, %v17157_v17  ;;  %v5672_v6 = vrot.slane %v17158_v50, 4  ;;  %v5668_v20 = vsel %vm12557_vm6, %v5666_v8, %v5667_v42  ;;  %v17159_v46 = vmov %v17158_v50  ;;  %v14400_v17 = vpop.f32.mrf.mxu0 }
 0x195   : > { %v5671_v51 = vsel %vm12557_vm6, %v5669_v31, %v17159_v46  ;;  %v2416_v22 = vadd.f32 %v14238_v14, %v17160_v11  ;;  %v10521_v50 = vcombine.low %v5665_v33, %v5668_v20  ;;  %v17162_v42 = vrot.slane %v14292_v61, 5  ;;  %v14414_v46 = vpop.f32.mrf.mxu1  ;;  %v14417_v33 = vld [vmem:[%s12349_s28 + $0x48] sm:$0xf]  ;;  %v17165_v61 = vld [vmem:[#allocation13_spill] sm:$0xff]  ;;  %v14426_v11 = vld [vmem:[%s12349_s28 + $0x50] sm:$0xf] }
 0x196   : > { %v14403_v18 = vadd.f32 %v14214_v27, %v2418_v62  ;;  %v2419_v31 = vadd.f32 %v14248_v48, %v17163_v15  ;;  %v2417_v62 = vadd.f32 %v14264_v4, %v17165_v61  ;;  %v14439_v4 = vld [vmem:[%s12349_s28 + $0x54] sm:$0xf] }
 0x197   : > { %v5674_v8 = vsel %vm12557_vm6, %v5672_v6, %v17162_v42  ;;  %v14420_v27 = vadd.f32 %v14223_v16, %v2416_v22  ;;  %v12009_v6 = vld [vmem:[%s12349_s28 + $0x3c] sm:$0xf]  ;;  %v14428_v42 = vpop.f32.mrf.mxu0  ;;  %11587 = vmatmul.mubr.msk.bf16.vlgmr.msra.gmra.mxu0 %vm605_vm0, %v10669_v28  ;;  %11524 = vmatprep.mubr.msk.bf16.mxu1 %vm605_vm0, %v10521_v50  ;;  %v12010_v16 = vld [vmem:[%s12349_s28 + $0x40] sm:$0xf]  ;;  %v12011_v22 = vld [vmem:[%s12349_s28 + $0x44] sm:$0xf]  ;;  %v14441_v61 = vpop.f32.mrf.mxu1  ;;  %v10671_v50 = vcombine.low %v14410_v53, %v14417_v33 }
 0x198   : > { %17161 = vst [vmem:[#allocation6_spill] sm:$0xff] %v14403_v18  ;;  %v10522_v14 = vcombine.low %v5671_v51, %v5674_v8  ;;  %v10503_v20 = vrot.slane %v12009_v6, 9  ;;  %v14434_v15 = vadd.f32 %v14233_v9, %v2419_v31  ;;  %v5677_v51 = vrot.slane %v12010_v16, 5  ;;  %v12012_v6 = vld [vmem:[%s16862_s1 + $0x40] sm:$0xff]   ;;  %11590 = vmatprep.mubr.msk.bf16.mxu0 %vm605_vm0, %v10670_v12  ;;  %v17170_v9 = vld [vmem:[#allocation7_spill] sm:$0xff] }
 0x199   : > { %17164 = vst [vmem:[#allocation9_spill] sm:$0xff] %v14420_v27  ;;  %v5680_v8 = vrot.slane %v12011_v22, 5  ;;  %11717 = vmatpush3.bf16.msra.mxu0 %v12012_v6  ;;  %v14451_v31 = vadd.f32 %v14240_v44, %v2417_v62  ;;  %v14453_v16 = vpop.f32.mrf.mxu0  ;;  %v14460_v28 = vpop.f32.mrf.mxu1  ;;  %v10672_v44 = vcombine.low %v14426_v11, %v14439_v4  ;;  %v17169_v62 = vrot.slane %v14301_v25, 5  ;;  %v17172_v27 = vld [vmem:[#allocation10_spill] sm:$0xff] }
 0x19a   : > { %17166 = vst [vmem:[#allocation8_spill] sm:$0xff] %v14434_v15  ;;  %11525 = vmatmul.mubr.msk.bf16.gmra.mxu1 %vm605_vm0, %v10522_v14  ;;  %v5678_v22 = vsel %vm12557_vm6, %v10503_v20, %v5677_v51  ;;  %v5679_v48 = vrot.slane %v5677_v51, 4  ;;  %v17168_v15 = vld [vmem:[#allocation11_spill] sm:$0xff]  ;;  %v2420_v20 = vadd.f32 %v14298_v29, %v17170_v9  ;;  %v17173_v9 = vrot.slane %v14319_v55, 5  ;;  %v12013_v55 = vld [vmem:[%s12349_s28 + $0x50] sm:$0xf] }
 0x19b   : > { %17167 = vst [vmem:[#allocation21_spill] sm:$0xff] %v14451_v31  ;;  %v5682_v6 = vrot.slane %v5680_v8, 4  ;;  %v2422_v12 = vadd.f32 %v14281_v30, %v17168_v15  ;;  %v5685_v14 = vrot.slane %v17169_v62, 4  ;;  %v14470_v51 = vpop.f32.mrf.mxu0  ;;  %v17171_v15 = vmov %v17169_v62  ;;  %v14483_v18 = vpop.f32.mrf.mxu1 }
 0x19c   : > { %v5681_v30 = vsel %vm12557_vm6, %v5679_v48, %v5680_v8  ;;  %v2423_v62 = vadd.f32 %v14316_v24, %v17172_v27  ;;  %v14490_v8 = vadd.f32 %v14273_v59, %v2420_v20  ;;  %v14500_v24 = vld [vmem:[%s12349_s28 + $0x5c] sm:$0xf] }
 0x19d   : > { %v14475_v53 = vadd.f32 %v14250_v54, %v2422_v12  ;;  %v5684_v31 = vsel %vm12557_vm6, %v5682_v6, %v17171_v15  ;;  %v10523_v29 = vcombine.low %v5678_v22, %v5681_v30  ;;  %v5687_v48 = vsel %vm12557_vm6, %v5685_v14, %v17173_v9  ;;  %v17175_v54 = vld [vmem:[#allocation12_spill] sm:$0xff]  ;;  %v14494_v12 = vpop.f32.mrf.mxu0  ;;  %v14497_v15 = vld [vmem:[%s12349_s28 + $0x58] sm:$0xf]  ;;  %v14507_v59 = vpop.f32.mrf.mxu1 }
 0x19e   : > { %17174 = vst [vmem:[#allocation13_spill] sm:$0xff] %v14490_v8  ;;  %v2421_v25 = vadd.f32 %v14339_v23, %v17175_v54  ;;  %v10524_v6 = vcombine.low %v5684_v31, %v5687_v48  ;;  %v14503_v27 = vadd.f32 %v14289_v0, %v2423_v62  ;;  %v10504_v22 = vrot.slane %v12013_v55, 9  ;;  %v12014_v14 = vld [vmem:[%s12349_s28 + $0x54] sm:$0xf]  ;;  %v12015_v9 = vld [vmem:[%s12349_s28 + $0x58] sm:$0xf] }
 0x19f   : > { %v5690_v30 = vrot.slane %v12014_v14, 5  ;;  %11528 = vmatprep.mubr.msk.bf16.mxu1 %vm605_vm0, %v10523_v29  ;;  %v5693_v48 = vrot.slane %v12015_v9, 5  ;;  %11591 = vmatmul.mubr.msk.bf16.gmra.mxu0 %vm605_vm0, %v10671_v50  ;;  %v14521_v29 = vpop.f32.mrf.mxu1  ;;  %v14523_v14 = vpop.f32.mrf.mxu0  ;;  %v17178_v50 = vld [vmem:[#allocation14_spill] sm:$0xff]  ;;  %v17179_v0 = vrot.slane %v14353_v45, 5 }
 0x1a0   : > { %17176 = vst [vmem:[#allocation11_spill] sm:$0xff] %v14503_v27  ;;  %v14513_v31 = vadd.f32 %v14308_v7, %v2421_v25  ;;  %11594 = vmatprep.mubr.msk.bf16.mxu0 %vm605_vm0, %v10672_v44  ;;  %v10673_v7 = vcombine.low %v14497_v15, %v14500_v24  ;;  %v2426_v9 = vadd.f32 %v14373_v13, %v17178_v50  ;;  %v14537_v23 = vld [vmem:[%s12349_s28 + $0x64] sm:$0xf]  ;;  %v14540_v44 = vld [vmem:[%s12349_s28 + $0x68] sm:$0xf] }
 0x1a1   : > { %v5691_v54 = vsel %vm12557_vm6, %v10504_v22, %v5690_v30  ;;  %v5692_v55 = vrot.slane %v5690_v30, 4  ;;  %v5695_v25 = vrot.slane %v5693_v48, 4  ;;  %v5698_v62 = vrot.slane %v17179_v0, 4  ;;  %17180 = vst [vmem:[#allocation10_spill] sm:$0xff] %v14537_v23  ;;  %17181 = vst [vmem:[#allocation12_spill] sm:$0xff] %v14540_v44  ;;  %v17182_v15 = vld [vmem:[#allocation15_spill] sm:$0xff]  ;;  %v14546_v50 = vpop.f32.mrf.mxu1 }
 0x1a2   : > { %17177 = vst [vmem:[#allocation7_spill] sm:$0xff] %v14513_v31  ;;  %11529 = vmatmul.mubr.msk.bf16.gmra.mxu1 %vm605_vm0, %v10524_v6  ;;  %v2424_v20 = vadd.f32 %v14388_v32, %v17182_v15  ;;  %v17183_v31 = vld [vmem:[#allocation16_spill] sm:$0xff]  ;;  %v14548_v6 = vpop.f32.mrf.mxu0  ;;  %v17186_v32 = vrot.slane %v14357_v34, 5  ;;  %v14562_v15 = vld [vmem:[%s12349_s28 + $0x6c] sm:$0xf]  ;;  %v10674_v34 = vcombine.low %v14537_v23, %v14540_v44 }
 0x1a3   : > { %v5694_v30 = vsel %vm12557_vm6, %v5692_v55, %v5693_v48  ;;  %v2427_v13 = vadd.f32 %v14414_v46, %v17183_v31  ;;  %v14551_v48 = vadd.f32 %v14328_v60, %v2426_v9  ;;  %v17185_v55 = vrot.slane %v14353_v45, 5  ;;  %v17189_v9 = vld [vmem:[#allocation17_spill] sm:$0xff] }
 0x1a4   : > { %v10525_v0 = vcombine.low %v5691_v54, %v5694_v30  ;;  %v5700_v46 = vsel %vm12557_vm6, %v5698_v62, %v17186_v32  ;;  %v14565_v54 = vadd.f32 %v14350_v47, %v2424_v20  ;;  %v2425_v45 = vadd.f32 %v14441_v61, %v17189_v9  ;;  %v14572_v30 = vpop.f32.mrf.mxu1  ;;  %v14580_v62 = vld [vmem:[%s12349_s28 + $0x70] sm:$0xf]  ;;  %v12017_v20 = vld [vmem:[%s12349_s28 + $0x68] sm:$0xf] }
 0x1a5   : > { %17184 = vst [vmem:[#allocation14_spill] sm:$0xff] %v14551_v48  ;;  %v5697_v22 = vsel %vm12557_vm6, %v5695_v25, %v17185_v55  ;;  %v14568_v60 = vadd.f32 %v14381_v52, %v2427_v13  ;;  %v14574_v25 = vpop.f32.mrf.mxu0  ;;  %17190 = vst [vmem:[#allocation17_spill] sm:$0xff] %v14580_v62  ;;  %v5703_v55 = vrot.slane %v12017_v20, 5  ;;  %v12018_v52 = vld [vmem:[%s12349_s28 + $0x6c] sm:$0xf] }
 0x1a6   : > { %v10526_v31 = vcombine.low %v5697_v22, %v5700_v46  ;;  %17187 = vst [vmem:[#allocation15_spill] sm:$0xff] %v14565_v54  ;;  %11532 = vmatprep.mubr.msk.bf16.mxu1 %vm605_vm0, %v10525_v0  ;;  %v12016_v22 = vld [vmem:[%s12349_s28 + $0x64] sm:$0xf]  ;;  %v5706_v13 = vrot.slane %v12018_v52, 5  ;;  %v14589_v0 = vadd.f32 %v14400_v17, %v2425_v45  ;;  %v14591_v9 = vpop.f32.mrf.mxu1  ;;  %v17192_v54 = vld [vmem:[#allocation19_spill] sm:$0xff]  ;;  %v10675_v17 = vcombine.low %v14562_v15, %v14580_v62 }
 0x1a7   : > { %17188 = vst [vmem:[#allocation16_spill] sm:$0xff] %v14568_v60  ;;  %v10505_v47 = vrot.slane %v12016_v22, 9  ;;  %v14593_v60 = vpop.f32.mrf.mxu0  ;;  %v5705_v20 = vrot.slane %v5703_v55, 4  ;;  %v2430_v61 = vadd.f32 %v14460_v28, %v17192_v54  ;;  %11595 = vmatmul.mubr.msk.bf16.gmra.mxu0 %vm605_vm0, %v10673_v7  ;;  %v12019_v46 = vld [vmem:[%s12349_s28 + $0x70] sm:$0xf]  ;;  %v17198_v45 = vld [vmem:[#allocation23_spill] sm:$0xff] }
 0x1a8   : > { %17191 = vst [vmem:[#allocation56_spill] sm:$0xff] %v14589_v0  ;;  %v5708_v52 = vrot.slane %v5706_v13, 4  ;;  %v5709_v32 = vrot.slane %v12019_v46, 5  ;;  %v12020_v0 = vld [vmem:[%s12349_s28 + $0x74] sm:$0x1]  ;;  %v2336_v44 = vpop.f32.mrf.mxu1  ;;  %11598 = vmatprep.mubr.msk.bf16.mxu0 %vm605_vm0, %v10674_v34  ;;  %v17197_v46 = vld [vmem:[#allocation22_spill] sm:$0xff]  ;;  %v2429_v62 = vadd.f32 %v14521_v29, %v17198_v45 }
 0x1a9   : > { %v5704_v22 = vsel %vm12557_vm6, %v10505_v47, %v5703_v55  ;;  %v5712_v48 = vrot.slane %v12020_v0, 5  ;;  %v5707_v47 = vsel %vm12557_vm6, %v5705_v20, %v5706_v13  ;;  %v14609_v28 = vld [vmem:[%s12349_s28 + $0x78] sm:$0xf]  ;;  %v14612_v7 = vld [vmem:[%s12349_s28 + $0x7c] sm:$0xf]  ;;  %v14615_v15 = vadd.f32 %v14428_v42, %v2430_v61  ;;  %v17196_v54 = vld [vmem:[#allocation20_spill] sm:$0xff] }
 0x1aa   : > { %17193 = vst [vmem:[#allocation19_spill] sm:$0xff] %v14609_v28  ;;  %17194 = vst [vmem:[#allocation57_spill] sm:$0xff] %v14612_v7  ;;  %v2428_v55 = vadd.f32 %v14483_v18, %v17196_v54  ;;  %v2431_v0 = vadd.f32 %v14507_v59, %v17197_v46  ;;  %11533 = vmatmul.mubr.msk.bf16.gmra.mxu1 %vm605_vm0, %v10526_v31  ;;  %v10527_v34 = vcombine.low %v5704_v22, %v5707_v47  ;;  %v14626_v23 = vpop.f32.mrf.mxu0  ;;  %v14629_v42 = vld [vmem:[%s12349_s28 + $0x80] sm:$0xf]  ;;  %v14632_v61 = vld [vmem:[%s12349_s28 + $0x84] sm:$0xf] }
 0x1ab   : > { %17195 = vst [vmem:[#allocation58_spill] sm:$0xff] %v14615_v15  ;;  %v5710_v13 = vsel %vm12557_vm6, %v5708_v52, %v5709_v32  ;;  %v5711_v20 = vrot.slane %v5709_v32, 4  ;;  %v12021_v31 = vld [vmem:[%s12349_s28 + $0x78] sm:$0xf]  ;;  %v12022_v52 = vld [vmem:[%s12349_s28 + $0x7c] sm:$0xf]  ;;  %v10676_v29 = vcombine.low %v14609_v28, %v14612_v7 }
 0x1ac   : > { %v14635_v18 = vadd.f32 %v14453_v16, %v2428_v55  ;;  %v14638_v59 = vadd.f32 %v14470_v51, %v2431_v0  ;;  %v10506_v22 = vrot.slane %v12021_v31, 9  ;;  %v5716_v47 = vrot.slane %v12022_v52, 5  ;;  %11536 = vmatprep.mubr.msk.bf16.mxu1 %vm605_vm0, %v10527_v34  ;;  %v12023_v45 = vld [vmem:[%s12349_s28 + $0x80] sm:$0xf]  ;;  %v11314_v54 = vpop.f32.mrf.mxu1  ;;  %v14651_v55 = vpop.f32.mrf.mxu0  ;;  %v14664_v52 = vld [vmem:[%s12349_s28 + $0x90] sm:$0xf] }
 0x1ad   : > { %v5713_v32 = vsel %vm12557_vm6, %v5711_v20, %v5712_v48  ;;  %v14648_v16 = vadd.f32 %v14494_v12, %v2429_v62  ;;  %v5719_v51 = vrot.slane %v12023_v45, 5  ;;  %v14661_v62 = vld [vmem:[%s12349_s28 + $0x8c] sm:$0xf]  ;;  %17202 = vst [vmem:[#allocation59_spill] sm:$0xff] %v14664_v52  ;;  %v17203_v45 = vld [vmem:[#allocation24_spill] sm:$0xff] }
 0x1ae   : > { %17199 = vst [vmem:[#allocation20_spill] sm:$0xff] %v14635_v18  ;;  %17200 = vst [vmem:[#allocation22_spill] sm:$0xff] %v14638_v59  ;;  %v5717_v34 = vsel %vm12557_vm6, %v10506_v22, %v5716_v47  ;;  %v5718_v31 = vrot.slane %v5716_v47, 4  ;;  %v10528_v20 = vcombine.low %v5710_v13, %v5713_v32  ;;  %v2434_v46 = vadd.f32 %v14546_v50, %v17203_v45  ;;  %v14668_v59 = vpop.f32.mrf.mxu0  ;;  %v12024_v48 = vld [vmem:[%s12349_s28 + $0x84] sm:$0xf]  ;;  %v17205_v45 = vld [vmem:[#allocation25_spill] sm:$0xff] }
 0x1af   : > { %17201 = vst [vmem:[#allocation23_spill] sm:$0xff] %v14648_v16  ;;  %v2349_v16 = vpop.f32.mrf.mxu1  ;;  %v5721_v47 = vrot.slane %v5719_v51, 4  ;;  %v5722_v13 = vrot.slane %v12024_v48, 5  ;;  %v12025_v32 = vld [vmem:[%s12349_s28 + $0x88] sm:$0x1]  ;;  %11599 = vmatmul.mubr.msk.bf16.gmra.mxu0 %vm605_vm0, %v10675_v17  ;;  %v2432_v15 = vadd.f32 %v14572_v30, %v17205_v45 }
 0x1b0   : > { %v5720_v22 = vsel %vm12557_vm6, %v5718_v31, %v5719_v51  ;;  %v5725_v0 = vrot.slane %v12025_v32, 5  ;;  %v14677_v50 = vadd.f32 %v14523_v14, %v2434_v46  ;;  %11602 = vmatprep.mubr.msk.bf16.mxu0 %vm605_vm0, %v10676_v29  ;;  %v10678_v31 = vcombine.low %v14661_v62, %v14664_v52  ;;  %v14685_v17 = vld [vmem:[%s12349_s28 + $0x94] sm:$0xf]  ;;  %v17206_v32 = vld [vmem:[#allocation26_spill] sm:$0xff]  ;;  %v3261_v14 = vpop.f32.mrf.mxu0  ;;  %v14692_v46 = vld [vmem:[%s12349_s28 + $0x98] sm:$0xf] }
 0x1b1   : > { %v10529_v18 = vcombine.low %v5717_v34, %v5720_v22  ;;  %v11315_v51 = vpop.f32.mrf.mxu1  ;;  %v5724_v48 = vrot.slane %v5722_v13, 4  ;;  %v2435_v34 = vadd.f32 %v14591_v9, %v17206_v32  ;;  %v17207_v22 = vld [vmem:[#allocation27_spill] sm:$0xff]  ;;  %v14695_v30 = vadd.f32 %v14548_v6, %v2432_v15  ;;  %v12028_v28 = vld [vmem:[%s12349_s28 + $0x94] sm:$0xf] }
 0x1b2   : > { %17204 = vst [vmem:[#allocation24_spill] sm:$0xff] %v14677_v50  ;;  %v2433_v12 = vadd.f32 %v2336_v44, %v17207_v22  ;;  %11537 = vmatmul.mubr.msk.bf16.gmra.mxu1 %vm605_vm0, %v10528_v20  ;;  %v12026_v29 = vld [vmem:[%s12349_s28 + $0x8c] sm:$0xf]  ;;  %v12027_v50 = vld [vmem:[%s12349_s28 + $0x90] sm:$0xf]  ;;  %v5732_v27 = vrot.slane %v12028_v28, 5  ;;  %v5723_v44 = vsel %vm12557_vm6, %v5721_v47, %v5722_v13 }
 0x1b3   : > { %17208 = vst [vmem:[#allocation25_spill] sm:$0xff] %v14695_v30  ;;  %v10507_v45 = vrot.slane %v12026_v29, 9  ;;  %v5729_v7 = vrot.slane %v12027_v50, 5  ;;  %v2352_v8 = vpop.f32.mrf.mxu1  ;;  %11540 = vmatprep.mubr.msk.bf16.mxu1 %vm605_vm0, %v10529_v18  ;;  %v5726_v9 = vsel %vm12557_vm6, %v5724_v48, %v5725_v0  ;;  %v14706_v6 = vadd.f32 %v14574_v25, %v2435_v34  ;;  %v14720_v13 = vld [vmem:[%s12349_s28 + $0xa0] sm:$0xf] }
 0x1b4   : > { %v14709_v15 = vadd.f32 %v14593_v60, %v2433_v12  ;;  %17211 = vst [vmem:[#allocation60_spill] sm:$0xff] %v14720_v13  ;;  %v14723_v60 = vld [vmem:[%s12349_s28 + $0xa4] sm:$0xf]  ;;  %v17213_v12 = vld [vmem:[#allocation28_spill] sm:$0xff]  ;;  %v10530_v34 = vcombine.low %v5723_v44, %v5726_v9  ;;  %v5734_v22 = vrot.slane %v5732_v27, 4  ;;  %v17216_v9 = vcombine.low %v14629_v42, %v14632_v61 }
 0x1b5   : > { %17209 = vst [vmem:[#allocation26_spill] sm:$0xff] %v14706_v6  ;;  %v5730_v18 = vsel %vm12557_vm6, %v10507_v45, %v5729_v7  ;;  %v5731_v50 = vrot.slane %v5729_v7, 4  ;;  %17212 = vst [vmem:[#allocation61_spill] sm:$0xff] %v14723_v60  ;;  %v2438_v48 = vadd.f32 %v11314_v54, %v17213_v12  ;;  %v11384_v32 = vpop.f32.mrf.mxu0  ;;  %v12029_v29 = vld [vmem:[%s12349_s28 + $0x98] sm:$0xf] }
 0x1b6   : > { %17210 = vst [vmem:[#allocation27_spill] sm:$0xff] %v14709_v15  ;;  %v5735_v45 = vrot.slane %v12029_v29, 5  ;;  %v11318_v47 = vpop.f32.mrf.mxu1  ;;  %v12030_v20 = vld [vmem:[%s12349_s28 + $0x9c] sm:$0x1]  ;;  %v12031_v42 = vld [vmem:[%s12349_s28 + $0xa0] sm:$0xf] }
 0x1b7   : > { %v5733_v7 = vsel %vm12557_vm6, %v5731_v50, %v5732_v27  ;;  %v14730_v25 = vadd.f32 %v14626_v23, %v2438_v48  ;;  %v5738_v0 = vrot.slane %v12030_v20, 5  ;;  %v17215_v54 = vld [vmem:[#allocation29_spill] sm:$0xff]  ;;  %v3274_v44 = vpop.f32.mrf.mxu0  ;;  %11603 = vmatmul.mubr.msk.bf16.gmra.mxu0 %vm605_vm0, %v17216_v9  ;;  %v10680_v27 = vcombine.low %v14720_v13, %v14723_v60  ;;  %v14741_v50 = vld [vmem:[%s12349_s28 + $0xa8] sm:$0xf]  ;;  %v17217_v23 = vld [vmem:[#allocation30_spill] sm:$0xff] }
 0x1b8   : > { %v10531_v28 = vcombine.low %v5730_v18, %v5733_v7  ;;  %v2436_v12 = vadd.f32 %v2349_v16, %v17215_v54  ;;  %v5737_v18 = vrot.slane %v5735_v45, 4  ;;  %v2439_v48 = vadd.f32 %v11315_v51, %v17217_v23  ;;  %v17218_v7 = vld [vmem:[#allocation31_spill] sm:$0xff]  ;;  %v2365_v20 = vpop.f32.mrf.mxu1  ;;  %11606 = vmatprep.mubr.msk.bf16.mxu0 %vm605_vm0, %v10678_v31 }
 0x1b9   : > { %17214 = vst [vmem:[#allocation28_spill] sm:$0xff] %v14730_v25  ;;  %v2437_v29 = vadd.f32 %v2352_v8, %v17218_v7  ;;  %v14747_v16 = vld [vmem:[%s12349_s28 + $0xac] sm:$0xf]  ;;  %v10508_v9 = vrot.slane %v12031_v42, 9  ;;  %v12032_v25 = vld [vmem:[%s12349_s28 + $0xa4] sm:$0xf]  ;;  %v11385_v52 = vpop.f32.mrf.mxu0 }
 0x1ba   : > { %v14750_v54 = vadd.f32 %v14651_v55, %v2436_v12  ;;  %v5742_v15 = vrot.slane %v12032_v25, 5  ;;  %v12033_v6 = vld [vmem:[%s12349_s28 + $0xa8] sm:$0xf]  ;;  %11541 = vmatmul.mubr.msk.bf16.gmra.mxu1 %vm605_vm0, %v10530_v34  ;;  %v14759_v31 = vadd.f32 %v14668_v59, %v2439_v48  ;;  %v11319_v12 = vpop.f32.mrf.mxu1  ;;  %v5739_v34 = vsel %vm12557_vm6, %v5737_v18, %v5738_v0  ;;  %v14770_v7 = vld [vmem:[%s12349_s28 + $0xb4] sm:$0xf] }
 0x1bb   : > { %v5745_v30 = vrot.slane %v12033_v6, 5  ;;  %v14761_v55 = vadd.f32 %v3261_v14, %v2437_v29  ;;  %11544 = vmatprep.mubr.msk.bf16.mxu1 %vm605_vm0, %v10531_v28  ;;  %v5736_v6 = vsel %vm12557_vm6, %v5734_v22, %v5735_v45  ;;  %v14773_v59 = vld [vmem:[%s12349_s28 + $0xb8] sm:$0xf]  ;;  %v17222_v29 = vld [vmem:[#allocation36_spill] sm:$0xff]  ;;  %v3277_v45 = vpop.f32.mrf.mxu0  ;;  %v12034_v25 = vld [vmem:[%s12349_s28 + $0xac] sm:$0xf] }
 0x1bc   : > { %17219 = vst [vmem:[#allocation29_spill] sm:$0xff] %v14750_v54  ;;  %17220 = vst [vmem:[#allocation30_spill] sm:$0xff] %v14759_v31  ;;  %v5744_v23 = vrot.slane %v5742_v15, 4  ;;  %v5743_v28 = vsel %vm12557_vm6, %v10508_v9, %v5742_v15  ;;  %v2442_v42 = vadd.f32 %v11318_v47, %v17222_v29  ;;  %v2368_v22 = vpop.f32.mrf.mxu1  ;;  %v5748_v51 = vrot.slane %v12034_v25, 5  ;;  %v12035_v8 = vld [vmem:[%s12349_s28 + $0xb0] sm:$0x1] }
 0x1bd   : > { %17221 = vst [vmem:[#allocation31_spill] sm:$0xff] %v14761_v55  ;;  %v5747_v18 = vrot.slane %v5745_v30, 4  ;;  %v5751_v14 = vrot.slane %v12035_v8, 5  ;;  %v10532_v48 = vcombine.low %v5736_v6, %v5739_v34  ;;  %v17224_v9 = vld [vmem:[#allocation37_spill] sm:$0xff]  ;;  %v17225_v54 = vld [vmem:[#allocation38_spill] sm:$0xff]  ;;  %v17226_v60 = vld [vmem:[#allocation39_spill] sm:$0xff]  ;;  %v17227_v8 = vcombine.low %v14685_v17, %v14692_v46 }
 0x1be   : > { %v5746_v0 = vsel %vm12557_vm6, %v5744_v23, %v5745_v30  ;;  %v14787_v47 = vadd.f32 %v11384_v32, %v2442_v42  ;;  %v2440_v29 = vadd.f32 %v2365_v20, %v17224_v9  ;;  %v11390_v55 = vpop.f32.mrf.mxu1  ;;  %v5750_v23 = vrot.slane %v5748_v51, 4  ;;  %v14791_v30 = vld [vmem:[%s12349_s28 + $0xbc] sm:$0xf]  ;;  %v14800_v6 = vld [vmem:[%s12349_s28 + $0xc0] sm:$0xf] }
 0x1bf   : > { %v10533_v31 = vcombine.low %v5743_v28, %v5746_v0  ;;  %v2443_v25 = vadd.f32 %v11319_v12, %v17225_v54  ;;  %v2441_v13 = vadd.f32 %v2368_v22, %v17226_v60  ;;  %11607 = vmatmul.mubr.msk.bf16.gmra.mxu0 %vm605_vm0, %v17227_v8  ;;  %17228 = vst [vmem:[#allocation37_spill] sm:$0xff] %v14800_v6  ;;  %v12036_v20 = vld [vmem:[%s12349_s28 + $0xb4] sm:$0xf]  ;;  %v12037_v28 = vld [vmem:[%s12349_s28 + $0xb8] sm:$0xf] }
 0x1c0   : > { %17223 = vst [vmem:[#allocation36_spill] sm:$0xff] %v14787_v47  ;;  %v14802_v32 = vadd.f32 %v3274_v44, %v2440_v29  ;;  %v10509_v34 = vrot.slane %v12036_v20, 9  ;;  %v5755_v42 = vrot.slane %v12037_v28, 5  ;;  %v12038_v0 = vld [vmem:[%s12349_s28 + $0xbc] sm:$0xf]  ;;  %v11456_v54 = vpop.f32.mrf.mxu0  ;;  %v3864_v12 = vpop.f32.mrf.mxu1  ;;  %11610 = vmatprep.mubr.msk.bf16.mxu0 %vm605_vm0, %v10680_v27  ;;  %v5749_v17 = vsel %vm12557_vm6, %v5747_v18, %v5748_v51 }
 0x1c1   : > { %v5758_v9 = vrot.slane %v12038_v0, 5  ;;  %v5752_v60 = vsel %vm12557_vm6, %v5750_v23, %v5751_v14  ;;  %v14812_v22 = vadd.f32 %v11385_v52, %v2443_v25  ;;  %v14814_v44 = vadd.f32 %v3277_v45, %v2441_v13  ;;  %v14817_v29 = vld [vmem:[%s12349_s28 + $0xc8] sm:$0xf]  ;;  %v14820_v8 = vld [vmem:[%s12349_s28 + $0xcc] sm:$0xf] }
 0x1c2   : > { %17229 = vst [vmem:[#allocation38_spill] sm:$0xff] %v14802_v32  ;;  %17232 = vst [vmem:[#allocation63_spill] sm:$0xff] %v14817_v29  ;;  %11545 = vmatmul.mubr.msk.bf16.gmra.mxu1 %vm605_vm0, %v10532_v48  ;;  %v5757_v18 = vrot.slane %v5755_v42, 4  ;;  %v5250_v28 = vpop.f32.mrf.mxu0  ;;  %v11391_v52 = vpop.f32.mrf.mxu1  ;;  %v5756_v48 = vsel %vm12557_vm6, %v10509_v34, %v5755_v42  ;;  %v4121_v45 = vadd.f32 %v11390_v55, %v13926_v39  ;;  %v12039_v51 = vld [vmem:[%s12349_s28 + $0xc0] sm:$0xf] }
 0x1c3   : > { %17230 = vst [vmem:[#allocation39_spill] sm:$0xff] %v14812_v22  ;;  %17231 = vst [vmem:[#allocation62_spill] sm:$0xff] %v14814_v44  ;;  %11548 = vmatprep.mubr.msk.bf16.mxu1 %vm605_vm0, %v10533_v31  ;;  %v10534_v23 = vcombine.low %v5749_v17, %v5752_v60  ;;  %v5761_v31 = vrot.slane %v12039_v51, 5  ;;  %v5760_v14 = vrot.slane %v5758_v9, 4  ;;  %v12040_v34 = vld [vmem:[%s12349_s28 + $0xc4] sm:$0x1]  ;;  %v4119_v55 = vadd.f32 %v3864_v12, %v13936_v26 }
 0x1c4   : > { %17233 = vst [vmem:[#allocation64_spill] sm:$0xff] %v14820_v8  ;;  %v5759_v25 = vsel %vm12557_vm6, %v5757_v18, %v5758_v9  ;;  %v11457_v27 = vpop.f32.mrf.mxu0  ;;  %v3867_v20 = vpop.f32.mrf.mxu1  ;;  %v14838_v13 = vadd.f32 %v11456_v54, %v4121_v45  ;;  %v5764_v39 = vrot.slane %v12040_v34, 5  ;;  %v14843_v60 = vld [vmem:[%s12349_s28 + $0xd0] sm:$0xf]  ;;  %v4122_v18 = vadd.f32 %v11391_v52, %v13943_v1  ;;  %v14848_v44 = vld [vmem:[%s12349_s28 + $0xd4] sm:$0xf] }
 0x1c5   : > { %v10535_v42 = vcombine.low %v5756_v48, %v5759_v25  ;;  %v5763_v17 = vrot.slane %v5761_v31, 4  ;;  %v4120_v51 = vadd.f32 %v3867_v20, %v13950_v38  ;;  %17235 = vst [vmem:[#allocation66_spill] sm:$0xff] %v14848_v44  ;;  %v14850_v9 = vadd.f32 %v5250_v28, %v4119_v55  ;;  %v12041_v54 = vld [vmem:[%s12349_s28 + $0xc8] sm:$0xf]  ;;  %v12042_v34 = vld [vmem:[%s12349_s28 + $0xcc] sm:$0xf] }
 0x1c6   : > { %17234 = vst [vmem:[#allocation65_spill] sm:$0xff] %v14838_v13  ;;  %v5253_v0 = vpop.f32.mrf.mxu0  ;;  %v11394_v15 = vpop.f32.mrf.mxu1  ;;  %v10510_v45 = vrot.slane %v12041_v54, 9  ;;  %v5768_v26 = vrot.slane %v12042_v34, 5  ;;  %v12043_v12 = vld [vmem:[%s12349_s28 + $0xd0] sm:$0xf]  ;;  %v17237_v25 = vcombine.low %v14741_v50, %v14747_v16  ;;  %v14861_v20 = vadd.f32 %v11457_v27, %v4122_v18 }
 0x1c7   : > { %17236 = vst [vmem:[#allocation67_spill] sm:$0xff] %v14850_v9  ;;  %v5771_v48 = vrot.slane %v12043_v12, 5  ;;  %v14863_v28 = vadd.f32 %v5253_v0, %v4120_v51  ;;  %v17240_v55 = vcombine.low %v14770_v7, %v14773_v59  ;;  %v5762_v50 = vsel %vm12557_vm6, %v5760_v14, %v5761_v31  ;;  %v14875_v18 = vld [vmem:[%s12349_s28 + $0xdc] sm:$0xf]  ;;  %v14878_v0 = vld [vmem:[%s12349_s28 + $0xe0] sm:$0xf] }
 0x1c8   : > { %11611 = vmatmul.mubr.msk.bf16.gmra.mxu0 %vm605_vm0, %v17237_v25  ;;  %17238 = vst [vmem:[#allocation68_spill] sm:$0xff] %v14861_v20  ;;  %v3880_v52 = vpop.f32.mrf.mxu1  ;;  %v5765_v34 = vsel %vm12557_vm6, %v5763_v17, %v5764_v39  ;;  %v5770_v27 = vrot.slane %v5768_v26, 4  ;;  %17241 = vst [vmem:[#allocation70_spill] sm:$0xff] %v14875_v18  ;;  %v11460_v51 = vpop.f32.mrf.mxu0  ;;  %v5769_v14 = vsel %vm12557_vm6, %v10510_v45, %v5768_v26  ;;  %v12045_v38 = vld [vmem:[%s12349_s28 + $0xd8] sm:$0x1] }
 0x1c9   : > { %17239 = vst [vmem:[#allocation69_spill] sm:$0xff] %v14863_v28  ;;  %11614 = vmatprep.mubr.msk.bf16.mxu0 %vm605_vm0, %v17240_v55  ;;  %17242 = vst [vmem:[#allocation71_spill] sm:$0xff] %v14878_v0  ;;  %v4125_v31 = vadd.f32 %v11394_v15, %v13955_v43  ;;  %v5773_v55 = vrot.slane %v5771_v48, 4  ;;  %v5777_v1 = vrot.slane %v12045_v38, 5  ;;  %v10536_v12 = vcombine.low %v5762_v50, %v5765_v34  ;;  %v14902_v38 = vld [vmem:[%s12349_s28 + $0xe8] sm:$0xf] }
 0x1ca   : > { %11549 = vmatmul.mubr.msk.bf16.gmra.mxu1 %vm605_vm0, %v10534_v23  ;;  %v11395_v39 = vpop.f32.mrf.mxu1  ;;  %v5772_v17 = vsel %vm12557_vm6, %v5770_v27, %v5771_v48  ;;  %v12044_v23 = vld [vmem:[%s12349_s28 + $0xd4] sm:$0xf]  ;;  %v5266_v25 = vpop.f32.mrf.mxu0  ;;  %v14899_v27 = vld [vmem:[%s12349_s28 + $0xe4] sm:$0xf]  ;;  %17244 = vst [vmem:[#allocation73_spill] sm:$0xff] %v14902_v38  ;;  %v17246_v28 = vld [vmem:[#allocation41_spill] sm:$0xff] }
 0x1cb   : > { %11552 = vmatprep.mubr.msk.bf16.mxu1 %vm605_vm0, %v10535_v42  ;;  %v5774_v54 = vrot.slane %v12044_v23, 5  ;;  %v14894_v15 = vadd.f32 %v11460_v51, %v4125_v31  ;;  %v4123_v42 = vadd.f32 %v3880_v52, %v13963_v63  ;;  %v17245_v23 = vld [vmem:[#allocation40_spill] sm:$0xff]  ;;  %v10537_v51 = vcombine.low %v5769_v14, %v5772_v17  ;;  %v12047_v52 = vld [vmem:[%s12349_s28 + $0xe0] sm:$0xf]  ;;  %v12048_v14 = vld [vmem:[%s12349_s28 + $0xe4] sm:$0xf] }
 0x1cc   : > { %v3883_v45 = vpop.f32.mrf.mxu1  ;;  %v4126_v50 = vadd.f32 %v11395_v39, %v17245_v23  ;;  %v11461_v34 = vpop.f32.mrf.mxu0  ;;  %v5781_v20 = vrot.slane %v12047_v52, 5  ;;  %v14911_v9 = vld [vmem:[%s12349_s28 + $0xf0] sm:$0xf]  ;;  %v14914_v26 = vld [vmem:[%s12349_s28 + $0xf4] sm:$0xf]  ;;  %v5784_v17 = vrot.slane %v12048_v14, 5 }
 0x1cd   : > { %17243 = vst [vmem:[#allocation72_spill] sm:$0xff] %v14894_v15  ;;  %v5776_v48 = vrot.slane %v5774_v54, 4  ;;  %v4124_v43 = vadd.f32 %v3883_v45, %v17246_v28  ;;  %v14906_v31 = vadd.f32 %v5266_v25, %v4123_v42  ;;  %v12046_v15 = vld [vmem:[%s12349_s28 + $0xdc] sm:$0xf]  ;;  %17248 = vst [vmem:[#allocation41_spill] sm:$0xff] %v14911_v9  ;;  %v14918_v22 = vsel %vm12557_vm6, %v5773_v55, %v5774_v54 }
 0x1ce   : > { %v10511_v63 = vrot.slane %v12046_v15, 9  ;;  %17249 = vst [vmem:[#allocation74_spill] sm:$0xff] %v14914_v26  ;;  %v11398_v13 = vpop.f32.mrf.mxu1  ;;  %v14924_v28 = vadd.f32 %v11461_v34, %v4126_v50  ;;  %v5269_v25 = vpop.f32.mrf.mxu0  ;;  %v17251_v15 = vcombine.low %v14791_v30, %v14800_v6  ;;  %v5783_v45 = vrot.slane %v5781_v20, 4  ;;  %v12050_v54 = vld [vmem:[%s12349_s28 + $0xec] sm:$0x1] }
 0x1cf   : > { %17247 = vst [vmem:[#allocation40_spill] sm:$0xff] %v14906_v31  ;;  %v14922_v39 = vsel %vm12557_vm6, %v5776_v48, %v5777_v1  ;;  %v14933_v55 = vadd.f32 %v5269_v25, %v4124_v43  ;;  %v17253_v48 = vcombine.low %v14817_v29, %v14820_v8  ;;  %v4129_v43 = vadd.f32 %v11398_v13, %v13984_v40  ;;  %v17257_v50 = vld [vmem:[#allocation43_spill] sm:$0xff]  ;;  %v12053_v8 = vld [vmem:[%s12349_s28 + $0xf0] sm:$0xf] }
 0x1d0   : > { %17250 = vst [vmem:[#allocation75_spill] sm:$0xff] %v14924_v28  ;;  %11615 = vmatmul.mubr.msk.bf16.gmra.mxu0 %vm605_vm0, %v17251_v15  ;;  %v3896_v1 = vpop.f32.mrf.mxu1  ;;  %v10538_v34 = vcombine.low %v14918_v22, %v14922_v39  ;;  %v5782_v52 = vsel %vm12557_vm6, %v10511_v63, %v5781_v20  ;;  %v12049_v15 = vld [vmem:[%s12349_s28 + $0xe8] sm:$0xf]  ;;  %v5785_v40 = vsel %vm12557_vm6, %v5783_v45, %v5784_v17  ;;  %v5786_v13 = vrot.slane %v5784_v17, 4  ;;  %v14958_v22 = vld [vmem:[%s12349_s28 + $0xf8] sm:$0xf] }
 0x1d1   : > { %17252 = vst [vmem:[#allocation76_spill] sm:$0xff] %v14933_v55  ;;  %11618 = vmatprep.mubr.msk.bf16.mxu0 %vm605_vm0, %v17253_v48  ;;  %v11464_v14 = vpop.f32.mrf.mxu0  ;;  %v5787_v48 = vrot.slane %v12049_v15, 5  ;;  %v14961_v39 = vld [vmem:[%s12349_s28 + $0xfc] sm:$0xf]  ;;  %v17256_v20 = vld [vmem:[#allocation42_spill] sm:$0xff]  ;;  %v10512_v29 = vrot.slane %v12053_v8, 9 }
 0x1d2   : > { %11553 = vmatmul.mubr.msk.bf16.gmra.mxu1 %vm605_vm0, %v10536_v12  ;;  %v11399_v30 = vpop.f32.mrf.mxu1  ;;  %v14955_v12 = vadd.f32 %v11464_v14, %v4129_v43  ;;  %17255 = vst [vmem:[#allocation78_spill] sm:$0xff] %v14961_v39  ;;  %v4127_v63 = vadd.f32 %v3896_v1, %v17256_v20  ;;  %v17259_v14 = vld [vmem:[#allocation44_spill] sm:$0xff]  ;;  %v12052_v28 = vld [vmem:[%s12349_s28 + $0xf8] sm:$0xf]  ;;  %v10539_v20 = vcombine.low %v5782_v52, %v5785_v40  ;;  %v12079_v6 = vld [vmem:[%s12349_s28 + $0x28] sm:$0xf] }
 0x1d3   : > { %11556 = vmatprep.mubr.msk.bf16.mxu1 %vm605_vm0, %v10537_v51  ;;  %v5789_v15 = vrot.slane %v5787_v48, 4  ;;  %v5790_v51 = vrot.slane %v12050_v54, 5  ;;  %v5282_v42 = vpop.f32.mrf.mxu0  ;;  %v4130_v17 = vadd.f32 %v11399_v30, %v17257_v50  ;;  %v12051_v55 = vld [vmem:[%s12349_s28 + $0xf4] sm:$0xf]  ;;  %v5797_v1 = vrot.slane %v12052_v28, 5 }
 0x1d4   : > { %17254 = vst [vmem:[#allocation77_spill] sm:$0xff] %v14955_v12  ;;  %v3899_v45 = vpop.f32.mrf.mxu1  ;;  %v14967_v43 = vadd.f32 %v5282_v42, %v4127_v63  ;;  %v5794_v12 = vrot.slane %v12051_v55, 5  ;;  %v14977_v30 = vld [vmem:[%s12349_s28 + $0x104] sm:$0xf]  ;;  %v14980_v42 = vld [vmem:[%s12349_s28 + $0x108] sm:$0xf]  ;;  %v14984_v55 = vsel %vm12557_vm6, %v5786_v13, %v5787_v48  ;;  %v17263_v63 = vcombine.low %v14843_v60, %v14848_v44 }
 0x1d5   : > { %v4128_v23 = vadd.f32 %v3899_v45, %v17259_v14  ;;  %v11465_v31 = vpop.f32.mrf.mxu0  ;;  %17260 = vst [vmem:[#allocation43_spill] sm:$0xff] %v14977_v30  ;;  %17261 = vst [vmem:[#allocation44_spill] sm:$0xff] %v14980_v42  ;;  %v14995_v8 = vsel %vm12557_vm6, %v5789_v15, %v5790_v51  ;;  %v5799_v14 = vrot.slane %v5797_v1, 4  ;;  %v12054_v13 = vld [vmem:[%s12349_s28 + $0xfc] sm:$0xf]  ;;  %v17304_v44 = vshrl.u32 %v14279_v41, 16 }
 0x1d6   : > { %17258 = vst [vmem:[#allocation42_spill] sm:$0xff] %v14967_v43  ;;  %v11402_v50 = vpop.f32.mrf.mxu1  ;;  %v14987_v52 = vadd.f32 %v11465_v31, %v4130_v17  ;;  %v5796_v40 = vrot.slane %v5794_v12, 4  ;;  %v5800_v25 = vrot.slane %v12054_v13, 5  ;;  %v17264_v31 = vcombine.low %v14875_v18, %v14878_v0  ;;  %v12055_v17 = vld [vmem:[%s12349_s28 + $0x100] sm:$0x1] }
 0x1d7   : > { %v5285_v45 = vpop.f32.mrf.mxu0  ;;  %v4133_v48 = vadd.f32 %v11402_v50, %v14022_v57  ;;  %v5803_v57 = vrot.slane %v12055_v17, 5  ;;  %v15012_v50 = vsel %vm12557_vm6, %v10512_v29, %v5794_v12  ;;  %v15025_v29 = vld [vmem:[%s12349_s28 + $0x10c] sm:$0xf]  ;;  %v15028_v12 = vld [vmem:[%s12349_s28 + $0x110] sm:$0xf]  ;;  %v10800_v47 = vrot.slane %v12079_v6, 9 }
 0x1d8   : > { %17262 = vst [vmem:[#allocation79_spill] sm:$0xff] %v14987_v52  ;;  %11619 = vmatmul.mubr.msk.bf16.gmra.mxu0 %vm605_vm0, %v17263_v63  ;;  %v3912_v54 = vpop.f32.mrf.mxu1  ;;  %v15003_v60 = vadd.f32 %v5285_v45, %v4128_v23  ;;  %v15016_v63 = vsel %vm12557_vm6, %v5796_v40, %v5797_v1  ;;  %v5802_v45 = vrot.slane %v5800_v25, 4  ;;  %17266 = vst [vmem:[#allocation81_spill] sm:$0xff] %v15028_v12  ;;  %v12056_v17 = vld [vmem:[%s12349_s28 + $0x108] sm:$0xf] }
 0x1d9   : > { %11622 = vmatprep.mubr.msk.bf16.mxu0 %vm605_vm0, %v17264_v31  ;;  %v4131_v1 = vadd.f32 %v3912_v54, %v14036_v21  ;;  %v5807_v23 = vrot.slane %v12056_v17, 5  ;;  %v12057_v15 = vld [vmem:[%s12349_s28 + $0x104] sm:$0xf]  ;;  %v15042_v52 = vld [vmem:[%s12349_s28 + $0x118] sm:$0xf]  ;;  %v10540_v21 = vcombine.low %v14984_v55, %v14995_v8 }
 0x1da   : > { %17265 = vst [vmem:[#allocation80_spill] sm:$0xff] %v15003_v60  ;;  %11557 = vmatmul.mubr.msk.bf16.gmra.mxu1 %vm605_vm0, %v10538_v34  ;;  %v11403_v13 = vpop.f32.mrf.mxu1  ;;  %v11468_v31 = vpop.f32.mrf.mxu0  ;;  %v15022_v34 = vsel %vm12557_vm6, %v5799_v14, %v5800_v25  ;;  %v10513_v25 = vrot.slane %v12057_v15, 9  ;;  %v12058_v14 = vld [vmem:[%s12349_s28 + $0x10c] sm:$0xf]  ;;  %17268 = vst [vmem:[#allocation83_spill] sm:$0xff] %v15042_v52 }
 0x1db   : > { %11560 = vmatprep.mubr.msk.bf16.mxu1 %vm605_vm0, %v10539_v20  ;;  %v4134_v40 = vadd.f32 %v11403_v13, %v14039_v35  ;;  %v15033_v51 = vadd.f32 %v11468_v31, %v4133_v48  ;;  %v15037_v20 = vsel %vm12557_vm6, %v5802_v45, %v5803_v57  ;;  %v5810_v60 = vrot.slane %v12058_v14, 5  ;;  %v15045_v43 = vld [vmem:[%s12349_s28 + $0x11c] sm:$0xf]  ;;  %v15092_v15 = vld [vmem:[%s12349_s28 + $0x12c] sm:$0xf] }
 0x1dc   : > { %v3915_v28 = vpop.f32.mrf.mxu1  ;;  %17269 = vst [vmem:[#allocation84_spill] sm:$0xff] %v15045_v43  ;;  %v5298_v54 = vpop.f32.mrf.mxu0  ;;  %v17270_v48 = vld [vmem:[#allocation45_spill] sm:$0xff]  ;;  %v5809_v57 = vrot.slane %v5807_v23, 4  ;;  %v10541_v45 = vcombine.low %v15012_v50, %v15016_v63  ;;  %v12059_v63 = vld [vmem:[%s12349_s28 + $0x110] sm:$0xf]  ;;  %v17272_v35 = vcombine.low %v14899_v27, %v14902_v38 }
 0x1dd   : > { %17267 = vst [vmem:[#allocation82_spill] sm:$0xff] %v15033_v51  ;;  %v4132_v13 = vadd.f32 %v3915_v28, %v17270_v48  ;;  %v15056_v17 = vadd.f32 %v5298_v54, %v4131_v1  ;;  %v5813_v48 = vrot.slane %v12059_v63, 5  ;;  %v15072_v54 = vsel %vm12557_vm6, %v10513_v25, %v5807_v23  ;;  %v15082_v63 = vld [vmem:[%s12349_s28 + $0x124] sm:$0xf]  ;;  %v15101_v0 = vld [vmem:[%s12349_s28 + $0x130] sm:$0xf] }
 0x1de   : > { %v11406_v14 = vpop.f32.mrf.mxu1  ;;  %v11469_v8 = vpop.f32.mrf.mxu0  ;;  %v15076_v31 = vsel %vm12557_vm6, %v5809_v57, %v5810_v60  ;;  %17274 = vst [vmem:[#allocation86_spill] sm:$0xff] %v15082_v63  ;;  %v12060_v57 = vld [vmem:[%s12349_s28 + $0x114] sm:$0x1]  ;;  %17279 = vst [vmem:[#allocation88_spill] sm:$0xff] %v15101_v0  ;;  %v12064_v25 = vld [vmem:[%s12349_s28 + $0x124] sm:$0xf] }
 0x1df   : > { %17271 = vst [vmem:[#allocation45_spill] sm:$0xff] %v15056_v17  ;;  %v4137_v50 = vadd.f32 %v11406_v14, %v14067_v10  ;;  %v15068_v1 = vadd.f32 %v11469_v8, %v4134_v40  ;;  %v5812_v10 = vrot.slane %v5810_v60, 4  ;;  %v15079_v14 = vld [vmem:[%s12349_s28 + $0x120] sm:$0xf]  ;;  %v17275_v40 = vcombine.low %v14911_v9, %v14914_v26  ;;  %v12061_v17 = vld [vmem:[%s12349_s28 + $0x118] sm:$0xf] }
 0x1e0   : > { %11623 = vmatmul.mubr.msk.bf16.gmra.mxu0 %vm605_vm0, %v17272_v35  ;;  %v3928_v27 = vpop.f32.mrf.mxu1  ;;  %v5301_v23 = vpop.f32.mrf.mxu0  ;;  %v5815_v35 = vrot.slane %v5813_v48, 4  ;;  %v5816_v8 = vrot.slane %v12060_v57, 5  ;;  %v17276_v60 = vld [vmem:[#allocation46_spill] sm:$0xff]  ;;  %v10514_v51 = vrot.slane %v12061_v17, 9  ;;  %v12062_v26 = vld [vmem:[%s12349_s28 + $0x11c] sm:$0xf] }
 0x1e1   : > { %17273 = vst [vmem:[#allocation85_spill] sm:$0xff] %v15068_v1  ;;  %11626 = vmatprep.mubr.msk.bf16.mxu0 %vm605_vm0, %v17275_v40  ;;  %v4135_v28 = vadd.f32 %v3928_v27, %v17276_v60  ;;  %17277 = vst [vmem:[#allocation46_spill] sm:$0xff] %v15092_v15  ;;  %v15095_v55 = vadd.f32 %v5301_v23, %v4132_v13  ;;  %v5820_v40 = vrot.slane %v12062_v26, 5  ;;  %v12063_v9 = vld [vmem:[%s12349_s28 + $0x120] sm:$0xf]  ;;  %v17280_v13 = vld [vmem:[#allocation47_spill] sm:$0xff] }
 0x1e2   : > { %11561 = vmatmul.mubr.msk.bf16.gmra.mxu1 %vm605_vm0, %v10540_v21  ;;  %v11407_v1 = vpop.f32.mrf.mxu1  ;;  %v5823_v38 = vrot.slane %v12063_v9, 5  ;;  %v10543_v27 = vcombine.low %v15072_v54, %v15076_v31  ;;  %v15111_v26 = vsel %vm12557_vm6, %v5812_v10, %v5813_v48  ;;  %v12065_v48 = vld [vmem:[%s12349_s28 + $0x128] sm:$0x1]  ;;  %v12076_v18 = vld [vmem:[%s12349_s28 + $0x2c] sm:$0xf] }
 0x1e3   : > { %17278 = vst [vmem:[#allocation87_spill] sm:$0xff] %v15095_v55  ;;  %11564 = vmatprep.mubr.msk.bf16.mxu1 %vm605_vm0, %v10541_v45  ;;  %v4138_v23 = vadd.f32 %v11407_v1, %v17280_v13  ;;  %v11472_v60 = vpop.f32.mrf.mxu0  ;;  %v5822_v31 = vrot.slane %v5820_v40, 4  ;;  %v15120_v1 = vsel %vm12557_vm6, %v5815_v35, %v5816_v8  ;;  %v17282_v13 = vld [vmem:[#allocation48_spill] sm:$0xff]  ;;  %v15127_v45 = vsel %vm12557_vm6, %v10514_v51, %v5820_v40  ;;  %v15143_v40 = vld [vmem:[%s12349_s28 + $0x138] sm:$0xf] }
 0x1e4   : > { %v3931_v17 = vpop.f32.mrf.mxu1  ;;  %v15116_v54 = vadd.f32 %v11472_v60, %v4137_v50  ;;  %v5825_v57 = vrot.slane %v5823_v38, 4  ;;  %v5826_v35 = vrot.slane %v12064_v25, 5  ;;  %v5829_v9 = vrot.slane %v12065_v48, 5  ;;  %v15140_v51 = vld [vmem:[%s12349_s28 + $0x134] sm:$0xf] }
 0x1e5   : > { %v4136_v21 = vadd.f32 %v3931_v17, %v17282_v13  ;;  %v5314_v10 = vpop.f32.mrf.mxu0  ;;  %v15135_v17 = vsel %vm12557_vm6, %v5822_v31, %v5823_v38  ;;  %v17284_v50 = vcombine.low %v14958_v22, %v14961_v39  ;;  %v17285_v55 = vcombine.low %v14977_v30, %v14980_v42  ;;  %v15220_v30 = vld [vmem:[%s12349_s28 + $0x154] sm:$0xf] }
 0x1e6   : > { %17281 = vst [vmem:[#allocation47_spill] sm:$0xff] %v15116_v54  ;;  %v11410_v60 = vpop.f32.mrf.mxu1  ;;  %v15131_v8 = vadd.f32 %v5314_v10, %v4135_v28  ;;  %v5828_v38 = vrot.slane %v5826_v35, 4  ;;  %v12066_v10 = vld [vmem:[%s12349_s28 + $0x12c] sm:$0xf]  ;;  %v12068_v28 = vld [vmem:[%s12349_s28 + $0x134] sm:$0xf]  ;;  %v10545_v42 = vcombine.low %v15127_v45, %v15135_v17  ;;  %v17314_v6 = vcombine.low %v15140_v51, %v15143_v40 }
 0x1e7   : > { %v4141_v13 = vadd.f32 %v11410_v60, %v14120_v3  ;;  %v11473_v25 = vpop.f32.mrf.mxu0  ;;  %v10515_v3 = vrot.slane %v12066_v10, 9  ;;  %v12067_v60 = vld [vmem:[%s12349_s28 + $0x130] sm:$0xf]  ;;  %v5836_v54 = vrot.slane %v12068_v28, 5  ;;  %v17287_v10 = vcombine.low %v15022_v34, %v15037_v20  ;;  %v15184_v17 = vld [vmem:[%s12349_s28 + $0x140] sm:$0xf] }
 0x1e8   : > { %17283 = vst [vmem:[#allocation48_spill] sm:$0xff] %v15131_v8  ;;  %11627 = vmatmul.mubr.msk.bf16.gmra.mxu0 %vm605_vm0, %v17284_v50  ;;  %v3944_v31 = vpop.f32.mrf.mxu1  ;;  %v5833_v48 = vrot.slane %v12067_v60, 5  ;;  %v15157_v8 = vadd.f32 %v11473_v25, %v4138_v23  ;;  %v15176_v34 = vsel %vm12557_vm6, %v5825_v57, %v5826_v35  ;;  %v15180_v20 = vsel %vm12557_vm6, %v5828_v38, %v5829_v9  ;;  %v12069_v35 = vld [vmem:[%s12349_s28 + $0x138] sm:$0xf] }
 0x1e9   : > { %11630 = vmatprep.mubr.msk.bf16.mxu0 %vm605_vm0, %v17285_v55  ;;  %v4139_v50 = vadd.f32 %v3944_v31, %v14140_v56  ;;  %v5317_v60 = vpop.f32.mrf.mxu0  ;;  %v15187_v31 = vld [vmem:[%s12349_s28 + $0x144] sm:$0xf]  ;;  %v5838_v57 = vrot.slane %v5836_v54, 4  ;;  %v5839_v9 = vrot.slane %v12069_v35, 5  ;;  %v17293_v35 = vcombine.low %v15025_v29, %v15028_v12 }
 0x1ea   : > { %17286 = vst [vmem:[#allocation89_spill] sm:$0xff] %v15157_v8  ;;  %11565 = vmatmul.mubr.msk.bf16.gmra.mxu1 %vm605_vm0, %v17287_v10  ;;  %v11411_v25 = vpop.f32.mrf.mxu1  ;;  %v5835_v56 = vrot.slane %v5833_v48, 4  ;;  %v15172_v28 = vadd.f32 %v5317_v60, %v4136_v21  ;;  %v15192_v60 = vsel %vm12557_vm6, %v10515_v3, %v5833_v48  ;;  %v12072_v3 = vld [vmem:[%s12349_s28 + $0x144] sm:$0xf] }
 0x1eb   : > { %11568 = vmatprep.mubr.msk.bf16.mxu1 %vm605_vm0, %v10543_v27  ;;  %v4142_v45 = vadd.f32 %v11411_v25, %v14143_v49  ;;  %v11476_v10 = vpop.f32.mrf.mxu0  ;;  %v17290_v49 = vld [vmem:[#allocation49_spill] sm:$0xff]  ;;  %v5846_v8 = vrot.slane %v12072_v3, 5 }
 0x1ec   : > { %17288 = vst [vmem:[#allocation90_spill] sm:$0xff] %v15172_v28  ;;  %v3947_v21 = vpop.f32.mrf.mxu1  ;;  %v15195_v38 = vadd.f32 %v11476_v10, %v4141_v13  ;;  %v15200_v55 = vsel %vm12557_vm6, %v5835_v56, %v5836_v54  ;;  %v12070_v27 = vld [vmem:[%s12349_s28 + $0x13c] sm:$0x1]  ;;  %v15212_v54 = vld [vmem:[%s12349_s28 + $0x14c] sm:$0xf] }
 0x1ed   : > { %v4140_v25 = vadd.f32 %v3947_v21, %v17290_v49  ;;  %v5842_v22 = vrot.slane %v12070_v27, 5  ;;  %v5330_v48 = vpop.f32.mrf.mxu0  ;;  %v5841_v21 = vrot.slane %v5839_v9, 4  ;;  %v15209_v49 = vld [vmem:[%s12349_s28 + $0x148] sm:$0xf]  ;;  %v17292_v27 = vld [vmem:[#allocation50_spill] sm:$0xff] }
 0x1ee   : > { %17289 = vst [vmem:[#allocation91_spill] sm:$0xff] %v15195_v38  ;;  %v11414_v10 = vpop.f32.mrf.mxu1  ;;  %v15214_v56 = vadd.f32 %v5330_v48, %v4139_v50  ;;  %v12071_v38 = vld [vmem:[%s12349_s28 + $0x140] sm:$0xf]  ;;  %v15223_v13 = vld [vmem:[%s12349_s28 + $0x158] sm:$0xf] }
 0x1ef   : > { %v4145_v23 = vadd.f32 %v11414_v10, %v17292_v27  ;;  %v10516_v28 = vrot.slane %v12071_v38, 9  ;;  %v11477_v39 = vpop.f32.mrf.mxu0  ;;  %v15234_v38 = vsel %vm12557_vm6, %v5838_v57, %v5839_v9  ;;  %v12073_v10 = vld [vmem:[%s12349_s28 + $0x148] sm:$0xf]  ;;  %v15251_v50 = vld [vmem:[%s12349_s28 + $0x15c] sm:$0xf] }
 0x1f0   : > { %17291 = vst [vmem:[#allocation49_spill] sm:$0xff] %v15214_v56  ;;  %11631 = vmatmul.mubr.msk.bf16.gmra.mxu0 %vm605_vm0, %v17293_v35  ;;  %v3960_v3 = vpop.f32.mrf.mxu1  ;;  %v5849_v27 = vrot.slane %v12073_v10, 5  ;;  %v17294_v56 = vcombine.low %v15042_v52, %v15045_v43  ;;  %v15241_v29 = vadd.f32 %v11477_v39, %v4142_v45  ;;  %v15245_v35 = vsel %vm12557_vm6, %v5841_v21, %v5842_v22  ;;  %v17296_v57 = vld [vmem:[#allocation51_spill] sm:$0xff]  ;;  %v15254_v10 = vld [vmem:[%s12349_s28 + $0x160] sm:$0xf] }
 0x1f1   : > { %v4143_v9 = vadd.f32 %v3960_v3, %v17296_v57  ;;  %v5333_v39 = vpop.f32.mrf.mxu0  ;;  %v15262_v22 = vsel %vm12557_vm6, %v10516_v28, %v5846_v8  ;;  %v5848_v21 = vrot.slane %v5846_v8, 4 }
 0x1f2   : > { %11634 = vmatprep.mubr.msk.bf16.mxu0 %vm605_vm0, %v17294_v56  ;;  %17295 = vst [vmem:[#allocation50_spill] sm:$0xff] %v15241_v29  ;;  %v17297_v56 = vcombine.low %v15111_v26, %v15120_v1  ;;  %v11415_v45 = vpop.f32.mrf.mxu1  ;;  %v5851_v48 = vrot.slane %v5849_v27, 4  ;;  %v15267_v57 = vadd.f32 %v5333_v39, %v4140_v25  ;;  %v17299_v29 = vld [vmem:[#allocation52_spill] sm:$0xff]  ;;  %v12074_v26 = vld [vmem:[%s12349_s28 + $0x14c] sm:$0xf]  ;;  %v17300_v25 = vshrl.u32 %v14271_v36, 16 }
 0x1f3   : > { %v4146_v43 = vadd.f32 %v11415_v45, %v17299_v29  ;;  %v5852_v1 = vrot.slane %v12074_v26, 5  ;;  %v15276_v8 = vsel %vm12557_vm6, %v5848_v21, %v5849_v27  ;;  %v17301_v45 = vld [vmem:[#allocation53_spill] sm:$0xff] }
 0x1f4   : > { %11569 = vmatmul.mubr.msk.bf16.gmra.mxu1 %vm605_vm0, %v17297_v56  ;;  %17298 = vst [vmem:[#allocation51_spill] sm:$0xff] %v15267_v57  ;;  %v12075_v56 = vld [vmem:[%s12349_s28 + $0x150] sm:$0x1]  ;;  %v3963_v12 = vpop.f32.mrf.mxu1  ;;  %v7372_v29 = vrot.slane %v17300_v25, 4  ;;  %v11480_v39 = vpop.f32.mrf.mxu0  ;;  %v7379_v25 = vshll.u32 %v12076_v18, 16 }
 0x1f5   : > { %11572 = vmatprep.mubr.msk.bf16.mxu1 %vm605_vm0, %v10545_v42  ;;  %v5855_v52 = vrot.slane %v12075_v56, 5  ;;  %v4144_v26 = vadd.f32 %v3963_v12, %v17301_v45  ;;  %v15287_v3 = vsel %vm12557_vm6, %v5851_v48, %v5852_v1  ;;  %v5854_v28 = vrot.slane %v5852_v1, 4 }
 0x1f6   : > { %v15289_v27 = vadd.f32 %v11480_v39, %v4145_v23  ;;  %v11418_v21 = vpop.f32.mrf.mxu1  ;;  %v17303_v42 = vshll.u32 %v14271_v36, 16  ;;  %v7385_v12 = vrot.slane %v17304_v44, 4  ;;  %v5346_v45 = vpop.f32.mrf.mxu0  ;;  %v15302_v23 = vld [vmem:[%s12349_s28 + $0x30] sm:$0xf]  ;;  %v7381_v39 = vrot.slane %v7379_v25, 5 }
 0x1f7   : > { %v4149_v56 = vadd.f32 %v11418_v21, %v14236_v19  ;;  %v15299_v48 = vsel %vm12557_vm6, %v5854_v28, %v5855_v52  ;;  %v7389_v1 = vshll.u32 %v15302_v23, 16  ;;  %v7393_v36 = vshrl.u32 %v15302_v23, 16  ;;  %v15315_v52 = vld [vmem:[%s12349_s28 + $0x38] sm:$0x1] }
 0x1f8   : > { %17302 = vst [vmem:[#allocation52_spill] sm:$0xff] %v15289_v27  ;;  %v7375_v57 = vrot.slane %v17303_v42, 5  ;;  %v17305_v42 = vcombine.low %v15079_v14, %v15082_v63  ;;  %v15310_v41 = vadd.f32 %v5346_v45, %v4143_v9  ;;  %v3976_v44 = vpop.f32.mrf.mxu1  ;;  %v17307_v21 = vcombine.low %v15092_v15, %v15101_v0  ;;  %v11481_v27 = vpop.f32.mrf.mxu0  ;;  %v12078_v9 = vld [vmem:[%s12349_s28 + $0x34] sm:$0xf] }
 0x1f9   : > { %v4147_v14 = vadd.f32 %v3976_v44, %v14259_v5  ;;  %v7391_v63 = vrot.slane %v7389_v1, 5  ;;  %v7399_v45 = vshll.u32 %v12078_v9, 16  ;;  %v17308_v19 = vcombine.low %v15176_v34, %v15180_v20  ;;  %v17311_v1 = vld [vmem:[#allocation54_spill] sm:$0xff] }
 0x1fa   : > { %11635 = vmatmul.mubr.msk.bf16.gmra.mxu0 %vm605_vm0, %v17305_v42  ;;  %17306 = vst [vmem:[#allocation53_spill] sm:$0xff] %v15310_v41  ;;  %v7376_v28 = vor.u32 %v7375_v57, %v7372_v29  ;;  %v7395_v42 = vrot.slane %v7393_v36, 4  ;;  %v15327_v41 = vadd.f32 %v11481_v27, %v4146_v43  ;;  %v11419_v57 = vpop.f32.mrf.mxu1  ;;  %v7386_v25 = vor.u32 %v7385_v12, %v7381_v39  ;;  %v5349_v5 = vpop.f32.mrf.mxu0 }
 0x1fb   : > { %11638 = vmatprep.mubr.msk.bf16.mxu0 %vm605_vm0, %v17307_v21  ;;  %v7403_v0 = vshrl.u32 %v12078_v9, 16  ;;  %v17310_v21 = vcombine.low %v15192_v60, %v15200_v55  ;;  %v4150_v36 = vadd.f32 %v11419_v57, %v17311_v1  ;;  %v7401_v15 = vrot.slane %v7399_v45, 5  ;;  %v17313_v55 = vld [vmem:[#allocation55_spill] sm:$0xff] }
 0x1fc   : > { %11573 = vmatmul.mubr.msk.bf16.gmra.mxu1 %vm605_vm0, %v17308_v19  ;;  %17309 = vst [vmem:[#allocation92_spill] sm:$0xff] %v15327_v41  ;;  %v7377_v29 = vrot.slane %v7376_v28, 4  ;;  %v7396_v44 = vor.u32 %v7395_v42, %v7391_v63  ;;  %v7409_v34 = vshll.u32 %v15315_v52, 16  ;;  %v15335_v20 = vadd.f32 %v5349_v5, %v4144_v26  ;;  %v3979_v43 = vpop.f32.mrf.mxu1  ;;  %v11484_v41 = vpop.f32.mrf.mxu0 }
 0x1fd   : > { %11576 = vmatprep.mubr.msk.bf16.mxu1 %vm605_vm0, %v17310_v21  ;;  %v7387_v19 = vrot.slane %v7386_v25, 4  ;;  %v7405_v28 = vrot.slane %v7403_v0, 4  ;;  %v4148_v60 = vadd.f32 %v3979_v43, %v17313_v55  ;;  %v15341_v57 = vadd.f32 %v11484_v41, %v4149_v56 }
 0x1fe   : > { %v7382_v12 = vsel %vm12527_vm5, %v7377_v29, %v7381_v39  ;;  %v7397_v32 = vrot.slane %v7396_v44, 4  ;;  %v7411_v21 = vrot.slane %v7409_v34, 5  ;;  %v8773_v45 = vrot.slane %v12076_v18, 5  ;;  %v11422_v5 = vpop.f32.mrf.mxu1  ;;  %v5362_v1 = vpop.f32.mrf.mxu0  ;;  %v17316_v34 = vld [vmem:[#allocation33_spill] sm:$0xff] }
 0x1ff   : > { %v7392_v42 = vsel %vm12527_vm5, %v7387_v19, %v7391_v63  ;;  %v7406_v26 = vor.u32 %v7405_v28, %v7401_v15  ;;  %v8776_v29 = vrot.slane %v15302_v23, 5  ;;  %v8779_v25 = vrot.slane %v12078_v9, 5  ;;  %v17318_v19 = vld [vmem:[#allocation32_spill] sm:$0xff] }
 0x200   : > { %v7402_v39 = vsel %vm12527_vm5, %v7397_v32, %v7401_v15  ;;  %v15347_v0 = vcombine.low %v7382_v12, %v7392_v42  ;;  %v15354_v56 = vadd.f32 %v5362_v1, %v4147_v14  ;;  %v15358_v18 = vsel %vm12557_vm6, %v10800_v47, %v8773_v45  ;;  %v3992_v44 = vpop.f32.mrf.mxu1  ;;  %v11485_v15 = vpop.f32.mrf.mxu0 }
 0x201   : > { %v7407_v63 = vrot.slane %v7406_v26, 4  ;;  %v8775_v41 = vrot.slane %v8773_v45, 4  ;;  %v17315_v32 = vcombine.low %v15184_v17, %v15187_v31  ;;  %v8778_v23 = vrot.slane %v8776_v29, 4 }
 0x202   : > { %11639 = vmatmul.mubr.msk.bf16.gmra.mxu0 %vm605_vm0, %v17314_v6  ;;  %v8781_v9 = vrot.slane %v8779_v25, 4  ;;  %v8782_v51 = vrot.slane %v15315_v52, 5  ;;  %v4153_v14 = vadd.f32 %v11422_v5, %v17316_v34  ;;  %v17317_v43 = vcombine.low %v15234_v38, %v15245_v35  ;;  %v11423_v52 = vpop.f32.mrf.mxu1  ;;  %v5365_v38 = vpop.f32.mrf.mxu0 }
 0x203   : > { %11642 = vmatprep.mubr.msk.bf16.mxu0 %vm605_vm0, %v17315_v32  ;;  %v15370_v47 = vadd.f32 %v11485_v15, %v4150_v36  ;;  %v7412_v12 = vsel %vm12527_vm5, %v7407_v63, %v7411_v21  ;;  %v15376_v31 = vsel %vm12557_vm6, %v8775_v41, %v8776_v29  ;;  %v4151_v28 = vadd.f32 %v3992_v44, %v17318_v19  ;;  %v12080_v44 = vld [vmem:[%s12349_s28 + $0x40] sm:$0xf] }
 0x204   : > { %11577 = vmatmul.mubr.msk.bf16.gmra.mxu1 %vm605_vm0, %v17317_v43  ;;  %v17319_v55 = vcombine.low %v15262_v22, %v15276_v8  ;;  %v15383_v35 = vcombine.low %v7402_v39, %v7412_v12  ;;  %v15387_v36 = vsel %vm12557_vm6, %v8778_v23, %v8779_v25  ;;  %v15391_v21 = vsel %vm12557_vm6, %v8781_v9, %v8782_v51  ;;  %v17321_v8 = vld [vmem:[#allocation34_spill] sm:$0xff]  ;;  %v3995_v5 = vpop.f32.mrf.mxu1  ;;  %v11488_v29 = vpop.f32.mrf.mxu0  ;;  %v17323_v25 = vld [vmem:[#allocation35_spill] sm:$0xff]  ;;  %v12082_v43 = vld [vmem:[%s12349_s28 + $0x3c] sm:$0xf] }
 0x205   : > { %v10818_v42 = vcombine.low %v15358_v18, %v15376_v31  ;;  %v15395_v26 = vadd.f32 %v5365_v38, %v4148_v60  ;;  %v10819_v22 = vcombine.low %v15387_v36, %v15391_v21  ;;  %v4154_v45 = vadd.f32 %v11423_v52, %v17321_v8  ;;  %v12081_v9 = vld [vmem:[%s12349_s28 + $0x44] sm:$0xf] }
 0x206   : > { %11580 = vmatprep.mubr.msk.bf16.mxu1 %vm605_vm0, %v17319_v55  ;;  %v17322_v1 = vshrl.u32 %v14368_v2, 16  ;;  %v4152_v6 = vadd.f32 %v3995_v5, %v17323_v25  ;;  %v17324_v63 = vshll.u32 %v14368_v2, 16  ;;  %v7423_v32 = vshll.u32 %v12080_v44, 16  ;;  %v5378_v19 = vpop.f32.mrf.mxu0  ;;  %v11426_v5 = vpop.f32.mrf.mxu1 }
 0x207   : > { %17320 = vst [vmem:[#allocation54_spill] sm:$0xff] %v15395_v26  ;;  %v17325_v60 = vshrl.u32 %v14371_v37, 16  ;;  %v15408_v23 = vadd.f32 %v11488_v29, %v4153_v14  ;;  %v7433_v51 = vshll.u32 %v12081_v9, 16  ;;  %v7437_v34 = vshrl.u32 %v12081_v9, 16  ;;  %v17329_v29 = vld [vmem:[#allocation6_spill] sm:$0xff] }
 0x208   : > { %v7416_v39 = vrot.slane %v17322_v1, 4  ;;  %v7419_v41 = vrot.slane %v17324_v63, 5  ;;  %v10801_v12 = vrot.slane %v12082_v43, 9  ;;  %v7425_v55 = vrot.slane %v7423_v32, 5  ;;  %v11489_v63 = vpop.f32.mrf.mxu0 }
 0x209   : > { %v7429_v15 = vrot.slane %v17325_v60, 4  ;;  %17326 = vst [vmem:[#allocation18_spill] sm:$0xff] %v15408_v23  ;;  %v8786_v38 = vrot.slane %v12080_v44, 5  ;;  %v8789_v8 = vrot.slane %v12081_v9, 5  ;;  %v17327_v2 = vcombine.low %v15209_v49, %v15212_v54 }
 0x20a   : > { %v7420_v52 = vor.u32 %v7419_v41, %v7416_v39  ;;  %v15416_v37 = vadd.f32 %v5378_v19, %v4151_v28  ;;  %v7435_v14 = vrot.slane %v7433_v51, 5  ;;  %v7439_v1 = vrot.slane %v7437_v34, 4  ;;  %v4008_v28 = vpop.f32.mrf.mxu1  ;;  %v12083_v51 = vld [vmem:[%s12349_s28 + $0x48] sm:$0xf] }
 0x20b   : > { %11643 = vmatmul.mubr.msk.bf16.gmra.mxu0 %vm605_vm0, %v17327_v2  ;;  %v4157_v25 = vadd.f32 %v11426_v5, %v17329_v29  ;;  %v17330_v39 = vcombine.low %v15220_v30, %v15223_v13  ;;  %v7430_v44 = vor.u32 %v7429_v15, %v7425_v55  ;;  %v15425_v49 = vsel %vm12557_vm6, %v10801_v12, %v8786_v38  ;;  %v10595_v13 = vld [vmem:[%s12349_s28 + $0x4c] sm:$0x1]  ;;  %v5381_v15 = vpop.f32.mrf.mxu0 }
 0x20c   : > { %17328 = vst [vmem:[#allocation55_spill] sm:$0xff] %v15416_v37  ;;  %v7421_v41 = vrot.slane %v7420_v52, 4  ;;  %v8788_v54 = vrot.slane %v8786_v38, 4  ;;  %v17331_v32 = vcombine.low %v15287_v3, %v15299_v48  ;;  %v15431_v60 = vadd.f32 %v11489_v63, %v4154_v45  ;;  %v11427_v19 = vpop.f32.mrf.mxu1  ;;  %v17479_v37 = vld [vmem:[#allocation45_spill] sm:$0xff] }
 0x20d   : > { %11646 = vmatprep.mubr.msk.bf16.mxu0 %vm605_vm0, %v17330_v39  ;;  %v7440_v9 = vor.u32 %v7439_v1, %v7435_v14  ;;  %v8791_v30 = vrot.slane %v8789_v8, 4  ;;  %v7443_v34 = vshll.u32 %v12083_v51, 16  ;;  %v7431_v12 = vrot.slane %v7430_v44, 4 }
 0x20e   : > { %11581 = vmatmul.mubr.msk.bf16.gmra.mxu1 %vm605_vm0, %v17331_v32  ;;  %17332 = vst [vmem:[#allocation33_spill] sm:$0xff] %v15431_v60  ;;  %v7426_v43 = vsel %vm12527_vm5, %v7421_v41, %v7425_v55  ;;  %v15441_v3 = vsel %vm12557_vm6, %v8788_v54, %v8789_v8  ;;  %v17333_v48 = vshrl.u32 %v14417_v33, 16  ;;  %v15445_v52 = vadd.f32 %v5381_v15, %v4152_v6  ;;  %v4011_v39 = vpop.f32.mrf.mxu1  ;;  %v17335_v6 = vld [vmem:[#allocation9_spill] sm:$0xff] }
 0x20f   : > { %11652 = vmatprep.mubr.msk.bf16.mxu1 %vm605_vm0, %v15347_v0  ;;  %v7441_v38 = vrot.slane %v7440_v9, 4  ;;  %v10820_v5 = vcombine.low %v15425_v49, %v15441_v3  ;;  %v7445_v0 = vrot.slane %v7443_v34, 5  ;;  %v7436_v2 = vsel %vm12527_vm5, %v7431_v12, %v7435_v14  ;;  %v17336_v9 = vld [vmem:[#allocation8_spill] sm:$0xff]  ;;  %v17338_v15 = vld [vmem:[#allocation21_spill] sm:$0xff] }
 0x210   : > { %v7449_v45 = vrot.slane %v17333_v48, 4  ;;  %17334 = vst [vmem:[#allocation32_spill] sm:$0xff] %v15445_v52  ;;  %v7453_v55 = vshll.u32 %v10595_v13, 16  ;;  %v8792_v1 = vrot.slane %v12083_v51, 5  ;;  %v8795_v29 = vrot.slane %v10595_v13, 5  ;;  %v11492_v51 = vpop.f32.mrf.mxu0  ;;  %v17347_v3 = vld [vmem:[#allocation13_spill] sm:$0xff] }
 0x211   : > { %v10737_v8 = vcombine.low %v7426_v43, %v7436_v2  ;;  %v7446_v33 = vsel %vm12527_vm5, %v7441_v38, %v7445_v0  ;;  %v4155_v41 = vadd.f32 %v4008_v28, %v17335_v6  ;;  %v4158_v14 = vadd.f32 %v11427_v19, %v17336_v9  ;;  %v11430_v2 = vpop.f32.mrf.mxu1 }
 0x212   : > { %v7450_v63 = vor.u32 %v7449_v45, %v7445_v0  ;;  %v7455_v44 = vrot.slane %v7453_v55, 5  ;;  %v15456_v54 = vsel %vm12557_vm6, %v8791_v30, %v8792_v1  ;;  %v8794_v32 = vrot.slane %v8792_v1, 4  ;;  %v5394_v31 = vpop.f32.mrf.mxu0 }
 0x213   : > { %v17337_v13 = vcombine.low %v15251_v50, %v15254_v10  ;;  %v4156_v43 = vadd.f32 %v4011_v39, %v17338_v15  ;;  %v17339_v28 = vshrl.u32 %v14426_v11, 16  ;;  %v17340_v48 = vshll.u32 %v14426_v11, 16  ;;  %v12084_v10 = vld [vmem:[%s12349_s28 + $0x54] sm:$0xf] }
 0x214   : > { %v7451_v34 = vrot.slane %v7450_v63, 4  ;;  %v15472_v45 = vadd.f32 %v11492_v51, %v4157_v25  ;;  %v15476_v50 = vsel %vm12557_vm6, %v8794_v32, %v8795_v29  ;;  %v7467_v19 = vshll.u32 %v12084_v10, 16  ;;  %v12085_v25 = vld [vmem:[%s12349_s28 + $0x58] sm:$0xf]  ;;  %v11493_v63 = vpop.f32.mrf.mxu0 }
 0x215   : > { %11647 = vmatmul.mubr.msk.bf16.gmra.mxu0 %vm605_vm0, %v17337_v13  ;;  %v7460_v12 = vrot.slane %v17339_v28, 4  ;;  %v7463_v30 = vrot.slane %v17340_v48, 5  ;;  %v17342_v38 = vshrl.u32 %v14439_v4, 16  ;;  %v10821_v18 = vcombine.low %v15456_v54, %v15476_v50  ;;  %v10605_v54 = vld [vmem:[%s12349_s28 + $0x74] sm:$0x1] }
 0x216   : > { %11718 = vmatprep.mubr.msk.bf16.mxu0 %vm605_vm0, %v10818_v42  ;;  %17341 = vst [vmem:[#allocation34_spill] sm:$0xff] %v15472_v45  ;;  %11653 = vmatmul.mubr.msk.bf16.vlgmr.msra.gmra.mxu1 %vm605_vm0, %v15383_v35  ;;  %v7456_v11 = vsel %vm12527_vm5, %v7451_v34, %v7455_v44  ;;  %v7477_v55 = vshll.u32 %v12085_v25, 16  ;;  %v15489_v1 = vadd.f32 %v5394_v31, %v4155_v41  ;;  %v7469_v29 = vrot.slane %v7467_v19, 5  ;;  %v4024_v35 = vpop.f32.mrf.mxu1  ;;  %v12086_v44 = vld [vmem:[%s12349_s28 + $0x50] sm:$0xf] }
 0x217   : > { %v7473_v0 = vrot.slane %v17342_v38, 4  ;;  %v7464_v42 = vor.u32 %v7463_v30, %v7460_v12  ;;  %11656 = vmatprep.mubr.msk.bf16.mxu1 %vm605_vm0, %v10737_v8  ;;  %v10738_v4 = vcombine.low %v7446_v33, %v7456_v11  ;;  %v7481_v39 = vshrl.u32 %v12085_v25, 16  ;;  %v10600_v8 = vld [vmem:[%s12349_s28 + $0x60] sm:$0x1]  ;;  %v5397_v33 = vpop.f32.mrf.mxu0  ;;  %v12087_v31 = vld [vmem:[%s12349_s28 + $0x5c] sm:$0xf] }
 0x218   : > { %17343 = vst [vmem:[#allocation35_spill] sm:$0xff] %v15489_v1  ;;  %v7479_v32 = vrot.slane %v7477_v55, 5  ;;  %v10802_v9 = vrot.slane %v12086_v44, 9  ;;  %v8799_v13 = vrot.slane %v12084_v10, 5  ;;  %v15492_v51 = vadd.f32 %v11493_v63, %v4158_v14  ;;  %v11431_v12 = vpop.f32.mrf.mxu1 }
 0x219   : > { %v7465_v6 = vrot.slane %v7464_v42, 4  ;;  %v7474_v34 = vor.u32 %v7473_v0, %v7469_v29  ;;  %v7483_v15 = vrot.slane %v7481_v39, 4  ;;  %v8802_v28 = vrot.slane %v12085_v25, 5 }
 0x21a   : > { %17344 = vst [vmem:[#allocation6_spill] sm:$0xff] %v15492_v51  ;;  %v8800_v48 = vsel %vm12557_vm6, %v10802_v9, %v8799_v13  ;;  %v8801_v30 = vrot.slane %v8799_v13, 4  ;;  %v4161_v19 = vadd.f32 %v11430_v2, %v14475_v53  ;;  %v15500_v38 = vadd.f32 %v5397_v33, %v4156_v43  ;;  %v4027_v53 = vpop.f32.mrf.mxu1  ;;  %v17348_v9 = vld [vmem:[#allocation11_spill] sm:$0xff] }
 0x21b   : > { %v7470_v41 = vsel %vm12527_vm5, %v7465_v6, %v7469_v29  ;;  %v7475_v14 = vrot.slane %v7474_v34, 4  ;;  %v7484_v10 = vor.u32 %v7483_v15, %v7479_v32  ;;  %v8804_v0 = vrot.slane %v8802_v28, 4  ;;  %v11496_v6 = vpop.f32.mrf.mxu0  ;;  %v17350_v15 = vld [vmem:[#allocation7_spill] sm:$0xff] }
 0x21c   : > { %17345 = vst [vmem:[#allocation9_spill] sm:$0xff] %v15500_v38  ;;  %v8803_v11 = vsel %vm12557_vm6, %v8801_v30, %v8802_v28  ;;  %v7487_v42 = vshll.u32 %v12087_v31, 16  ;;  %v17346_v25 = vshrl.u32 %v14500_v24, 16  ;;  %v7497_v29 = vshll.u32 %v10600_v8, 16 }
 0x21d   : > { %11719 = vmatmul.mubr.msk.bf16.vlgmr.msra.gmra.mxu0 %vm605_vm0, %v10819_v22  ;;  %v7480_v36 = vsel %vm12527_vm5, %v7475_v14, %v7479_v32  ;;  %v7485_v21 = vrot.slane %v7484_v10, 4  ;;  %v10822_v22 = vcombine.low %v8800_v48, %v8803_v11  ;;  %v8805_v43 = vrot.slane %v12087_v31, 5  ;;  %v17351_v48 = vld [vmem:[#allocation10_spill] sm:$0xff] }
 0x21e   : > { %v7493_v55 = vrot.slane %v17346_v25, 4  ;;  %11722 = vmatprep.mubr.msk.bf16.mxu0 %vm605_vm0, %v10820_v5  ;;  %11657 = vmatmul.mubr.msk.bf16.gmra.mxu1 %vm605_vm0, %v10738_v4  ;;  %v10739_v2 = vcombine.low %v7470_v41, %v7480_v36  ;;  %v7489_v39 = vrot.slane %v7487_v42, 5  ;;  %v7499_v63 = vrot.slane %v7497_v29, 5  ;;  %v5410_v41 = vpop.f32.mrf.mxu0  ;;  %v17355_v42 = vld [vmem:[#allocation12_spill] sm:$0xff] }
 0x21f   : > { %v8808_v24 = vrot.slane %v10600_v8, 5  ;;  %v15520_v44 = vsel %vm12557_vm6, %v8804_v0, %v8805_v43  ;;  %v8807_v49 = vrot.slane %v8805_v43, 4  ;;  %v4159_v5 = vadd.f32 %v4024_v35, %v17347_v3  ;;  %v11434_v8 = vpop.f32.mrf.mxu1  ;;  %v12089_v43 = vld [vmem:[%s12349_s28 + $0x6c] sm:$0xf] }
 0x220   : > { %v4162_v32 = vadd.f32 %v11431_v12, %v17348_v9  ;;  %11660 = vmatprep.mubr.msk.bf16.mxu1 %vm605_vm0, %v10739_v2  ;;  %v15525_v13 = vadd.f32 %v11496_v6, %v4161_v19  ;;  %v7490_v4 = vsel %vm12527_vm5, %v7485_v21, %v7489_v39  ;;  %v7494_v34 = vor.u32 %v7493_v55, %v7489_v39  ;;  %v12088_v19 = vld [vmem:[%s12349_s28 + $0x68] sm:$0xf] }
 0x221   : > { %v4160_v28 = vadd.f32 %v4027_v53, %v17350_v15  ;;  %v8809_v33 = vsel %vm12557_vm6, %v8807_v49, %v8808_v24  ;;  %v17352_v35 = vshrl.u32 %v17351_v48, 16  ;;  %v17353_v12 = vshll.u32 %v17351_v48, 16  ;;  %v4040_v29 = vpop.f32.mrf.mxu1  ;;  %v11497_v53 = vpop.f32.mrf.mxu0 }
 0x222   : > { %17349 = vst [vmem:[#allocation8_spill] sm:$0xff] %v15525_v13  ;;  %v7511_v10 = vshll.u32 %v12088_v19, 16  ;;  %v7495_v0 = vrot.slane %v7494_v34, 4  ;;  %v10823_v11 = vcombine.low %v15520_v44, %v8809_v33  ;;  %v15538_v31 = vadd.f32 %v5410_v41, %v4159_v5  ;;  %v12090_v44 = vld [vmem:[%s12349_s28 + $0x64] sm:$0xf] }
 0x223   : > { %v7504_v30 = vrot.slane %v17352_v35, 4  ;;  %v7507_v14 = vrot.slane %v17353_v12, 5  ;;  %v17356_v25 = vshrl.u32 %v17355_v42, 16  ;;  %v7521_v2 = vshll.u32 %v12089_v43, 16  ;;  %v11435_v5 = vpop.f32.mrf.mxu1  ;;  %v5413_v34 = vpop.f32.mrf.mxu0  ;;  %v17359_v35 = vld [vmem:[#allocation14_spill] sm:$0xff] }
 0x224   : > { %17354 = vst [vmem:[#allocation21_spill] sm:$0xff] %v15538_v31  ;;  %v7513_v21 = vrot.slane %v7511_v10, 5  ;;  %v7525_v39 = vshrl.u32 %v12089_v43, 16  ;;  %v7500_v24 = vsel %vm12527_vm5, %v7495_v0, %v7499_v63  ;;  %v15549_v6 = vadd.f32 %v11497_v53, %v4162_v32 }
 0x225   : > { %v7517_v55 = vrot.slane %v17356_v25, 4  ;;  %v7508_v36 = vor.u32 %v7507_v14, %v7504_v30  ;;  %11723 = vmatmul.mubr.msk.bf16.gmra.mxu0 %vm605_vm0, %v10821_v18  ;;  %v10803_v49 = vrot.slane %v12090_v44, 9  ;;  %v8812_v3 = vrot.slane %v12088_v19, 5  ;;  %v4043_v12 = vpop.f32.mrf.mxu1  ;;  %v12091_v19 = vld [vmem:[%s12349_s28 + $0x70] sm:$0xf] }
 0x226   : > { %17357 = vst [vmem:[#allocation13_spill] sm:$0xff] %v15549_v6  ;;  %11726 = vmatprep.mubr.msk.bf16.mxu0 %vm605_vm0, %v10822_v22  ;;  %v10740_v9 = vcombine.low %v7490_v4, %v7500_v24  ;;  %v7523_v41 = vrot.slane %v7521_v2, 5  ;;  %v15554_v50 = vadd.f32 %v5413_v34, %v4160_v28  ;;  %v7527_v18 = vrot.slane %v7525_v39, 4  ;;  %v17360_v28 = vld [vmem:[#allocation17_spill] sm:$0xff] }
 0x227   : > { %v7509_v15 = vrot.slane %v7508_v36, 4  ;;  %v7518_v33 = vor.u32 %v7517_v55, %v7513_v21  ;;  %v8813_v63 = vsel %vm12557_vm6, %v10803_v49, %v8812_v3  ;;  %v8814_v32 = vrot.slane %v8812_v3, 4  ;;  %v11438_v34 = vpop.f32.mrf.mxu1 }
 0x228   : > { %17358 = vst [vmem:[#allocation11_spill] sm:$0xff] %v15554_v50  ;;  %11661 = vmatmul.mubr.msk.bf16.gmra.mxu1 %vm605_vm0, %v10740_v9  ;;  %v8815_v4 = vrot.slane %v12089_v43, 5  ;;  %v4165_v30 = vadd.f32 %v11434_v8, %v17359_v35  ;;  %v7528_v14 = vor.u32 %v7527_v18, %v7523_v41  ;;  %v7531_v10 = vshll.u32 %v12091_v19, 16  ;;  %v11500_v8 = vpop.f32.mrf.mxu0  ;;  %v17363_v18 = vld [vmem:[#allocation15_spill] sm:$0xff] }
 0x229   : > { %v7514_v48 = vsel %vm12527_vm5, %v7509_v15, %v7513_v21  ;;  %v7519_v22 = vrot.slane %v7518_v33, 4  ;;  %v17361_v0 = vshrl.u32 %v17360_v28, 16  ;;  %v7541_v25 = vshll.u32 %v10605_v54, 16  ;;  %v4056_v28 = vpop.f32.mrf.mxu1 }
 0x22a   : > { %v8816_v53 = vsel %vm12557_vm6, %v8814_v32, %v8815_v4  ;;  %v8817_v36 = vrot.slane %v8815_v4, 4  ;;  %v8818_v21 = vrot.slane %v12091_v19, 5  ;;  %v7529_v2 = vrot.slane %v7528_v14, 4  ;;  %v5426_v32 = vpop.f32.mrf.mxu0  ;;  %v17365_v4 = vld [vmem:[#allocation56_spill] sm:$0xff] }
 0x22b   : > { %v7537_v42 = vrot.slane %v17361_v0, 4  ;;  %v7524_v55 = vsel %vm12527_vm5, %v7519_v22, %v7523_v41  ;;  %v10824_v39 = vcombine.low %v8813_v63, %v8816_v53  ;;  %v7533_v24 = vrot.slane %v7531_v10, 5 }
 0x22c   : > { %v10741_v43 = vcombine.low %v7514_v48, %v7524_v55  ;;  %v15569_v44 = vadd.f32 %v11500_v8, %v4165_v30  ;;  %v7543_v49 = vrot.slane %v7541_v25, 5  ;;  %v8819_v3 = vsel %vm12557_vm6, %v8817_v36, %v8818_v21  ;;  %v17364_v48 = vld [vmem:[#allocation16_spill] sm:$0xff]  ;;  %v17366_v30 = vld [vmem:[#allocation19_spill] sm:$0xff]  ;;  %v12092_v25 = vld [vmem:[%s12349_s28 + $0x7c] sm:$0xf] }
 0x22d   : > { %v8820_v9 = vrot.slane %v8818_v21, 4  ;;  %11727 = vmatmul.mubr.msk.bf16.gmra.mxu0 %vm605_vm0, %v10823_v11  ;;  %v7534_v15 = vsel %vm12527_vm5, %v7529_v2, %v7533_v24  ;;  %v7538_v33 = vor.u32 %v7537_v42, %v7533_v24  ;;  %v8821_v41 = vrot.slane %v10605_v54, 5  ;;  %v11501_v42 = vpop.f32.mrf.mxu0  ;;  %v17371_v36 = vld [vmem:[#allocation57_spill] sm:$0xff] }
 0x22e   : > { %17362 = vst [vmem:[#allocation7_spill] sm:$0xff] %v15569_v44  ;;  %11664 = vmatprep.mubr.msk.bf16.mxu1 %vm605_vm0, %v10741_v43  ;;  %v4163_v63 = vadd.f32 %v4040_v29, %v17363_v18  ;;  %11730 = vmatprep.mubr.msk.bf16.mxu0 %vm605_vm0, %v10824_v39  ;;  %v4166_v22 = vadd.f32 %v11435_v5, %v17364_v48  ;;  %v17367_v14 = vshrl.u32 %v17366_v30, 16  ;;  %v17368_v19 = vshll.u32 %v17366_v30, 16  ;;  %v11439_v43 = vpop.f32.mrf.mxu1 }
 0x22f   : > { %v4164_v35 = vadd.f32 %v4043_v12, %v17365_v4  ;;  %v7539_v0 = vrot.slane %v7538_v33, 4  ;;  %v8822_v54 = vsel %vm12557_vm6, %v8820_v9, %v8821_v41  ;;  %v7555_v5 = vshll.u32 %v12092_v25, 16  ;;  %v5429_v8 = vpop.f32.mrf.mxu0  ;;  %v12093_v9 = vld [vmem:[%s12349_s28 + $0x80] sm:$0xf] }
 0x230   : > { %v7548_v11 = vrot.slane %v17367_v14, 4  ;;  %v7551_v10 = vrot.slane %v17368_v19, 5  ;;  %v15587_v29 = vadd.f32 %v5426_v32, %v4163_v63  ;;  %v10825_v55 = vcombine.low %v8819_v3, %v8822_v54  ;;  %v12094_v32 = vld [vmem:[%s12349_s28 + $0x78] sm:$0xf]  ;;  %v10610_v19 = vld [vmem:[%s12349_s28 + $0x88] sm:$0x1] }
 0x231   : > { %v15590_v12 = vadd.f32 %v11501_v42, %v4166_v22  ;;  %v17372_v21 = vshrl.u32 %v17371_v36, 16  ;;  %v7544_v39 = vsel %vm12527_vm5, %v7539_v0, %v7543_v49  ;;  %v7557_v24 = vrot.slane %v7555_v5, 5  ;;  %v4059_v22 = vpop.f32.mrf.mxu1  ;;  %v17374_v0 = vld [vmem:[#allocation58_spill] sm:$0xff] }
 0x232   : > { %17369 = vst [vmem:[#allocation10_spill] sm:$0xff] %v15587_v29  ;;  %v7552_v53 = vor.u32 %v7551_v10, %v7548_v11  ;;  %v7565_v33 = vshll.u32 %v12093_v9, 16  ;;  %v7569_v41 = vshrl.u32 %v12093_v9, 16  ;;  %v10742_v18 = vcombine.low %v7534_v15, %v7544_v39  ;;  %v12095_v15 = vld [vmem:[%s12349_s28 + $0x84] sm:$0xf] }
 0x233   : > { %17370 = vst [vmem:[#allocation12_spill] sm:$0xff] %v15590_v12  ;;  %v7561_v2 = vrot.slane %v17372_v21, 4  ;;  %v15597_v63 = vadd.f32 %v5429_v8, %v4164_v35  ;;  %v10804_v48 = vrot.slane %v12094_v32, 9  ;;  %v8825_v11 = vrot.slane %v12092_v25, 5  ;;  %v11504_v21 = vpop.f32.mrf.mxu0 }
 0x234   : > { %v7553_v3 = vrot.slane %v7552_v53, 4  ;;  %v7567_v30 = vrot.slane %v7565_v33, 5  ;;  %v7571_v14 = vrot.slane %v7569_v41, 4  ;;  %11665 = vmatmul.mubr.msk.bf16.gmra.mxu1 %vm605_vm0, %v10742_v18  ;;  %v8828_v10 = vrot.slane %v12093_v9, 5  ;;  %v11442_v9 = vpop.f32.mrf.mxu1 }
 0x235   : > { %17373 = vst [vmem:[#allocation14_spill] sm:$0xff] %v15597_v63  ;;  %v7562_v4 = vor.u32 %v7561_v2, %v7557_v24  ;;  %v4169_v54 = vadd.f32 %v11438_v34, %v17374_v0  ;;  %v7575_v35 = vshll.u32 %v12095_v15, 16  ;;  %11731 = vmatmul.mubr.msk.bf16.gmra.mxu0 %vm605_vm0, %v10825_v55  ;;  %v8826_v53 = vsel %vm12557_vm6, %v10804_v48, %v8825_v11 }
 0x236   : > { %v7558_v49 = vsel %vm12527_vm5, %v7553_v3, %v7557_v24  ;;  %v7572_v5 = vor.u32 %v7571_v14, %v7567_v30  ;;  %v8827_v36 = vrot.slane %v8825_v11, 4  ;;  %v8830_v25 = vrot.slane %v8828_v10, 4  ;;  %v15617_v14 = vpop.f32.mrf.mxu1 }
 0x237   : > { %v7563_v42 = vrot.slane %v7562_v4, 4  ;;  %v7577_v2 = vrot.slane %v7575_v35, 5  ;;  %v17375_v39 = vshrl.u32 %v14632_v61, 16  ;;  %v7585_v24 = vshll.u32 %v10610_v19, 16  ;;  %v5442_v4 = vpop.f32.mrf.mxu0  ;;  %v17377_v35 = vld [vmem:[#allocation20_spill] sm:$0xff] }
 0x238   : > { %v7573_v33 = vrot.slane %v7572_v5, 4  ;;  %v8829_v55 = vsel %vm12557_vm6, %v8827_v36, %v8828_v10  ;;  %v15615_v41 = vadd.f32 %v11504_v21, %v4169_v54  ;;  %v8831_v11 = vrot.slane %v12095_v15, 5  ;;  %v17379_v5 = vld [vmem:[#allocation23_spill] sm:$0xff] }
 0x239   : > { %v7581_v8 = vrot.slane %v17375_v39, 4  ;;  %v7568_v34 = vsel %vm12527_vm5, %v7563_v42, %v7567_v30  ;;  %v10826_v3 = vcombine.low %v8826_v53, %v8829_v55  ;;  %v7587_v48 = vrot.slane %v7585_v24, 5  ;;  %v11505_v42 = vpop.f32.mrf.mxu0  ;;  %v15628_v39 = vpop.f32.mrf.mxu1  ;;  %v17384_v55 = vld [vmem:[#allocation59_spill] sm:$0xff] }
 0x23a   : > { %17376 = vst [vmem:[#allocation17_spill] sm:$0xff] %v15615_v41  ;;  %v10743_v18 = vcombine.low %v7558_v49, %v7568_v34  ;;  %v7578_v61 = vsel %vm12527_vm5, %v7573_v33, %v7577_v2  ;;  %v8834_v0 = vrot.slane %v10610_v19, 5  ;;  %v4167_v30 = vadd.f32 %v4056_v28, %v17377_v35  ;;  %v17378_v49 = vld [vmem:[#allocation22_spill] sm:$0xff]  ;;  %v12096_v34 = vld [vmem:[%s12349_s28 + $0x90] sm:$0xf] }
 0x23b   : > { %v7582_v32 = vor.u32 %v7581_v8, %v7577_v2  ;;  %11734 = vmatprep.mubr.msk.bf16.mxu0 %vm605_vm0, %v10826_v3  ;;  %v4170_v54 = vadd.f32 %v11439_v43, %v17378_v49  ;;  %v4168_v53 = vadd.f32 %v4059_v22, %v17379_v5  ;;  %v17380_v36 = vshrl.u32 %v14661_v62, 16  ;;  %v5445_v22 = vpop.f32.mrf.mxu0 }
 0x23c   : > { %11668 = vmatprep.mubr.msk.bf16.mxu1 %vm605_vm0, %v10743_v18  ;;  %v8832_v19 = vsel %vm12557_vm6, %v8830_v25, %v8831_v11  ;;  %v8833_v28 = vrot.slane %v8831_v11, 4  ;;  %v15632_v15 = vadd.f32 %v5442_v4, %v4167_v30  ;;  %v17382_v2 = vshll.u32 %v14661_v62, 16  ;;  %v4075_v11 = vpop.f32.mrf.mxu1 }
 0x23d   : > { %v7583_v10 = vrot.slane %v7582_v32, 4  ;;  %v7592_v21 = vrot.slane %v17380_v36, 4  ;;  %v15638_v24 = vadd.f32 %v11505_v42, %v4170_v54  ;;  %v7599_v33 = vshll.u32 %v12096_v34, 16  ;;  %v12098_v42 = vld [vmem:[%s12349_s28 + $0x8c] sm:$0xf] }
 0x23e   : > { %17381 = vst [vmem:[#allocation15_spill] sm:$0xff] %v15632_v15  ;;  %v7595_v8 = vrot.slane %v17382_v2, 5  ;;  %v17385_v18 = vshrl.u32 %v17384_v55, 16  ;;  %v8835_v32 = vsel %vm12557_vm6, %v8833_v28, %v8834_v0  ;;  %v15645_v4 = vadd.f32 %v5445_v22, %v4168_v53  ;;  %v17387_v28 = vld [vmem:[#allocation24_spill] sm:$0xff]  ;;  %v11508_v2 = vpop.f32.mrf.mxu0 }
 0x23f   : > { %v7588_v43 = vsel %vm12527_vm5, %v7583_v10, %v7587_v48  ;;  %17383 = vst [vmem:[#allocation16_spill] sm:$0xff] %v15638_v24  ;;  %v10827_v35 = vcombine.low %v8832_v19, %v8835_v32  ;;  %v7601_v30 = vrot.slane %v7599_v33, 5  ;;  %v12097_v48 = vld [vmem:[%s12349_s28 + $0x94] sm:$0xf]  ;;  %v10805_v5 = vrot.slane %v12098_v42, 9 }
 0x240   : > { %v7605_v3 = vrot.slane %v17385_v18, 4  ;;  %v10744_v25 = vcombine.low %v7578_v61, %v7588_v43  ;;  %17386 = vst [vmem:[#allocation56_spill] sm:$0xff] %v15645_v4  ;;  %v7596_v62 = vor.u32 %v7595_v8, %v7592_v21  ;;  %v7609_v10 = vshll.u32 %v12097_v48, 16  ;;  %v10615_v8 = vld [vmem:[%s12349_s28 + $0x9c] sm:$0x1] }
 0x241   : > { %v7613_v49 = vshrl.u32 %v12097_v48, 16  ;;  %v8838_v36 = vrot.slane %v12096_v34, 5  ;;  %v8841_v61 = vrot.slane %v12097_v48, 5  ;;  %11735 = vmatmul.mubr.msk.bf16.gmra.mxu0 %vm605_vm0, %v10827_v35  ;;  %v4173_v19 = vadd.f32 %v11442_v9, %v17387_v28  ;;  %v15657_v34 = vpop.f32.mrf.mxu1  ;;  %v5458_v35 = vpop.f32.mrf.mxu0 }
 0x242   : > { %11669 = vmatmul.mubr.msk.bf16.gmra.mxu1 %vm605_vm0, %v10744_v25  ;;  %v7597_v54 = vrot.slane %v7596_v62, 4  ;;  %v7606_v0 = vor.u32 %v7605_v3, %v7601_v30  ;;  %v7611_v53 = vrot.slane %v7609_v10, 5  ;;  %v12099_v3 = vld [vmem:[%s12349_s28 + $0x98] sm:$0xf]  ;;  %v17389_v48 = vshrl.u32 %v14692_v46, 16 }
 0x243   : > { %v7615_v21 = vrot.slane %v7613_v49, 4  ;;  %v8839_v22 = vsel %vm12557_vm6, %v10805_v5, %v8838_v36  ;;  %v8840_v33 = vrot.slane %v8838_v36, 4  ;;  %v8843_v55 = vrot.slane %v8841_v61, 4 }
 0x244   : > { %v7602_v43 = vsel %vm12527_vm5, %v7597_v54, %v7601_v30  ;;  %v7607_v18 = vrot.slane %v7606_v0, 4  ;;  %v15659_v32 = vadd.f32 %v11508_v2, %v4173_v19  ;;  %v7619_v62 = vshll.u32 %v12099_v3, 16  ;;  %v15666_v54 = vpop.f32.mrf.mxu1 }
 0x245   : > { %v7616_v25 = vor.u32 %v7615_v21, %v7611_v53  ;;  %v8842_v9 = vsel %vm12557_vm6, %v8840_v33, %v8841_v61  ;;  %v7625_v30 = vrot.slane %v17389_v48, 4  ;;  %v7629_v10 = vshll.u32 %v10615_v8, 16  ;;  %v11509_v21 = vpop.f32.mrf.mxu0  ;;  %v17393_v48 = vld [vmem:[#allocation60_spill] sm:$0xff] }
 0x246   : > { %17388 = vst [vmem:[#allocation19_spill] sm:$0xff] %v15659_v32  ;;  %v8844_v49 = vrot.slane %v12099_v3, 5  ;;  %v7612_v42 = vsel %vm12527_vm5, %v7607_v18, %v7611_v53  ;;  %v10828_v36 = vcombine.low %v8839_v22, %v8842_v9  ;;  %v7621_v0 = vrot.slane %v7619_v62, 5  ;;  %v15672_v33 = vpop.f32.mrf.mxu1  ;;  %v17390_v18 = vld [vmem:[#allocation25_spill] sm:$0xff]  ;;  %v12101_v32 = vld [vmem:[%s12349_s28 + $0xa8] sm:$0xf] }
 0x247   : > { %v7617_v5 = vrot.slane %v7616_v25, 4  ;;  %v10745_v28 = vcombine.low %v7602_v43, %v7612_v42  ;;  %v7631_v19 = vrot.slane %v7629_v10, 5  ;;  %v8847_v53 = vrot.slane %v10615_v8, 5  ;;  %v17391_v43 = vld [vmem:[#allocation26_spill] sm:$0xff]  ;;  %v5461_v9 = vpop.f32.mrf.mxu0 }
 0x248   : > { %v8845_v2 = vsel %vm12557_vm6, %v8843_v55, %v8844_v49  ;;  %v8846_v61 = vrot.slane %v8844_v49, 4  ;;  %11738 = vmatprep.mubr.msk.bf16.mxu0 %vm605_vm0, %v10828_v36  ;;  %v7626_v3 = vor.u32 %v7625_v30, %v7621_v0  ;;  %v4171_v22 = vadd.f32 %v15617_v14, %v17390_v18  ;;  %v17392_v55 = vld [vmem:[#allocation27_spill] sm:$0xff]  ;;  %v15687_v30 = vpop.f32.mrf.mxu1 }
 0x249   : > { %v7622_v46 = vsel %vm12527_vm5, %v7617_v5, %v7621_v0  ;;  %11672 = vmatprep.mubr.msk.bf16.mxu1 %vm605_vm0, %v10745_v28  ;;  %v4174_v25 = vadd.f32 %v15628_v39, %v17391_v43  ;;  %v4172_v62 = vadd.f32 %v4075_v11, %v17392_v55  ;;  %v17394_v10 = vshrl.u32 %v17393_v48, 16  ;;  %v12100_v39 = vld [vmem:[%s12349_s28 + $0xa4] sm:$0xf] }
 0x24a   : > { %v17395_v42 = vshll.u32 %v17393_v48, 16  ;;  %v7627_v8 = vrot.slane %v7626_v3, 4  ;;  %v8848_v14 = vsel %vm12557_vm6, %v8846_v61, %v8847_v53  ;;  %v15691_v36 = vadd.f32 %v5458_v35, %v4171_v22  ;;  %v12102_v53 = vld [vmem:[%s12349_s28 + $0xa0] sm:$0xf] }
 0x24b   : > { %v7636_v49 = vrot.slane %v17394_v10, 4  ;;  %v7643_v0 = vshll.u32 %v12100_v39, 16  ;;  %v10829_v11 = vcombine.low %v8845_v2, %v8848_v14  ;;  %v15694_v28 = vadd.f32 %v11509_v21, %v4174_v25  ;;  %v17399_v10 = vld [vmem:[#allocation61_spill] sm:$0xff]  ;;  %v11512_v25 = vpop.f32.mrf.mxu0  ;;  %v17401_v14 = vld [vmem:[#allocation28_spill] sm:$0xff] }
 0x24c   : > { %v7639_v5 = vrot.slane %v17395_v42, 5  ;;  %17396 = vst [vmem:[#allocation57_spill] sm:$0xff] %v15691_v36  ;;  %v15696_v18 = vadd.f32 %v5461_v9, %v4172_v62  ;;  %v7632_v55 = vsel %vm12527_vm5, %v7627_v8, %v7631_v19  ;;  %v17400_v3 = vshrl.u32 %v17399_v10, 16  ;;  %v15705_v62 = vpop.f32.mrf.mxu1 }
 0x24d   : > { %17397 = vst [vmem:[#allocation58_spill] sm:$0xff] %v15694_v28  ;;  %v7645_v48 = vrot.slane %v7643_v0, 5  ;;  %v7653_v61 = vshll.u32 %v12101_v32, 16  ;;  %v10746_v35 = vcombine.low %v7622_v46, %v7632_v55  ;;  %11739 = vmatmul.mubr.msk.bf16.gmra.mxu0 %vm605_vm0, %v10829_v11  ;;  %v7657_v21 = vshrl.u32 %v12101_v32, 16  ;;  %v10620_v11 = vld [vmem:[%s12349_s28 + $0xb0] sm:$0x1]  ;;  %v5474_v10 = vpop.f32.mrf.mxu0 }
 0x24e   : > { %17398 = vst [vmem:[#allocation20_spill] sm:$0xff] %v15696_v18  ;;  %v7640_v43 = vor.u32 %v7639_v5, %v7636_v49  ;;  %v7649_v42 = vrot.slane %v17400_v3, 4  ;;  %v10806_v22 = vrot.slane %v12102_v53, 9  ;;  %v8851_v49 = vrot.slane %v12100_v39, 5  ;;  %v15714_v3 = vpop.f32.mrf.mxu1 }
 0x24f   : > { %v7655_v19 = vrot.slane %v7653_v61, 5  ;;  %v8854_v5 = vrot.slane %v12101_v32, 5  ;;  %11673 = vmatmul.mubr.msk.bf16.gmra.mxu1 %vm605_vm0, %v10746_v35  ;;  %v7659_v8 = vrot.slane %v7657_v21, 4  ;;  %v4177_v0 = vadd.f32 %v15657_v34, %v17401_v14  ;;  %v11513_v34 = vpop.f32.mrf.mxu0 }
 0x250   : > { %v7641_v2 = vrot.slane %v7640_v43, 4  ;;  %v7650_v9 = vor.u32 %v7649_v42, %v7645_v48  ;;  %v12103_v43 = vld [vmem:[%s12349_s28 + $0xac] sm:$0xf]  ;;  %v8852_v39 = vsel %vm12557_vm6, %v10806_v22, %v8851_v49  ;;  %v8853_v32 = vrot.slane %v8851_v49, 4  ;;  %v15722_v14 = vpop.f32.mrf.mxu1 }
 0x251   : > { %v7663_v55 = vshll.u32 %v12103_v43, 16  ;;  %v8856_v42 = vrot.slane %v8854_v5, 4  ;;  %v7660_v61 = vor.u32 %v7659_v8, %v7655_v19  ;;  %v15718_v35 = vadd.f32 %v11512_v25, %v4177_v0  ;;  %v5477_v0 = vpop.f32.mrf.mxu0 }
 0x252   : > { %v7646_v46 = vsel %vm12527_vm5, %v7641_v2, %v7645_v48  ;;  %v7651_v53 = vrot.slane %v7650_v9, 4  ;;  %v17403_v2 = vshrl.u32 %v14747_v16, 16  ;;  %v8855_v9 = vsel %vm12557_vm6, %v8853_v32, %v8854_v5 }
 0x253   : > { %17402 = vst [vmem:[#allocation22_spill] sm:$0xff] %v15718_v35  ;;  %v7665_v48 = vrot.slane %v7663_v55, 5  ;;  %v7673_v28 = vshll.u32 %v10620_v11, 16  ;;  %v8857_v22 = vrot.slane %v12103_v43, 5  ;;  %v7661_v49 = vrot.slane %v7660_v61, 4  ;;  %v17404_v43 = vld [vmem:[#allocation29_spill] sm:$0xff] }
 0x254   : > { %v7669_v21 = vrot.slane %v17403_v2, 4  ;;  %v7656_v18 = vsel %vm12527_vm5, %v7651_v53, %v7655_v19  ;;  %v10830_v8 = vcombine.low %v8852_v39, %v8855_v9  ;;  %v8860_v35 = vrot.slane %v10620_v11, 5  ;;  %v15738_v53 = vpop.f32.mrf.mxu1  ;;  %v17406_v39 = vld [vmem:[#allocation31_spill] sm:$0xff] }
 0x255   : > { %v10747_v36 = vcombine.low %v7646_v46, %v7656_v18  ;;  %v7675_v55 = vrot.slane %v7673_v28, 5  ;;  %v8858_v16 = vsel %vm12557_vm6, %v8856_v42, %v8857_v22  ;;  %v8859_v2 = vrot.slane %v8857_v22, 4  ;;  %v17405_v46 = vld [vmem:[#allocation30_spill] sm:$0xff] }
 0x256   : > { %v7670_v25 = vor.u32 %v7669_v21, %v7665_v48  ;;  %11742 = vmatprep.mubr.msk.bf16.mxu0 %vm605_vm0, %v10830_v8  ;;  %v7666_v19 = vsel %vm12527_vm5, %v7661_v49, %v7665_v48  ;;  %v4175_v18 = vadd.f32 %v15666_v54, %v17404_v43  ;;  %v4178_v28 = vadd.f32 %v15672_v33, %v17405_v46  ;;  %v12104_v8 = vld [vmem:[%s12349_s28 + $0xb8] sm:$0xf]  ;;  %v12105_v43 = vld [vmem:[%s12349_s28 + $0xbc] sm:$0xf] }
 0x257   : > { %11676 = vmatprep.mubr.msk.bf16.mxu1 %vm605_vm0, %v10747_v36  ;;  %v8861_v11 = vsel %vm12557_vm6, %v8859_v2, %v8860_v35  ;;  %v4176_v36 = vadd.f32 %v15687_v30, %v17406_v39  ;;  %v17407_v32 = vshrl.u32 %v14770_v7, 16  ;;  %v17408_v61 = vshll.u32 %v14770_v7, 16  ;;  %v11516_v35 = vpop.f32.mrf.mxu0 }
 0x258   : > { %v7671_v5 = vrot.slane %v7670_v25, 4  ;;  %v10831_v33 = vcombine.low %v8858_v16, %v8861_v11  ;;  %v15750_v21 = vadd.f32 %v5474_v10, %v4175_v18  ;;  %v15752_v9 = vadd.f32 %v11513_v34, %v4178_v28  ;;  %v12106_v16 = vld [vmem:[%s12349_s28 + $0xb4] sm:$0xf]  ;;  %v15762_v18 = vpop.f32.mrf.mxu1 }
 0x259   : > { %v7680_v42 = vrot.slane %v17407_v32, 4  ;;  %v7683_v48 = vrot.slane %v17408_v61, 5  ;;  %v15754_v49 = vadd.f32 %v5477_v0, %v4176_v36  ;;  %v7687_v25 = vshll.u32 %v12104_v8, 16  ;;  %v10625_v32 = vld [vmem:[%s12349_s28 + $0xc4] sm:$0x1] }
 0x25a   : > { %v7676_v54 = vsel %vm12527_vm5, %v7671_v5, %v7675_v55  ;;  %17409 = vst [vmem:[#allocation23_spill] sm:$0xff] %v15750_v21  ;;  %17410 = vst [vmem:[#allocation59_spill] sm:$0xff] %v15752_v9  ;;  %11743 = vmatmul.mubr.msk.bf16.gmra.mxu0 %vm605_vm0, %v10831_v33  ;;  %v17412_v7 = vshrl.u32 %v14773_v59, 16  ;;  %v7697_v55 = vshll.u32 %v12105_v43, 16  ;;  %v7701_v10 = vshrl.u32 %v12105_v43, 16  ;;  %v5490_v5 = vpop.f32.mrf.mxu0  ;;  %v17413_v59 = vld [vmem:[#allocation36_spill] sm:$0xff] }
 0x25b   : > { %v10748_v22 = vcombine.low %v7666_v19, %v7676_v54  ;;  %17411 = vst [vmem:[#allocation24_spill] sm:$0xff] %v15754_v49  ;;  %v7684_v30 = vor.u32 %v7683_v48, %v7680_v42  ;;  %v10807_v34 = vrot.slane %v12106_v16, 9  ;;  %v7689_v19 = vrot.slane %v7687_v25, 5  ;;  %v12107_v42 = vld [vmem:[%s12349_s28 + $0xc0] sm:$0xf]  ;;  %v15769_v54 = vpop.f32.mrf.mxu1  ;;  %v17415_v49 = vld [vmem:[#allocation37_spill] sm:$0xff] }
 0x25c   : > { %v7693_v2 = vrot.slane %v17412_v7, 4  ;;  %v8864_v46 = vrot.slane %v12104_v8, 5  ;;  %v8867_v28 = vrot.slane %v12105_v43, 5  ;;  %v7699_v11 = vrot.slane %v7697_v55, 5  ;;  %v11517_v48 = vpop.f32.mrf.mxu0 }
 0x25d   : > { %11677 = vmatmul.mubr.msk.bf16.gmra.mxu1 %vm605_vm0, %v10748_v22  ;;  %v7685_v0 = vrot.slane %v7684_v30, 4  ;;  %v7703_v39 = vrot.slane %v7701_v10, 4  ;;  %v4181_v36 = vadd.f32 %v15705_v62, %v17413_v59  ;;  %v7707_v61 = vshll.u32 %v12107_v42, 16  ;;  %v15777_v10 = vpop.f32.mrf.mxu1 }
 0x25e   : > { %v7694_v7 = vor.u32 %v7693_v2, %v7689_v19  ;;  %v8865_v22 = vsel %vm12557_vm6, %v10807_v34, %v8864_v46  ;;  %v8866_v30 = vrot.slane %v8864_v46, 4  ;;  %v8869_v25 = vrot.slane %v8867_v28, 4  ;;  %v5493_v62 = vpop.f32.mrf.mxu0 }
 0x25f   : > { %v7690_v33 = vsel %vm12527_vm5, %v7685_v0, %v7689_v19  ;;  %v7704_v8 = vor.u32 %v7703_v39, %v7699_v11  ;;  %v15775_v43 = vadd.f32 %v11516_v35, %v4181_v36  ;;  %v7709_v55 = vrot.slane %v7707_v61, 5  ;;  %v15783_v4 = vpop.f32.mrf.mxu1 }
 0x260   : > { %v7695_v16 = vrot.slane %v7694_v7, 4  ;;  %v8868_v59 = vsel %vm12557_vm6, %v8866_v30, %v8867_v28  ;;  %v17416_v9 = vshrl.u32 %v17415_v49, 16  ;;  %v7717_v2 = vshll.u32 %v10625_v32, 16  ;;  %v11588_v39 = vpop.f32.mrf.mxu0  ;;  %v17417_v7 = vld [vmem:[#allocation38_spill] sm:$0xff] }
 0x261   : > { %17414 = vst [vmem:[#allocation25_spill] sm:$0xff] %v15775_v43  ;;  %v7705_v19 = vrot.slane %v7704_v8, 4  ;;  %v10832_v21 = vcombine.low %v8865_v22, %v8868_v59  ;;  %v8870_v34 = vrot.slane %v12107_v42, 5  ;;  %v8873_v46 = vrot.slane %v10625_v32, 5  ;;  %v15796_v22 = vpop.f32.mrf.mxu1  ;;  %v17419_v8 = vld [vmem:[#allocation39_spill] sm:$0xff] }
 0x262   : > { %v7713_v0 = vrot.slane %v17416_v9, 4  ;;  %v7700_v35 = vsel %vm12527_vm5, %v7695_v16, %v7699_v11  ;;  %v7719_v61 = vrot.slane %v7717_v2, 5  ;;  %v4179_v43 = vadd.f32 %v15714_v3, %v17417_v7  ;;  %v15794_v42 = vpop.f32.mrf.mxu0 }
 0x263   : > { %v10749_v28 = vcombine.low %v7690_v33, %v7700_v35  ;;  %11746 = vmatprep.mubr.msk.bf16.mxu0 %vm605_vm0, %v10832_v21  ;;  %v7710_v9 = vsel %vm12527_vm5, %v7705_v19, %v7709_v55  ;;  %v8871_v49 = vsel %vm12557_vm6, %v8869_v25, %v8870_v34  ;;  %v8872_v32 = vrot.slane %v8870_v34, 4  ;;  %v17420_v33 = vld [vmem:[#allocation62_spill] sm:$0xff]  ;;  %v17421_v25 = vld [vmem:[#allocation63_spill] sm:$0xff] }
 0x264   : > { %v7714_v36 = vor.u32 %v7713_v0, %v7709_v55  ;;  %v15798_v30 = vadd.f32 %v5490_v5, %v4179_v43  ;;  %v4182_v3 = vadd.f32 %v15722_v14, %v17419_v8  ;;  %v4180_v21 = vadd.f32 %v15738_v53, %v17420_v33  ;;  %v12108_v5 = vld [vmem:[%s12349_s28 + $0xcc] sm:$0xf]  ;;  %v15812_v19 = vpop.f32.mrf.mxu0  ;;  %v15814_v14 = vpop.f32.mrf.mxu1 }
 0x265   : > { %11680 = vmatprep.mubr.msk.bf16.mxu1 %vm605_vm0, %v10749_v28  ;;  %v8874_v55 = vsel %vm12557_vm6, %v8872_v32, %v8873_v46  ;;  %v17422_v16 = vshrl.u32 %v17421_v25, 16  ;;  %v17423_v0 = vshll.u32 %v17421_v25, 16  ;;  %v7731_v43 = vshll.u32 %v12108_v5, 16  ;;  %v17426_v32 = vld [vmem:[#allocation64_spill] sm:$0xff] }
 0x266   : > { %v7715_v11 = vrot.slane %v7714_v36, 4  ;;  %17418 = vst [vmem:[#allocation26_spill] sm:$0xff] %v15798_v30  ;;  %v10833_v34 = vcombine.low %v8871_v49, %v8874_v55  ;;  %v15818_v35 = vadd.f32 %v11517_v48, %v4182_v3  ;;  %v15820_v46 = vadd.f32 %v5493_v62, %v4180_v21  ;;  %v15824_v25 = vpop.f32.mrf.mxu0  ;;  %v12110_v48 = vld [vmem:[%s12349_s28 + $0xc8] sm:$0xf]  ;;  %v17428_v21 = vld [vmem:[#allocation65_spill] sm:$0xff] }
 0x267   : > { %v7724_v59 = vrot.slane %v17422_v16, 4  ;;  %v7727_v2 = vrot.slane %v17423_v0, 5  ;;  %v7733_v28 = vrot.slane %v7731_v43, 5  ;;  %v17427_v8 = vshrl.u32 %v17426_v32, 16  ;;  %v15826_v16 = vpop.f32.mrf.mxu1  ;;  %v12109_v0 = vld [vmem:[%s12349_s28 + $0xd0] sm:$0xf] }
 0x268   : > { %v7720_v53 = vsel %vm12527_vm5, %v7715_v11, %v7719_v61  ;;  %17424 = vst [vmem:[#allocation27_spill] sm:$0xff] %v15818_v35  ;;  %17425 = vst [vmem:[#allocation60_spill] sm:$0xff] %v15820_v46  ;;  %11747 = vmatmul.mubr.msk.bf16.gmra.mxu0 %vm605_vm0, %v10833_v34  ;;  %v7741_v30 = vshll.u32 %v12109_v0, 16  ;;  %v7745_v61 = vshrl.u32 %v12109_v0, 16  ;;  %v10808_v49 = vrot.slane %v12110_v48, 9 }
 0x269   : > { %v10750_v36 = vcombine.low %v7710_v9, %v7720_v53  ;;  %v7728_v7 = vor.u32 %v7727_v2, %v7724_v59  ;;  %v7737_v33 = vrot.slane %v17427_v8, 4  ;;  %v8877_v62 = vrot.slane %v12108_v5, 5  ;;  %v15834_v59 = vpop.f32.mrf.mxu0  ;;  %v15836_v2 = vpop.f32.mrf.mxu1  ;;  %v10630_v5 = vld [vmem:[%s12349_s28 + $0xd8] sm:$0x1] }
 0x26a   : > { %v8880_v3 = vrot.slane %v12109_v0, 5  ;;  %v6413_v55 = vadd.f32 %v15762_v18, %v17428_v21  ;;  %17429 = vst [vmem:[#allocation61_spill] sm:$0xff] %v15836_v2  ;;  %v7743_v43 = vrot.slane %v7741_v30, 5  ;;  %v7747_v53 = vrot.slane %v7745_v61, 4  ;;  %v12111_v61 = vld [vmem:[%s12349_s28 + $0xd4] sm:$0xf] }
 0x26b   : > { %11681 = vmatmul.mubr.msk.bf16.gmra.mxu1 %vm605_vm0, %v10750_v36  ;;  %v7729_v9 = vrot.slane %v7728_v7, 4  ;;  %v7738_v11 = vor.u32 %v7737_v33, %v7733_v28  ;;  %v8878_v34 = vsel %vm12557_vm6, %v10808_v49, %v8877_v62  ;;  %v8879_v32 = vrot.slane %v8877_v62, 4  ;;  %v15845_v18 = vpop.f32.mrf.mxu0  ;;  %v15847_v0 = vpop.f32.mrf.mxu1  ;;  %v17431_v49 = vld [vmem:[#allocation66_spill] sm:$0xff] }
 0x26c   : > { %v8882_v8 = vrot.slane %v8880_v3, 4  ;;  %v15843_v33 = vadd.f32 %v11588_v39, %v6413_v55  ;;  %v7748_v48 = vor.u32 %v7747_v53, %v7743_v43  ;;  %v7751_v21 = vshll.u32 %v12111_v61, 16 }
 0x26d   : > { %v7734_v36 = vsel %vm12527_vm5, %v7729_v9, %v7733_v28  ;;  %v7739_v7 = vrot.slane %v7738_v11, 4  ;;  %v8881_v30 = vsel %vm12557_vm6, %v8879_v32, %v8880_v3  ;;  %v17432_v62 = vshrl.u32 %v17431_v49, 16  ;;  %v15856_v55 = vpop.f32.mrf.mxu0 }
 0x26e   : > { %17430 = vst [vmem:[#allocation28_spill] sm:$0xff] %v15843_v33  ;;  %v10834_v9 = vcombine.low %v8878_v34, %v8881_v30  ;;  %v7761_v11 = vshll.u32 %v10630_v5, 16  ;;  %v8883_v39 = vrot.slane %v12111_v61, 5  ;;  %v15858_v33 = vpop.f32.mrf.mxu1  ;;  %v7749_v46 = vrot.slane %v7748_v48, 4  ;;  %v17435_v48 = vld [vmem:[#allocation68_spill] sm:$0xff]  ;;  %v17436_v61 = vld [vmem:[#allocation69_spill] sm:$0xff] }
 0x26f   : > { %v7757_v2 = vrot.slane %v17432_v62, 4  ;;  %v7744_v28 = vsel %vm12527_vm5, %v7739_v7, %v7743_v43  ;;  %v7753_v35 = vrot.slane %v7751_v21, 5  ;;  %v8886_v24 = vrot.slane %v10630_v5, 5  ;;  %v17433_v62 = vld [vmem:[#allocation67_spill] sm:$0xff]  ;;  %v15865_v34 = vpop.f32.mrf.mxu0 }
 0x270   : > { %v10751_v53 = vcombine.low %v7734_v36, %v7744_v28  ;;  %11750 = vmatprep.mubr.msk.bf16.mxu0 %vm605_vm0, %v10834_v9  ;;  %v7763_v3 = vrot.slane %v7761_v11, 5  ;;  %v8884_v32 = vsel %vm12557_vm6, %v8882_v8, %v8883_v39  ;;  %v8885_v49 = vrot.slane %v8883_v39, 4  ;;  %17434 = vst [vmem:[#allocation29_spill] sm:$0xff] %v15865_v34  ;;  %v15867_v7 = vpop.f32.mrf.mxu1  ;;  %v17438_v28 = vld [vmem:[#allocation70_spill] sm:$0xff] }
 0x271   : > { %v6411_v43 = vadd.f32 %v15769_v54, %v17433_v62  ;;  %v7754_v5 = vsel %vm12527_vm5, %v7749_v46, %v7753_v35  ;;  %v7758_v36 = vor.u32 %v7757_v2, %v7753_v35  ;;  %v6414_v30 = vadd.f32 %v15777_v10, %v17435_v48  ;;  %v15885_v35 = vpop.f32.mrf.mxu0 }
 0x272   : > { %11684 = vmatprep.mubr.msk.bf16.mxu1 %vm605_vm0, %v10751_v53  ;;  %v6412_v8 = vadd.f32 %v15783_v4, %v17436_v61  ;;  %v8887_v54 = vsel %vm12557_vm6, %v8885_v49, %v8886_v24  ;;  %v17439_v9 = vshrl.u32 %v17438_v28, 16  ;;  %v17440_v39 = vshll.u32 %v17438_v28, 16  ;;  %v15887_v2 = vpop.f32.mrf.mxu1  ;;  %v12112_v49 = vld [vmem:[%s12349_s28 + $0xe0] sm:$0xf]  ;;  %v12113_v28 = vld [vmem:[%s12349_s28 + $0xe4] sm:$0xf] }
 0x273   : > { %v15879_v21 = vadd.f32 %v15794_v42, %v6411_v43  ;;  %17441 = vst [vmem:[#allocation31_spill] sm:$0xff] %v15887_v2  ;;  %v7759_v10 = vrot.slane %v7758_v36, 4  ;;  %v10835_v53 = vcombine.low %v8884_v32, %v8887_v54  ;;  %v15890_v4 = vadd.f32 %v15812_v19, %v6414_v30  ;;  %v17444_v43 = vld [vmem:[#allocation71_spill] sm:$0xff] }
 0x274   : > { %v7768_v11 = vrot.slane %v17439_v9, 4  ;;  %v7771_v46 = vrot.slane %v17440_v39, 5  ;;  %v15893_v24 = vadd.f32 %v15824_v25, %v6412_v8  ;;  %v7775_v62 = vshll.u32 %v12112_v49, 16  ;;  %v15899_v39 = vpop.f32.mrf.mxu0  ;;  %v15901_v2 = vpop.f32.mrf.mxu1  ;;  %v12114_v25 = vld [vmem:[%s12349_s28 + $0xdc] sm:$0xf] }
 0x275   : > { %17437 = vst [vmem:[#allocation30_spill] sm:$0xff] %v15879_v21  ;;  %17442 = vst [vmem:[#allocation36_spill] sm:$0xff] %v15890_v4  ;;  %v17445_v48 = vshrl.u32 %v17444_v43, 16  ;;  %v7785_v9 = vshll.u32 %v12113_v28, 16  ;;  %v7764_v32 = vsel %vm12527_vm5, %v7759_v10, %v7763_v3  ;;  %11751 = vmatmul.mubr.msk.bf16.gmra.mxu0 %vm605_vm0, %v10835_v53  ;;  %v7789_v19 = vshrl.u32 %v12113_v28, 16 }
 0x276   : > { %17443 = vst [vmem:[#allocation37_spill] sm:$0xff] %v15893_v24  ;;  %v7772_v42 = vor.u32 %v7771_v46, %v7768_v11  ;;  %v10809_v36 = vrot.slane %v12114_v25, 9  ;;  %v8890_v30 = vrot.slane %v12112_v49, 5  ;;  %v10752_v8 = vcombine.low %v7754_v5, %v7764_v32  ;;  %v15907_v43 = vpop.f32.mrf.mxu0  ;;  %v17446_v5 = vld [vmem:[#allocation72_spill] sm:$0xff] }
 0x277   : > { %v7781_v61 = vrot.slane %v17445_v48, 4  ;;  %v7777_v11 = vrot.slane %v7775_v62, 5  ;;  %v7787_v46 = vrot.slane %v7785_v9, 5  ;;  %v15909_v48 = vpop.f32.mrf.mxu1  ;;  %v7791_v34 = vrot.slane %v7789_v19, 4  ;;  %v10635_v62 = vld [vmem:[%s12349_s28 + $0xec] sm:$0x1] }
 0x278   : > { %v7773_v54 = vrot.slane %v7772_v42, 4  ;;  %v8891_v3 = vsel %vm12557_vm6, %v10809_v36, %v8890_v30  ;;  %v8892_v10 = vrot.slane %v8890_v30, 4  ;;  %v8893_v53 = vrot.slane %v12113_v28, 5  ;;  %11685 = vmatmul.mubr.msk.bf16.gmra.mxu1 %vm605_vm0, %v10752_v8  ;;  %v12115_v9 = vld [vmem:[%s12349_s28 + $0xe8] sm:$0xf]  ;;  %v15920_v24 = vpop.f32.mrf.mxu0  ;;  %v17448_v30 = vld [vmem:[#allocation73_spill] sm:$0xff] }
 0x279   : > { %v7782_v25 = vor.u32 %v7781_v61, %v7777_v11  ;;  %v6417_v42 = vadd.f32 %v15796_v22, %v17446_v5  ;;  %v7795_v32 = vshll.u32 %v12115_v9, 16  ;;  %17447 = vst [vmem:[#allocation38_spill] sm:$0xff] %v15920_v24  ;;  %v15922_v19 = vpop.f32.mrf.mxu1  ;;  %v7792_v4 = vor.u32 %v7791_v34, %v7787_v46 }
 0x27a   : > { %v7778_v49 = vsel %vm12527_vm5, %v7773_v54, %v7777_v11  ;;  %v8894_v28 = vsel %vm12557_vm6, %v8892_v10, %v8893_v53  ;;  %v8895_v36 = vrot.slane %v8893_v53, 4  ;;  %v17449_v8 = vshrl.u32 %v17448_v30, 16  ;;  %v15931_v5 = vpop.f32.mrf.mxu0 }
 0x27b   : > { %v7783_v54 = vrot.slane %v7782_v25, 4  ;;  %v10836_v61 = vcombine.low %v8891_v3, %v8894_v28  ;;  %v15929_v11 = vadd.f32 %v15834_v59, %v6417_v42  ;;  %v7797_v22 = vrot.slane %v7795_v32, 5  ;;  %v15933_v15 = vpop.f32.mrf.mxu1  ;;  %v17452_v3 = vld [vmem:[#allocation40_spill] sm:$0xff]  ;;  %v17453_v25 = vld [vmem:[#allocation75_spill] sm:$0xff] }
 0x27c   : > { %v7801_v21 = vrot.slane %v17449_v8, 4  ;;  %17451 = vst [vmem:[#allocation62_spill] sm:$0xff] %v15933_v15  ;;  %v7793_v24 = vrot.slane %v7792_v4, 4  ;;  %v7805_v41 = vshll.u32 %v10635_v62, 16  ;;  %v8896_v34 = vrot.slane %v12115_v9, 5  ;;  %v15942_v32 = vpop.f32.mrf.mxu0 }
 0x27d   : > { %17450 = vst [vmem:[#allocation39_spill] sm:$0xff] %v15929_v11  ;;  %v8899_v63 = vrot.slane %v10635_v62, 5  ;;  %v7788_v10 = vsel %vm12527_vm5, %v7783_v54, %v7787_v46  ;;  %11754 = vmatprep.mubr.msk.bf16.mxu0 %vm605_vm0, %v10836_v61  ;;  %v6415_v59 = vadd.f32 %v15814_v14, %v17452_v3  ;;  %v6418_v42 = vadd.f32 %v15826_v16, %v17453_v25  ;;  %v15944_v28 = vpop.f32.mrf.mxu1  ;;  %v15961_v54 = vld [vmem:[%s12349_s28 + $0x144] sm:$0xf] }
 0x27e   : > { %v7802_v53 = vor.u32 %v7801_v21, %v7797_v22  ;;  %v10753_v4 = vcombine.low %v7778_v49, %v7788_v10  ;;  %v7798_v62 = vsel %vm12527_vm5, %v7793_v24, %v7797_v22  ;;  %v7807_v46 = vrot.slane %v7805_v41, 5  ;;  %v15956_v8 = vpop.f32.mrf.mxu0  ;;  %v17456_v24 = vld [vmem:[#allocation41_spill] sm:$0xff]  ;;  %v17459_v3 = vld [vmem:[#allocation74_spill] sm:$0xff] }
 0x27f   : > { %v8897_v9 = vsel %vm12557_vm6, %v8895_v36, %v8896_v34  ;;  %v8898_v30 = vrot.slane %v8896_v34, 4  ;;  %v15951_v14 = vadd.f32 %v15845_v18, %v6415_v59  ;;  %v15954_v16 = vadd.f32 %v15856_v55, %v6418_v42  ;;  %v15958_v49 = vpop.f32.mrf.mxu1  ;;  %v12117_v34 = vld [vmem:[%s12349_s28 + $0xf4] sm:$0xf]  ;;  %v12118_v42 = vld [vmem:[%s12349_s28 + $0xf8] sm:$0xf] }
 0x280   : > { %v7803_v21 = vrot.slane %v7802_v53, 4  ;;  %11688 = vmatprep.mubr.msk.bf16.mxu1 %vm605_vm0, %v10753_v4  ;;  %v17457_v36 = vshrl.u32 %v17456_v24, 16  ;;  %v17458_v18 = vshll.u32 %v17456_v24, 16  ;;  %v7819_v55 = vshll.u32 %v12117_v34, 16  ;;  %v15977_v41 = vpop.f32.mrf.mxu0  ;;  %v15982_v24 = vld [vmem:[%s12349_s28 + $0x14c] sm:$0xf] }
 0x281   : > { %17454 = vst [vmem:[#allocation63_spill] sm:$0xff] %v15951_v14  ;;  %17455 = vst [vmem:[#allocation64_spill] sm:$0xff] %v15954_v16  ;;  %v8900_v53 = vsel %vm12557_vm6, %v8898_v30, %v8899_v63  ;;  %v17460_v59 = vshrl.u32 %v17459_v3, 16  ;;  %v7829_v4 = vshll.u32 %v12118_v42, 16  ;;  %v12120_v30 = vld [vmem:[%s12349_s28 + $0xf0] sm:$0xf] }
 0x282   : > { %v7812_v61 = vrot.slane %v17457_v36, 4  ;;  %v7815_v22 = vrot.slane %v17458_v18, 5  ;;  %v7808_v10 = vsel %vm12527_vm5, %v7803_v21, %v7807_v46  ;;  %17461 = vst [vmem:[#allocation65_spill] sm:$0xff] %v15977_v41  ;;  %v15979_v36 = vpop.f32.mrf.mxu1  ;;  %v10837_v16 = vcombine.low %v8897_v9, %v8900_v53  ;;  %v17462_v9 = vld [vmem:[#allocation77_spill] sm:$0xff] }
 0x283   : > { %v7825_v25 = vrot.slane %v17460_v59, 4  ;;  %v10754_v15 = vcombine.low %v7798_v62, %v7808_v10  ;;  %v7821_v46 = vrot.slane %v7819_v55, 5  ;;  %v7831_v63 = vrot.slane %v7829_v4, 5  ;;  %v15986_v59 = vpop.f32.mrf.mxu0  ;;  %v10640_v10 = vld [vmem:[%s12349_s28 + $0x100] sm:$0x1] }
 0x284   : > { %v7816_v14 = vor.u32 %v7815_v22, %v7812_v61  ;;  %v7833_v21 = vshrl.u32 %v12118_v42, 16  ;;  %v10810_v3 = vrot.slane %v12120_v30, 9  ;;  %v15988_v11 = vpop.f32.mrf.mxu1  ;;  %11755 = vmatmul.mubr.msk.bf16.gmra.mxu0 %vm605_vm0, %v10837_v16  ;;  %v8903_v18 = vrot.slane %v12117_v34, 5  ;;  %v12121_v53 = vld [vmem:[%s12349_s28 + $0xfc] sm:$0xf]  ;;  %v17463_v30 = vld [vmem:[#allocation78_spill] sm:$0xff] }
 0x285   : > { %11689 = vmatmul.mubr.msk.bf16.gmra.mxu1 %vm605_vm0, %v10754_v15  ;;  %v8906_v62 = vrot.slane %v12118_v42, 5  ;;  %v6421_v61 = vadd.f32 %v15847_v0, %v17462_v9  ;;  %v7826_v22 = vor.u32 %v7825_v25, %v7821_v46  ;;  %v7839_v4 = vshll.u32 %v12121_v53, 16  ;;  %v15998_v44 = vpop.f32.mrf.mxu0 }
 0x286   : > { %v7817_v41 = vrot.slane %v7816_v14, 4  ;;  %v7835_v55 = vrot.slane %v7833_v21, 4  ;;  %v17464_v12 = vshrl.u32 %v17463_v30, 16  ;;  %v16000_v50 = vpop.f32.mrf.mxu1  ;;  %v8904_v14 = vsel %vm12557_vm6, %v10810_v3, %v8903_v18 }
 0x287   : > { %v8905_v16 = vrot.slane %v8903_v18, 4  ;;  %v8908_v0 = vrot.slane %v8906_v62, 4  ;;  %v7827_v34 = vrot.slane %v7826_v22, 4  ;;  %v16007_v42 = vadd.f32 %v15885_v35, %v6421_v61  ;;  %v16009_v9 = vpop.f32.mrf.mxu0 }
 0x288   : > { %v7845_v29 = vrot.slane %v17464_v12, 4  ;;  %v7822_v15 = vsel %vm12527_vm5, %v7817_v41, %v7821_v46  ;;  %v7836_v25 = vor.u32 %v7835_v55, %v7831_v63  ;;  %v7841_v21 = vrot.slane %v7839_v4, 5  ;;  %v16011_v12 = vpop.f32.mrf.mxu1 }
 0x289   : > { %17465 = vst [vmem:[#allocation66_spill] sm:$0xff] %v16007_v42  ;;  %v8907_v30 = vsel %vm12557_vm6, %v8905_v16, %v8906_v62  ;;  %v7849_v6 = vshll.u32 %v10640_v10, 16  ;;  %v8909_v41 = vrot.slane %v12121_v53, 5  ;;  %v8912_v46 = vrot.slane %v10640_v10, 5  ;;  %v16017_v35 = vpop.f32.mrf.mxu0  ;;  %v17466_v53 = vld [vmem:[#allocation42_spill] sm:$0xff] }
 0x28a   : > { %v7832_v18 = vsel %vm12527_vm5, %v7827_v34, %v7831_v63  ;;  %v7837_v3 = vrot.slane %v7836_v25, 4  ;;  %v10838_v22 = vcombine.low %v8904_v14, %v8907_v30  ;;  %v7846_v55 = vor.u32 %v7845_v29, %v7841_v21  ;;  %v16019_v61 = vpop.f32.mrf.mxu1  ;;  %v17467_v29 = vld [vmem:[#allocation79_spill] sm:$0xff] }
 0x28b   : > { %v10755_v4 = vcombine.low %v7822_v15, %v7832_v18  ;;  %v7851_v42 = vrot.slane %v7849_v6, 5  ;;  %v8910_v31 = vsel %vm12557_vm6, %v8908_v0, %v8909_v41  ;;  %v8911_v62 = vrot.slane %v8909_v41, 4  ;;  %v16030_v34 = vpop.f32.mrf.mxu0  ;;  %v16035_v6 = vld [vmem:[%s12349_s28 + $0x154] sm:$0xf] }
 0x28c   : > { %11758 = vmatprep.mubr.msk.bf16.mxu0 %vm605_vm0, %v10838_v22  ;;  %v7842_v10 = vsel %vm12527_vm5, %v7837_v3, %v7841_v21  ;;  %v7847_v63 = vrot.slane %v7846_v55, 4  ;;  %v6419_v14 = vadd.f32 %v15858_v33, %v17466_v53  ;;  %v6422_v16 = vadd.f32 %v15867_v7, %v17467_v29  ;;  %v16032_v15 = vpop.f32.mrf.mxu1  ;;  %v17468_v21 = vld [vmem:[#allocation43_spill] sm:$0xff] }
 0x28d   : > { %11692 = vmatprep.mubr.msk.bf16.mxu1 %vm605_vm0, %v10755_v4  ;;  %v8913_v25 = vsel %vm12557_vm6, %v8911_v62, %v8912_v46  ;;  %v17469_v30 = vshrl.u32 %v17468_v21, 16  ;;  %v17470_v7 = vshll.u32 %v17468_v21, 16  ;;  %v16053_v4 = vpop.f32.mrf.mxu0  ;;  %v12123_v21 = vld [vmem:[%s12349_s28 + $0x108] sm:$0xf] }
 0x28e   : > { %v7852_v18 = vsel %vm12527_vm5, %v7847_v63, %v7851_v42  ;;  %v10839_v3 = vcombine.low %v8910_v31, %v8913_v25  ;;  %v16048_v22 = vadd.f32 %v15899_v39, %v6419_v14  ;;  %v16051_v55 = vadd.f32 %v15907_v43, %v6422_v16  ;;  %v16055_v46 = vpop.f32.mrf.mxu1  ;;  %v17473_v42 = vld [vmem:[#allocation44_spill] sm:$0xff]  ;;  %v12124_v39 = vld [vmem:[%s12349_s28 + $0x10c] sm:$0xf]  ;;  %v12125_v16 = vld [vmem:[%s12349_s28 + $0x104] sm:$0xf] }
 0x28f   : > { %v7856_v33 = vrot.slane %v17469_v30, 4  ;;  %v7859_v41 = vrot.slane %v17470_v7, 5  ;;  %v10756_v53 = vcombine.low %v7842_v10, %v7852_v18  ;;  %v7863_v30 = vshll.u32 %v12123_v21, 16  ;;  %v16064_v7 = vpop.f32.mrf.mxu0 }
 0x290   : > { %17471 = vst [vmem:[#allocation67_spill] sm:$0xff] %v16048_v22  ;;  %17472 = vst [vmem:[#allocation68_spill] sm:$0xff] %v16051_v55  ;;  %11759 = vmatmul.mubr.msk.bf16.gmra.mxu0 %vm605_vm0, %v10839_v3  ;;  %v17474_v31 = vshrl.u32 %v17473_v42, 16  ;;  %v7873_v43 = vshll.u32 %v12124_v39, 16  ;;  %v7877_v14 = vshrl.u32 %v12124_v39, 16  ;;  %v10811_v25 = vrot.slane %v12125_v16, 9  ;;  %v16066_v0 = vpop.f32.mrf.mxu1 }
 0x291   : > { %v7860_v29 = vor.u32 %v7859_v41, %v7856_v33  ;;  %11693 = vmatmul.mubr.msk.bf16.gmra.mxu1 %vm605_vm0, %v10756_v53  ;;  %v7865_v33 = vrot.slane %v7863_v30, 5  ;;  %v8916_v41 = vrot.slane %v12123_v21, 5  ;;  %v8919_v18 = vrot.slane %v12124_v39, 5  ;;  %v10645_v55 = vld [vmem:[%s12349_s28 + $0x114] sm:$0x1]  ;;  %v16073_v38 = vpop.f32.mrf.mxu0 }
 0x292   : > { %v7869_v63 = vrot.slane %v17474_v31, 4  ;;  %v7875_v3 = vrot.slane %v7873_v43, 5  ;;  %v7879_v42 = vrot.slane %v7877_v14, 4  ;;  %v17475_v31 = vld [vmem:[#allocation82_spill] sm:$0xff]  ;;  %v12126_v22 = vld [vmem:[%s12349_s28 + $0x110] sm:$0xf]  ;;  %v16075_v16 = vpop.f32.mrf.mxu1 }
 0x293   : > { %v7861_v10 = vrot.slane %v7860_v29, 4  ;;  %v6425_v62 = vadd.f32 %v15901_v2, %v17475_v31  ;;  %v7883_v13 = vshll.u32 %v12126_v22, 16  ;;  %v8917_v29 = vsel %vm12557_vm6, %v10811_v25, %v8916_v41  ;;  %v16084_v14 = vpop.f32.mrf.mxu0 }
 0x294   : > { %v7870_v53 = vor.u32 %v7869_v63, %v7865_v33  ;;  %v8918_v21 = vrot.slane %v8916_v41, 4  ;;  %v7880_v30 = vor.u32 %v7879_v42, %v7875_v3  ;;  %v8921_v39 = vrot.slane %v8919_v18, 4  ;;  %v16086_v31 = vpop.f32.mrf.mxu1  ;;  %v17477_v63 = vld [vmem:[#allocation81_spill] sm:$0xff] }
 0x295   : > { %v7866_v51 = vsel %vm12527_vm5, %v7861_v10, %v7865_v33  ;;  %v16082_v43 = vadd.f32 %v15931_v5, %v6425_v62  ;;  %v7885_v2 = vrot.slane %v7883_v13, 5  ;;  %v17478_v33 = vshrl.u32 %v17477_v63, 16  ;;  %v16092_v5 = vpop.f32.mrf.mxu0 }
 0x296   : > { %v7871_v1 = vrot.slane %v7870_v53, 4  ;;  %v8920_v10 = vsel %vm12557_vm6, %v8918_v21, %v8919_v18  ;;  %v7893_v25 = vshll.u32 %v10645_v55, 16  ;;  %v7881_v41 = vrot.slane %v7880_v30, 4  ;;  %v16094_v13 = vpop.f32.mrf.mxu1  ;;  %v16101_v21 = vld [vmem:[%s12349_s28 + $0x158] sm:$0xf] }
 0x297   : > { %17476 = vst [vmem:[#allocation69_spill] sm:$0xff] %v16082_v43  ;;  %v7889_v45 = vrot.slane %v17478_v33, 4  ;;  %v10840_v42 = vcombine.low %v8917_v29, %v8920_v10  ;;  %v8922_v52 = vrot.slane %v12126_v22, 5  ;;  %v8925_v60 = vrot.slane %v10645_v55, 5  ;;  %v16107_v10 = vpop.f32.mrf.mxu0 }
 0x298   : > { %v7876_v62 = vsel %vm12527_vm5, %v7871_v1, %v7875_v3  ;;  %v7895_v53 = vrot.slane %v7893_v25, 5  ;;  %v6423_v18 = vadd.f32 %v15909_v48, %v17479_v37  ;;  %v7886_v37 = vsel %vm12527_vm5, %v7881_v41, %v7885_v2  ;;  %v17481_v3 = vld [vmem:[#allocation85_spill] sm:$0xff]  ;;  %v12130_v41 = vld [vmem:[%s12349_s28 + $0x120] sm:$0xf] }
 0x299   : > { %v7890_v43 = vor.u32 %v7889_v45, %v7885_v2  ;;  %v10757_v29 = vcombine.low %v7866_v51, %v7876_v62  ;;  %11762 = vmatprep.mubr.msk.bf16.mxu0 %vm605_vm0, %v10840_v42  ;;  %v8923_v22 = vsel %vm12557_vm6, %v8921_v39, %v8922_v52  ;;  %v8924_v55 = vrot.slane %v8922_v52, 4  ;;  %v16109_v45 = vpop.f32.mrf.mxu1  ;;  %v17482_v52 = vld [vmem:[#allocation83_spill] sm:$0xff]  ;;  %v12128_v62 = vld [vmem:[%s12349_s28 + $0x11c] sm:$0xf]  ;;  %v16126_v2 = vpop.f32.mrf.mxu0 }
 0x29a   : > { %v16114_v48 = vadd.f32 %v15942_v32, %v6423_v18  ;;  %v6426_v51 = vadd.f32 %v15922_v19, %v17481_v3  ;;  %v17483_v63 = vshrl.u32 %v17482_v52, 16  ;;  %v17484_v25 = vshll.u32 %v17482_v52, 16  ;;  %v16131_v19 = vld [vmem:[%s12349_s28 + $0x160] sm:$0xf] }
 0x29b   : > { %v7891_v1 = vrot.slane %v7890_v43, 4  ;;  %11696 = vmatprep.mubr.msk.bf16.mxu1 %vm605_vm0, %v10757_v29  ;;  %v8926_v39 = vsel %vm12557_vm6, %v8924_v55, %v8925_v60  ;;  %v7907_v43 = vshll.u32 %v12128_v62, 16  ;;  %v16128_v32 = vpop.f32.mrf.mxu1  ;;  %v7917_v26 = vshll.u32 %v12130_v41, 16 }
 0x29c   : > { %17480 = vst [vmem:[#allocation70_spill] sm:$0xff] %v16114_v48  ;;  %v7900_v33 = vrot.slane %v17483_v63, 4  ;;  %v7903_v42 = vrot.slane %v17484_v25, 5  ;;  %17485 = vst [vmem:[#allocation71_spill] sm:$0xff] %v16128_v32  ;;  %v10841_v18 = vcombine.low %v8923_v22, %v8926_v39  ;;  %v16137_v29 = vadd.f32 %v15956_v8, %v6426_v51  ;;  %v17487_v63 = vld [vmem:[#allocation84_spill] sm:$0xff]  ;;  %v16141_v48 = vpop.f32.mrf.mxu0 }
 0x29d   : > { %v7896_v60 = vsel %vm12527_vm5, %v7891_v1, %v7895_v53  ;;  %v7909_v52 = vrot.slane %v7907_v43, 5  ;;  %v17488_v25 = vshrl.u32 %v17487_v63, 16  ;;  %v16143_v23 = vpop.f32.mrf.mxu1  ;;  %v7921_v53 = vshrl.u32 %v12130_v41, 16  ;;  %v12131_v22 = vld [vmem:[%s12349_s28 + $0x118] sm:$0xf] }
 0x29e   : > { %17486 = vst [vmem:[#allocation72_spill] sm:$0xff] %v16137_v29  ;;  %v10758_v55 = vcombine.low %v7886_v37, %v7896_v60  ;;  %v7904_v3 = vor.u32 %v7903_v42, %v7900_v33  ;;  %17489 = vst [vmem:[#allocation73_spill] sm:$0xff] %v16143_v23  ;;  %11763 = vmatmul.mubr.msk.bf16.gmra.mxu0 %vm605_vm0, %v10841_v18  ;;  %v10812_v1 = vrot.slane %v12131_v22, 9  ;;  %v8929_v8 = vrot.slane %v12128_v62, 5  ;;  %v17490_v33 = vld [vmem:[#allocation47_spill] sm:$0xff]  ;;  %v16151_v43 = vpop.f32.mrf.mxu0 }
 0x29f   : > { %v7913_v30 = vrot.slane %v17488_v25, 4  ;;  %v8932_v39 = vrot.slane %v12130_v41, 5  ;;  %v6429_v42 = vadd.f32 %v15944_v28, %v17490_v33  ;;  %v16153_v60 = vpop.f32.mrf.mxu1  ;;  %v7919_v18 = vrot.slane %v7917_v26, 5  ;;  %v10650_v62 = vld [vmem:[%s12349_s28 + $0x128] sm:$0x1] }
 0x2a0   : > { %11697 = vmatmul.mubr.msk.bf16.gmra.mxu1 %vm605_vm0, %v10758_v55  ;;  %v7905_v37 = vrot.slane %v7904_v3, 4  ;;  %17491 = vst [vmem:[#allocation40_spill] sm:$0xff] %v16153_v60  ;;  %v7923_v63 = vrot.slane %v7921_v53, 4  ;;  %v8930_v25 = vsel %vm12557_vm6, %v10812_v1, %v8929_v8  ;;  %v8931_v22 = vrot.slane %v8929_v8, 4  ;;  %v16163_v28 = vpop.f32.mrf.mxu0  ;;  %v12132_v53 = vld [vmem:[%s12349_s28 + $0x124] sm:$0xf] }
 0x2a1   : > { %v7914_v51 = vor.u32 %v7913_v30, %v7909_v52  ;;  %v8934_v41 = vrot.slane %v8932_v39, 4  ;;  %v16161_v3 = vadd.f32 %v15986_v59, %v6429_v42  ;;  %17493 = vst [vmem:[#allocation41_spill] sm:$0xff] %v16163_v28  ;;  %v16165_v33 = vpop.f32.mrf.mxu1  ;;  %v7927_v1 = vshll.u32 %v12132_v53, 16  ;;  %v17495_v8 = vld [vmem:[#allocation86_spill] sm:$0xff] }
 0x2a2   : > { %v7910_v55 = vsel %vm12527_vm5, %v7905_v37, %v7909_v52  ;;  %17494 = vst [vmem:[#allocation74_spill] sm:$0xff] %v16165_v33  ;;  %v7924_v29 = vor.u32 %v7923_v63, %v7919_v18  ;;  %v8933_v26 = vsel %vm12557_vm6, %v8931_v22, %v8932_v39  ;;  %v17496_v60 = vshrl.u32 %v17495_v8, 16  ;;  %v16174_v42 = vpop.f32.mrf.mxu0  ;;  %v17497_v8 = vld [vmem:[#allocation48_spill] sm:$0xff] }
 0x2a3   : > { %v7915_v30 = vrot.slane %v7914_v51, 4  ;;  %17492 = vst [vmem:[#allocation75_spill] sm:$0xff] %v16161_v3  ;;  %v10842_v37 = vcombine.low %v8930_v25, %v8933_v26  ;;  %v7937_v51 = vshll.u32 %v10650_v62, 16  ;;  %v8935_v59 = vrot.slane %v12132_v53, 5  ;;  %v16176_v3 = vpop.f32.mrf.mxu1  ;;  %v17499_v53 = vld [vmem:[#allocation90_spill] sm:$0xff] }
 0x2a4   : > { %v7933_v23 = vrot.slane %v17496_v60, 4  ;;  %v7925_v28 = vrot.slane %v7924_v29, 4  ;;  %v7929_v33 = vrot.slane %v7927_v1, 5  ;;  %v8938_v32 = vrot.slane %v10650_v62, 5  ;;  %v16183_v25 = vpop.f32.mrf.mxu0 }
 0x2a5   : > { %v7920_v52 = vsel %vm12527_vm5, %v7915_v30, %v7919_v18  ;;  %11766 = vmatprep.mubr.msk.bf16.mxu0 %vm605_vm0, %v10842_v37  ;;  %v7939_v39 = vrot.slane %v7937_v51, 5  ;;  %v8936_v60 = vsel %vm12557_vm6, %v8934_v41, %v8935_v59  ;;  %v8937_v22 = vrot.slane %v8935_v59, 4  ;;  %v16185_v30 = vpop.f32.mrf.mxu1 }
 0x2a6   : > { %v10759_v63 = vcombine.low %v7910_v55, %v7920_v52  ;;  %v6427_v18 = vadd.f32 %v15958_v49, %v17497_v8  ;;  %v7930_v29 = vsel %vm12527_vm5, %v7925_v28, %v7929_v33  ;;  %v7934_v62 = vor.u32 %v7933_v23, %v7929_v33  ;;  %v17498_v55 = vld [vmem:[#allocation89_spill] sm:$0xff]  ;;  %v17501_v52 = vld [vmem:[#allocation46_spill] sm:$0xff]  ;;  %v16203_v23 = vpop.f32.mrf.mxu0 }
 0x2a7   : > { %v6430_v26 = vadd.f32 %v15979_v36, %v17498_v55  ;;  %v6428_v41 = vadd.f32 %v15988_v11, %v17499_v53  ;;  %v8939_v49 = vsel %vm12557_vm6, %v8937_v22, %v8938_v32  ;;  %v17502_v37 = vshrl.u32 %v17501_v52, 16  ;;  %v16205_v33 = vpop.f32.mrf.mxu1  ;;  %v12133_v22 = vld [vmem:[%s12349_s28 + $0x130] sm:$0xf] }
 0x2a8   : > { %11700 = vmatprep.mubr.msk.bf16.mxu1 %vm605_vm0, %v10759_v63  ;;  %v16197_v1 = vadd.f32 %v15998_v44, %v6427_v18  ;;  %v17503_v59 = vshll.u32 %v17501_v52, 16  ;;  %v7935_v36 = vrot.slane %v7934_v62, 4  ;;  %v10843_v63 = vcombine.low %v8936_v60, %v8939_v49  ;;  %v17506_v18 = vld [vmem:[#allocation88_spill] sm:$0xff] }
 0x2a9   : > { %v7944_v51 = vrot.slane %v17502_v37, 4  ;;  %v16208_v11 = vadd.f32 %v16009_v9, %v6430_v26  ;;  %v16211_v32 = vadd.f32 %v16017_v35, %v6428_v41  ;;  %v7951_v8 = vshll.u32 %v12133_v22, 16  ;;  %v12134_v52 = vld [vmem:[%s12349_s28 + $0x134] sm:$0xf]  ;;  %v12135_v35 = vld [vmem:[%s12349_s28 + $0x12c] sm:$0xf] }
 0x2aa   : > { %17500 = vst [vmem:[#allocation77_spill] sm:$0xff] %v16197_v1  ;;  %v7947_v28 = vrot.slane %v17503_v59, 5  ;;  %v17507_v55 = vshrl.u32 %v17506_v18, 16  ;;  %v7961_v37 = vshll.u32 %v12134_v52, 16  ;;  %v16217_v59 = vpop.f32.mrf.mxu0  ;;  %v16219_v1 = vpop.f32.mrf.mxu1  ;;  %v7940_v60 = vsel %vm12527_vm5, %v7935_v36, %v7939_v39  ;;  %11767 = vmatmul.mubr.msk.bf16.gmra.mxu0 %vm605_vm0, %v10843_v63 }
 0x2ab   : > { %17504 = vst [vmem:[#allocation78_spill] sm:$0xff] %v16208_v11  ;;  %17505 = vst [vmem:[#allocation42_spill] sm:$0xff] %v16211_v32  ;;  %v7965_v9 = vshrl.u32 %v12134_v52, 16  ;;  %v10813_v62 = vrot.slane %v12135_v35, 9  ;;  %v8942_v26 = vrot.slane %v12133_v22, 5  ;;  %v10760_v41 = vcombine.low %v7930_v29, %v7940_v60  ;;  %v17511_v29 = vld [vmem:[#allocation91_spill] sm:$0xff] }
 0x2ac   : > { %v7948_v44 = vor.u32 %v7947_v28, %v7944_v51  ;;  %v7957_v53 = vrot.slane %v17507_v55, 4  ;;  %17508 = vst [vmem:[#allocation79_spill] sm:$0xff] %v16219_v1  ;;  %v7953_v51 = vrot.slane %v7951_v8, 5  ;;  %v7963_v28 = vrot.slane %v7961_v37, 5  ;;  %v16225_v18 = vpop.f32.mrf.mxu0  ;;  %v16227_v55 = vpop.f32.mrf.mxu1  ;;  %v10655_v8 = vld [vmem:[%s12349_s28 + $0x13c] sm:$0x1] }
 0x2ad   : > { %17509 = vst [vmem:[#allocation43_spill] sm:$0xff] %v16225_v18  ;;  %17510 = vst [vmem:[#allocation44_spill] sm:$0xff] %v16227_v55  ;;  %v7967_v32 = vrot.slane %v7965_v9, 4  ;;  %v8943_v39 = vsel %vm12557_vm6, %v10813_v62, %v8942_v26  ;;  %v8944_v36 = vrot.slane %v8942_v26, 4  ;;  %v8945_v63 = vrot.slane %v12134_v52, 5  ;;  %11701 = vmatmul.mubr.msk.bf16.gmra.mxu1 %vm605_vm0, %v10760_v41 }
 0x2ae   : > { %v7949_v49 = vrot.slane %v7948_v44, 4  ;;  %v7958_v35 = vor.u32 %v7957_v53, %v7953_v51  ;;  %v6433_v44 = vadd.f32 %v16000_v50, %v17511_v29  ;;  %v12136_v37 = vld [vmem:[%s12349_s28 + $0x138] sm:$0xf]  ;;  %v16238_v11 = vpop.f32.mrf.mxu0  ;;  %v16240_v9 = vpop.f32.mrf.mxu1  ;;  %v17514_v26 = vshrl.u32 %v15143_v40, 16 }
 0x2af   : > { %v7971_v60 = vshll.u32 %v12136_v37, 16  ;;  %17512 = vst [vmem:[#allocation82_spill] sm:$0xff] %v16238_v11  ;;  %17513 = vst [vmem:[#allocation81_spill] sm:$0xff] %v16240_v9  ;;  %v7968_v18 = vor.u32 %v7967_v32, %v7963_v28  ;;  %v8946_v52 = vsel %vm12557_vm6, %v8944_v36, %v8945_v63  ;;  %v8947_v62 = vrot.slane %v8945_v63, 4  ;;  %v17516_v63 = vld [vmem:[#allocation49_spill] sm:$0xff] }
 0x2b0   : > { %v7954_v22 = vsel %vm12527_vm5, %v7949_v49, %v7953_v51  ;;  %v7977_v41 = vrot.slane %v17514_v26, 4  ;;  %v7959_v49 = vrot.slane %v7958_v35, 4  ;;  %v10844_v53 = vcombine.low %v8943_v39, %v8946_v52  ;;  %v16249_v29 = vpop.f32.mrf.mxu0  ;;  %v16251_v55 = vpop.f32.mrf.mxu1 }
 0x2b1   : > { %v16247_v51 = vadd.f32 %v16030_v34, %v6433_v44  ;;  %v7973_v50 = vrot.slane %v7971_v60, 5  ;;  %v7969_v11 = vrot.slane %v7968_v18, 4  ;;  %v7981_v9 = vshll.u32 %v10655_v8, 16  ;;  %v17517_v34 = vld [vmem:[#allocation50_spill] sm:$0xff] }
 0x2b2   : > { %v8948_v32 = vrot.slane %v12136_v37, 5  ;;  %v8951_v1 = vrot.slane %v10655_v8, 5  ;;  %v7964_v36 = vsel %vm12527_vm5, %v7959_v49, %v7963_v28  ;;  %11770 = vmatprep.mubr.msk.bf16.mxu0 %vm605_vm0, %v10844_v53  ;;  %v6431_v39 = vadd.f32 %v16011_v12, %v17516_v63  ;;  %v16260_v44 = vpop.f32.mrf.mxu0  ;;  %v16262_v60 = vpop.f32.mrf.mxu1  ;;  %v12137_v63 = vld [vmem:[%s12349_s28 + $0x148] sm:$0xf] }
 0x2b3   : > { %17515 = vst [vmem:[#allocation45_spill] sm:$0xff] %v16247_v51  ;;  %v7978_v40 = vor.u32 %v7977_v41, %v7973_v50  ;;  %v6434_v35 = vadd.f32 %v16019_v61, %v17517_v34  ;;  %v10761_v18 = vcombine.low %v7954_v22, %v7964_v36  ;;  %v7974_v8 = vsel %vm12527_vm5, %v7969_v11, %v7973_v50  ;;  %v17520_v11 = vld [vmem:[#allocation51_spill] sm:$0xff] }
 0x2b4   : > { %v7983_v37 = vrot.slane %v7981_v9, 5  ;;  %v8949_v28 = vsel %vm12557_vm6, %v8947_v62, %v8948_v32  ;;  %v8950_v26 = vrot.slane %v8948_v32, 4  ;;  %v16269_v12 = vadd.f32 %v16053_v4, %v6431_v39  ;;  %v16274_v41 = vpop.f32.mrf.mxu0  ;;  %v16276_v49 = vpop.f32.mrf.mxu1 }
 0x2b5   : > { %v7979_v52 = vrot.slane %v7978_v40, 4  ;;  %v16272_v61 = vadd.f32 %v16064_v7, %v6434_v35  ;;  %11704 = vmatprep.mubr.msk.bf16.mxu1 %vm605_vm0, %v10761_v18  ;;  %v6432_v22 = vadd.f32 %v16032_v15, %v17520_v11  ;;  %v17521_v9 = vshrl.u32 %v15184_v17, 16 }
 0x2b6   : > { %17518 = vst [vmem:[#allocation85_spill] sm:$0xff] %v16269_v12  ;;  %v17522_v53 = vshll.u32 %v15184_v17, 16  ;;  %v7995_v4 = vshll.u32 %v15961_v54, 16  ;;  %v8952_v32 = vsel %vm12557_vm6, %v8950_v26, %v8951_v1  ;;  %v17523_v36 = vshrl.u32 %v15961_v54, 16  ;;  %v16293_v39 = vpop.f32.mrf.mxu0  ;;  %v16295_v34 = vpop.f32.mrf.mxu1  ;;  %v12138_v1 = vld [vmem:[%s12349_s28 + $0x140] sm:$0xf] }
 0x2b7   : > { %17519 = vst [vmem:[#allocation83_spill] sm:$0xff] %v16272_v61  ;;  %v7988_v62 = vrot.slane %v17521_v9, 4  ;;  %v7984_v7 = vsel %vm12527_vm5, %v7979_v52, %v7983_v37  ;;  %v8005_v15 = vshll.u32 %v12137_v63, 16  ;;  %v10845_v35 = vcombine.low %v8949_v28, %v8952_v32 }
 0x2b8   : > { %v7991_v50 = vrot.slane %v17522_v53, 5  ;;  %v8001_v40 = vrot.slane %v17523_v36, 4  ;;  %v10762_v17 = vcombine.low %v7974_v8, %v7984_v7  ;;  %v16298_v18 = vadd.f32 %v16073_v38, %v6432_v22  ;;  %v16301_v53 = vpop.f32.mrf.mxu0  ;;  %v16303_v36 = vpop.f32.mrf.mxu1  ;;  %v17525_v22 = vld [vmem:[#allocation52_spill] sm:$0xff] }
 0x2b9   : > { %v7997_v37 = vrot.slane %v7995_v4, 5  ;;  %v8007_v52 = vrot.slane %v8005_v15, 5  ;;  %v8009_v9 = vshrl.u32 %v12137_v63, 16  ;;  %v10814_v26 = vrot.slane %v12138_v1, 9  ;;  %11771 = vmatmul.mubr.msk.bf16.gmra.mxu0 %vm605_vm0, %v10845_v35  ;;  %v10660_v7 = vld [vmem:[%s12349_s28 + $0x150] sm:$0x1] }
 0x2ba   : > { %17524 = vst [vmem:[#allocation84_spill] sm:$0xff] %v16298_v18  ;;  %v7992_v11 = vor.u32 %v7991_v50, %v7988_v62  ;;  %11705 = vmatmul.mubr.msk.bf16.gmra.mxu1 %vm605_vm0, %v10762_v17  ;;  %v8955_v28 = vrot.slane %v15961_v54, 5  ;;  %v8958_v38 = vrot.slane %v12137_v63, 5  ;;  %v6437_v62 = vadd.f32 %v16055_v46, %v17525_v22  ;;  %v16314_v18 = vpop.f32.mrf.mxu0  ;;  %v16316_v17 = vpop.f32.mrf.mxu1 }
 0x2bb   : > { %v8002_v50 = vor.u32 %v8001_v40, %v7997_v37  ;;  %v8011_v4 = vrot.slane %v8009_v9, 4  ;;  %v8015_v32 = vshll.u32 %v15982_v24, 16  ;;  %v17526_v15 = vshrl.u32 %v15982_v24, 16 }
 0x2bc   : > { %v7993_v8 = vrot.slane %v7992_v11, 4  ;;  %v8956_v54 = vsel %vm12557_vm6, %v10814_v26, %v8955_v28  ;;  %v8957_v63 = vrot.slane %v8955_v28, 4  ;;  %v8960_v46 = vrot.slane %v8958_v38, 4  ;;  %v16325_v61 = vpop.f32.mrf.mxu0 }
 0x2bd   : > { %v8021_v1 = vrot.slane %v17526_v15, 4  ;;  %v8003_v40 = vrot.slane %v8002_v50, 4  ;;  %v8012_v11 = vor.u32 %v8011_v4, %v8007_v52  ;;  %v16323_v9 = vadd.f32 %v16084_v14, %v6437_v62  ;;  %17528 = vst [vmem:[#allocation86_spill] sm:$0xff] %v16325_v61  ;;  %v16327_v15 = vpop.f32.mrf.mxu1 }
 0x2be   : > { %v7998_v35 = vsel %vm12527_vm5, %v7993_v8, %v7997_v37  ;;  %v8017_v22 = vrot.slane %v8015_v32, 5  ;;  %v8959_v12 = vsel %vm12557_vm6, %v8957_v63, %v8958_v38  ;;  %v8025_v51 = vshll.u32 %v10660_v7, 16  ;;  %v16334_v14 = vpop.f32.mrf.mxu0 }
 0x2bf   : > { %17527 = vst [vmem:[#allocation47_spill] sm:$0xff] %v16323_v9  ;;  %v8961_v37 = vrot.slane %v15982_v24, 5  ;;  %v8964_v8 = vrot.slane %v10660_v7, 5  ;;  %v8008_v26 = vsel %vm12527_vm5, %v8003_v40, %v8007_v52  ;;  %v8013_v28 = vrot.slane %v8012_v11, 4  ;;  %v16336_v62 = vpop.f32.mrf.mxu1  ;;  %v17529_v52 = vld [vmem:[#allocation53_spill] sm:$0xff] }
 0x2c0   : > { %v10846_v50 = vcombine.low %v8956_v54, %v8959_v12  ;;  %v8022_v4 = vor.u32 %v8021_v1, %v8017_v22  ;;  %v10763_v32 = vcombine.low %v7998_v35, %v8008_v26  ;;  %v8027_v9 = vrot.slane %v8025_v51, 5  ;;  %v17530_v1 = vld [vmem:[#allocation92_spill] sm:$0xff]  ;;  %v16347_v63 = vpop.f32.mrf.mxu0 }
 0x2c1   : > { %v8962_v61 = vsel %vm12557_vm6, %v8960_v46, %v8961_v37  ;;  %v8963_v38 = vrot.slane %v8961_v37, 4  ;;  %v8018_v24 = vsel %vm12527_vm5, %v8013_v28, %v8017_v22  ;;  %v6435_v12 = vadd.f32 %v16066_v0, %v17529_v52  ;;  %v16349_v35 = vpop.f32.mrf.mxu1 }
 0x2c2   : > { %11774 = vmatprep.mubr.msk.bf16.mxu0 %vm605_vm0, %v10846_v50  ;;  %v8023_v7 = vrot.slane %v8022_v4, 4  ;;  %v6438_v54 = vadd.f32 %v16075_v16, %v17530_v1  ;;  %11708 = vmatprep.mubr.msk.bf16.mxu1 %vm605_vm0, %v10763_v32  ;;  %v6436_v46 = vadd.f32 %v16086_v31, %v15335_v20  ;;  %v17531_v40 = vshrl.u32 %v16035_v6, 16 }
 0x2c3   : > { %v8965_v51 = vsel %vm12557_vm6, %v8963_v38, %v8964_v8  ;;  %v17532_v0 = vshll.u32 %v16035_v6, 16  ;;  %v16363_v26 = vadd.f32 %v16092_v5, %v6435_v12  ;;  %v16368_v8 = vpop.f32.mrf.mxu0  ;;  %v16370_v50 = vpop.f32.mrf.mxu1  ;;  %v8039_v32 = vshll.u32 %v16101_v21, 16 }
 0x2c4   : > { %v8032_v11 = vrot.slane %v17531_v40, 4  ;;  %v8028_v16 = vsel %vm12527_vm5, %v8023_v7, %v8027_v9  ;;  %v10847_v37 = vcombine.low %v8962_v61, %v8965_v51  ;;  %v16366_v28 = vadd.f32 %v16107_v10, %v6438_v54  ;;  %v12139_v9 = vld [vmem:[%s12349_s28 + $0x15c] sm:$0xf] }
 0x2c5   : > { %v8035_v22 = vrot.slane %v17532_v0, 5  ;;  %v10764_v20 = vcombine.low %v8018_v24, %v8028_v16  ;;  %v16373_v31 = vadd.f32 %v16126_v2, %v6436_v46  ;;  %v17534_v61 = vshrl.u32 %v16101_v21, 16  ;;  %v16381_v52 = vpop.f32.mrf.mxu0  ;;  %v16383_v24 = vpop.f32.mrf.mxu1 }
 0x2c6   : > { %11775 = vmatmul.mubr.msk.bf16.gmra.mxu0 %vm605_vm0, %v10847_v37  ;;  %v8049_v10 = vshll.u32 %v12139_v9, 16  ;;  %v8053_v38 = vshrl.u32 %v12139_v9, 16  ;;  %v10815_v7 = vrot.slane %v16035_v6, 9  ;;  %v8041_v12 = vrot.slane %v8039_v32, 5 }
 0x2c7   : > { %17533 = vst [vmem:[#allocation48_spill] sm:$0xff] %v16373_v31  ;;  %v8036_v4 = vor.u32 %v8035_v22, %v8032_v11  ;;  %v8045_v5 = vrot.slane %v17534_v61, 4  ;;  %11709 = vmatmul.mubr.msk.bf16.gmra.mxu1 %vm605_vm0, %v10764_v20  ;;  %v8968_v1 = vrot.slane %v16101_v21, 5  ;;  %v8971_v54 = vrot.slane %v12139_v9, 5  ;;  %v10665_v11 = vld [vmem:[%s12349_s28 + $0x164] sm:$0x1]  ;;  %v16391_v6 = vpop.f32.mrf.mxu0  ;;  %v16393_v22 = vpop.f32.mrf.mxu1 }
 0x2c8   : > { %v8051_v51 = vrot.slane %v8049_v10, 5  ;;  %v8055_v46 = vrot.slane %v8053_v38, 4  ;;  %v6441_v40 = vadd.f32 %v16094_v13, %v15341_v57  ;;  %v8059_v0 = vshll.u32 %v16131_v19, 16  ;;  %s208_s28 = sand.u32 1, %s12208_s13  }
 0x2c9   : > { %v8037_v2 = vrot.slane %v8036_v4, 4  ;;  %v8046_v37 = vor.u32 %v8045_v5, %v8041_v12  ;;  %v8969_v21 = vsel %vm12557_vm6, %v10815_v7, %v8968_v1  ;;  %v8970_v20 = vrot.slane %v8968_v1, 4  ;;  %v16402_v13 = vpop.f32.mrf.mxu0  ;;  %v16404_v9 = vpop.f32.mrf.mxu1  ;;  %s10065_s20 = sshll.u32 %s208_s28, 9  ;;  %s16810_s7 = scalar_lea.sflag [#allocation4], %s208_s28 }
 0x2ca   : > { %v8056_v4 = vor.u32 %v8055_v46, %v8051_v51  ;;  %v8973_v32 = vrot.slane %v8971_v54, 4  ;;  %v16400_v61 = vadd.f32 %v16141_v48, %v6441_v40  ;;  %v8061_v57 = vrot.slane %v8059_v0, 5  ;;  %s16607_s21 = scalar_lea.vmem [#allocation3], %s10065_s20 }
 0x2cb   : > { %v8042_v16 = vsel %vm12527_vm5, %v8037_v2, %v8041_v12  ;;  %v8047_v10 = vrot.slane %v8046_v37, 4  ;;  %v8972_v38 = vsel %vm12557_vm6, %v8970_v20, %v8971_v54  ;;  %v17536_v5 = vshrl.u32 %v16131_v19, 16  ;;  %v16411_v48 = vpop.f32.mrf.mxu0  ;;  %v16413_v40 = vpop.f32.mrf.mxu1  ;;  %s9941_s16 = sshll.u32 %s16607_s21, 4  ;;  %s16804_s16 = int_to_ptr.vmem [resolvable:$true] %s9941_s16 }
 0x2cc   : > { %17535 = vst [vmem:[#allocation89_spill] sm:$0xff] %v16400_v61  ;;  %v8069_v12 = vshll.u32 %v10665_v11, 16  ;;  %v8057_v7 = vrot.slane %v8056_v4, 4  ;;  %v10848_v1 = vcombine.low %v8969_v21, %v8972_v38  ;;  %v8974_v46 = vrot.slane %v16131_v19, 5  ;;  %s12140_s8 = scalar_lea.vmem %s16804_s16, 8192  ;;  %p12147_p2 = scmp.lt.s32.totalorder %s16804_s16, %s12145_s10 }
 0x2cd   : > { %v8065_v2 = vrot.slane %v17536_v5, 4  ;;  %v8977_v31 = vrot.slane %v10665_v11, 5  ;;  %v8052_v0 = vsel %vm12527_vm5, %v8047_v10, %v8051_v51  ;;  %v6439_v54 = vadd.f32 %v16109_v45, %v15354_v56  ;;  %v16424_v4 = vpop.f32.mrf.mxu0  ;;  %v16426_v38 = vpop.f32.mrf.mxu1  ;;  %v17537_v56 = vld [vmem:[#allocation71_spill] sm:$0xff]  ;;  %v17539_v5 = vld [vmem:[#allocation73_spill] sm:$0xff]  ;;  %p12141_p13 = scmp.ne.s32.totalorder %s16804_s16, %s12140_s8  ;;  %p12148_p4 = scmp.lt.s32.totalorder %s12146_s11, %s12140_s8 }
 0x2ce   : > { %v8071_v61 = vrot.slane %v8069_v12, 5  ;;  %v10765_v20 = vcombine.low %v8042_v16, %v8052_v0  ;;  %11778 = vmatprep.mubr.msk.bf16.mxu0 %vm605_vm0, %v10848_v1  ;;  %v8062_v21 = vsel %vm12527_vm5, %v8057_v7, %v8061_v57  ;;  %v8975_v19 = vsel %vm12557_vm6, %v8973_v32, %v8974_v46  ;;  %v17538_v16 = vld [vmem:[#allocation54_spill] sm:$0xff]  ;;  %v17541_v12 = vld [vmem:[#allocation40_spill] sm:$0xff]  ;;  %v17542_v1 = vld [vmem:[#allocation55_spill] sm:$0xff] }
 0x2cf   : > { %v8066_v37 = vor.u32 %v8065_v2, %v8061_v57  ;;  %v8976_v11 = vrot.slane %v8974_v46, 4  ;;  %v16429_v10 = vadd.f32 %v16151_v43, %v6439_v54  ;;  %v6442_v45 = vadd.f32 %v17537_v56, %v15370_v47  ;;  %v17540_v57 = vld [vmem:[#allocation18_spill] sm:$0xff]  ;;  %v16444_v54 = vpop.f32.mrf.mxu0  ;;  %v6367_v47 = vpop.f32.mrf.mxu1  ;;  %p12142_p0 = pnand %p12141_p13, %p12308_p3  ;;  %p12149_p5 = por %p12148_p4, %p12147_p2 }
 0x2d0   : > { %v6440_v2 = vadd.f32 %v17539_v5, %v17538_v16  ;;  %11712 = vmatprep.mubr.msk.bf16.mxu1 %vm605_vm0, %v10765_v20  ;;  %v6445_v7 = vadd.f32 %v17541_v12, %v17540_v57  ;;  %v17543_v46 = vld [vmem:[#allocation74_spill] sm:$0xff]  ;;  %v17545_v20 = vld [vmem:[#allocation41_spill] sm:$0xff] }
 0x2d1   : > { %v8067_v51 = vrot.slane %v8066_v37, 4  ;;  %v8978_v32 = vsel %vm12557_vm6, %v8976_v11, %v8977_v31  ;;  %v6443_v0 = vadd.f32 %v17543_v46, %v17542_v1  ;;  %v17544_v37 = vld [vmem:[#allocation33_spill] sm:$0xff]  ;;  %v16449_v5 = vadd.f32 %v17545_v20, %v6442_v45  ;;  %v7194_v12 = vpop.f32.mrf.mxu0  ;;  %v11578_v27 = vpop.f32.mrf.mxu1  ;;  %v17549_v45 = vld [vmem:[#allocation79_spill] sm:$0xff]  ;;  %v17554_v46 = vld [vmem:[#allocation8_spill] sm:$0xff]  ;;  %p12143_p1 = pneg %p12142_p0 }
 0x2d2   : > { %v6446_v43 = vadd.f32 %v16176_v3, %v17544_v37  ;;  %v10849_v16 = vcombine.low %v8975_v19, %v8978_v32  ;;  %v16452_v58 = vadd.f32 %v16174_v42, %v6440_v2  ;;  %v16455_v11 = vadd.f32 %v16183_v25, %v6445_v7  ;;  %v17550_v2 = vld [vmem:[#allocation6_spill] sm:$0xff]  ;;  %v17551_v32 = vld [vmem:[#allocation44_spill] sm:$0xff]  ;;  %v17553_v7 = vld [vmem:[#allocation81_spill] sm:$0xff] }
 0x2d3   : > { %v8072_v56 = vsel %vm12527_vm5, %v8067_v51, %v8071_v61  ;;  %v16458_v57 = vadd.f32 %v16203_v23, %v6443_v0  ;;  %v17546_v61 = vld [vmem:[#allocation32_spill] sm:$0xff]  ;;  %v17547_v51 = vld [vmem:[#allocation34_spill] sm:$0xff]  ;;  %v6450_v23 = vadd.f32 %v17551_v32, %v17550_v2  ;;  %v6453_v0 = vadd.f32 %v16251_v55, %v17554_v46  ;;  %v17555_v37 = vld [vmem:[#allocation21_spill] sm:$0xff]  ;;  %p12150_p6 = pnand %p12149_p5, %p12143_p1 }
 0x2d4   : > { %v10766_v31 = vcombine.low %v8062_v21, %v8072_v56  ;;  %v16461_v3 = vadd.f32 %v16217_v59, %v6446_v43  ;;  %11779 = vmatmul.mubr.msk.bf16.gmra.mxu0 %vm605_vm0, %v10849_v16  ;;  %v6444_v19 = vadd.f32 %v16185_v30, %v17546_v61  ;;  %v6449_v42 = vadd.f32 %v16205_v33, %v17547_v51  ;;  %v17548_v21 = vld [vmem:[#allocation35_spill] sm:$0xff]  ;;  %v17552_v59 = vld [vmem:[#allocation9_spill] sm:$0xff]  ;;  %v11641_v56 = vpop.f32.mrf.mxu0  ;;  %v6380_v16 = vpop.f32.mrf.mxu1  ;;  %v17558_v51 = vld [vmem:[#allocation82_spill] sm:$0xff] }
 0x2d5   : > { %v6447_v25 = vadd.f32 %v17549_v45, %v17548_v21  ;;  %v6448_v1 = vadd.f32 %v17553_v7, %v17552_v59  ;;  %v6451_v30 = vadd.f32 %v16262_v60, %v17555_v37  ;;  %v17556_v43 = vld [vmem:[#allocation13_spill] sm:$0xff]  ;;  %v17557_v20 = vld [vmem:[#allocation43_spill] sm:$0xff]  ;;  %v16491_v45 = vadd.f32 %v16260_v44, %v6450_v23  ;;  %v17561_v23 = vld [vmem:[#allocation10_spill] sm:$0xff] }
 0x2d6   : > { %11713 = vmatmul.mubr.msk.bf16.gmra.mxu1 %vm605_vm0, %v10766_v31  ;;  %v6454_v33 = vadd.f32 %v16276_v49, %v17556_v43  ;;  %v16482_v61 = vadd.f32 %v17557_v20, %v6444_v19  ;;  %v16485_v21 = vadd.f32 %v17558_v51, %v6449_v42  ;;  %v16497_v60 = vadd.f32 %v16293_v39, %v6453_v0  ;;  %v7197_v42 = vpop.f32.mrf.mxu0  ;;  %v11579_v2 = vpop.f32.mrf.mxu1  ;;  %v17559_v32 = vld [vmem:[#allocation11_spill] sm:$0xff]  ;;  %v17562_v59 = vld [vmem:[#allocation12_spill] sm:$0xff]  ;;  %v17563_v7 = vld [vmem:[#allocation14_spill] sm:$0xff] }
 0x2d7   : > { %v16488_v31 = vadd.f32 %v16249_v29, %v6447_v25  ;;  %v16494_v55 = vadd.f32 %v16274_v41, %v6448_v1  ;;  %v16500_v49 = vadd.f32 %v16301_v53, %v6451_v30  ;;  %v6452_v29 = vadd.f32 %v16295_v34, %v17559_v32  ;;  %v17560_v25 = vld [vmem:[#allocation7_spill] sm:$0xff]  ;;  %v17564_v1 = vld [vmem:[#allocation17_spill] sm:$0xff]  ;;  %v17566_v37 = vld [vmem:[#allocation16_spill] sm:$0xff] }
 0x2d8   : > { %v16503_v19 = vadd.f32 %v16314_v18, %v6454_v33  ;;  %v6457_v44 = vadd.f32 %v16303_v36, %v17560_v25  ;;  %v6455_v41 = vadd.f32 %v16316_v17, %v17561_v23  ;;  %v6458_v39 = vadd.f32 %v16327_v15, %v17562_v59  ;;  %v17565_v46 = vld [vmem:[#allocation15_spill] sm:$0xff]  ;;  %v11644_v30 = vpop.f32.mrf.mxu0  ;;  %v6383_v36 = vpop.f32.mrf.mxu1  ;;  %v17567_v43 = vld [vmem:[#allocation86_spill] sm:$0xff]  ;;  %v17568_v32 = vld [vmem:[#allocation56_spill] sm:$0xff] }
 0x2d9   : > { %v6456_v53 = vadd.f32 %v16336_v62, %v17563_v7  ;;  %v6461_v18 = vadd.f32 %v16349_v35, %v17564_v1  ;;  %v6459_v0 = vadd.f32 %v16370_v50, %v17565_v46  ;;  %v6462_v34 = vadd.f32 %v16383_v24, %v17566_v37  ;;  %v17570_v25 = vld [vmem:[#allocation57_spill] sm:$0xff]  ;;  %v17572_v23 = vld [vmem:[#allocation20_spill] sm:$0xff]  ;;  %v17575_v7 = vld [vmem:[#allocation59_spill] sm:$0xff] }
 0x2da   : > { %v16522_v33 = vadd.f32 %v17567_v43, %v6452_v29  ;;  %v16525_v17 = vadd.f32 %v16334_v14, %v6457_v44  ;;  %v16528_v15 = vadd.f32 %v16347_v63, %v6455_v41  ;;  %v16531_v62 = vadd.f32 %v16368_v8, %v6458_v39  ;;  %v7210_v14 = vpop.f32.mrf.mxu0  ;;  %v11582_v51 = vpop.f32.mrf.mxu1  ;;  %v17569_v29 = vld [vmem:[#allocation19_spill] sm:$0xff]  ;;  %v17571_v44 = vld [vmem:[#allocation58_spill] sm:$0xff]  ;;  %v17576_v37 = vld [vmem:[#allocation24_spill] sm:$0xff] }
 0x2db   : > { %v16534_v35 = vadd.f32 %v16381_v52, %v6456_v53  ;;  %v16537_v50 = vadd.f32 %v16391_v6, %v6461_v18  ;;  %v16540_v24 = vadd.f32 %v16402_v13, %v6459_v0  ;;  %v16543_v20 = vadd.f32 %v16411_v48, %v6462_v34  ;;  %v17573_v41 = vld [vmem:[#allocation22_spill] sm:$0xff]  ;;  %v17574_v48 = vld [vmem:[#allocation23_spill] sm:$0xff]  ;;  %v17577_v34 = vld [vmem:[#allocation25_spill] sm:$0xff] }
 0x2dc   : > { %v6460_v63 = vadd.f32 %v16393_v22, %v17568_v32  ;;  %v6465_v8 = vadd.f32 %v16404_v9, %v17569_v29  ;;  %v6463_v52 = vadd.f32 %v16413_v40, %v17570_v25  ;;  %v6466_v6 = vadd.f32 %v16426_v38, %v17571_v44  ;;  %v11645_v1 = vpop.f32.mrf.mxu0  ;;  %v6396_v18 = vpop.f32.mrf.mxu1  ;;  %v17579_v32 = vld [vmem:[#allocation27_spill] sm:$0xff] }
 0x2dd   : > { %v6464_v13 = vadd.f32 %v6367_v47, %v17572_v23  ;;  %v6469_v59 = vadd.f32 %v11578_v27, %v17573_v41  ;;  %v6467_v39 = vadd.f32 %v6380_v16, %v17574_v48  ;;  %v6470_v53 = vadd.f32 %v11579_v2, %v17575_v7  ;;  %v17581_v23 = vld [vmem:[#allocation28_spill] sm:$0xff] }
 0x2de   : > { %v16558_v22 = vadd.f32 %v16424_v4, %v6460_v63  ;;  %v16561_v9 = vadd.f32 %v16444_v54, %v6465_v8  ;;  %v16563_v40 = vadd.f32 %v7194_v12, %v6463_v52  ;;  %v16565_v46 = vadd.f32 %v11641_v56, %v6466_v6  ;;  %v7213_v2 = vpop.f32.mrf.mxu0  ;;  %v11583_v0 = vpop.f32.mrf.mxu1  ;;  %v17578_v54 = vld [vmem:[#allocation26_spill] sm:$0xff] }
 0x2df   : > { %v16567_v38 = vadd.f32 %v7197_v42, %v6464_v13  ;;  %v16569_v47 = vadd.f32 %v11644_v30, %v6469_v59  ;;  %v16571_v27 = vadd.f32 %v7210_v14, %v6467_v39  ;;  %v16573_v16 = vadd.f32 %v11645_v1, %v6470_v53  ;;  %v17580_v14 = vld [vmem:[#allocation60_spill] sm:$0xff]  ;;  %v17582_v39 = vld [vmem:[#allocation30_spill] sm:$0xff] }
 0x2e0   : > { %v6468_v4 = vadd.f32 %v6383_v36, %v17576_v37  ;;  %v6473_v43 = vadd.f32 %v11582_v51, %v17577_v34  ;;  %v6471_v12 = vadd.f32 %v6396_v18, %v17578_v54  ;;  %v6474_v56 = vadd.f32 %v11583_v0, %v17579_v32  ;;  %v11648_v63 = vpop.f32.mrf.mxu0  ;;  %v6399_v42 = vpop.f32.mrf.mxu1  ;;  %v16596_v1 = vld [vmem:[%s16863_s2] ss:$0 sm:$0xff]  ;;  %v17583_v0 = vld [vmem:[#allocation36_spill] sm:$0xff] }
 0x2e1   : > { %v6472_v8 = vadd.f32 %v6399_v42, %v17580_v14 }
 0x2e2   : > { %v16579_v29 = vadd.f32 %v7213_v2, %v6468_v4  ;;  %v16581_v30 = vadd.f32 %v11648_v63, %v6473_v43  ;;  %v7226_v25 = vpop.f32.mrf.mxu0  ;;  %v11654_v52 = vpop.f32.mrf.mxu1  ;;  %v17586_v63 = vld [vmem:[#allocation61_spill] sm:$0xff] }
 0x2e3   : > { %v16584_v44 = vadd.f32 %v7226_v25, %v6471_v12  ;;  %v8629_v13 = vadd.f32 %v11654_v52, %v17581_v23  ;;  %v17584_v12 = vld [vmem:[#allocation37_spill] sm:$0xff] }
 0x2e4   : > { %v11649_v36 = vpop.f32.mrf.mxu0  ;;  %v8372_v51 = vpop.f32.mrf.mxu1 }
 0x2e5   : > { %v16586_v6 = vadd.f32 %v11649_v36, %v6474_v56  ;;  %v8627_v7 = vadd.f32 %v8372_v51, %v17582_v39  ;;  %v17585_v56 = vld [vmem:[#allocation76_spill] sm:$0xff]  ;;  %v17587_v51 = vld [vmem:[#allocation39_spill] sm:$0xff] }
 0x2e6   : > { %v7229_v41 = vpop.f32.mrf.mxu0  ;;  %v11655_v59 = vpop.f32.mrf.mxu1  ;;  %v6416_v42 = vadd.f32 %v17586_v63, %v17585_v56 }
 0x2e7   : > { %v16590_v48 = vadd.f32 %v7229_v41, %v6472_v8  ;;  %v8630_v37 = vadd.f32 %v11655_v59, %v17583_v0 }
 0x2e8   : > { %v11720_v53 = vpop.f32.mrf.mxu0  ;;  %v8375_v18 = vpop.f32.mrf.mxu1 }
 0x2e9   : > { %v9535_v2 = vadd.f32 %v11720_v53, %v8629_v13  ;;  %v8628_v32 = vadd.f32 %v8375_v18, %v17584_v12  ;;  %v17588_v53 = vld [vmem:[#allocation63_spill] sm:$0xff]  ;;  %v17590_v12 = vld [vmem:[#allocation64_spill] sm:$0xff] }
 0x2ea   : > { %v9278_v4 = vpop.f32.mrf.mxu0  ;;  %v11658_v34 = vpop.f32.mrf.mxu1 }
 0x2eb   : > { %v9734_v43 = vadd.f32 %v16596_v1, %v9535_v2  ;;  %v9533_v54 = vadd.f32 %v9278_v4, %v8627_v7  ;;  %v8633_v23 = vadd.f32 %v11658_v34, %v17587_v51  ;;  %v17589_v2 = vld [vmem:[#allocation29_spill] sm:$0xff] }
 0x2ec   : > { %v11721_v14 = vpop.f32.mrf.mxu0  ;;  %v8388_v8 = vpop.f32.mrf.mxu1  ;;  %v7246_v0 = vadd.f32 %v17589_v2, %v6416_v42  ;;  %v17591_v42 = vld [vmem:[#allocation80_spill] sm:$0xff] }
 0x2ed   : > { %v9798_v25 = vmax.f32 %v9734_v43, 0.0  ;;  %v9732_v52 = vadd.f32 %v16596_v1, %v9533_v54  ;;  %v9536_v36 = vadd.f32 %v11721_v14, %v8630_v37  ;;  %v8631_v18 = vadd.f32 %v8388_v8, %v17588_v53 }
 0x2ee   : > { %v9281_v13 = vpop.f32.mrf.mxu0  ;;  %v11659_v41 = vpop.f32.mrf.mxu1 }
 0x2ef   : > { %9862 = vst [vmem:[%s16607_s21 + $0x10] sm:$0xff] %v9798_v25  ;;  %v9796_v59 = vmax.f32 %v9732_v52, 0.0  ;;  %v9735_v39 = vadd.f32 %v16596_v1, %v9536_v36  ;;  %v9534_v7 = vadd.f32 %v9281_v13, %v8628_v32  ;;  %v8634_v56 = vadd.f32 %v11659_v41, %v17590_v12  ;;  %v17592_v36 = vld [vmem:[#allocation31_spill] sm:$0xff]  ;;  %v17593_v41 = vld [vmem:[#allocation66_spill] sm:$0xff] }
 0x2f0   : > { %v11724_v4 = vpop.f32.mrf.mxu0  ;;  %v8391_v37 = vpop.f32.mrf.mxu1  ;;  %v6420_v51 = vadd.f32 %v17592_v36, %v17591_v42 }
 0x2f1   : > { %9860 = vst [vmem:[%s16607_s21] sm:$0xff] %v9796_v59  ;;  %v9799_v34 = vmax.f32 %v9735_v39, 0.0  ;;  %v9733_v43 = vadd.f32 %v16596_v1, %v9534_v7  ;;  %v9539_v54 = vadd.f32 %v11724_v4, %v8633_v23  ;;  %v8632_v8 = vadd.f32 %v8391_v37, %v7246_v0  ;;  %v17594_v37 = vld [vmem:[#allocation67_spill] sm:$0xff] }
 0x2f2   : > { %v9294_v63 = vpop.f32.mrf.mxu0  ;;  %v11662_v52 = vpop.f32.mrf.mxu1 }
 0x2f3   : > { %9863 = vst [vmem:[%s16607_s21 + $0x18] sm:$0xff] %v9799_v34  ;;  %v9797_v14 = vmax.f32 %v9733_v43, 0.0  ;;  %v9738_v32 = vadd.f32 %v16596_v1, %v9539_v54  ;;  %v9537_v25 = vadd.f32 %v9294_v63, %v8631_v18  ;;  %v8637_v7 = vadd.f32 %v11662_v52, %v17593_v41  ;;  %v17595_v54 = vld [vmem:[#allocation38_spill] sm:$0xff] }
 0x2f4   : > { %v11725_v13 = vpop.f32.mrf.mxu0  ;;  %v8404_v53 = vpop.f32.mrf.mxu1  ;;  %v7250_v12 = vadd.f32 %v17595_v54, %v6420_v51 }
 0x2f5   : > { %9861 = vst [vmem:[%s16607_s21 + $0x8] sm:$0xff] %v9797_v14  ;;  %v9802_v59 = vmax.f32 %v9738_v32, 0.0  ;;  %v9736_v23 = vadd.f32 %v16596_v1, %v9537_v25  ;;  %v9540_v39 = vadd.f32 %v11725_v13, %v8634_v56  ;;  %v8635_v34 = vadd.f32 %v8404_v53, %v17594_v37  ;;  %v17596_v25 = vld [vmem:[#allocation68_spill] sm:$0xff]  ;;  %v17597_v37 = vld [vmem:[#allocation87_spill] sm:$0xff] }
 0x2f6   : > { %v9297_v2 = vpop.f32.mrf.mxu0  ;;  %v11663_v43 = vpop.f32.mrf.mxu1 }
 0x2f7   : > { %9866 = vst [vmem:[%s16607_s21 + $0x30] sm:$0xff] %v9802_v59  ;;  %v9800_v4 = vmax.f32 %v9736_v23, 0.0  ;;  %v9739_v18 = vadd.f32 %v16596_v1, %v9540_v39  ;;  %v9538_v0 = vadd.f32 %v9297_v2, %v8632_v8  ;;  %v8638_v52 = vadd.f32 %v11663_v43, %v17596_v25  ;;  %v17598_v43 = vld [vmem:[#allocation62_spill] sm:$0xff] }
 0x2f8   : > { %v11728_v63 = vpop.f32.mrf.mxu0  ;;  %v8407_v42 = vpop.f32.mrf.mxu1  ;;  %v6424_v54 = vadd.f32 %v17598_v43, %v17597_v37 }
 0x2f9   : > { %9864 = vst [vmem:[%s16607_s21 + $0x20] sm:$0xff] %v9800_v4  ;;  %v9803_v14 = vmax.f32 %v9739_v18, 0.0  ;;  %v9737_v56 = vadd.f32 %v16596_v1, %v9538_v0  ;;  %v9543_v32 = vadd.f32 %v11728_v63, %v8637_v7  ;;  %v8636_v23 = vadd.f32 %v8407_v42, %v7250_v12 }
 0x2fa   : > { %v9310_v36 = vpop.f32.mrf.mxu0  ;;  %v11666_v0 = vpop.f32.mrf.mxu1 }
 0x2fb   : > { %9867 = vst [vmem:[%s16607_s21 + $0x38] sm:$0xff] %v9803_v14  ;;  %v9801_v13 = vmax.f32 %v9737_v56, 0.0  ;;  %v9742_v8 = vadd.f32 %v16596_v1, %v9543_v32  ;;  %v9541_v59 = vadd.f32 %v9310_v36, %v8635_v34  ;;  %v17599_v34 = vld [vmem:[#allocation69_spill] sm:$0xff] }
 0x2fc   : > { %v11729_v39 = vpop.f32.mrf.mxu0  ;;  %v8641_v63 = vadd.f32 %v11666_v0, %v17599_v34  ;;  %v8420_v32 = vpop.f32.mrf.mxu1 }
 0x2fd   : > { %9865 = vst [vmem:[%s16607_s21 + $0x28] sm:$0xff] %v9801_v13  ;;  %v9806_v51 = vmax.f32 %v9742_v8, 0.0  ;;  %v9740_v41 = vadd.f32 %v16596_v1, %v9541_v59  ;;  %v9544_v53 = vadd.f32 %v11729_v39, %v8638_v52  ;;  %v17600_v52 = vld [vmem:[#allocation70_spill] sm:$0xff]  ;;  %v17601_v59 = vld [vmem:[#allocation65_spill] sm:$0xff] }
 0x2fe   : > { %v9313_v2 = vpop.f32.mrf.mxu0  ;;  %v8639_v42 = vadd.f32 %v8420_v32, %v17600_v52  ;;  %v11667_v8 = vpop.f32.mrf.mxu1  ;;  %v17603_v32 = vld [vmem:[#allocation75_spill] sm:$0xff] }
 0x2ff   : > { %9870 = vst [vmem:[%s16607_s21 + $0x50] sm:$0xff] %v9806_v51  ;;  %v9804_v7 = vmax.f32 %v9740_v41, 0.0  ;;  %v9743_v4 = vadd.f32 %v16596_v1, %v9544_v53  ;;  %v9542_v18 = vadd.f32 %v9313_v2, %v8636_v23  ;;  %v7254_v23 = vadd.f32 %v17601_v59, %v6424_v54  ;;  %v17602_v41 = vld [vmem:[#allocation72_spill] sm:$0xff] }
 0x300   : > { %v11732_v12 = vpop.f32.mrf.mxu0  ;;  %v8642_v53 = vadd.f32 %v11667_v8, %v17602_v41  ;;  %v17604_v8 = vld [vmem:[#allocation77_spill] sm:$0xff] }
 0x301   : > { %9868 = vst [vmem:[%s16607_s21 + $0x40] sm:$0xff] %v9804_v7  ;;  %v9807_v14 = vmax.f32 %v9743_v4, 0.0  ;;  %v9741_v56 = vadd.f32 %v16596_v1, %v9542_v18  ;;  %v9547_v25 = vadd.f32 %v11732_v12, %v8641_v63  ;;  %v8423_v7 = vpop.f32.mrf.mxu1 }
 0x302   : > { %v9326_v36 = vpop.f32.mrf.mxu0  ;;  %v8640_v37 = vadd.f32 %v8423_v7, %v7254_v23 }
 0x303   : > { %9871 = vst [vmem:[%s16607_s21 + $0x58] sm:$0xff] %v9807_v14  ;;  %v9805_v13 = vmax.f32 %v9741_v56, 0.0  ;;  %v9746_v39 = vadd.f32 %v16596_v1, %v9547_v25  ;;  %v9545_v51 = vadd.f32 %v9326_v36, %v8639_v42  ;;  %v11670_v56 = vpop.f32.mrf.mxu1 }
 0x304   : > { %v11733_v2 = vpop.f32.mrf.mxu0  ;;  %v8645_v25 = vadd.f32 %v11670_v56, %v17603_v32 }
 0x305   : > { %9869 = vst [vmem:[%s16607_s21 + $0x48] sm:$0xff] %v9805_v13  ;;  %v9810_v4 = vmax.f32 %v9746_v39, 0.0  ;;  %v9744_v18 = vadd.f32 %v16596_v1, %v9545_v51  ;;  %v9548_v0 = vadd.f32 %v11733_v2, %v8642_v53  ;;  %v8436_v36 = vpop.f32.mrf.mxu1  ;;  %v17605_v53 = vld [vmem:[#allocation78_spill] sm:$0xff] }
 0x306   : > { %v9329_v43 = vpop.f32.mrf.mxu0  ;;  %v8643_v59 = vadd.f32 %v8436_v36, %v17604_v8 }
 0x307   : > { %9874 = vst [vmem:[%s16607_s21 + $0x70] sm:$0xff] %v9810_v4  ;;  %v9808_v34 = vmax.f32 %v9744_v18, 0.0  ;;  %v9747_v54 = vadd.f32 %v16596_v1, %v9548_v0  ;;  %v9546_v63 = vadd.f32 %v9329_v43, %v8640_v37  ;;  %v11671_v39 = vpop.f32.mrf.mxu1  ;;  %v17606_v43 = vld [vmem:[#allocation42_spill] sm:$0xff] }
 0x308   : > { %v11736_v52 = vpop.f32.mrf.mxu0  ;;  %v8646_v2 = vadd.f32 %v11671_v39, %v17605_v53 }
 0x309   : > { %9872 = vst [vmem:[%s16607_s21 + $0x60] sm:$0xff] %v9808_v34  ;;  %v9811_v12 = vmax.f32 %v9747_v54, 0.0  ;;  %v9745_v14 = vadd.f32 %v16596_v1, %v9546_v63  ;;  %v9551_v13 = vadd.f32 %v11736_v52, %v8645_v25  ;;  %v8439_v4 = vpop.f32.mrf.mxu1 }
 0x30a   : > { %v9342_v23 = vpop.f32.mrf.mxu0  ;;  %v8644_v34 = vadd.f32 %v8439_v4, %v17606_v43  ;;  %v17609_v4 = vld [vmem:[#allocation83_spill] sm:$0xff] }
 0x30b   : > { %9875 = vst [vmem:[%s16607_s21 + $0x78] sm:$0xff] %v9811_v12  ;;  %v9809_v42 = vmax.f32 %v9745_v14, 0.0  ;;  %v9750_v51 = vadd.f32 %v16596_v1, %v9551_v13  ;;  %v9549_v41 = vadd.f32 %v9342_v23, %v8643_v59  ;;  %v17607_v13 = vld [vmem:[#allocation45_spill] sm:$0xff] }
 0x30c   : > { %v11737_v7 = vpop.f32.mrf.mxu0 }
 0x30d   : > { %9873 = vst [vmem:[%s16607_s21 + $0x68] sm:$0xff] %v9809_v42  ;;  %v9814_v18 = vmax.f32 %v9750_v51, 0.0  ;;  %v9748_v0 = vadd.f32 %v16596_v1, %v9549_v41  ;;  %v9552_v37 = vadd.f32 %v11737_v7, %v8646_v2  ;;  %v17608_v51 = vld [vmem:[#allocation85_spill] sm:$0xff] }
 0x30e   : > { %v9345_v54 = vpop.f32.mrf.mxu0 }
 0x30f   : > { %9878 = vst [vmem:[%s16607_s21 + $0x90] sm:$0xff] %v9814_v18  ;;  %v9812_v63 = vmax.f32 %v9748_v0, 0.0  ;;  %v9751_v12 = vadd.f32 %v16596_v1, %v9552_v37  ;;  %v9550_v14 = vadd.f32 %v9345_v54, %v8644_v34  ;;  %v11674_v42 = vpop.f32.mrf.mxu1 }
 0x310   : > { %v11740_v25 = vpop.f32.mrf.mxu0  ;;  %v8649_v8 = vadd.f32 %v11674_v42, %v17607_v13  ;;  %v17611_v13 = vld [vmem:[#allocation47_spill] sm:$0xff] }
 0x311   : > { %9876 = vst [vmem:[%s16607_s21 + $0x80] sm:$0xff] %v9812_v63  ;;  %v9815_v56 = vmax.f32 %v9751_v12, 0.0  ;;  %v9749_v32 = vadd.f32 %v16596_v1, %v9550_v14  ;;  %v8452_v59 = vpop.f32.mrf.mxu1  ;;  %v17610_v63 = vld [vmem:[#allocation84_spill] sm:$0xff] }
 0x312   : > { %v9358_v36 = vpop.f32.mrf.mxu0  ;;  %v9555_v39 = vadd.f32 %v11740_v25, %v8649_v8  ;;  %v8647_v41 = vadd.f32 %v8452_v59, %v17608_v51 }
 0x313   : > { %9879 = vst [vmem:[%s16607_s21 + $0x98] sm:$0xff] %v9815_v56  ;;  %v9813_v52 = vmax.f32 %v9749_v32, 0.0  ;;  %v11675_v53 = vpop.f32.mrf.mxu1 }
 0x314   : > { %v11741_v23 = vpop.f32.mrf.mxu0  ;;  %v9754_v2 = vadd.f32 %v16596_v1, %v9555_v39  ;;  %v9553_v7 = vadd.f32 %v9358_v36, %v8647_v41  ;;  %v8650_v18 = vadd.f32 %v11675_v53, %v17609_v4 }
 0x315   : > { %9877 = vst [vmem:[%s16607_s21 + $0x88] sm:$0xff] %v9813_v52  ;;  %v8455_v0 = vpop.f32.mrf.mxu1 }
 0x316   : > { %v9361_v37 = vpop.f32.mrf.mxu0  ;;  %v9818_v43 = vmax.f32 %v9754_v2, 0.0  ;;  %v9752_v34 = vadd.f32 %v16596_v1, %v9553_v7  ;;  %v9556_v54 = vadd.f32 %v11741_v23, %v8650_v18  ;;  %v8648_v12 = vadd.f32 %v8455_v0, %v17610_v63 }
 0x318   : > { %9882 = vst [vmem:[%s16607_s21 + $0xb0] sm:$0xff] %v9818_v43  ;;  %v9816_v14 = vmax.f32 %v9752_v34, 0.0  ;;  %v9755_v56 = vadd.f32 %v16596_v1, %v9556_v54  ;;  %v9554_v32 = vadd.f32 %v9361_v37, %v8648_v12  ;;  %v17612_v54 = vld [vmem:[#allocation48_spill] sm:$0xff] }
 0x31a   : > { %v11744_v25 = vpop.f32.mrf.mxu0  ;;  %9880 = vst [vmem:[%s16607_s21 + $0xa0] sm:$0xff] %v9816_v14  ;;  %v9819_v52 = vmax.f32 %v9755_v56, 0.0  ;;  %v9753_v42 = vadd.f32 %v16596_v1, %v9554_v32 }
 0x31c   : > { %v9374_v59 = vpop.f32.mrf.mxu0  ;;  %9883 = vst [vmem:[%s16607_s21 + $0xb8] sm:$0xff] %v9819_v52  ;;  %v9817_v39 = vmax.f32 %v9753_v42, 0.0 }
 0x31d   : > { %v11678_v36 = vpop.f32.mrf.mxu1 }
 0x31e   : > { %v8653_v8 = vadd.f32 %v11678_v36, %v17611_v13  ;;  %9881 = vst [vmem:[%s16607_s21 + $0xa8] sm:$0xff] %v9817_v39  ;;  %v11745_v2 = vpop.f32.mrf.mxu0  ;;  %v17613_v36 = vld [vmem:[#allocation89_spill] sm:$0xff] }
 0x31f   : > { %v8468_v23 = vpop.f32.mrf.mxu1 }
 0x320   : > { %v9559_v51 = vadd.f32 %v11744_v25, %v8653_v8  ;;  %v8651_v41 = vadd.f32 %v8468_v23, %v16363_v26  ;;  %v9377_v12 = vpop.f32.mrf.mxu0 }
 0x321   : > { %v11679_v53 = vpop.f32.mrf.mxu1 }
 0x322   : > { %v9758_v7 = vadd.f32 %v16596_v1, %v9559_v51  ;;  %v9557_v4 = vadd.f32 %v9374_v59, %v8651_v41  ;;  %v8654_v18 = vadd.f32 %v11679_v53, %v16366_v28 }
 0x323   : > { %v8471_v0 = vpop.f32.mrf.mxu1 }
 0x324   : > { %v9822_v37 = vmax.f32 %v9758_v7, 0.0  ;;  %v9756_v43 = vadd.f32 %v16596_v1, %v9557_v4  ;;  %v9560_v34 = vadd.f32 %v11745_v2, %v8654_v18  ;;  %v8652_v63 = vadd.f32 %v8471_v0, %v17612_v54 }
 0x326   : > { %9886 = vst [vmem:[%s16607_s21 + $0xd0] sm:$0xff] %v9822_v37  ;;  %v9820_v26 = vmax.f32 %v9756_v43, 0.0  ;;  %v9759_v14 = vadd.f32 %v16596_v1, %v9560_v34  ;;  %v9558_v56 = vadd.f32 %v9377_v12, %v8652_v63 }
 0x328   : > { %9884 = vst [vmem:[%s16607_s21 + $0xc0] sm:$0xff] %v9820_v26  ;;  %v9823_v32 = vmax.f32 %v9759_v14, 0.0  ;;  %v9757_v25 = vadd.f32 %v16596_v1, %v9558_v56  ;;  %v11748_v52 = vpop.f32.mrf.mxu0 }
 0x32a   : > { %9887 = vst [vmem:[%s16607_s21 + $0xd8] sm:$0xff] %v9823_v32  ;;  %v9821_v28 = vmax.f32 %v9757_v25, 0.0  ;;  %v9390_v8 = vpop.f32.mrf.mxu0 }
 0x32b   : > { %v11682_v42 = vpop.f32.mrf.mxu1 }
 0x32c   : > { %v8657_v13 = vadd.f32 %v11682_v42, %v17613_v36  ;;  %9885 = vst [vmem:[%s16607_s21 + $0xc8] sm:$0xff] %v9821_v28  ;;  %v11749_v51 = vpop.f32.mrf.mxu0 }
 0x32d   : > { %v8484_v59 = vpop.f32.mrf.mxu1 }
 0x32e   : > { %v9563_v39 = vadd.f32 %v11748_v52, %v8657_v13  ;;  %v8655_v23 = vadd.f32 %v8484_v59, %v16429_v10  ;;  %v9393_v34 = vpop.f32.mrf.mxu0 }
 0x32f   : > { %v11683_v41 = vpop.f32.mrf.mxu1 }
 0x330   : > { %v9762_v53 = vadd.f32 %v16596_v1, %v9563_v39  ;;  %v9561_v2 = vadd.f32 %v9390_v8, %v8655_v23  ;;  %v8658_v7 = vadd.f32 %v11683_v41, %v16449_v5 }
 0x331   : > { %v8487_v4 = vpop.f32.mrf.mxu1 }
 0x332   : > { %v9826_v18 = vmax.f32 %v9762_v53, 0.0  ;;  %v9760_v0 = vadd.f32 %v16596_v1, %v9561_v2  ;;  %v9564_v37 = vadd.f32 %v11749_v51, %v8658_v7  ;;  %v8656_v43 = vadd.f32 %v8487_v4, %v16452_v58 }
 0x334   : > { %9890 = vst [vmem:[%s16607_s21 + $0xf0] sm:$0xff] %v9826_v18  ;;  %v9824_v10 = vmax.f32 %v9760_v0, 0.0  ;;  %v9763_v54 = vadd.f32 %v16596_v1, %v9564_v37  ;;  %v9562_v63 = vadd.f32 %v9393_v34, %v8656_v43 }
 0x335   : > { %v11752_v14 = vpop.f32.mrf.mxu0 }
 0x336   : > { %9888 = vst [vmem:[%s16607_s21 + $0xe0] sm:$0xff] %v9824_v10  ;;  %v9827_v12 = vmax.f32 %v9763_v54, 0.0  ;;  %v9761_v26 = vadd.f32 %v16596_v1, %v9562_v63 }
 0x337   : > { %v9406_v56 = vpop.f32.mrf.mxu0 }
 0x338   : > { %9891 = vst [vmem:[%s16607_s21 + $0xf8] sm:$0xff] %v9827_v12  ;;  %v9825_v5 = vmax.f32 %v9761_v26, 0.0  ;;  %v11686_v32 = vpop.f32.mrf.mxu1 }
 0x339   : > { %v8661_v25 = vadd.f32 %v11686_v32, %v16455_v11  ;;  %v11753_v42 = vpop.f32.mrf.mxu0 }
 0x33a   : > { %9889 = vst [vmem:[%s16607_s21 + $0xe8] sm:$0xff] %v9825_v5  ;;  %v8500_v58 = vpop.f32.mrf.mxu1 }
 0x33b   : > { %v9567_v52 = vadd.f32 %v11752_v14, %v8661_v25  ;;  %v8659_v28 = vadd.f32 %v8500_v58, %v16458_v57  ;;  %v9409_v53 = vpop.f32.mrf.mxu0 }
 0x33c   : > { %v11687_v36 = vpop.f32.mrf.mxu1 }
 0x33d   : > { %v9766_v13 = vadd.f32 %v16596_v1, %v9567_v52  ;;  %v9565_v8 = vadd.f32 %v9406_v56, %v8659_v28  ;;  %v8662_v59 = vadd.f32 %v11687_v36, %v16461_v3 }
 0x33e   : > { %v8503_v39 = vpop.f32.mrf.mxu1 }
 0x33f   : > { %v9830_v23 = vmax.f32 %v9766_v13, 0.0  ;;  %v9764_v51 = vadd.f32 %v16596_v1, %v9565_v8  ;;  %v9568_v41 = vadd.f32 %v11753_v42, %v8662_v59  ;;  %v8660_v11 = vadd.f32 %v8503_v39, %v16482_v61 }
 0x341   : > { %9894 = vst [vmem:[%s16607_s21 + $0x110] sm:$0xff] %v9830_v23  ;;  %v9828_v57 = vmax.f32 %v9764_v51, 0.0  ;;  %v9767_v2 = vadd.f32 %v16596_v1, %v9568_v41  ;;  %v9566_v7 = vadd.f32 %v9409_v53, %v8660_v11 }
 0x343   : > { %9892 = vst [vmem:[%s16607_s21 + $0x100] sm:$0xff] %v9828_v57  ;;  %v9831_v4 = vmax.f32 %v9767_v2, 0.0  ;;  %v9765_v18 = vadd.f32 %v16596_v1, %v9566_v7 }
 0x344   : > { %v11756_v0 = vpop.f32.mrf.mxu0 }
 0x345   : > { %v11690_v3 = vpop.f32.mrf.mxu1  ;;  %9895 = vst [vmem:[%s16607_s21 + $0x118] sm:$0xff] %v9831_v4  ;;  %v9829_v43 = vmax.f32 %v9765_v18, 0.0 }
 0x346   : > { %v8665_v37 = vadd.f32 %v11690_v3, %v16485_v21  ;;  %v9422_v61 = vpop.f32.mrf.mxu0 }
 0x347   : > { %v8516_v34 = vpop.f32.mrf.mxu1  ;;  %9893 = vst [vmem:[%s16607_s21 + $0x108] sm:$0xff] %v9829_v43 }
 0x348   : > { %v9571_v10 = vadd.f32 %v11756_v0, %v8665_v37  ;;  %v8663_v54 = vadd.f32 %v8516_v34, %v16488_v31  ;;  %v11757_v12 = vpop.f32.mrf.mxu0 }
 0x349   : > { %v11691_v63 = vpop.f32.mrf.mxu1 }
 0x34a   : > { %v9770_v26 = vadd.f32 %v16596_v1, %v9571_v10  ;;  %v9569_v14 = vadd.f32 %v9422_v61, %v8663_v54  ;;  %v8666_v5 = vadd.f32 %v11691_v63, %v16491_v45  ;;  %v9425_v52 = vpop.f32.mrf.mxu0 }
 0x34b   : > { %v8519_v56 = vpop.f32.mrf.mxu1 }
 0x34c   : > { %v9834_v21 = vmax.f32 %v9770_v26, 0.0  ;;  %v9768_v32 = vadd.f32 %v16596_v1, %v9569_v14  ;;  %v9572_v25 = vadd.f32 %v11757_v12, %v8666_v5  ;;  %v8664_v58 = vadd.f32 %v8519_v56, %v16494_v55 }
 0x34e   : > { %9898 = vst [vmem:[%s16607_s21 + $0x130] sm:$0xff] %v9834_v21  ;;  %v9832_v31 = vmax.f32 %v9768_v32, 0.0  ;;  %v9771_v28 = vadd.f32 %v16596_v1, %v9572_v25  ;;  %v9570_v42 = vadd.f32 %v9425_v52, %v8664_v58 }
 0x350   : > { %9896 = vst [vmem:[%s16607_s21 + $0x120] sm:$0xff] %v9832_v31  ;;  %v9835_v36 = vmax.f32 %v9771_v28, 0.0  ;;  %v9769_v13 = vadd.f32 %v16596_v1, %v9570_v42  ;;  %v11760_v45 = vpop.f32.mrf.mxu0 }
 0x351   : > { %v11694_v8 = vpop.f32.mrf.mxu1 }
 0x352   : > { %9899 = vst [vmem:[%s16607_s21 + $0x138] sm:$0xff] %v9835_v36  ;;  %v9833_v59 = vmax.f32 %v9769_v13, 0.0  ;;  %v8669_v39 = vadd.f32 %v11694_v8, %v16497_v60  ;;  %v9438_v23 = vpop.f32.mrf.mxu0 }
 0x353   : > { %v8532_v55 = vpop.f32.mrf.mxu1 }
 0x354   : > { %9897 = vst [vmem:[%s16607_s21 + $0x128] sm:$0xff] %v9833_v59  ;;  %v9575_v51 = vadd.f32 %v11760_v45, %v8669_v39  ;;  %v8667_v41 = vadd.f32 %v8532_v55, %v16500_v49  ;;  %v11761_v53 = vpop.f32.mrf.mxu0 }
 0x355   : > { %v11695_v11 = vpop.f32.mrf.mxu1 }
 0x356   : > { %v9774_v57 = vadd.f32 %v16596_v1, %v9575_v51  ;;  %v9573_v2 = vadd.f32 %v9438_v23, %v8667_v41  ;;  %v8670_v7 = vadd.f32 %v11695_v11, %v16503_v19  ;;  %v9441_v37 = vpop.f32.mrf.mxu0 }
 0x357   : > { %v8535_v4 = vpop.f32.mrf.mxu1 }
 0x358   : > { %v9838_v18 = vmax.f32 %v9774_v57, 0.0  ;;  %v9772_v60 = vadd.f32 %v16596_v1, %v9573_v2  ;;  %v9576_v3 = vadd.f32 %v11761_v53, %v8670_v7  ;;  %v8668_v0 = vadd.f32 %v8535_v4, %v16522_v33 }
 0x35a   : > { %9902 = vst [vmem:[%s16607_s21 + $0x150] sm:$0xff] %v9838_v18  ;;  %v9836_v49 = vmax.f32 %v9772_v60, 0.0  ;;  %v9775_v43 = vadd.f32 %v16596_v1, %v9576_v3  ;;  %v9574_v34 = vadd.f32 %v9441_v37, %v8668_v0 }
 0x35c   : > { %9900 = vst [vmem:[%s16607_s21 + $0x140] sm:$0xff] %v9836_v49  ;;  %v9839_v61 = vmax.f32 %v9775_v43, 0.0  ;;  %v9773_v10 = vadd.f32 %v16596_v1, %v9574_v34 }
 0x35e   : > { %v11764_v54 = vpop.f32.mrf.mxu0  ;;  %9903 = vst [vmem:[%s16607_s21 + $0x158] sm:$0xff] %v9839_v61  ;;  %v9837_v19 = vmax.f32 %v9773_v10, 0.0 }
 0x360   : > { %v11698_v63 = vpop.f32.mrf.mxu1  ;;  %v9454_v26 = vpop.f32.mrf.mxu0  ;;  %9901 = vst [vmem:[%s16607_s21 + $0x148] sm:$0xff] %v9837_v19 }
 0x361   : > { %v8673_v12 = vadd.f32 %v11698_v63, %v16525_v17 }
 0x362   : > { %v8548_v33 = vpop.f32.mrf.mxu1  ;;  %v11765_v56 = vpop.f32.mrf.mxu0 }
 0x363   : > { %v9579_v14 = vadd.f32 %v11764_v54, %v8673_v12  ;;  %v8671_v5 = vadd.f32 %v8548_v33, %v16528_v15 }
 0x364   : > { %v11699_v21 = vpop.f32.mrf.mxu1  ;;  %v9457_v36 = vpop.f32.mrf.mxu0 }
 0x365   : > { %v9778_v32 = vadd.f32 %v16596_v1, %v9579_v14  ;;  %v9577_v25 = vadd.f32 %v9454_v26, %v8671_v5  ;;  %v8674_v58 = vadd.f32 %v11699_v21, %v16531_v62 }
 0x366   : > { %v8551_v52 = vpop.f32.mrf.mxu1 }
 0x367   : > { %v9842_v31 = vmax.f32 %v9778_v32, 0.0  ;;  %v9776_v17 = vadd.f32 %v16596_v1, %v9577_v25  ;;  %v9580_v28 = vadd.f32 %v11765_v56, %v8674_v58  ;;  %v8672_v42 = vadd.f32 %v8551_v52, %v16534_v35 }
 0x369   : > { %9906 = vst [vmem:[%s16607_s21 + $0x170] sm:$0xff] %v9842_v31  ;;  %v9840_v15 = vmax.f32 %v9776_v17, 0.0  ;;  %v9779_v13 = vadd.f32 %v16596_v1, %v9580_v28  ;;  %v9578_v45 = vadd.f32 %v9457_v36, %v8672_v42 }
 0x36a   : > { %v11768_v39 = vpop.f32.mrf.mxu0 }
 0x36b   : > { %9904 = vst [vmem:[%s16607_s21 + $0x160] sm:$0xff] %v9840_v15  ;;  %v9843_v8 = vmax.f32 %v9779_v13, 0.0  ;;  %v9777_v59 = vadd.f32 %v16596_v1, %v9578_v45 }
 0x36c   : > { %v9470_v23 = vpop.f32.mrf.mxu0 }
 0x36d   : > { %9907 = vst [vmem:[%s16607_s21 + $0x178] sm:$0xff] %v9843_v8  ;;  %v9841_v62 = vmax.f32 %v9777_v59, 0.0  ;;  %v11702_v55 = vpop.f32.mrf.mxu1 }
 0x36e   : > { %v8677_v51 = vadd.f32 %v11702_v55, %v16537_v50  ;;  %v11769_v53 = vpop.f32.mrf.mxu0 }
 0x36f   : > { %9905 = vst [vmem:[%s16607_s21 + $0x168] sm:$0xff] %v9841_v62  ;;  %v8564_v35 = vpop.f32.mrf.mxu1 }
 0x370   : > { %v9583_v41 = vadd.f32 %v11768_v39, %v8677_v51  ;;  %v8675_v11 = vadd.f32 %v8564_v35, %v16540_v24  ;;  %v9473_v37 = vpop.f32.mrf.mxu0 }
 0x371   : > { %v11703_v57 = vpop.f32.mrf.mxu1 }
 0x372   : > { %v9782_v2 = vadd.f32 %v16596_v1, %v9583_v41  ;;  %v9581_v7 = vadd.f32 %v9470_v23, %v8675_v11  ;;  %v8678_v4 = vadd.f32 %v11703_v57, %v16543_v20 }
 0x373   : > { %v8567_v18 = vpop.f32.mrf.mxu1 }
 0x374   : > { %v9846_v60 = vmax.f32 %v9782_v2, 0.0  ;;  %v9780_v3 = vadd.f32 %v16596_v1, %v9581_v7  ;;  %v9584_v0 = vadd.f32 %v11769_v53, %v8678_v4  ;;  %v8676_v50 = vadd.f32 %v8567_v18, %v16558_v22 }
 0x376   : > { %9910 = vst [vmem:[%s16607_s21 + $0x190] sm:$0xff] %v9846_v60  ;;  %v9844_v24 = vmax.f32 %v9780_v3, 0.0  ;;  %v9783_v49 = vadd.f32 %v16596_v1, %v9584_v0  ;;  %v9582_v43 = vadd.f32 %v9473_v37, %v8676_v50 }
 0x378   : > { %9908 = vst [vmem:[%s16607_s21 + $0x180] sm:$0xff] %v9844_v24  ;;  %v9847_v34 = vmax.f32 %v9783_v49, 0.0  ;;  %v9781_v61 = vadd.f32 %v16596_v1, %v9582_v43 }
 0x379   : > { %v11772_v10 = vpop.f32.mrf.mxu0 }
 0x37a   : > { %v11706_v20 = vpop.f32.mrf.mxu1  ;;  %9911 = vst [vmem:[%s16607_s21 + $0x198] sm:$0xff] %v9847_v34  ;;  %v9845_v19 = vmax.f32 %v9781_v61, 0.0 }
 0x37b   : > { %v8681_v54 = vadd.f32 %v11706_v20, %v16561_v9  ;;  %v9486_v22 = vpop.f32.mrf.mxu0 }
 0x37c   : > { %v8580_v63 = vpop.f32.mrf.mxu1  ;;  %9909 = vst [vmem:[%s16607_s21 + $0x188] sm:$0xff] %v9845_v19 }
 0x37d   : > { %v9587_v12 = vadd.f32 %v11772_v10, %v8681_v54  ;;  %v8679_v26 = vadd.f32 %v8580_v63, %v16563_v40  ;;  %v11773_v14 = vpop.f32.mrf.mxu0 }
 0x37e   : > { %v11707_v33 = vpop.f32.mrf.mxu1 }
 0x37f   : > { %v9786_v5 = vadd.f32 %v16596_v1, %v9587_v12  ;;  %v9585_v56 = vadd.f32 %v9486_v22, %v8679_v26  ;;  %v8682_v21 = vadd.f32 %v11707_v33, %v16565_v46  ;;  %v9489_v31 = vpop.f32.mrf.mxu0 }
 0x380   : > { %v8583_v32 = vpop.f32.mrf.mxu1 }
 0x381   : > { %v9850_v9 = vmax.f32 %v9786_v5, 0.0  ;;  %v9784_v25 = vadd.f32 %v16596_v1, %v9585_v56  ;;  %v9588_v58 = vadd.f32 %v11773_v14, %v8682_v21  ;;  %v8680_v52 = vadd.f32 %v8583_v32, %v16567_v38 }
 0x383   : > { %9914 = vst [vmem:[%s16607_s21 + $0x1b0] sm:$0xff] %v9850_v9  ;;  %v9848_v40 = vmax.f32 %v9784_v25, 0.0  ;;  %v9787_v17 = vadd.f32 %v16596_v1, %v9588_v58  ;;  %v9586_v28 = vadd.f32 %v9489_v31, %v8680_v52 }
 0x385   : > { %9912 = vst [vmem:[%s16607_s21 + $0x1a0] sm:$0xff] %v9848_v40  ;;  %v9851_v42 = vmax.f32 %v9787_v17, 0.0  ;;  %v9785_v36 = vadd.f32 %v16596_v1, %v9586_v28 }
 0x386   : > { %v11776_v46 = vpop.f32.mrf.mxu0 }
 0x387   : > { %v11710_v15 = vpop.f32.mrf.mxu1  ;;  %9915 = vst [vmem:[%s16607_s21 + $0x1b8] sm:$0xff] %v9851_v42  ;;  %v9849_v13 = vmax.f32 %v9785_v36, 0.0 }
 0x388   : > { %v8685_v45 = vadd.f32 %v11710_v15, %v16569_v47  ;;  %v9502_v8 = vpop.f32.mrf.mxu0 }
 0x389   : > { %v8596_v38 = vpop.f32.mrf.mxu1  ;;  %9913 = vst [vmem:[%s16607_s21 + $0x1a8] sm:$0xff] %v9849_v13 }
 0x38a   : > { %v9591_v59 = vadd.f32 %v11776_v46, %v8685_v45  ;;  %v8683_v39 = vadd.f32 %v8596_v38, %v16571_v27  ;;  %v11777_v23 = vpop.f32.mrf.mxu0 }
 0x38b   : > { %v11711_v62 = vpop.f32.mrf.mxu1 }
 0x38c   : > { %v9790_v55 = vadd.f32 %v16596_v1, %v9591_v59  ;;  %v9589_v51 = vadd.f32 %v9502_v8, %v8683_v39  ;;  %v8686_v35 = vadd.f32 %v11711_v62, %v16573_v16  ;;  %v9505_v2 = vpop.f32.mrf.mxu0 }
 0x38d   : > { %v8599_v41 = vpop.f32.mrf.mxu1 }
 0x38e   : > { %v9854_v11 = vmax.f32 %v9790_v55, 0.0  ;;  %v9788_v47 = vadd.f32 %v16596_v1, %v9589_v51  ;;  %v9592_v53 = vadd.f32 %v11777_v23, %v8686_v35  ;;  %v8684_v57 = vadd.f32 %v8599_v41, %v16579_v29 }
 0x390   : > { %9918 = vst [vmem:[%s16607_s21 + $0x1d0] sm:$0xff] %v9854_v11  ;;  %v9852_v27 = vmax.f32 %v9788_v47, 0.0  ;;  %v9791_v7 = vadd.f32 %v16596_v1, %v9592_v53  ;;  %v9590_v4 = vadd.f32 %v9505_v2, %v8684_v57 }
 0x392   : > { %9916 = vst [vmem:[%s16607_s21 + $0x1c0] sm:$0xff] %v9852_v27  ;;  %v9855_v18 = vmax.f32 %v9791_v7, 0.0  ;;  %v9789_v16 = vadd.f32 %v16596_v1, %v9590_v4 }
 0x394   : > { %v11780_v60 = vpop.f32.mrf.mxu0  ;;  %9919 = vst [vmem:[%s16607_s21 + $0x1d8] sm:$0xff] %v9855_v18  ;;  %v9853_v3 = vmax.f32 %v9789_v16, 0.0 }
 0x396   : > { %v11714_v0 = vpop.f32.mrf.mxu1  ;;  %v9518_v37 = vpop.f32.mrf.mxu0  ;;  %9917 = vst [vmem:[%s16607_s21 + $0x1c8] sm:$0xff] %v9853_v3 }
 0x397   : > { %v8689_v50 = vadd.f32 %v11714_v0, %v16581_v30 }
 0x398   : > { %v8612_v29 = vpop.f32.mrf.mxu1  ;;  %v11781_v34 = vpop.f32.mrf.mxu0 }
 0x399   : > { %v9595_v24 = vadd.f32 %v11780_v60, %v8689_v50  ;;  %v8687_v49 = vadd.f32 %v8612_v29, %v16584_v44 }
 0x39a   : > { %v11715_v43 = vpop.f32.mrf.mxu1  ;;  %v9521_v22 = vpop.f32.mrf.mxu0 }
 0x39b   : > { %v9794_v61 = vadd.f32 %v16596_v1, %v9595_v24  ;;  %v9593_v20 = vadd.f32 %v9518_v37, %v8687_v49  ;;  %v8690_v10 = vadd.f32 %v11715_v43, %v16586_v6 }
 0x39c   : > { %v8615_v54 = vpop.f32.mrf.mxu1 }
 0x39d   : > { %v9858_v30 = vmax.f32 %v9794_v61, 0.0  ;;  %v9792_v19 = vadd.f32 %v16596_v1, %v9593_v20  ;;  %v9596_v63 = vadd.f32 %v11781_v34, %v8690_v10  ;;  %v8688_v44 = vadd.f32 %v8615_v54, %v16590_v48 }
 0x39f   : > { %9922 = vst [vmem:[%s16607_s21 + $0x1f0] sm:$0xff] %v9858_v30  ;;  %v9856_v12 = vmax.f32 %v9792_v19, 0.0  ;;  %v9795_v26 = vadd.f32 %v16596_v1, %v9596_v63  ;;  %v9594_v33 = vadd.f32 %v9521_v22, %v8688_v44 }
 0x3a1   : > { %9920 = vst [vmem:[%s16607_s21 + $0x1e0] sm:$0xff] %v9856_v12  ;;  %v9859_v6 = vmax.f32 %v9795_v26, 0.0  ;;  %v9793_v14 = vadd.f32 %v16596_v1, %v9594_v33 }
 0x3a3   : > { %9923 = vst [vmem:[%s16607_s21 + $0x1f8] sm:$0xff] %v9859_v6  ;;  %v9857_v48 = vmax.f32 %v9793_v14, 0.0 }
 0x3a5   : > { %9921 = vst [vmem:[%s16607_s21 + $0x1e8] sm:$0xff] %v9857_v48 }
 0x3a6   : > { %12153 = shalt.err (!%p12150_p6)
}
 0x3a7   : > { %s12154_s28 = scalar_lea.hbm %s16802_s6, 8192  ;;  %s12158_s24 = scalar_lea.hbm %s16864_s3, 32768 }
 0x3a8   : > { %p12155_p7 = scmp.ne.s32.totalorder %s16802_s6, %s12154_s28  ;;  %p12159_p11 = scmp.lt.s32.totalorder %s16802_s6, %s16864_s3 }
 0x3a9   : > { %p12160_p12 = scmp.lt.s32.totalorder %s12158_s24, %s12154_s28 }
 0x3aa   : > { %p12156_p9 = pnand %p12155_p7, %p12308_p3 }
 0x3ab   : > { %p12161_p13 = por %p12160_p12, %p12159_p11 }
 0x3ac   : > { %p12157_p10 = pneg %p12156_p9 }
 0x3ae   : > { %p12162_p0 = pnand %p12161_p13, %p12157_p10 }
 0x3b0   : > { %12165 = shalt.err (!%p12162_p0)
}
 0x3b1   : > { %s12235_s15 = smov 128   ;;  %s12236_s4 = smov 8  }
 0x3b2   : > { %11785 = dma.vmem_to_hbm [thread:$0]  (%p12308_p3), %s16804_s16, 8192, %s16802_s6, %s16810_s7, %s12235_s15, %s12235_s15, %s12236_s4  }
 0x3b3 PF: > { %p11791_p1 = scmp.ge.s32.totalorder %s12232_s19, 2  ;;  %s9956_s5 = sand.u32 1, %s12204_s12  }
 0x3b4   : > { %s9957_s8 = scalar_lea.sflag [#allocation4], %s9956_s5 }
 0x3b5   : > { %p11788_p2 = pnand %p11791_p1, %p12317_p8 }
 0x3b7   : > { %p11789_p4 = pneg %p11788_p2 }
 0x3b9   : > { %12199 = dma.done.wait (%p11789_p4), %s9957_s8, 8192  }
 0x3ba   : > { %12201 = vsyncadd (%p11789_p4), %s9957_s8, 4294959104  ;;  %s16_s19 = sadd.s32 1, %s12232_s19   ;;  %s17614_s12 = smov %s12208_s13 }
 0x3bb   : > { %p13_p5 = scmp.ge.s32.totalorder %s16_s19, 6   ;;  %s17615_s13 = smov %s12212_s14 }
 0x3bc   : > { %s17616_s14 = smov %s12326_s30  ;;  %s17617_s15 = smov %s12224_s17 }
 0x3bd   : > { %s17618_s16 = smov %s12228_s18  ;;  %s17619_s17 = smov %s17622_s22 }
 0x3be   : > { %s17620_s18 = smov %s17626_s23  ;;  %15 = sbr.rel (!%p13_p5) target bundleno = 5 (0x5), region = 84 }
 0x3c3   :  { %9962 = vsyncpa [#allocation4], 1 }
 0x3c4   :  { %9964 = vsyncpa [#allocation4 + $0x1], 1 }

</bundles_post_ra>
